<compile_context>
chip_gen: v5e
topology: v5e:2x2
jax: 0.10.0
libtpu: 0.0.40
codegen_flags: <defaults>
</compile_context>

<pallas_src>
import math

import numpy as np
import jax
import jax.numpy as jnp
from jax.experimental import pallas as pl
from jax.experimental.pallas import tpu as pltpu


# ----------------------------------------------------------------------------
# Fused Pallas kernel: the whole STGCN forward in one body.
# ----------------------------------------------------------------------------

def _stgcn_fused_kernel(
    x_ref, at_ref,
    b1_tc1_w, b1_tc1_b, b1_theta, b1_tc2_w, b1_tc2_b, b1_gamma, b1_beta,
    b2_tc1_w, b2_tc1_b, b2_theta, b2_tc2_w, b2_tc2_b, b2_gamma, b2_beta,
    etc_w, etc_b, fcn_w, fcn_b,
    out_ref,
):
    at = at_ref[...]                                      # A_hat^T, (N, N)

    def tconv(xin, w_ref, bias_ref):
        # Gated temporal conv (kernel_size=3), gate-fused:
        #   w_ref: (3 taps, Cin, 3*Cout) -> 3 matmuls with 192-lane outputs;
        #   bias (1, 3*Cout) added ONCE after summing the tap matmuls;
        #   gates p/q/r are 64-lane output slices.
        Bq, T, N, Cin = xin.shape
        Cout = w_ref.shape[-1] // 3
        To = T - 2
        rows = Bq * To * N
        z = jnp.dot(xin[:, 0:To].reshape(rows, Cin), w_ref[0],
                    preferred_element_type=jnp.float32)
        z = z + jnp.dot(xin[:, 1:1 + To].reshape(rows, Cin), w_ref[1],
                        preferred_element_type=jnp.float32)
        z = z + jnp.dot(xin[:, 2:2 + To].reshape(rows, Cin), w_ref[2],
                        preferred_element_type=jnp.float32)
        z = z + bias_ref[...]
        p = z[:, :Cout]
        q = z[:, Cout:2 * Cout]
        r = z[:, 2 * Cout:]
        h = jnp.maximum(p * jax.nn.sigmoid(q) + r, 0.0)
        return h.reshape(Bq, To, N, Cout)

    def gconv(t, theta_ref):
        # relu(A (t Theta)) == relu((A t) Theta); Theta first so channels
        # shrink 64 -> 16, then A applied as ONE 2-D matmul (against A^T),
        # bracketed by two minor-dim (last-two-axes) swaps on the XLU.
        Bq, To, N, C = t.shape
        Cs = theta_ref.shape[-1]
        R = Bq * To
        y = jnp.dot(t.reshape(R * N, C), theta_ref[...],
                    preferred_element_type=jnp.float32)   # (R*N, Cs)
        yt = jnp.swapaxes(y.reshape(R, N, Cs), 1, 2)      # (R, Cs, N)
        # z[(r,c), i] = sum_j y[r, j, c] * A[i, j]
        z = jnp.dot(yt.reshape(R * Cs, N), at,
                    preferred_element_type=jnp.float32)   # (R*Cs, N)
        lfs = jnp.swapaxes(z.reshape(R, Cs, N), 1, 2)     # (R, N, Cs)
        return jnp.maximum(lfs, 0.0).reshape(Bq, To, N, Cs)

    def batch_norm(xv, gamma_ref, beta_ref):
        # BatchNorm2d(num_nodes), training-mode stats: per node over (B,T,C).
        Bq, T, N, C = xv.shape
        cnt = Bq * T * C
        xr = xv.reshape(Bq * T, N, C)
        mean = jnp.sum(jnp.sum(xr, axis=2, keepdims=True),
                       axis=0, keepdims=True) / cnt       # (1, N, 1)
        d = xr - mean
        var = jnp.sum(jnp.sum(d * d, axis=2, keepdims=True),
                      axis=0, keepdims=True) / cnt        # (1, N, 1)
        g = gamma_ref[...].reshape(1, N, 1)
        b = beta_ref[...].reshape(1, N, 1)
        y = d * jax.lax.rsqrt(var + 1e-5) * g + b
        return y.reshape(Bq, T, N, C)

    def block(xin, tc1_w, tc1_b, theta, tc2_w, tc2_b, gamma, beta):
        t = tconv(xin, tc1_w, tc1_b)
        t2 = gconv(t, theta)
        t3 = tconv(t2, tc2_w, tc2_b)
        return batch_norm(t3, gamma, beta)

    x = x_ref[...]                                        # (B, T, N, F)
    o1 = block(x, b1_tc1_w, b1_tc1_b, b1_theta, b1_tc2_w, b1_tc2_b,
               b1_gamma, b1_beta)
    o2 = block(o1, b2_tc1_w, b2_tc1_b, b2_theta, b2_tc2_w, b2_tc2_b,
               b2_gamma, b2_beta)
    o3 = tconv(o2, etc_w, etc_b)                          # (B, Tf, N, 64)

    # Final FC: flattened feature index is tf*64 + c (matching torch's
    # reshape), so out = sum_tf o3[:, tf] @ W[tf*64:(tf+1)*64] + bias.
    # Row-block matmuls against the original (Tf*64, T_out) weight; bias once.
    Bq, Tf, N, C = o3.shape
    rows = Bq * N
    acc = jnp.dot(o3[:, 0].reshape(rows, C), fcn_w[0:C, :],
                  preferred_element_type=jnp.float32)
    for tf in range(1, Tf):
        acc = acc + jnp.dot(o3[:, tf].reshape(rows, C),
                            fcn_w[tf * C:(tf + 1) * C, :],
                            preferred_element_type=jnp.float32)
    out_ref[...] = (acc + fcn_b[...]).reshape(out_ref.shape)


# ----------------------------------------------------------------------------
# pallas_call wrapper (single launch, no grid, everything resident in VMEM)
# ----------------------------------------------------------------------------

def stgcn_pallas(a_hat, x, packed):
    """x: (B, N, T, F) (torch convention) -> output (B, N, T_out)."""
    B, N, T, _ = x.shape
    xl = jnp.transpose(x, (0, 2, 1, 3))                   # glue: (B, T, N, F)
    a_t = jnp.transpose(a_hat)                            # kernel consumes A^T
    t_out = packed[-1].shape[-1]
    inputs = (xl, a_t) + tuple(packed)
    vmem = pl.BlockSpec(memory_space=pltpu.MemorySpace.VMEM)
    return pl.pallas_call(
        _stgcn_fused_kernel,
        out_shape=jax.ShapeDtypeStruct((B, N, t_out), jnp.float32),
        in_specs=[vmem] * len(inputs),
        out_specs=vmem,
    )(*inputs)


def _fuse_tconv(w, b):
    """Fuse the 3 gates of a gated temporal conv into wide matmul weights.

    w: (3 gates, 3 taps, Cin, Cout) -> (3 taps, Cin, 3*Cout) with
    column index = gate*Cout + o.  b: (3, Cout) -> (1, 3*Cout)."""
    G, K, Cin, Cout = w.shape
    w_f = jnp.transpose(w, (1, 2, 0, 3)).reshape(K, Cin, G * Cout)
    b_f = b.reshape(1, G * Cout)
    return w_f, b_f


def pack_params(params):
    """Flatten params into fused-kernel argument order (gate-fused convs)."""
    def block_args(p):
        w1, bb1 = _fuse_tconv(p["tc1_w"], p["tc1_b"])
        w2, bb2 = _fuse_tconv(p["tc2_w"], p["tc2_b"])
        return (w1, bb1, p["theta"], w2, bb2, p["gamma"], p["beta"])

    ew, eb = _fuse_tconv(params["etc_w"], params["etc_b"])
    return (block_args(params["block1"]) + block_args(params["block2"])
            + (ew, eb, params["fcn_w"], params["fcn_b"]))


# ----------------------------------------------------------------------------
# Pure-JAX reference (mirrors the torch code, incl. its permutes) for checking
# ----------------------------------------------------------------------------

_HI = jax.lax.Precision.HIGHEST


def _ref_temporal_conv(x, w, b):
    # x: (B, T, N, Cin) as TemporalConv receives it.
    To = x.shape[1] - 2

    def one(i):
        acc = jnp.zeros((x.shape[0], To, x.shape[2], w.shape[-1]), jnp.float32)
        for k in range(3):
            acc = acc + jnp.einsum("btnc,cd->btnd", x[:, k:k + To], w[i, k],
                                   precision=_HI)
        return acc + b[i]

    p, q, r = one(0), one(1), one(2)
    return jax.nn.relu(p * jax.nn.sigmoid(q) + r)


def _ref_block(x, a_hat, p):
    # x: (B, N, T, Cin)  (torch convention)
    xp = jnp.transpose(x, (0, 2, 1, 3))
    t = _ref_temporal_conv(xp, p["tc1_w"], p["tc1_b"])
    t = jnp.transpose(t, (0, 2, 1, 3))                    # (B, N, T-2, 64)
    lfs = jnp.einsum("ij,bjtc->bitc", a_hat, t, precision=_HI)
    t2 = jax.nn.relu(jnp.einsum("bitc,cs->bits", lfs, p["theta"], precision=_HI))
    t2 = jnp.transpose(t2, (0, 2, 1, 3))
    t3 = _ref_temporal_conv(t2, p["tc2_w"], p["tc2_b"])
    t3 = jnp.transpose(t3, (0, 2, 1, 3))                  # (B, N, T-4, 64)
    mean = jnp.mean(t3, axis=(0, 2, 3), keepdims=True)
    var = jnp.mean((t3 - mean) ** 2, axis=(0, 2, 3), keepdims=True)
    g = p["gamma"].reshape(1, -1, 1, 1)
    bt = p["beta"].reshape(1, -1, 1, 1)
    return (t3 - mean) * jax.lax.rsqrt(var + 1e-5) * g + bt


def stgcn_reference(a_hat, x, params):
    o1 = _ref_block(x, a_hat, params["block1"])
    o2 = _ref_block(o1, a_hat, params["block2"])
    o2 = jnp.transpose(o2, (0, 2, 1, 3))
    o3 = _ref_temporal_conv(o2, params["etc_w"], params["etc_b"])
    o3 = jnp.transpose(o3, (0, 2, 1, 3))
    B, N = o3.shape[0], o3.shape[1]
    flat = o3.reshape(B, N, -1)
    return jnp.einsum("bnd,dt->bnt", flat, params["fcn_w"],
                      precision=_HI) + params["fcn_b"]


# ----------------------------------------------------------------------------
# Deterministic parameter init (mirrors the torch module's shapes/inits)
# ----------------------------------------------------------------------------

def _conv_params(key, cin, cout):
    kw, kb = jax.random.split(key)
    bound = 1.0 / math.sqrt(cin * 3)
    w = jax.random.uniform(kw, (3, 3, cin, cout), jnp.float32, -bound, bound)
    b = jax.random.uniform(kb, (3, cout), jnp.float32, -bound, bound)
    return w, b


def _block_params(key, cin, spatial, cout, num_nodes):
    k1, k2, k3 = jax.random.split(key, 3)
    tc1_w, tc1_b = _conv_params(k1, cin, cout)
    tc2_w, tc2_b = _conv_params(k2, spatial, cout)
    stdv = 1.0 / math.sqrt(spatial)
    theta = jax.random.uniform(k3, (cout, spatial), jnp.float32, -stdv, stdv)
    gamma = jnp.ones((1, 1, num_nodes, 1), jnp.float32)
    beta = jnp.zeros((1, 1, num_nodes, 1), jnp.float32)
    return dict(tc1_w=tc1_w, tc1_b=tc1_b, tc2_w=tc2_w, tc2_b=tc2_b,
                theta=theta, gamma=gamma, beta=beta)


def init_params(key, num_nodes, num_features, t_in, t_out):
    k1, k2, k3, k4 = jax.random.split(key, 4)
    block1 = _block_params(k1, num_features, 16, 64, num_nodes)
    block2 = _block_params(k2, 64, 16, 64, num_nodes)
    etc_w, etc_b = _conv_params(k3, 64, 64)
    d = (t_in - 2 * 5) * 64
    kw, kb = jax.random.split(k4)
    bound = 1.0 / math.sqrt(d)
    fcn_w = jax.random.uniform(kw, (d, t_out), jnp.float32, -bound, bound)
    fcn_b = jax.random.uniform(kb, (1, t_out), jnp.float32, -bound, bound)
    return dict(block1=block1, block2=block2, etc_w=etc_w, etc_b=etc_b,
                fcn_w=fcn_w, fcn_b=fcn_b)


# ----------------------------------------------------------------------------

if __name__ == "__main__":
    B, N, T_IN, F_IN, T_OUT = 2, 8, 12, 4, 3

    key = jax.random.PRNGKey(0)
    k_x, k_a, k_p = jax.random.split(key, 3)

    X = jax.random.uniform(k_x, (B, N, T_IN, F_IN), jnp.float32)
    A = jax.random.uniform(k_a, (N, N), jnp.float32) + jnp.eye(N, jnp.float32.dtype and None or None, dtype=jnp.float32)
    # Row-normalized (deliberately asymmetric) adjacency so any transposition
    # bug in the kernel's A^T handling would be caught by the check below.
    A_hat = A / jnp.sum(A, axis=1, keepdims=True)

    params = init_params(k_p, N, F_IN, T_IN, T_OUT)
    packed = pack_params(params)

    run = jax.jit(stgcn_pallas)
    out = jax.block_until_ready(run(A_hat, X, packed))

    assert out.shape == (B, N, T_OUT), out.shape
    ref = jax.block_until_ready(stgcn_reference(A_hat, X, params))
    np.testing.assert_allclose(np.asarray(out), np.asarray(ref),
                               rtol=5e-3, atol=5e-3)
    print("KERNEL_OK")
</pallas_src>

<mosaic_0001>
module attributes {stable_mosaic.version = 11 : i64} {
  func.func @_stgcn_fused_kernel(%arg0: memref<2x12x8x4xf32, #tpu.memory_space<vmem>>, %arg1: memref<8x8xf32, #tpu.memory_space<vmem>>, %arg2: memref<3x4x192xf32, #tpu.memory_space<vmem>>, %arg3: memref<1x192xf32, #tpu.memory_space<vmem>>, %arg4: memref<64x16xf32, #tpu.memory_space<vmem>>, %arg5: memref<3x16x192xf32, #tpu.memory_space<vmem>>, %arg6: memref<1x192xf32, #tpu.memory_space<vmem>>, %arg7: memref<1x1x8x1xf32, #tpu.memory_space<vmem>>, %arg8: memref<1x1x8x1xf32, #tpu.memory_space<vmem>>, %arg9: memref<3x64x192xf32, #tpu.memory_space<vmem>>, %arg10: memref<1x192xf32, #tpu.memory_space<vmem>>, %arg11: memref<64x16xf32, #tpu.memory_space<vmem>>, %arg12: memref<3x16x192xf32, #tpu.memory_space<vmem>>, %arg13: memref<1x192xf32, #tpu.memory_space<vmem>>, %arg14: memref<1x1x8x1xf32, #tpu.memory_space<vmem>>, %arg15: memref<1x1x8x1xf32, #tpu.memory_space<vmem>>, %arg16: memref<3x64x192xf32, #tpu.memory_space<vmem>>, %arg17: memref<1x192xf32, #tpu.memory_space<vmem>>, %arg18: memref<128x3xf32, #tpu.memory_space<vmem>>, %arg19: memref<1x3xf32, #tpu.memory_space<vmem>>, %arg20: memref<2x8x3xf32, #tpu.memory_space<vmem>>) attributes {dimension_semantics = [], scalar_prefetch = 0 : i64, scratch_operands = 0 : i64, tpu.core_type = #tpu.core_type<tc>} {
    %c0 = arith.constant 0 : index
    %c0_0 = arith.constant 0 : index
    %0 = vector.load %arg1[%c0, %c0_0] : memref<8x8xf32, #tpu.memory_space<vmem>>, vector<8x8xf32>
    %c0_1 = arith.constant 0 : index
    %c0_2 = arith.constant 0 : index
    %c0_3 = arith.constant 0 : index
    %c0_4 = arith.constant 0 : index
    %1 = vector.load %arg0[%c0_1, %c0_2, %c0_3, %c0_4] : memref<2x12x8x4xf32, #tpu.memory_space<vmem>>, vector<2x12x8x4xf32>
    %2 = vector.extract_strided_slice %1 {offsets = [0, 0, 0, 0], sizes = [2, 10, 8, 4], strides = [1, 1, 1, 1]} : vector<2x12x8x4xf32> to vector<2x10x8x4xf32>
    %3 = vector.shape_cast %2 : vector<2x10x8x4xf32> to vector<160x4xf32>
    %c0_5 = arith.constant 0 : index
    %c0_6 = arith.constant 0 : index
    %c0_7 = arith.constant 0 : index
    %4 = vector.load %arg2[%c0_5, %c0_6, %c0_7] : memref<3x4x192xf32, #tpu.memory_space<vmem>>, vector<1x4x192xf32>
    %5 = vector.shape_cast %4 : vector<1x4x192xf32> to vector<4x192xf32>
    %cst = arith.constant dense<0.000000e+00> : vector<160x192xf32>
    %6 = tpu.matmul %3, %5, %cst {dimension_numbers = #tpu.dot_dimension_numbers<[1], [0], [0], [1], [0, 0, 1, 1], [], []>} : vector<160x4xf32>, vector<4x192xf32>, vector<160x192xf32> -> vector<160x192xf32>
    %7 = vector.extract_strided_slice %1 {offsets = [0, 1, 0, 0], sizes = [2, 10, 8, 4], strides = [1, 1, 1, 1]} : vector<2x12x8x4xf32> to vector<2x10x8x4xf32>
    %8 = vector.shape_cast %7 : vector<2x10x8x4xf32> to vector<160x4xf32>
    %c1 = arith.constant 1 : index
    %c0_8 = arith.constant 0 : index
    %c0_9 = arith.constant 0 : index
    %9 = vector.load %arg2[%c1, %c0_8, %c0_9] : memref<3x4x192xf32, #tpu.memory_space<vmem>>, vector<1x4x192xf32>
    %10 = vector.shape_cast %9 : vector<1x4x192xf32> to vector<4x192xf32>
    %cst_10 = arith.constant dense<0.000000e+00> : vector<160x192xf32>
    %11 = tpu.matmul %8, %10, %cst_10 {dimension_numbers = #tpu.dot_dimension_numbers<[1], [0], [0], [1], [0, 0, 1, 1], [], []>} : vector<160x4xf32>, vector<4x192xf32>, vector<160x192xf32> -> vector<160x192xf32>
    %12 = arith.addf %6, %11 : vector<160x192xf32>
    %13 = vector.extract_strided_slice %1 {offsets = [0, 2, 0, 0], sizes = [2, 10, 8, 4], strides = [1, 1, 1, 1]} : vector<2x12x8x4xf32> to vector<2x10x8x4xf32>
    %14 = vector.shape_cast %13 : vector<2x10x8x4xf32> to vector<160x4xf32>
    %c2 = arith.constant 2 : index
    %c0_11 = arith.constant 0 : index
    %c0_12 = arith.constant 0 : index
    %15 = vector.load %arg2[%c2, %c0_11, %c0_12] : memref<3x4x192xf32, #tpu.memory_space<vmem>>, vector<1x4x192xf32>
    %16 = vector.shape_cast %15 : vector<1x4x192xf32> to vector<4x192xf32>
    %cst_13 = arith.constant dense<0.000000e+00> : vector<160x192xf32>
    %17 = tpu.matmul %14, %16, %cst_13 {dimension_numbers = #tpu.dot_dimension_numbers<[1], [0], [0], [1], [0, 0, 1, 1], [], []>} : vector<160x4xf32>, vector<4x192xf32>, vector<160x192xf32> -> vector<160x192xf32>
    %18 = arith.addf %12, %17 : vector<160x192xf32>
    %c0_14 = arith.constant 0 : index
    %c0_15 = arith.constant 0 : index
    %19 = vector.load %arg3[%c0_14, %c0_15] : memref<1x192xf32, #tpu.memory_space<vmem>>, vector<1x192xf32>
    %20 = vector.broadcast %19 : vector<1x192xf32> to vector<160x192xf32>
    %21 = arith.addf %18, %20 : vector<160x192xf32>
    %22 = vector.extract_strided_slice %21 {offsets = [0, 0], sizes = [160, 64], strides = [1, 1]} : vector<160x192xf32> to vector<160x64xf32>
    %23 = vector.extract_strided_slice %21 {offsets = [0, 64], sizes = [160, 64], strides = [1, 1]} : vector<160x192xf32> to vector<160x64xf32>
    %24 = vector.extract_strided_slice %21 {offsets = [0, 128], sizes = [160, 64], strides = [1, 1]} : vector<160x192xf32> to vector<160x64xf32>
    %25 = arith.negf %23 : vector<160x64xf32>
    %26 = math.exp %25 : vector<160x64xf32>
    %cst_16 = arith.constant 1.000000e+00 : f32
    %27 = vector.broadcast %cst_16 : f32 to vector<160x64xf32>
    %28 = arith.addf %27, %26 : vector<160x64xf32>
    %29 = arith.divf %27, %28 : vector<160x64xf32>
    %30 = arith.mulf %22, %29 : vector<160x64xf32>
    %31 = arith.addf %30, %24 : vector<160x64xf32>
    %cst_17 = arith.constant 0.000000e+00 : f32
    %32 = vector.broadcast %cst_17 : f32 to vector<160x64xf32>
    %33 = arith.maximumf %31, %32 : vector<160x64xf32>
    %34 = vector.shape_cast %33 : vector<160x64xf32> to vector<2x10x8x64xf32>
    %35 = vector.shape_cast %34 : vector<2x10x8x64xf32> to vector<160x64xf32>
    %c0_18 = arith.constant 0 : index
    %c0_19 = arith.constant 0 : index
    %36 = vector.load %arg4[%c0_18, %c0_19] : memref<64x16xf32, #tpu.memory_space<vmem>>, vector<64x16xf32>
    %cst_20 = arith.constant dense<0.000000e+00> : vector<160x16xf32>
    %37 = tpu.matmul %35, %36, %cst_20 {dimension_numbers = #tpu.dot_dimension_numbers<[1], [0], [0], [1], [0, 0, 1, 1], [], []>} : vector<160x64xf32>, vector<64x16xf32>, vector<160x16xf32> -> vector<160x16xf32>
    %38 = vector.shape_cast %37 : vector<160x16xf32> to vector<20x8x16xf32>
    %39 = tpu.transpose %38, [0, 2, 1] : vector<20x8x16xf32> -> vector<20x16x8xf32>
    %40 = vector.shape_cast %39 : vector<20x16x8xf32> to vector<320x8xf32>
    %cst_21 = arith.constant dense<0.000000e+00> : vector<320x8xf32>
    %41 = tpu.matmul %40, %0, %cst_21 {dimension_numbers = #tpu.dot_dimension_numbers<[1], [0], [0], [1], [0, 0, 1, 1], [], []>} : vector<320x8xf32>, vector<8x8xf32>, vector<320x8xf32> -> vector<320x8xf32>
    %42 = vector.shape_cast %41 : vector<320x8xf32> to vector<20x16x8xf32>
    %43 = tpu.transpose %42, [0, 2, 1] : vector<20x16x8xf32> -> vector<20x8x16xf32>
    %cst_22 = arith.constant 0.000000e+00 : f32
    %44 = vector.broadcast %cst_22 : f32 to vector<20x8x16xf32>
    %45 = arith.maximumf %43, %44 : vector<20x8x16xf32>
    %46 = vector.shape_cast %45 : vector<20x8x16xf32> to vector<2x10x8x16xf32>
    %47 = vector.extract_strided_slice %46 {offsets = [0, 0, 0, 0], sizes = [2, 8, 8, 16], strides = [1, 1, 1, 1]} : vector<2x10x8x16xf32> to vector<2x8x8x16xf32>
    %48 = vector.shape_cast %47 : vector<2x8x8x16xf32> to vector<128x16xf32>
    %c0_23 = arith.constant 0 : index
    %c0_24 = arith.constant 0 : index
    %c0_25 = arith.constant 0 : index
    %49 = vector.load %arg5[%c0_23, %c0_24, %c0_25] : memref<3x16x192xf32, #tpu.memory_space<vmem>>, vector<1x16x192xf32>
    %50 = vector.shape_cast %49 : vector<1x16x192xf32> to vector<16x192xf32>
    %cst_26 = arith.constant dense<0.000000e+00> : vector<128x192xf32>
    %51 = tpu.matmul %48, %50, %cst_26 {dimension_numbers = #tpu.dot_dimension_numbers<[1], [0], [0], [1], [0, 0, 1, 1], [], []>} : vector<128x16xf32>, vector<16x192xf32>, vector<128x192xf32> -> vector<128x192xf32>
    %52 = vector.extract_strided_slice %46 {offsets = [0, 1, 0, 0], sizes = [2, 8, 8, 16], strides = [1, 1, 1, 1]} : vector<2x10x8x16xf32> to vector<2x8x8x16xf32>
    %53 = vector.shape_cast %52 : vector<2x8x8x16xf32> to vector<128x16xf32>
    %c1_27 = arith.constant 1 : index
    %c0_28 = arith.constant 0 : index
    %c0_29 = arith.constant 0 : index
    %54 = vector.load %arg5[%c1_27, %c0_28, %c0_29] : memref<3x16x192xf32, #tpu.memory_space<vmem>>, vector<1x16x192xf32>
    %55 = vector.shape_cast %54 : vector<1x16x192xf32> to vector<16x192xf32>
    %cst_30 = arith.constant dense<0.000000e+00> : vector<128x192xf32>
    %56 = tpu.matmul %53, %55, %cst_30 {dimension_numbers = #tpu.dot_dimension_numbers<[1], [0], [0], [1], [0, 0, 1, 1], [], []>} : vector<128x16xf32>, vector<16x192xf32>, vector<128x192xf32> -> vector<128x192xf32>
    %57 = arith.addf %51, %56 : vector<128x192xf32>
    %58 = vector.extract_strided_slice %46 {offsets = [0, 2, 0, 0], sizes = [2, 8, 8, 16], strides = [1, 1, 1, 1]} : vector<2x10x8x16xf32> to vector<2x8x8x16xf32>
    %59 = vector.shape_cast %58 : vector<2x8x8x16xf32> to vector<128x16xf32>
    %c2_31 = arith.constant 2 : index
    %c0_32 = arith.constant 0 : index
    %c0_33 = arith.constant 0 : index
    %60 = vector.load %arg5[%c2_31, %c0_32, %c0_33] : memref<3x16x192xf32, #tpu.memory_space<vmem>>, vector<1x16x192xf32>
    %61 = vector.shape_cast %60 : vector<1x16x192xf32> to vector<16x192xf32>
    %cst_34 = arith.constant dense<0.000000e+00> : vector<128x192xf32>
    %62 = tpu.matmul %59, %61, %cst_34 {dimension_numbers = #tpu.dot_dimension_numbers<[1], [0], [0], [1], [0, 0, 1, 1], [], []>} : vector<128x16xf32>, vector<16x192xf32>, vector<128x192xf32> -> vector<128x192xf32>
    %63 = arith.addf %57, %62 : vector<128x192xf32>
    %c0_35 = arith.constant 0 : index
    %c0_36 = arith.constant 0 : index
    %64 = vector.load %arg6[%c0_35, %c0_36] : memref<1x192xf32, #tpu.memory_space<vmem>>, vector<1x192xf32>
    %65 = vector.broadcast %64 : vector<1x192xf32> to vector<128x192xf32>
    %66 = arith.addf %63, %65 : vector<128x192xf32>
    %67 = vector.extract_strided_slice %66 {offsets = [0, 0], sizes = [128, 64], strides = [1, 1]} : vector<128x192xf32> to vector<128x64xf32>
    %68 = vector.extract_strided_slice %66 {offsets = [0, 64], sizes = [128, 64], strides = [1, 1]} : vector<128x192xf32> to vector<128x64xf32>
    %69 = vector.extract_strided_slice %66 {offsets = [0, 128], sizes = [128, 64], strides = [1, 1]} : vector<128x192xf32> to vector<128x64xf32>
    %70 = arith.negf %68 : vector<128x64xf32>
    %71 = math.exp %70 : vector<128x64xf32>
    %cst_37 = arith.constant 1.000000e+00 : f32
    %72 = vector.broadcast %cst_37 : f32 to vector<128x64xf32>
    %73 = arith.addf %72, %71 : vector<128x64xf32>
    %74 = arith.divf %72, %73 : vector<128x64xf32>
    %75 = arith.mulf %67, %74 : vector<128x64xf32>
    %76 = arith.addf %75, %69 : vector<128x64xf32>
    %cst_38 = arith.constant 0.000000e+00 : f32
    %77 = vector.broadcast %cst_38 : f32 to vector<128x64xf32>
    %78 = arith.maximumf %76, %77 : vector<128x64xf32>
    %79 = vector.shape_cast %78 : vector<128x64xf32> to vector<2x8x8x64xf32>
    %80 = vector.shape_cast %79 : vector<2x8x8x64xf32> to vector<16x8x64xf32>
    %cst_39 = arith.constant dense<0.000000e+00> : vector<16x8xf32>
    %81 = vector.multi_reduction <add>, %80, %cst_39 [2] : vector<16x8x64xf32> to vector<16x8xf32>
    %82 = vector.shape_cast %81 : vector<16x8xf32> to vector<16x8x1xf32>
    %cst_40 = arith.constant dense<0.000000e+00> : vector<8x1xf32>
    %83 = vector.multi_reduction <add>, %82, %cst_40 [0] : vector<16x8x1xf32> to vector<8x1xf32>
    %84 = vector.shape_cast %83 : vector<8x1xf32> to vector<1x8x1xf32>
    %cst_41 = arith.constant 1.024000e+03 : f32
    %85 = vector.broadcast %cst_41 : f32 to vector<1x8x1xf32>
    %86 = arith.divf %84, %85 : vector<1x8x1xf32>
    %87 = vector.broadcast %86 : vector<1x8x1xf32> to vector<16x8x64xf32>
    %88 = arith.subf %80, %87 : vector<16x8x64xf32>
    %89 = arith.mulf %88, %88 : vector<16x8x64xf32>
    %cst_42 = arith.constant dense<0.000000e+00> : vector<16x8xf32>
    %90 = vector.multi_reduction <add>, %89, %cst_42 [2] : vector<16x8x64xf32> to vector<16x8xf32>
    %91 = vector.shape_cast %90 : vector<16x8xf32> to vector<16x8x1xf32>
    %cst_43 = arith.constant dense<0.000000e+00> : vector<8x1xf32>
    %92 = vector.multi_reduction <add>, %91, %cst_43 [0] : vector<16x8x1xf32> to vector<8x1xf32>
    %93 = vector.shape_cast %92 : vector<8x1xf32> to vector<1x8x1xf32>
    %cst_44 = arith.constant 1.024000e+03 : f32
    %94 = vector.broadcast %cst_44 : f32 to vector<1x8x1xf32>
    %95 = arith.divf %93, %94 : vector<1x8x1xf32>
    %c0_45 = arith.constant 0 : index
    %c0_46 = arith.constant 0 : index
    %c0_47 = arith.constant 0 : index
    %c0_48 = arith.constant 0 : index
    %96 = vector.load %arg7[%c0_45, %c0_46, %c0_47, %c0_48] : memref<1x1x8x1xf32, #tpu.memory_space<vmem>>, vector<1x1x8x1xf32>
    %97 = vector.shape_cast %96 : vector<1x1x8x1xf32> to vector<1x8x1xf32>
    %c0_49 = arith.constant 0 : index
    %c0_50 = arith.constant 0 : index
    %c0_51 = arith.constant 0 : index
    %c0_52 = arith.constant 0 : index
    %98 = vector.load %arg8[%c0_49, %c0_50, %c0_51, %c0_52] : memref<1x1x8x1xf32, #tpu.memory_space<vmem>>, vector<1x1x8x1xf32>
    %99 = vector.shape_cast %98 : vector<1x1x8x1xf32> to vector<1x8x1xf32>
    %cst_53 = arith.constant 9.99999974E-6 : f32
    %100 = vector.broadcast %cst_53 : f32 to vector<1x8x1xf32>
    %101 = arith.addf %95, %100 : vector<1x8x1xf32>
    %102 = math.rsqrt %101 : vector<1x8x1xf32>
    %103 = vector.broadcast %102 : vector<1x8x1xf32> to vector<16x8x64xf32>
    %104 = arith.mulf %88, %103 : vector<16x8x64xf32>
    %105 = vector.broadcast %97 : vector<1x8x1xf32> to vector<16x8x64xf32>
    %106 = arith.mulf %104, %105 : vector<16x8x64xf32>
    %107 = vector.broadcast %99 : vector<1x8x1xf32> to vector<16x8x64xf32>
    %108 = arith.addf %106, %107 : vector<16x8x64xf32>
    %109 = vector.shape_cast %108 : vector<16x8x64xf32> to vector<2x8x8x64xf32>
    %110 = vector.extract_strided_slice %109 {offsets = [0, 0, 0, 0], sizes = [2, 6, 8, 64], strides = [1, 1, 1, 1]} : vector<2x8x8x64xf32> to vector<2x6x8x64xf32>
    %111 = vector.shape_cast %110 : vector<2x6x8x64xf32> to vector<96x64xf32>
    %c0_54 = arith.constant 0 : index
    %c0_55 = arith.constant 0 : index
    %c0_56 = arith.constant 0 : index
    %112 = vector.load %arg9[%c0_54, %c0_55, %c0_56] : memref<3x64x192xf32, #tpu.memory_space<vmem>>, vector<1x64x192xf32>
    %113 = vector.shape_cast %112 : vector<1x64x192xf32> to vector<64x192xf32>
    %cst_57 = arith.constant dense<0.000000e+00> : vector<96x192xf32>
    %114 = tpu.matmul %111, %113, %cst_57 {dimension_numbers = #tpu.dot_dimension_numbers<[1], [0], [0], [1], [0, 0, 1, 1], [], []>} : vector<96x64xf32>, vector<64x192xf32>, vector<96x192xf32> -> vector<96x192xf32>
    %115 = vector.extract_strided_slice %109 {offsets = [0, 1, 0, 0], sizes = [2, 6, 8, 64], strides = [1, 1, 1, 1]} : vector<2x8x8x64xf32> to vector<2x6x8x64xf32>
    %116 = vector.shape_cast %115 : vector<2x6x8x64xf32> to vector<96x64xf32>
    %c1_58 = arith.constant 1 : index
    %c0_59 = arith.constant 0 : index
    %c0_60 = arith.constant 0 : index
    %117 = vector.load %arg9[%c1_58, %c0_59, %c0_60] : memref<3x64x192xf32, #tpu.memory_space<vmem>>, vector<1x64x192xf32>
    %118 = vector.shape_cast %117 : vector<1x64x192xf32> to vector<64x192xf32>
    %cst_61 = arith.constant dense<0.000000e+00> : vector<96x192xf32>
    %119 = tpu.matmul %116, %118, %cst_61 {dimension_numbers = #tpu.dot_dimension_numbers<[1], [0], [0], [1], [0, 0, 1, 1], [], []>} : vector<96x64xf32>, vector<64x192xf32>, vector<96x192xf32> -> vector<96x192xf32>
    %120 = arith.addf %114, %119 : vector<96x192xf32>
    %121 = vector.extract_strided_slice %109 {offsets = [0, 2, 0, 0], sizes = [2, 6, 8, 64], strides = [1, 1, 1, 1]} : vector<2x8x8x64xf32> to vector<2x6x8x64xf32>
    %122 = vector.shape_cast %121 : vector<2x6x8x64xf32> to vector<96x64xf32>
    %c2_62 = arith.constant 2 : index
    %c0_63 = arith.constant 0 : index
    %c0_64 = arith.constant 0 : index
    %123 = vector.load %arg9[%c2_62, %c0_63, %c0_64] : memref<3x64x192xf32, #tpu.memory_space<vmem>>, vector<1x64x192xf32>
    %124 = vector.shape_cast %123 : vector<1x64x192xf32> to vector<64x192xf32>
    %cst_65 = arith.constant dense<0.000000e+00> : vector<96x192xf32>
    %125 = tpu.matmul %122, %124, %cst_65 {dimension_numbers = #tpu.dot_dimension_numbers<[1], [0], [0], [1], [0, 0, 1, 1], [], []>} : vector<96x64xf32>, vector<64x192xf32>, vector<96x192xf32> -> vector<96x192xf32>
    %126 = arith.addf %120, %125 : vector<96x192xf32>
    %c0_66 = arith.constant 0 : index
    %c0_67 = arith.constant 0 : index
    %127 = vector.load %arg10[%c0_66, %c0_67] : memref<1x192xf32, #tpu.memory_space<vmem>>, vector<1x192xf32>
    %128 = vector.broadcast %127 : vector<1x192xf32> to vector<96x192xf32>
    %129 = arith.addf %126, %128 : vector<96x192xf32>
    %130 = vector.extract_strided_slice %129 {offsets = [0, 0], sizes = [96, 64], strides = [1, 1]} : vector<96x192xf32> to vector<96x64xf32>
    %131 = vector.extract_strided_slice %129 {offsets = [0, 64], sizes = [96, 64], strides = [1, 1]} : vector<96x192xf32> to vector<96x64xf32>
    %132 = vector.extract_strided_slice %129 {offsets = [0, 128], sizes = [96, 64], strides = [1, 1]} : vector<96x192xf32> to vector<96x64xf32>
    %133 = arith.negf %131 : vector<96x64xf32>
    %134 = math.exp %133 : vector<96x64xf32>
    %cst_68 = arith.constant 1.000000e+00 : f32
    %135 = vector.broadcast %cst_68 : f32 to vector<96x64xf32>
    %136 = arith.addf %135, %134 : vector<96x64xf32>
    %137 = arith.divf %135, %136 : vector<96x64xf32>
    %138 = arith.mulf %130, %137 : vector<96x64xf32>
    %139 = arith.addf %138, %132 : vector<96x64xf32>
    %cst_69 = arith.constant 0.000000e+00 : f32
    %140 = vector.broadcast %cst_69 : f32 to vector<96x64xf32>
    %141 = arith.maximumf %139, %140 : vector<96x64xf32>
    %142 = vector.shape_cast %141 : vector<96x64xf32> to vector<2x6x8x64xf32>
    %143 = vector.shape_cast %142 : vector<2x6x8x64xf32> to vector<96x64xf32>
    %c0_70 = arith.constant 0 : index
    %c0_71 = arith.constant 0 : index
    %144 = vector.load %arg11[%c0_70, %c0_71] : memref<64x16xf32, #tpu.memory_space<vmem>>, vector<64x16xf32>
    %cst_72 = arith.constant dense<0.000000e+00> : vector<96x16xf32>
    %145 = tpu.matmul %143, %144, %cst_72 {dimension_numbers = #tpu.dot_dimension_numbers<[1], [0], [0], [1], [0, 0, 1, 1], [], []>} : vector<96x64xf32>, vector<64x16xf32>, vector<96x16xf32> -> vector<96x16xf32>
    %146 = vector.shape_cast %145 : vector<96x16xf32> to vector<12x8x16xf32>
    %147 = tpu.transpose %146, [0, 2, 1] : vector<12x8x16xf32> -> vector<12x16x8xf32>
    %148 = vector.shape_cast %147 : vector<12x16x8xf32> to vector<192x8xf32>
    %cst_73 = arith.constant dense<0.000000e+00> : vector<192x8xf32>
    %149 = tpu.matmul %148, %0, %cst_73 {dimension_numbers = #tpu.dot_dimension_numbers<[1], [0], [0], [1], [0, 0, 1, 1], [], []>} : vector<192x8xf32>, vector<8x8xf32>, vector<192x8xf32> -> vector<192x8xf32>
    %150 = vector.shape_cast %149 : vector<192x8xf32> to vector<12x16x8xf32>
    %151 = tpu.transpose %150, [0, 2, 1] : vector<12x16x8xf32> -> vector<12x8x16xf32>
    %cst_74 = arith.constant 0.000000e+00 : f32
    %152 = vector.broadcast %cst_74 : f32 to vector<12x8x16xf32>
    %153 = arith.maximumf %151, %152 : vector<12x8x16xf32>
    %154 = vector.shape_cast %153 : vector<12x8x16xf32> to vector<2x6x8x16xf32>
    %155 = vector.extract_strided_slice %154 {offsets = [0, 0, 0, 0], sizes = [2, 4, 8, 16], strides = [1, 1, 1, 1]} : vector<2x6x8x16xf32> to vector<2x4x8x16xf32>
    %156 = vector.shape_cast %155 : vector<2x4x8x16xf32> to vector<64x16xf32>
    %c0_75 = arith.constant 0 : index
    %c0_76 = arith.constant 0 : index
    %c0_77 = arith.constant 0 : index
    %157 = vector.load %arg12[%c0_75, %c0_76, %c0_77] : memref<3x16x192xf32, #tpu.memory_space<vmem>>, vector<1x16x192xf32>
    %158 = vector.shape_cast %157 : vector<1x16x192xf32> to vector<16x192xf32>
    %cst_78 = arith.constant dense<0.000000e+00> : vector<64x192xf32>
    %159 = tpu.matmul %156, %158, %cst_78 {dimension_numbers = #tpu.dot_dimension_numbers<[1], [0], [0], [1], [0, 0, 1, 1], [], []>} : vector<64x16xf32>, vector<16x192xf32>, vector<64x192xf32> -> vector<64x192xf32>
    %160 = vector.extract_strided_slice %154 {offsets = [0, 1, 0, 0], sizes = [2, 4, 8, 16], strides = [1, 1, 1, 1]} : vector<2x6x8x16xf32> to vector<2x4x8x16xf32>
    %161 = vector.shape_cast %160 : vector<2x4x8x16xf32> to vector<64x16xf32>
    %c1_79 = arith.constant 1 : index
    %c0_80 = arith.constant 0 : index
    %c0_81 = arith.constant 0 : index
    %162 = vector.load %arg12[%c1_79, %c0_80, %c0_81] : memref<3x16x192xf32, #tpu.memory_space<vmem>>, vector<1x16x192xf32>
    %163 = vector.shape_cast %162 : vector<1x16x192xf32> to vector<16x192xf32>
    %cst_82 = arith.constant dense<0.000000e+00> : vector<64x192xf32>
    %164 = tpu.matmul %161, %163, %cst_82 {dimension_numbers = #tpu.dot_dimension_numbers<[1], [0], [0], [1], [0, 0, 1, 1], [], []>} : vector<64x16xf32>, vector<16x192xf32>, vector<64x192xf32> -> vector<64x192xf32>
    %165 = arith.addf %159, %164 : vector<64x192xf32>
    %166 = vector.extract_strided_slice %154 {offsets = [0, 2, 0, 0], sizes = [2, 4, 8, 16], strides = [1, 1, 1, 1]} : vector<2x6x8x16xf32> to vector<2x4x8x16xf32>
    %167 = vector.shape_cast %166 : vector<2x4x8x16xf32> to vector<64x16xf32>
    %c2_83 = arith.constant 2 : index
    %c0_84 = arith.constant 0 : index
    %c0_85 = arith.constant 0 : index
    %168 = vector.load %arg12[%c2_83, %c0_84, %c0_85] : memref<3x16x192xf32, #tpu.memory_space<vmem>>, vector<1x16x192xf32>
    %169 = vector.shape_cast %168 : vector<1x16x192xf32> to vector<16x192xf32>
    %cst_86 = arith.constant dense<0.000000e+00> : vector<64x192xf32>
    %170 = tpu.matmul %167, %169, %cst_86 {dimension_numbers = #tpu.dot_dimension_numbers<[1], [0], [0], [1], [0, 0, 1, 1], [], []>} : vector<64x16xf32>, vector<16x192xf32>, vector<64x192xf32> -> vector<64x192xf32>
    %171 = arith.addf %165, %170 : vector<64x192xf32>
    %c0_87 = arith.constant 0 : index
    %c0_88 = arith.constant 0 : index
    %172 = vector.load %arg13[%c0_87, %c0_88] : memref<1x192xf32, #tpu.memory_space<vmem>>, vector<1x192xf32>
    %173 = vector.broadcast %172 : vector<1x192xf32> to vector<64x192xf32>
    %174 = arith.addf %171, %173 : vector<64x192xf32>
    %175 = vector.extract_strided_slice %174 {offsets = [0, 0], sizes = [64, 64], strides = [1, 1]} : vector<64x192xf32> to vector<64x64xf32>
    %176 = vector.extract_strided_slice %174 {offsets = [0, 64], sizes = [64, 64], strides = [1, 1]} : vector<64x192xf32> to vector<64x64xf32>
    %177 = vector.extract_strided_slice %174 {offsets = [0, 128], sizes = [64, 64], strides = [1, 1]} : vector<64x192xf32> to vector<64x64xf32>
    %178 = arith.negf %176 : vector<64x64xf32>
    %179 = math.exp %178 : vector<64x64xf32>
    %cst_89 = arith.constant 1.000000e+00 : f32
    %180 = vector.broadcast %cst_89 : f32 to vector<64x64xf32>
    %181 = arith.addf %180, %179 : vector<64x64xf32>
    %182 = arith.divf %180, %181 : vector<64x64xf32>
    %183 = arith.mulf %175, %182 : vector<64x64xf32>
    %184 = arith.addf %183, %177 : vector<64x64xf32>
    %cst_90 = arith.constant 0.000000e+00 : f32
    %185 = vector.broadcast %cst_90 : f32 to vector<64x64xf32>
    %186 = arith.maximumf %184, %185 : vector<64x64xf32>
    %187 = vector.shape_cast %186 : vector<64x64xf32> to vector<2x4x8x64xf32>
    %188 = vector.shape_cast %187 : vector<2x4x8x64xf32> to vector<8x8x64xf32>
    %cst_91 = arith.constant dense<0.000000e+00> : vector<8x8xf32>
    %189 = vector.multi_reduction <add>, %188, %cst_91 [2] : vector<8x8x64xf32> to vector<8x8xf32>
    %190 = vector.shape_cast %189 : vector<8x8xf32> to vector<8x8x1xf32>
    %cst_92 = arith.constant dense<0.000000e+00> : vector<8x1xf32>
    %191 = vector.multi_reduction <add>, %190, %cst_92 [0] : vector<8x8x1xf32> to vector<8x1xf32>
    %192 = vector.shape_cast %191 : vector<8x1xf32> to vector<1x8x1xf32>
    %cst_93 = arith.constant 5.120000e+02 : f32
    %193 = vector.broadcast %cst_93 : f32 to vector<1x8x1xf32>
    %194 = arith.divf %192, %193 : vector<1x8x1xf32>
    %195 = vector.broadcast %194 : vector<1x8x1xf32> to vector<8x8x64xf32>
    %196 = arith.subf %188, %195 : vector<8x8x64xf32>
    %197 = arith.mulf %196, %196 : vector<8x8x64xf32>
    %cst_94 = arith.constant dense<0.000000e+00> : vector<8x8xf32>
    %198 = vector.multi_reduction <add>, %197, %cst_94 [2] : vector<8x8x64xf32> to vector<8x8xf32>
    %199 = vector.shape_cast %198 : vector<8x8xf32> to vector<8x8x1xf32>
    %cst_95 = arith.constant dense<0.000000e+00> : vector<8x1xf32>
    %200 = vector.multi_reduction <add>, %199, %cst_95 [0] : vector<8x8x1xf32> to vector<8x1xf32>
    %201 = vector.shape_cast %200 : vector<8x1xf32> to vector<1x8x1xf32>
    %cst_96 = arith.constant 5.120000e+02 : f32
    %202 = vector.broadcast %cst_96 : f32 to vector<1x8x1xf32>
    %203 = arith.divf %201, %202 : vector<1x8x1xf32>
    %c0_97 = arith.constant 0 : index
    %c0_98 = arith.constant 0 : index
    %c0_99 = arith.constant 0 : index
    %c0_100 = arith.constant 0 : index
    %204 = vector.load %arg14[%c0_97, %c0_98, %c0_99, %c0_100] : memref<1x1x8x1xf32, #tpu.memory_space<vmem>>, vector<1x1x8x1xf32>
    %205 = vector.shape_cast %204 : vector<1x1x8x1xf32> to vector<1x8x1xf32>
    %c0_101 = arith.constant 0 : index
    %c0_102 = arith.constant 0 : index
    %c0_103 = arith.constant 0 : index
    %c0_104 = arith.constant 0 : index
    %206 = vector.load %arg15[%c0_101, %c0_102, %c0_103, %c0_104] : memref<1x1x8x1xf32, #tpu.memory_space<vmem>>, vector<1x1x8x1xf32>
    %207 = vector.shape_cast %206 : vector<1x1x8x1xf32> to vector<1x8x1xf32>
    %cst_105 = arith.constant 9.99999974E-6 : f32
    %208 = vector.broadcast %cst_105 : f32 to vector<1x8x1xf32>
    %209 = arith.addf %203, %208 : vector<1x8x1xf32>
    %210 = math.rsqrt %209 : vector<1x8x1xf32>
    %211 = vector.broadcast %210 : vector<1x8x1xf32> to vector<8x8x64xf32>
    %212 = arith.mulf %196, %211 : vector<8x8x64xf32>
    %213 = vector.broadcast %205 : vector<1x8x1xf32> to vector<8x8x64xf32>
    %214 = arith.mulf %212, %213 : vector<8x8x64xf32>
    %215 = vector.broadcast %207 : vector<1x8x1xf32> to vector<8x8x64xf32>
    %216 = arith.addf %214, %215 : vector<8x8x64xf32>
    %217 = vector.shape_cast %216 : vector<8x8x64xf32> to vector<2x4x8x64xf32>
    %218 = vector.extract_strided_slice %217 {offsets = [0, 0, 0, 0], sizes = [2, 2, 8, 64], strides = [1, 1, 1, 1]} : vector<2x4x8x64xf32> to vector<2x2x8x64xf32>
    %219 = vector.shape_cast %218 : vector<2x2x8x64xf32> to vector<32x64xf32>
    %c0_106 = arith.constant 0 : index
    %c0_107 = arith.constant 0 : index
    %c0_108 = arith.constant 0 : index
    %220 = vector.load %arg16[%c0_106, %c0_107, %c0_108] : memref<3x64x192xf32, #tpu.memory_space<vmem>>, vector<1x64x192xf32>
    %221 = vector.shape_cast %220 : vector<1x64x192xf32> to vector<64x192xf32>
    %cst_109 = arith.constant dense<0.000000e+00> : vector<32x192xf32>
    %222 = tpu.matmul %219, %221, %cst_109 {dimension_numbers = #tpu.dot_dimension_numbers<[1], [0], [0], [1], [0, 0, 1, 1], [], []>} : vector<32x64xf32>, vector<64x192xf32>, vector<32x192xf32> -> vector<32x192xf32>
    %223 = vector.extract_strided_slice %217 {offsets = [0, 1, 0, 0], sizes = [2, 2, 8, 64], strides = [1, 1, 1, 1]} : vector<2x4x8x64xf32> to vector<2x2x8x64xf32>
    %224 = vector.shape_cast %223 : vector<2x2x8x64xf32> to vector<32x64xf32>
    %c1_110 = arith.constant 1 : index
    %c0_111 = arith.constant 0 : index
    %c0_112 = arith.constant 0 : index
    %225 = vector.load %arg16[%c1_110, %c0_111, %c0_112] : memref<3x64x192xf32, #tpu.memory_space<vmem>>, vector<1x64x192xf32>
    %226 = vector.shape_cast %225 : vector<1x64x192xf32> to vector<64x192xf32>
    %cst_113 = arith.constant dense<0.000000e+00> : vector<32x192xf32>
    %227 = tpu.matmul %224, %226, %cst_113 {dimension_numbers = #tpu.dot_dimension_numbers<[1], [0], [0], [1], [0, 0, 1, 1], [], []>} : vector<32x64xf32>, vector<64x192xf32>, vector<32x192xf32> -> vector<32x192xf32>
    %228 = arith.addf %222, %227 : vector<32x192xf32>
    %229 = vector.extract_strided_slice %217 {offsets = [0, 2, 0, 0], sizes = [2, 2, 8, 64], strides = [1, 1, 1, 1]} : vector<2x4x8x64xf32> to vector<2x2x8x64xf32>
    %230 = vector.shape_cast %229 : vector<2x2x8x64xf32> to vector<32x64xf32>
    %c2_114 = arith.constant 2 : index
    %c0_115 = arith.constant 0 : index
    %c0_116 = arith.constant 0 : index
    %231 = vector.load %arg16[%c2_114, %c0_115, %c0_116] : memref<3x64x192xf32, #tpu.memory_space<vmem>>, vector<1x64x192xf32>
    %232 = vector.shape_cast %231 : vector<1x64x192xf32> to vector<64x192xf32>
    %cst_117 = arith.constant dense<0.000000e+00> : vector<32x192xf32>
    %233 = tpu.matmul %230, %232, %cst_117 {dimension_numbers = #tpu.dot_dimension_numbers<[1], [0], [0], [1], [0, 0, 1, 1], [], []>} : vector<32x64xf32>, vector<64x192xf32>, vector<32x192xf32> -> vector<32x192xf32>
    %234 = arith.addf %228, %233 : vector<32x192xf32>
    %c0_118 = arith.constant 0 : index
    %c0_119 = arith.constant 0 : index
    %235 = vector.load %arg17[%c0_118, %c0_119] : memref<1x192xf32, #tpu.memory_space<vmem>>, vector<1x192xf32>
    %236 = vector.broadcast %235 : vector<1x192xf32> to vector<32x192xf32>
    %237 = arith.addf %234, %236 : vector<32x192xf32>
    %238 = vector.extract_strided_slice %237 {offsets = [0, 0], sizes = [32, 64], strides = [1, 1]} : vector<32x192xf32> to vector<32x64xf32>
    %239 = vector.extract_strided_slice %237 {offsets = [0, 64], sizes = [32, 64], strides = [1, 1]} : vector<32x192xf32> to vector<32x64xf32>
    %240 = vector.extract_strided_slice %237 {offsets = [0, 128], sizes = [32, 64], strides = [1, 1]} : vector<32x192xf32> to vector<32x64xf32>
    %241 = arith.negf %239 : vector<32x64xf32>
    %242 = math.exp %241 : vector<32x64xf32>
    %cst_120 = arith.constant 1.000000e+00 : f32
    %243 = vector.broadcast %cst_120 : f32 to vector<32x64xf32>
    %244 = arith.addf %243, %242 : vector<32x64xf32>
    %245 = arith.divf %243, %244 : vector<32x64xf32>
    %246 = arith.mulf %238, %245 : vector<32x64xf32>
    %247 = arith.addf %246, %240 : vector<32x64xf32>
    %cst_121 = arith.constant 0.000000e+00 : f32
    %248 = vector.broadcast %cst_121 : f32 to vector<32x64xf32>
    %249 = arith.maximumf %247, %248 : vector<32x64xf32>
    %250 = vector.shape_cast %249 : vector<32x64xf32> to vector<2x2x8x64xf32>
    %251 = vector.extract_strided_slice %250 {offsets = [0, 0, 0, 0], sizes = [2, 1, 8, 64], strides = [1, 1, 1, 1]} : vector<2x2x8x64xf32> to vector<2x1x8x64xf32>
    %252 = vector.shape_cast %251 : vector<2x1x8x64xf32> to vector<2x8x64xf32>
    %253 = vector.shape_cast %252 : vector<2x8x64xf32> to vector<16x64xf32>
    %c0_122 = arith.constant 0 : index
    %c0_123 = arith.constant 0 : index
    %254 = vector.load %arg18[%c0_122, %c0_123] : memref<128x3xf32, #tpu.memory_space<vmem>>, vector<64x3xf32>
    %cst_124 = arith.constant dense<0.000000e+00> : vector<16x3xf32>
    %255 = tpu.matmul %253, %254, %cst_124 {dimension_numbers = #tpu.dot_dimension_numbers<[1], [0], [0], [1], [0, 0, 1, 1], [], []>} : vector<16x64xf32>, vector<64x3xf32>, vector<16x3xf32> -> vector<16x3xf32>
    %256 = vector.extract_strided_slice %250 {offsets = [0, 1, 0, 0], sizes = [2, 1, 8, 64], strides = [1, 1, 1, 1]} : vector<2x2x8x64xf32> to vector<2x1x8x64xf32>
    %257 = vector.shape_cast %256 : vector<2x1x8x64xf32> to vector<2x8x64xf32>
    %258 = vector.shape_cast %257 : vector<2x8x64xf32> to vector<16x64xf32>
    %c64 = arith.constant 64 : index
    %c0_125 = arith.constant 0 : index
    %259 = vector.load %arg18[%c64, %c0_125] : memref<128x3xf32, #tpu.memory_space<vmem>>, vector<64x3xf32>
    %cst_126 = arith.constant dense<0.000000e+00> : vector<16x3xf32>
    %260 = tpu.matmul %258, %259, %cst_126 {dimension_numbers = #tpu.dot_dimension_numbers<[1], [0], [0], [1], [0, 0, 1, 1], [], []>} : vector<16x64xf32>, vector<64x3xf32>, vector<16x3xf32> -> vector<16x3xf32>
    %261 = arith.addf %255, %260 : vector<16x3xf32>
    %c0_127 = arith.constant 0 : index
    %c0_128 = arith.constant 0 : index
    %262 = vector.load %arg19[%c0_127, %c0_128] : memref<1x3xf32, #tpu.memory_space<vmem>>, vector<1x3xf32>
    %263 = vector.broadcast %262 : vector<1x3xf32> to vector<16x3xf32>
    %264 = arith.addf %261, %263 : vector<16x3xf32>
    %265 = vector.shape_cast %264 : vector<16x3xf32> to vector<2x8x3xf32>
    %c0_129 = arith.constant 0 : index
    %c0_130 = arith.constant 0 : index
    %c0_131 = arith.constant 0 : index
    %266 = vector.load %arg20[%c0_129, %c0_130, %c0_131] : memref<2x8x3xf32, #tpu.memory_space<vmem>>, vector<2x8x3xf32>
    tpu.vector_store %arg20[%c0_129, %c0_130, %c0_131], %265 {strides = array<i32>} : memref<2x8x3xf32, #tpu.memory_space<vmem>>, vector<2x8x3xf32>,
    return
  }
}

</mosaic_0001>

<bundles_post_ra>
// kernel: stgcn_pallas.1
= control target key start
LH: loop header
LB: loop body
LE: loop exit
PB: predicated region body
PF: predicated region fallthrough
CT: control target
= control target key end

     0   :  { %s10522_s0 = inlined_call_operand.vmem [shape: f32[2,12,8,4], index: 0, kind: input, shape index: {}]   ;;  %s10523_s1 = inlined_call_operand.vmem [shape: f32[8,8], index: 1, kind: input, shape index: {}]   ;;  %s10524_s2 = inlined_call_operand.vmem [shape: f32[3,4,192], index: 2, kind: input, shape index: {}]   ;;  %s10525_s3 = inlined_call_operand.vmem [shape: f32[1,192], index: 3, kind: input, shape index: {}]   ;;  %s10526_s4 = inlined_call_operand.vmem [shape: f32[64,16], index: 4, kind: input, shape index: {}]   ;;  %s10527_s5 = inlined_call_operand.vmem [shape: f32[3,16,192], index: 5, kind: input, shape index: {}]   ;;  %s10528_s6 = inlined_call_operand.vmem [shape: f32[1,192], index: 6, kind: input, shape index: {}]   ;;  %s10529_s7 = inlined_call_operand.vmem [shape: f32[1,1,8,1], index: 7, kind: input, shape index: {}]   ;;  %s10530_s8 = inlined_call_operand.vmem [shape: f32[1,1,8,1], index: 8, kind: input, shape index: {}]   ;;  %s10531_s9 = inlined_call_operand.hbm [shape: f32[3,64,192], index: 9, kind: input, shape index: {}]   ;;  %s10532_s10 = inlined_call_operand.vmem [shape: f32[1,192], index: 10, kind: input, shape index: {}]   ;;  %s10533_s11 = inlined_call_operand.vmem [shape: f32[64,16], index: 11, kind: input, shape index: {}]   ;;  %s10534_s12 = inlined_call_operand.vmem [shape: f32[3,16,192], index: 12, kind: input, shape index: {}]   ;;  %s10535_s13 = inlined_call_operand.vmem [shape: f32[1,192], index: 13, kind: input, shape index: {}]   ;;  %s10536_s14 = inlined_call_operand.vmem [shape: f32[1,1,8,1], index: 14, kind: input, shape index: {}]   ;;  %s10537_s15 = inlined_call_operand.vmem [shape: f32[1,1,8,1], index: 15, kind: input, shape index: {}]   ;;  %s10538_s16 = inlined_call_operand.hbm [shape: f32[3,64,192], index: 16, kind: input, shape index: {}]   ;;  %s10539_s17 = inlined_call_operand.vmem [shape: f32[1,192], index: 17, kind: input, shape index: {}]   ;;  %s10540_s18 = inlined_call_operand.vmem [shape: f32[128,3], index: 18, kind: input, shape index: {}]   ;;  %s10541_s19 = inlined_call_operand.vmem [shape: f32[1,3], index: 19, kind: input, shape index: {}]   ;;  %s10542_s20 = inlined_call_operand.vmem [shape: f32[2,8,3], index: 20, kind: output, shape index: {}]  }
   0x1   :  { %10548 = sst [smem:[#allocation13_spill]] %s10522_s0 }
   0x2   :  { %10549 = sst [smem:[#allocation14_spill]] %s10523_s1 }
   0x3   :  { %10550 = sst [smem:[#allocation15_spill]] %s10524_s2 }
   0x4   :  { %10551 = sst [smem:[#allocation16_spill]] %s10525_s3 }
   0x5   :  { %10552 = sst [smem:[#allocation17_spill]] %s10526_s4 }
   0x6   :  { %25 = vsyncpa [#allocation3], 0  ;;  %s49_s23 = sshll.u32 %s10531_s9, 4  ;;  %s50_s23 = int_to_ptr.hbm [resolvable:$true] %s49_s23 }
   0x7   :  { %26 = vsyncpa [#allocation5], 0  ;;  %s8005_s24 = smov [#allocation2]   ;;  %s74_s26 = sshll.u32 %s10538_s16, 4  ;;  %s75_s26 = int_to_ptr.hbm [resolvable:$true] %s74_s26 }
   0x8   :  { %s51_s2 = sshll.u32 %s8005_s24, 4  ;;  %s8006_s27 = smov 256   ;;  %s52_s2 = int_to_ptr.vmem [resolvable:$true] %s51_s2 }
   0x9   :  { %s8007_s28 = smov 16   ;;  %s8008_s4 = smov [#allocation4]  }
   0xa   :  { %57 = dma.hbm_to_vmem [thread:$0]  %s50_s23, 6144, %s52_s2, [#allocation3], %s8006_s27, %s8006_s27, %s8007_s28  }
   0xb   :  { %s76_s29 = sshll.u32 %s8008_s4, 4  ;;  %s77_s29 = int_to_ptr.vmem [resolvable:$true] %s76_s29 }
   0xc   :  { %82 = dma.hbm_to_vmem [thread:$0]  %s75_s26, 6144, %s77_s29, [#allocation5], %s8006_s27, %s8006_s27, %s8007_s28  }
   0xd   :  { %8001 = dma.done.wait [#allocation3], 6144  }
   0xe   :  { %8002 = vsyncadd [#allocation3], 4294961152 }
   0xf   :  { %8003 = dma.done.wait [#allocation5], 6144  }
  0x10   :  { %8004 = vsyncadd [#allocation5], 4294961152  ;;  %s10553_s0 = sld [smem:[#allocation15_spill]]  ;;  %vm190_vm0 = vcmask 1043456   ;;  %vm129_vm1 = vcmask 31744   ;;  %s8009_s9 = smov 64  }
  0x11   :  { %s10554_s23 = sld [smem:[#allocation13_spill]] }
  0x12   :  { %s10556_s24 = sld [smem:[#allocation17_spill]] }
  0x13   :  { %s10557_s3 = sld [smem:[#allocation16_spill]] }
  0x14   :  { %s10562_s28 = sld [smem:[#allocation14_spill]] }
  0x16   :  { %v7145_v0 = vld [vmem:[%s10553_s0 + $0x8] sm:$0xff]  ;;  %v122_v1 = vld [vmem:[%s10553_s0] sm:$0xff]  ;;  %v7230_v6 = vld [vmem:[%s10553_s0 + $0x10] sm:$0xff] }
  0x17   :  { %126 = vst [vmem:[#allocation1] ss:$2 sm:$0xff] %v7145_v0  ;;  %v99_v2 = vld [vmem:[%s10554_s23 + $0x8] sm:$0xff]  ;;  %v8136_v3 = vld [vmem:[%s10554_s23 + $0xb0] sm:$0xff]  ;;  %v98_v8 = vld [vmem:[%s10554_s23] sm:$0xff] }
  0x18   :  { %v8154_v7 = vld [vmem:[%s10554_s23 + $0x10] sm:$0xff]  ;;  %v8170_v11 = vld [vmem:[%s10554_s23 + $0x18] sm:$0xff]  ;;  %v8182_v13 = vld [vmem:[%s10554_s23 + $0x20] sm:$0xff] }
  0x19   :  { %v8195_v14 = vld [vmem:[%s10554_s23 + $0x28] sm:$0xff]  ;;  %v8208_v15 = vld [vmem:[%s10554_s23 + $0x30] sm:$0xff]  ;;  %v8221_v16 = vld [vmem:[%s10554_s23 + $0x38] sm:$0xff] }
  0x1a   :  { %v8234_v17 = vld [vmem:[%s10554_s23 + $0x40] sm:$0xff]  ;;  %v8247_v18 = vld [vmem:[%s10554_s23 + $0x48] sm:$0xff]  ;;  %v8260_v19 = vld [vmem:[%s10554_s23 + $0x50] sm:$0xff] }
  0x1b   :  { %v111_v20 = vld [vmem:[%s10554_s23 + $0x68] sm:$0xff]  ;;  %v8282_v21 = vld [vmem:[%s10554_s23 + $0x70] sm:$0xff]  ;;  %v110_v22 = vld [vmem:[%s10554_s23 + $0x60] sm:$0xff] }
  0x1c   :  { %v8296_v23 = vld [vmem:[%s10554_s23 + $0x78] sm:$0xff]  ;;  %v8307_v24 = vld [vmem:[%s10554_s23 + $0x80] sm:$0xff]  ;;  %v8320_v25 = vld [vmem:[%s10554_s23 + $0x88] sm:$0xff] }
  0x1d   :  { %v8333_v26 = vld [vmem:[%s10554_s23 + $0x90] sm:$0xff]  ;;  %v8349_v29 = vld [vmem:[%s10554_s23 + $0x98] sm:$0xff]  ;;  %v8364_v31 = vld [vmem:[%s10554_s23 + $0xa0] sm:$0xff] }
  0x1e   :  { %v127_v4 = vld.sshfl [vmem:[#allocation1] sm:$0xff pattern:$0x75316420]  ;;  %v128_v5 = vld.sshfl [vmem:[#allocation1 + $0x8] sm:$0xff pattern:$0x75316420] }
  0x1f   :  { %7146 = vmatpush.msk.msra.mxu0 %vm190_vm0, %v127_v4  ;;  %7689 = vmatpush.msk.msra.mxu2 %vm190_vm0, %v127_v4  ;;  %350 = vst [vmem:[#allocation1] ss:$2 sm:$0xff] %v122_v1  ;;  %v8379_v33 = vld [vmem:[%s10554_s23 + $0xa8] sm:$0xff]  ;;  %v109_v50 = vld [vmem:[%s10554_s23 + $0x58] sm:$0xff] }
  0x20   :  { %7167 = vmatpush.msk.msra.mxu1 %vm190_vm0, %v128_v5  ;;  %7147 = vmatmul.msk.f32.vlgmr.msra.gmra.mxu0 %vm129_vm1, %v99_v2 }
  0x21   :  { %7166 = vmatmul.msk.f32.vlgmr.msra.gmra.mxu2 %vm129_vm1, %v8136_v3  ;;  %7168 = vmatmul.msk.f32.vlgmr.msra.gmra.mxu1 %vm129_vm1, %v99_v2 }
  0x22   :  { %7690 = vmatpush.msk.msra.mxu3 %vm190_vm0, %v128_v5  ;;  %v8524_v5 = vld [vmem:[%s10557_s3] sm:$0x3] }
  0x23   :  { %7187 = vmatmul.msk.f32.vlgmr.msra.gmra.mxu3 %vm129_vm1, %v8136_v3 }
  0x26   :  { %v351_v9 = vld.sshfl [vmem:[#allocation1] sm:$0xff pattern:$0x75316420]  ;;  %v352_v10 = vld.sshfl [vmem:[#allocation1 + $0x8] sm:$0xff pattern:$0x75316420] }
  0x27   :  { %7188 = vmatpush.msk.msrb.mxu2 %vm190_vm0, %v351_v9  ;;  %520 = vst [vmem:[#allocation1] ss:$2 sm:$0xff] %v7230_v6  ;;  %7209 = vmatpush.msk.msrb.mxu3 %vm190_vm0, %v352_v10 }
  0x28   :  { %7148 = vmatmul.msk.f32.gmra.mxu0 %vm129_vm1, %v8154_v7 }
  0x29   :  { %7169 = vmatmul.msk.f32.gmra.mxu1 %vm129_vm1, %v8154_v7  ;;  %7189 = vmatmul.msk.f32.vlgmr.msrb.gmra.mxu2 %vm129_vm1, %v98_v8 }
  0x2b   :  { %7210 = vmatmul.msk.f32.vlgmr.msrb.gmra.mxu3 %vm129_vm1, %v98_v8  ;;  %v8530_v8 = vperm.slane %v8524_v5, 0 }
  0x2e   :  { %v521_v12 = vld.sshfl [vmem:[#allocation1] sm:$0xff pattern:$0x75316420]  ;;  %v522_v27 = vld.sshfl [vmem:[#allocation1 + $0x8] sm:$0xff pattern:$0x75316420] }
  0x2f   :  { %7231 = vmatpush.msk.msrb.mxu0 %vm190_vm0, %v521_v12  ;;  %7252 = vmatpush.msk.msrb.mxu1 %vm190_vm0, %v522_v27 }
  0x30   :  { %7149 = vmatmul.msk.f32.gmra.mxu0 %vm129_vm1, %v8170_v11 }
  0x31   :  { %7170 = vmatmul.msk.f32.gmra.mxu1 %vm129_vm1, %v8170_v11  ;;  %7190 = vmatmul.msk.f32.gmra.mxu2 %vm129_vm1, %v99_v2 }
  0x33   :  { %7211 = vmatmul.msk.f32.gmra.mxu3 %vm129_vm1, %v99_v2  ;;  %v1300_v2 = vld [vmem:[%s10556_s24 + $0x38] sm:$0xff] }
  0x34   :  { %1370 = vmatpush.msra.mxu2 %v1300_v2 }
  0x38   :  { %7150 = vmatmul.msk.f32.gmra.mxu0 %vm129_vm1, %v8182_v13 }
  0x39   :  { %7171 = vmatmul.msk.f32.gmra.mxu1 %vm129_vm1, %v8182_v13  ;;  %7191 = vmatmul.msk.f32.gmra.mxu2 %vm129_vm1, %v8154_v7 }
  0x3b   :  { %7212 = vmatmul.msk.f32.gmra.mxu3 %vm129_vm1, %v8154_v7 }
  0x40   :  { %7151 = vmatmul.msk.f32.gmra.mxu0 %vm129_vm1, %v8195_v14 }
  0x41   :  { %7172 = vmatmul.msk.f32.gmra.mxu1 %vm129_vm1, %v8195_v14  ;;  %7192 = vmatmul.msk.f32.gmra.mxu2 %vm129_vm1, %v8170_v11 }
  0x43   :  { %7213 = vmatmul.msk.f32.gmra.mxu3 %vm129_vm1, %v8170_v11 }
  0x48   :  { %7152 = vmatmul.msk.f32.gmra.mxu0 %vm129_vm1, %v8208_v15 }
  0x49   :  { %7173 = vmatmul.msk.f32.gmra.mxu1 %vm129_vm1, %v8208_v15  ;;  %7193 = vmatmul.msk.f32.gmra.mxu2 %vm129_vm1, %v8182_v13 }
  0x4b   :  { %7214 = vmatmul.msk.f32.gmra.mxu3 %vm129_vm1, %v8182_v13 }
  0x50   :  { %7153 = vmatmul.msk.f32.gmra.mxu0 %vm129_vm1, %v8221_v16 }
  0x51   :  { %7174 = vmatmul.msk.f32.gmra.mxu1 %vm129_vm1, %v8221_v16  ;;  %7194 = vmatmul.msk.f32.gmra.mxu2 %vm129_vm1, %v8195_v14 }
  0x53   :  { %7215 = vmatmul.msk.f32.gmra.mxu3 %vm129_vm1, %v8195_v14 }
  0x58   :  { %7154 = vmatmul.msk.f32.gmra.mxu0 %vm129_vm1, %v8234_v17 }
  0x59   :  { %7175 = vmatmul.msk.f32.gmra.mxu1 %vm129_vm1, %v8234_v17  ;;  %7195 = vmatmul.msk.f32.gmra.mxu2 %vm129_vm1, %v8208_v15 }
  0x5b   :  { %7216 = vmatmul.msk.f32.gmra.mxu3 %vm129_vm1, %v8208_v15 }
  0x60   :  { %7155 = vmatmul.msk.f32.gmra.mxu0 %vm129_vm1, %v8247_v18 }
  0x61   :  { %7176 = vmatmul.msk.f32.gmra.mxu1 %vm129_vm1, %v8247_v18  ;;  %7196 = vmatmul.msk.f32.gmra.mxu2 %vm129_vm1, %v8221_v16 }
  0x63   :  { %7217 = vmatmul.msk.f32.gmra.mxu3 %vm129_vm1, %v8221_v16 }
  0x68   :  { %7156 = vmatmul.msk.f32.gmra.mxu0 %vm129_vm1, %v8260_v19 }
  0x69   :  { %7177 = vmatmul.msk.f32.gmra.mxu1 %vm129_vm1, %v8260_v19  ;;  %7197 = vmatmul.msk.f32.gmra.mxu2 %vm129_vm1, %v8234_v17 }
  0x6b   :  { %7218 = vmatmul.msk.f32.gmra.mxu3 %vm129_vm1, %v8234_v17 }
  0x70   :  { %7157 = vmatmul.msk.f32.gmra.mxu0 %vm129_vm1, %v111_v20 }
  0x71   :  { %7178 = vmatmul.msk.f32.gmra.mxu1 %vm129_vm1, %v111_v20  ;;  %7198 = vmatmul.msk.f32.gmra.mxu2 %vm129_vm1, %v8247_v18 }
  0x73   :  { %7219 = vmatmul.msk.f32.gmra.mxu3 %vm129_vm1, %v8247_v18 }
  0x78   :  { %7158 = vmatmul.msk.f32.gmra.mxu0 %vm129_vm1, %v8282_v21 }
  0x79   :  { %7179 = vmatmul.msk.f32.gmra.mxu1 %vm129_vm1, %v8282_v21  ;;  %7199 = vmatmul.msk.f32.gmra.mxu2 %vm129_vm1, %v110_v22 }
  0x7b   :  { %7220 = vmatmul.msk.f32.gmra.mxu3 %vm129_vm1, %v110_v22 }
  0x80   :  { %7159 = vmatmul.msk.f32.gmra.mxu0 %vm129_vm1, %v8296_v23 }
  0x81   :  { %7180 = vmatmul.msk.f32.gmra.mxu1 %vm129_vm1, %v8296_v23  ;;  %7200 = vmatmul.msk.f32.gmra.mxu2 %vm129_vm1, %v111_v20 }
  0x83   :  { %7221 = vmatmul.msk.f32.gmra.mxu3 %vm129_vm1, %v111_v20 }
  0x88   :  { %7160 = vmatmul.msk.f32.gmra.mxu0 %vm129_vm1, %v8307_v24 }
  0x89   :  { %7181 = vmatmul.msk.f32.gmra.mxu1 %vm129_vm1, %v8307_v24  ;;  %7201 = vmatmul.msk.f32.gmra.mxu2 %vm129_vm1, %v8282_v21 }
  0x8b   :  { %7222 = vmatmul.msk.f32.gmra.mxu3 %vm129_vm1, %v8282_v21 }
  0x90   :  { %7161 = vmatmul.msk.f32.gmra.mxu0 %vm129_vm1, %v8320_v25 }
  0x91   :  { %7182 = vmatmul.msk.f32.gmra.mxu1 %vm129_vm1, %v8320_v25  ;;  %7202 = vmatmul.msk.f32.gmra.mxu2 %vm129_vm1, %v8296_v23 }
  0x93   :  { %7223 = vmatmul.msk.f32.gmra.mxu3 %vm129_vm1, %v8296_v23 }
  0x98   :  { %7162 = vmatmul.msk.f32.gmra.mxu0 %vm129_vm1, %v8333_v26 }
  0x99   :  { %7183 = vmatmul.msk.f32.gmra.mxu1 %vm129_vm1, %v8333_v26  ;;  %7203 = vmatmul.msk.f32.gmra.mxu2 %vm129_vm1, %v8307_v24 }
  0x9b   :  { %7224 = vmatmul.msk.f32.gmra.mxu3 %vm129_vm1, %v8307_v24 }
  0x9d   :  { %v8344_v28 = vpop.f32.mrf.mxu0 }
  0x9e   :  { %v8409_v36 = vpop.f32.mrf.mxu1 }
  0xa0   :  { %7163 = vmatmul.msk.f32.gmra.mxu0 %vm129_vm1, %v8349_v29 }
  0xa1   :  { %7184 = vmatmul.msk.f32.gmra.mxu1 %vm129_vm1, %v8349_v29  ;;  %7204 = vmatmul.msk.f32.gmra.mxu2 %vm129_vm1, %v8320_v25 }
  0xa3   :  { %7225 = vmatmul.msk.f32.gmra.mxu3 %vm129_vm1, %v8320_v25 }
  0xa4   :  { %v8474_v53 = vpop.f32.mrf.mxu2 }
  0xa5   :  { %v8359_v30 = vpop.f32.mrf.mxu0  ;;  %10555 = vst [vmem:[#allocation8_spill] sm:$0xff] %v8474_v53 }
  0xa6   :  { %v8419_v39 = vpop.f32.mrf.mxu1 }
  0xa8   :  { %7164 = vmatmul.msk.f32.gmra.mxu0 %vm129_vm1, %v8364_v31 }
  0xa9   :  { %7185 = vmatmul.msk.f32.gmra.mxu1 %vm129_vm1, %v8364_v31  ;;  %7205 = vmatmul.msk.f32.gmra.mxu2 %vm129_vm1, %v8333_v26 }
  0xab   :  { %7226 = vmatmul.msk.f32.gmra.mxu3 %vm129_vm1, %v8333_v26 }
  0xac   :  { %v380_v56 = vpop.f32.mrf.mxu2 }
  0xad   :  { %v8374_v32 = vpop.f32.mrf.mxu0 }
  0xae   :  { %v8429_v41 = vpop.f32.mrf.mxu1 }
  0xb0   :  { %7165 = vmatmul.msk.f32.gmra.mxu0 %vm129_vm1, %v8379_v33 }
  0xb1   :  { %7186 = vmatmul.msk.f32.gmra.mxu1 %vm129_vm1, %v8379_v33  ;;  %7206 = vmatmul.msk.f32.gmra.mxu2 %vm129_vm1, %v8349_v29 }
  0xb3   :  { %7227 = vmatmul.msk.f32.gmra.mxu3 %vm129_vm1, %v8349_v29 }
  0xb4   :  { %v383_v59 = vpop.f32.mrf.mxu2 }
  0xb5   :  { %v8389_v34 = vpop.f32.mrf.mxu0 }
  0xb6   :  { %v8439_v43 = vpop.f32.mrf.mxu1 }
  0xb8   :  { %7232 = vmatmul.msk.f32.vlgmr.msrb.gmra.mxu0 %vm129_vm1, %v8154_v7 }
  0xb9   :  { %7207 = vmatmul.msk.f32.gmra.mxu2 %vm129_vm1, %v8364_v31  ;;  %7253 = vmatmul.msk.f32.vlgmr.msrb.gmra.mxu1 %vm129_vm1, %v8154_v7  ;;  %v381_v7 = vadd.f32 %v380_v56, %v8344_v28 }
  0xbb   :  { %7228 = vmatmul.msk.f32.gmra.mxu3 %vm129_vm1, %v8364_v31 }
  0xbc   :  { %v386_v62 = vpop.f32.mrf.mxu2 }
  0xbd   :  { %v8399_v35 = vpop.f32.mrf.mxu0 }
  0xbe   :  { %v8447_v45 = vpop.f32.mrf.mxu1 }
  0xc0   :  { %7233 = vmatmul.msk.f32.gmra.mxu0 %vm129_vm1, %v8170_v11 }
  0xc1   :  { %7208 = vmatmul.msk.f32.gmra.mxu2 %vm129_vm1, %v8379_v33  ;;  %7254 = vmatmul.msk.f32.gmra.mxu1 %vm129_vm1, %v8170_v11 }
  0xc3   :  { %7229 = vmatmul.msk.f32.gmra.mxu3 %vm129_vm1, %v8379_v33 }
  0xc4   :  { %v389_v4 = vpop.f32.mrf.mxu2 }
  0xc5   :  { %v8411_v37 = vpop.f32.mrf.mxu0 }
  0xc6   :  { %v8457_v48 = vpop.f32.mrf.mxu1 }
  0xc8   :  { %7234 = vmatmul.msk.f32.gmra.mxu0 %vm129_vm1, %v8182_v13 }
  0xc9   :  { %7255 = vmatmul.msk.f32.gmra.mxu1 %vm129_vm1, %v8182_v13 }
  0xcc   :  { %v392_v11 = vpop.f32.mrf.mxu2 }
  0xcd   :  { %v8417_v38 = vpop.f32.mrf.mxu0 }
  0xce   :  { %v8469_v51 = vpop.f32.mrf.mxu1 }
  0xd0   :  { %7235 = vmatmul.msk.f32.gmra.mxu0 %vm129_vm1, %v8195_v14 }
  0xd1   :  { %7256 = vmatmul.msk.f32.gmra.mxu1 %vm129_vm1, %v8195_v14  ;;  %v384_v14 = vadd.f32 %v383_v59, %v8359_v30 }
  0xd5   :  { %v8425_v40 = vpop.f32.mrf.mxu0 }
  0xd6   :  { %v8480_v54 = vpop.f32.mrf.mxu1 }
  0xd8   :  { %7236 = vmatmul.msk.f32.gmra.mxu0 %vm129_vm1, %v8208_v15 }
  0xd9   :  { %7257 = vmatmul.msk.f32.gmra.mxu1 %vm129_vm1, %v8208_v15 }
  0xdd   :  { %v8433_v42 = vpop.f32.mrf.mxu0 }
  0xde   :  { %v8488_v57 = vpop.f32.mrf.mxu1 }
  0xe0   :  { %7237 = vmatmul.msk.f32.gmra.mxu0 %vm129_vm1, %v8221_v16 }
  0xe1   :  { %7258 = vmatmul.msk.f32.gmra.mxu1 %vm129_vm1, %v8221_v16 }
  0xe5   :  { %v8441_v44 = vpop.f32.mrf.mxu0 }
  0xe6   :  { %v8498_v61 = vpop.f32.mrf.mxu1 }
  0xe8   :  { %7238 = vmatmul.msk.f32.gmra.mxu0 %vm129_vm1, %v8234_v17 }
  0xe9   :  { %7259 = vmatmul.msk.f32.gmra.mxu1 %vm129_vm1, %v8234_v17  ;;  %v1299_v17 = vld [vmem:[%s10556_s24 + $0x30] sm:$0xff] }
  0xea   :  { %1371 = vmatpush.msra.mxu2 %v1299_v17 }
  0xed   :  { %v8449_v46 = vpop.f32.mrf.mxu0 }
  0xee   :  { %v8508_v0 = vpop.f32.mrf.mxu1 }
  0xf0   :  { %7239 = vmatmul.msk.f32.gmra.mxu0 %vm129_vm1, %v8247_v18 }
  0xf1   :  { %7260 = vmatmul.msk.f32.gmra.mxu1 %vm129_vm1, %v8247_v18 }
  0xf5   :  { %v8455_v47 = vpop.f32.mrf.mxu0 }
  0xf6   :  { %v8526_v6 = vpop.f32.mrf.mxu1 }
  0xf8   :  { %7240 = vmatmul.msk.f32.gmra.mxu0 %vm129_vm1, %v8260_v19 }
  0xf9   :  { %7261 = vmatmul.msk.f32.gmra.mxu1 %vm129_vm1, %v8260_v19 }
  0xfd   :  { %v8463_v49 = vpop.f32.mrf.mxu0 }
  0xfe   :  { %v8541_v15 = vpop.f32.mrf.mxu1 }
 0x100   :  { %7241 = vmatmul.msk.f32.gmra.mxu0 %vm129_vm1, %v109_v50 }
 0x101   :  { %7262 = vmatmul.msk.f32.gmra.mxu1 %vm129_vm1, %v109_v50 }
 0x105   :  { %v8472_v52 = vpop.f32.mrf.mxu0 }
 0x106   :  { %v8557_v27 = vpop.f32.mrf.mxu1 }
 0x108   :  { %7242 = vmatmul.msk.f32.gmra.mxu0 %vm129_vm1, %v8282_v21 }
 0x109   :  { %7263 = vmatmul.msk.f32.gmra.mxu1 %vm129_vm1, %v8282_v21  ;;  %v8553_v21 = vpop.f32.mrf.mxu2 }
 0x10d   :  { %v8482_v55 = vpop.f32.mrf.mxu0 }
 0x110   :  { %7243 = vmatmul.msk.f32.gmra.mxu0 %vm129_vm1, %v8296_v23 }
 0x111   :  { %7264 = vmatmul.msk.f32.gmra.mxu1 %vm129_vm1, %v8296_v23  ;;  %v8568_v50 = vpop.f32.mrf.mxu2 }
 0x115   :  { %v8490_v58 = vpop.f32.mrf.mxu0 }
 0x118   :  { %7244 = vmatmul.msk.f32.gmra.mxu0 %vm129_vm1, %v8307_v24 }
 0x119   :  { %7265 = vmatmul.msk.f32.gmra.mxu1 %vm129_vm1, %v8307_v24  ;;  %v387_v24 = vadd.f32 %v386_v62, %v8374_v32  ;;  %v121_v62 = vld [vmem:[%s10554_s23 + $0xb8] sm:$0xff] }
 0x11d   :  { %v8496_v60 = vpop.f32.mrf.mxu0 }
 0x120   :  { %7245 = vmatmul.msk.f32.gmra.mxu0 %vm129_vm1, %v8320_v25 }
 0x121   :  { %7266 = vmatmul.msk.f32.gmra.mxu1 %vm129_vm1, %v8320_v25 }
 0x125   :  { %v8504_v63 = vpop.f32.mrf.mxu0 }
 0x128   :  { %7246 = vmatmul.msk.f32.gmra.mxu0 %vm129_vm1, %v8333_v26 }
 0x129   :  { %7267 = vmatmul.msk.f32.gmra.mxu1 %vm129_vm1, %v8333_v26 }
 0x12d   :  { %v8512_v1 = vpop.f32.mrf.mxu0 }
 0x130   :  { %7247 = vmatmul.msk.f32.gmra.mxu0 %vm129_vm1, %v8349_v29 }
 0x131   :  { %7268 = vmatmul.msk.f32.gmra.mxu1 %vm129_vm1, %v8349_v29 }
 0x135   :  { %v550_v9 = vpop.f32.mrf.mxu0 }
 0x136   :  { %v687_v10 = vadd.f32 %v550_v9, %v381_v7 }
 0x138   :  { %v8533_v12 = vadd.f32 %v8530_v8, %v687_v10  ;;  %7248 = vmatmul.msk.f32.gmra.mxu0 %vm129_vm1, %v8364_v31 }
 0x139   :  { %7269 = vmatmul.msk.f32.gmra.mxu1 %vm129_vm1, %v8364_v31 }
 0x13a   :  { %v7273_v13 = vmul.f32 -1.442695, %v8533_v12 }
 0x13c   :  { %7704 = vpow2.f32 %v7273_v13 }
 0x13d   :  { %v553_v16 = vpop.f32.mrf.mxu0 }
 0x13e   :  { %v689_v18 = vadd.f32 %v553_v16, %v384_v14 }
 0x140   :  { %v8547_v19 = vadd.f32 %v8530_v8, %v689_v18  ;;  %7249 = vmatmul.msk.f32.gmra.mxu0 %vm129_vm1, %v8379_v33  ;;  %v393_v18 = vadd.f32 %v392_v11, %v8399_v35 }
 0x141   :  { %7270 = vmatmul.msk.f32.gmra.mxu1 %vm129_vm1, %v8379_v33  ;;  %v390_v33 = vadd.f32 %v389_v4, %v8389_v34  ;;  %v8577_v4 = vpop.f32.mrf.mxu1 }
 0x142   :  { %v7705_v20 = vpop.eup %7704  ;;  %v7274_v22 = vmul.f32 -1.442695, %v8547_v19 }
 0x143   :  { %v833_v23 = vadd.f32 1.0, %v7705_v20 }
 0x144   :  { %7706 = vpow2.f32 %v7274_v22 }
 0x145   :  { %7708 = vrcp.f32 %v833_v23  ;;  %v556_v25 = vpop.f32.mrf.mxu0  ;;  %v862_v34 = vand.u32 2147483647, %v833_v23  ;;  %vm858_vm3 = vweird.f32 %v833_v23 }
 0x146   :  { %v691_v26 = vadd.f32 %v556_v25, %v387_v24 }
 0x147   :  { %vm863_vm5 = vcmp.eq.f32.partialorder %v862_v34, 8.507059e+37 }
 0x148   :  { %v8560_v28 = vadd.f32 %v8530_v8, %v691_v26  ;;  %7250 = vmatmul.msk.f32.gmra.mxu0 %vm129_vm1, %v8136_v3 }
 0x149   :  { %7271 = vmatmul.msk.f32.gmra.mxu1 %vm129_vm1, %v8136_v3  ;;  %v864_v3 = vand.u32 2147483648, %v833_v23 }
 0x14a   :  { %v7707_v29 = vpop.eup %7706  ;;  %v7275_v30 = vmul.f32 -1.442695, %v8560_v28 }
 0x14b   :  { %v7709_v31 = vpop.eup %7708  ;;  %v834_v32 = vadd.f32 1.0, %v7707_v29  ;;  %v865_v22 = vor.u32 1.1754944e-38, %v864_v3 }
 0x14c   :  { %7710 = vpow2.f32 %v7275_v30  ;;  %v854_v56 = vmul.f32 %v7709_v31, %v833_v23  ;;  %vm859_vm2 = vweird.f32 %v7709_v31  ;;  %v1298_v30 = vld [vmem:[%s10556_s24 + $0x28] sm:$0xff] }
 0x14d   :  { %7712 = vrcp.f32 %v834_v32  ;;  %v559_v59 = vpop.f32.mrf.mxu0  ;;  %vm860_vm4 = vmor %vm858_vm3, %vm859_vm2  ;;  %1372 = vmatpush.msra.mxu2 %v1298_v30  ;;  %v879_v11 = vand.u32 2147483648, %v834_v32  ;;  %vm873_vm7 = vweird.f32 %v834_v32 }
 0x14e   :  { %v693_v2 = vadd.f32 %v559_v59, %v390_v33  ;;  %v855_v7 = vsub.f32 1.0, %v854_v56  ;;  %v8585_v33 = vpop.f32.mrf.mxu2  ;;  %v877_v59 = vand.u32 2147483647, %v834_v32 }
 0x150   :  { %v8574_v9 = vadd.f32 %v8530_v8, %v693_v2  ;;  %7251 = vmatmul.msk.f32.gmra.mxu0 %vm129_vm1, %v121_v62  ;;  %v856_v10 = vmul.f32 %v7709_v31, %v855_v7  ;;  %vm878_vm9 = vcmp.eq.f32.partialorder %v877_v59, 8.507059e+37 }
 0x151   :  { %7272 = vmatmul.msk.f32.gmra.mxu1 %vm129_vm1, %v121_v62 }
 0x152   :  { %v7711_v13 = vpop.eup %7710  ;;  %v7276_v14 = vmul.f32 -1.442695, %v8574_v9  ;;  %v857_v16 = vadd.f32 %v7709_v31, %v856_v10  ;;  %v396_v10 = vadd.f32 %v8553_v21, %v8411_v37 }
 0x153   :  { %v7713_v17 = vpop.eup %7712  ;;  %v835_v20 = vadd.f32 1.0, %v7711_v13  ;;  %v880_v13 = vor.u32 1.1754944e-38, %v879_v11  ;;  %v399_v11 = vadd.f32 %v8568_v50, %v8417_v38 }
 0x154   :  { %7714 = vpow2.f32 %v7276_v14  ;;  %v861_v24 = vsel %vm860_vm4, %v7709_v31, %v857_v16  ;;  %v869_v25 = vmul.f32 %v7713_v17, %v834_v32  ;;  %vm874_vm6 = vweird.f32 %v7713_v17 }
 0x155   :  { %7716 = vrcp.f32 %v835_v20  ;;  %v562_v26 = vpop.f32.mrf.mxu0  ;;  %v866_v29 = vsel %vm863_vm5, %v865_v22, %v861_v24  ;;  %vm875_vm8 = vmor %vm873_vm7, %vm874_vm6  ;;  %v892_v21 = vand.u32 2147483647, %v835_v20  ;;  %vm888_vm11 = vweird.f32 %v835_v20 }
 0x156   :  { %v695_v23 = vadd.f32 %v562_v26, %v393_v18  ;;  %1173 = vrot.lane.b32.xlu0 %v866_v29, %s8009_s9  ;;  %v870_v35 = vsub.f32 1.0, %v869_v25  ;;  %v894_v26 = vand.u32 2147483648, %v835_v20  ;;  %v404_v32 = vpop.f32.mrf.mxu2 }
 0x157   :  { %vm893_vm13 = vcmp.eq.f32.partialorder %v892_v21, 8.507059e+37 }
 0x158   :  { %v8589_v31 = vadd.f32 %v8530_v8, %v695_v23  ;;  %v871_v56 = vmul.f32 %v7713_v17, %v870_v35  ;;  %v895_v59 = vor.u32 1.1754944e-38, %v894_v26 }
 0x15a   :  { %v7715_v62 = vpop.eup %7714  ;;  %v7277_v2 = vmul.f32 -1.442695, %v8589_v31  ;;  %v872_v7 = vadd.f32 %v7713_v17, %v871_v56 }
 0x15b   :  { %v7717_v3 = vpop.eup %7716  ;;  %v836_v34 = vadd.f32 1.0, %v7715_v62 }
 0x15c   :  { %7718 = vpow2.f32 %v7277_v2  ;;  %v876_v14 = vsel %vm875_vm8, %v7713_v17, %v872_v7  ;;  %v884_v16 = vmul.f32 %v7717_v3, %v835_v20  ;;  %vm889_vm10 = vweird.f32 %v7717_v3 }
 0x15d   :  { %7720 = vrcp.f32 %v836_v34  ;;  %v565_v18 = vpop.f32.mrf.mxu0  ;;  %v881_v22 = vsel %vm878_vm9, %v880_v13, %v876_v14  ;;  %vm890_vm12 = vmor %vm888_vm11, %vm889_vm10  ;;  %v1297_v13 = vld [vmem:[%s10556_s24 + $0x20] sm:$0xff]  ;;  %v909_v38 = vand.u32 2147483648, %v836_v34  ;;  %vm903_vm15 = vweird.f32 %v836_v34 }
 0x15e   :  { %v697_v24 = vadd.f32 %v565_v18, %v396_v10  ;;  %1175 = vrot.lane.b32.xlu0 %v881_v22, %s8009_s9  ;;  %v885_v25 = vsub.f32 1.0, %v884_v16  ;;  %1373 = vmatpush.msra.mxu2 %v1297_v13  ;;  %v407_v22 = vpop.f32.mrf.mxu2 }
 0x160   :  { %v8596_v29 = vadd.f32 %v8530_v8, %v697_v24  ;;  %v886_v37 = vmul.f32 %v7717_v3, %v885_v25 }
 0x162   :  { %v7719_v30 = vpop.eup %7718  ;;  %v7278_v17 = vmul.f32 -1.442695, %v8596_v29  ;;  %v887_v23 = vadd.f32 %v7717_v3, %v886_v37  ;;  %v402_v37 = vadd.f32 %v8585_v33, %v8425_v40 }
 0x163   :  { %v7721_v35 = vpop.eup %7720  ;;  %v837_v56 = vadd.f32 1.0, %v7719_v30  ;;  %v910_v30 = vor.u32 1.1754944e-38, %v909_v38 }
 0x164   :  { %7722 = vpow2.f32 %v7278_v17  ;;  %v891_v62 = vsel %vm890_vm12, %v7717_v3, %v887_v23  ;;  %v899_v2 = vmul.f32 %v7721_v35, %v836_v34  ;;  %vm904_vm14 = vweird.f32 %v7721_v35 }
 0x165   :  { %7724 = vrcp.f32 %v837_v56  ;;  %v568_v7 = vpop.f32.mrf.mxu0  ;;  %v896_v10 = vsel %vm893_vm13, %v895_v59, %v891_v62  ;;  %v907_v3 = vand.u32 2147483647, %v836_v34  ;;  %vm905_vm0 = vmor %vm903_vm15, %vm904_vm14  ;;  %v922_v40 = vand.u32 2147483647, %v837_v56 }
 0x166   :  { %v699_v14 = vadd.f32 %v568_v7, %v399_v11  ;;  %1177 = vrot.lane.b32.xlu1 %v896_v10, %s8009_s9  ;;  %v900_v20 = vsub.f32 1.0, %v899_v2  ;;  %v924_v7 = vand.u32 2147483648, %v837_v56  ;;  %vm918_vm3 = vweird.f32 %v837_v56 }
 0x167   :  { %vm908_vm1 = vcmp.eq.f32.partialorder %v907_v3, 8.507059e+37  ;;  %v410_v3 = vpop.f32.mrf.mxu2  ;;  %vm923_vm5 = vcmp.eq.f32.partialorder %v922_v40, 8.507059e+37 }
 0x168   :  { %v8606_v50 = vadd.f32 %v8530_v8, %v699_v14  ;;  %v901_v16 = vmul.f32 %v7721_v35, %v900_v20  ;;  %v405_v20 = vadd.f32 %v404_v32, %v8433_v42 }
 0x16a   :  { %v7723_v18 = vpop.eup %7722  ;;  %v7279_v24 = vmul.f32 -1.442695, %v8606_v50  ;;  %v902_v25 = vadd.f32 %v7721_v35, %v901_v16  ;;  %v925_v16 = vor.u32 1.1754944e-38, %v924_v7 }
 0x16b   :  { %v7725_v26 = vpop.eup %7724  ;;  %v838_v21 = vadd.f32 1.0, %v7723_v18 }
 0x16c   :  { %7726 = vpow2.f32 %v7279_v24  ;;  %v906_v17 = vsel %vm905_vm0, %v7721_v35, %v902_v25  ;;  %v914_v23 = vmul.f32 %v7725_v26, %v837_v56  ;;  %vm919_vm2 = vweird.f32 %v7725_v26 }
 0x16d   :  { %7728 = vrcp.f32 %v838_v21  ;;  %v571_v11 = vpop.f32.mrf.mxu0  ;;  %v911_v59 = vsel %vm908_vm1, %v910_v30, %v906_v17  ;;  %vm920_vm4 = vmor %vm918_vm3, %vm919_vm2  ;;  %v937_v32 = vand.u32 2147483647, %v838_v21  ;;  %vm933_vm7 = vweird.f32 %v838_v21 }
 0x16e   :  { %v701_v62 = vadd.f32 %v571_v11, %v402_v37  ;;  %1179 = vrot.lane.b32.xlu1 %v911_v59, %s8009_s9  ;;  %v915_v2 = vsub.f32 1.0, %v914_v23  ;;  %v939_v23 = vand.u32 2147483648, %v838_v21 }
 0x16f   :  { %vm938_vm9 = vcmp.eq.f32.partialorder %v937_v32, 8.507059e+37 }
 0x170   :  { %v8613_v34 = vadd.f32 %v8530_v8, %v701_v62  ;;  %v916_v10 = vmul.f32 %v7725_v26, %v915_v2  ;;  %v408_v2 = vadd.f32 %v407_v22, %v8441_v44  ;;  %v8627_v22 = vpop.f32.mrf.mxu1 }
 0x172   :  { %v7727_v33 = vpop.eup %7726  ;;  %v7280_v13 = vmul.f32 -1.442695, %v8613_v34  ;;  %v917_v35 = vadd.f32 %v7725_v26, %v916_v10  ;;  %v940_v10 = vor.u32 1.1754944e-38, %v939_v23 }
 0x173   :  { %v7729_v14 = vpop.eup %7728  ;;  %v839_v38 = vadd.f32 1.0, %v7727_v33 }
 0x174   :  { %7730 = vpow2.f32 %v7280_v13  ;;  %v921_v18 = vsel %vm920_vm4, %v7725_v26, %v917_v35  ;;  %v929_v24 = vmul.f32 %v7729_v14, %v838_v21  ;;  %vm934_vm6 = vweird.f32 %v7729_v14 }
 0x175   :  { %7732 = vrcp.f32 %v839_v38  ;;  %v574_v25 = vpop.f32.mrf.mxu0  ;;  %v926_v37 = vsel %vm923_vm5, %v925_v16, %v921_v18  ;;  %vm935_vm8 = vmor %vm933_vm7, %vm934_vm6  ;;  %v413_v16 = vpop.f32.mrf.mxu2  ;;  %v954_v44 = vand.u32 2147483648, %v839_v38  ;;  %vm948_vm11 = vweird.f32 %v839_v38 }
 0x176   :  { %v703_v30 = vadd.f32 %v574_v25, %v405_v20  ;;  %1181 = vrot.lane.b32.xlu2 %v926_v37, %s8009_s9  ;;  %v930_v17 = vsub.f32 1.0, %v929_v24  ;;  %v1296_v20 = vld [vmem:[%s10556_s24 + $0x18] sm:$0xff]  ;;  %v952_v25 = vand.u32 2147483647, %v839_v38 }
 0x177   :  { %1374 = vmatpush.msra.mxu2 %v1296_v20 }
 0x178   :  { %v8619_v56 = vadd.f32 %v8530_v8, %v703_v30  ;;  %v931_v42 = vmul.f32 %v7729_v14, %v930_v17  ;;  %vm953_vm13 = vcmp.eq.f32.partialorder %v952_v25, 8.507059e+37 }
 0x17a   :  { %v7731_v11 = vpop.eup %7730  ;;  %v7281_v59 = vmul.f32 -1.442695, %v8619_v56  ;;  %v932_v26 = vadd.f32 %v7729_v14, %v931_v42  ;;  %v411_v42 = vadd.f32 %v410_v3, %v8449_v46 }
 0x17b   :  { %v7733_v62 = vpop.eup %7732  ;;  %v840_v7 = vadd.f32 1.0, %v7731_v11  ;;  %v955_v11 = vor.u32 1.1754944e-38, %v954_v44 }
 0x17c   :  { %7734 = vpow2.f32 %v7281_v59  ;;  %v936_v40 = vsel %vm935_vm8, %v7729_v14, %v932_v26  ;;  %v944_v33 = vmul.f32 %v7733_v62, %v839_v38  ;;  %vm949_vm10 = vweird.f32 %v7733_v62 }
 0x17d   :  { %7736 = vrcp.f32 %v840_v7  ;;  %v577_v13 = vpop.f32.mrf.mxu0  ;;  %v941_v35 = vsel %vm938_vm9, %v940_v10, %v936_v40  ;;  %vm950_vm12 = vmor %vm948_vm11, %vm949_vm10  ;;  %v967_v3 = vand.u32 2147483647, %v840_v7  ;;  %vm963_vm15 = vweird.f32 %v840_v7 }
 0x17e   :  { %v705_v18 = vadd.f32 %v577_v13, %v408_v2  ;;  %1183 = vrot.lane.b32.xlu2 %v941_v35, %s8009_s9  ;;  %v945_v21 = vsub.f32 1.0, %v944_v33  ;;  %v969_v13 = vand.u32 2147483648, %v840_v7  ;;  %v416_v35 = vpop.f32.mrf.mxu2 }
 0x17f   :  { %vm968_vm1 = vcmp.eq.f32.partialorder %v967_v3, 8.507059e+37  ;;  %v417_v3 = vadd.f32 %v416_v35, %v8463_v49 }
 0x180   :  { %v8630_v14 = vadd.f32 %v8530_v8, %v705_v18  ;;  %v946_v24 = vmul.f32 %v7733_v62, %v945_v21  ;;  %v8638_v18 = vpop.f32.mrf.mxu1 }
 0x182   :  { %v7735_v37 = vpop.eup %7734  ;;  %v7282_v30 = vmul.f32 -1.442695, %v8630_v14  ;;  %v947_v17 = vadd.f32 %v7733_v62, %v946_v24  ;;  %v414_v24 = vadd.f32 %v413_v16, %v8455_v47 }
 0x183   :  { %v7737_v23 = vpop.eup %7736  ;;  %v841_v32 = vadd.f32 1.0, %v7735_v37  ;;  %v970_v37 = vor.u32 1.1754944e-38, %v969_v13 }
 0x184   :  { %7738 = vpow2.f32 %v7282_v30  ;;  %v951_v59 = vsel %vm950_vm12, %v7733_v62, %v947_v17  ;;  %v959_v26 = vmul.f32 %v7737_v23, %v840_v7  ;;  %vm964_vm14 = vweird.f32 %v7737_v23 }
 0x185   :  { %7740 = vrcp.f32 %v841_v32  ;;  %v580_v2 = vpop.f32.mrf.mxu0  ;;  %v956_v10 = vsel %vm953_vm13, %v955_v11, %v951_v59  ;;  %vm965_vm0 = vmor %vm963_vm15, %vm964_vm14  ;;  %v1295_v59 = vld [vmem:[%s10556_s24 + $0x10] sm:$0xff]  ;;  %v984_v47 = vand.u32 2147483648, %v841_v32  ;;  %vm978_vm3 = vweird.f32 %v841_v32 }
 0x186   :  { %v707_v40 = vadd.f32 %v580_v2, %v411_v42  ;;  %1185 = vrot.lane.b32.xlu0 %v956_v10, %s8009_s9  ;;  %v960_v33 = vsub.f32 1.0, %v959_v26  ;;  %1375 = vmatpush.msra.mxu2 %v1295_v59 }
 0x188   :  { %v8636_v38 = vadd.f32 %v8530_v8, %v707_v40  ;;  %v961_v46 = vmul.f32 %v7737_v23, %v960_v33  ;;  %v419_v40 = vpop.f32.mrf.mxu2 }
 0x18a   :  { %v7739_v20 = vpop.eup %7738  ;;  %v7283_v62 = vmul.f32 -1.442695, %v8636_v38  ;;  %v962_v21 = vadd.f32 %v7737_v23, %v961_v46 }
 0x18b   :  { %v7741_v44 = vpop.eup %7740  ;;  %v842_v25 = vadd.f32 1.0, %v7739_v20 }
 0x18c   :  { %7742 = vpow2.f32 %v7283_v62  ;;  %v966_v30 = vsel %vm965_vm0, %v7737_v23, %v962_v21  ;;  %v974_v17 = vmul.f32 %v7741_v44, %v841_v32  ;;  %vm979_vm2 = vweird.f32 %v7741_v44  ;;  %v8651_v21 = vpop.f32.mrf.mxu1 }
 0x18d   :  { %7744 = vrcp.f32 %v842_v25  ;;  %v583_v42 = vpop.f32.mrf.mxu0  ;;  %v971_v11 = vsel %vm968_vm1, %v970_v37, %v966_v30  ;;  %v982_v23 = vand.u32 2147483647, %v841_v32  ;;  %vm980_vm4 = vmor %vm978_vm3, %vm979_vm2  ;;  %v985_v62 = vor.u32 1.1754944e-38, %v984_v47  ;;  %10558 = vst [vmem:[#allocation9_spill] sm:$0xff] %v8651_v21 }
 0x18e   :  { %v709_v26 = vadd.f32 %v583_v42, %v414_v24  ;;  %1187 = vrot.lane.b32.xlu1 %v971_v11, %s8009_s9  ;;  %v975_v7 = vsub.f32 1.0, %v974_v17  ;;  %v999_v32 = vand.u32 2147483648, %v842_v25  ;;  %v997_v35 = vand.u32 2147483647, %v842_v25 }
 0x18f   :  { %vm983_vm5 = vcmp.eq.f32.partialorder %v982_v23, 8.507059e+37  ;;  %vm993_vm7 = vweird.f32 %v842_v25 }
 0x190   :  { %v8647_v16 = vadd.f32 %v8530_v8, %v709_v26  ;;  %v976_v2 = vmul.f32 %v7741_v44, %v975_v7  ;;  %vm998_vm9 = vcmp.eq.f32.partialorder %v997_v35, 8.507059e+37 }
 0x192   :  { %v7743_v10 = vpop.eup %7742  ;;  %v7284_v33 = vmul.f32 -1.442695, %v8647_v16  ;;  %v977_v13 = vadd.f32 %v7741_v44, %v976_v2  ;;  %v420_v2 = vadd.f32 %v419_v40, %v8472_v52 }
 0x193   :  { %v7745_v46 = vpop.eup %7744  ;;  %v843_v20 = vadd.f32 1.0, %v7743_v10  ;;  %v1000_v10 = vor.u32 1.1754944e-38, %v999_v32 }
 0x194   :  { %7746 = vpow2.f32 %v7284_v33  ;;  %v981_v24 = vsel %vm980_vm4, %v7741_v44, %v977_v13  ;;  %v989_v37 = vmul.f32 %v7745_v46, %v842_v25  ;;  %vm994_vm6 = vweird.f32 %v7745_v46  ;;  %v8659_v33 = vpop.f32.mrf.mxu2 }
 0x195   :  { %7748 = vrcp.f32 %v843_v20  ;;  %v586_v30 = vpop.f32.mrf.mxu0  ;;  %v986_v17 = vsel %vm983_vm5, %v985_v62, %v981_v24  ;;  %vm995_vm8 = vmor %vm993_vm7, %vm994_vm6  ;;  %v8661_v62 = vpop.f32.mrf.mxu3  ;;  %v1014_v40 = vand.u32 2147483648, %v843_v20  ;;  %vm1008_vm11 = vweird.f32 %v843_v20 }
 0x196   :  { %v711_v42 = vadd.f32 %v586_v30, %v417_v3  ;;  %1189 = vrot.lane.b32.xlu2 %v986_v17, %s8009_s9  ;;  %v990_v11 = vsub.f32 1.0, %v989_v37  ;;  %10559 = vst [vmem:[#allocation10_spill] sm:$0xff] %v8661_v62  ;;  %v8663_v30 = vpop.f32.mrf.mxu1 }
 0x197   :  { %10560 = vst [vmem:[#allocation11_spill] sm:$0xff] %v8663_v30 }
 0x198   :  { %v8655_v59 = vadd.f32 %v8530_v8, %v711_v42  ;;  %v991_v49 = vmul.f32 %v7745_v46, %v990_v11 }
 0x19a   :  { %v7747_v26 = vpop.eup %7746  ;;  %v7285_v7 = vmul.f32 -1.442695, %v8655_v59  ;;  %v992_v44 = vadd.f32 %v7745_v46, %v991_v49 }
 0x19b   :  { %v7749_v47 = vpop.eup %7748  ;;  %v844_v23 = vadd.f32 1.0, %v7747_v26 }
 0x19c   :  { %7750 = vpow2.f32 %v7285_v7  ;;  %v996_v13 = vsel %vm995_vm8, %v7745_v46, %v992_v44  ;;  %v1004_v3 = vmul.f32 %v7749_v47, %v843_v20  ;;  %vm1009_vm10 = vweird.f32 %v7749_v47 }
 0x19d   :  { %7752 = vrcp.f32 %v844_v23  ;;  %v589_v24 = vpop.f32.mrf.mxu0  ;;  %v1001_v37 = vsel %vm998_vm9, %v1000_v10, %v996_v13  ;;  %v1012_v46 = vand.u32 2147483647, %v843_v20  ;;  %vm1010_vm12 = vmor %vm1008_vm11, %vm1009_vm10  ;;  %v1015_v7 = vor.u32 1.1754944e-38, %v1014_v40 }
 0x19e   :  { %v713_v25 = vadd.f32 %v589_v24, %v420_v2  ;;  %1191 = vrot.lane.b32.xlu0 %v1001_v37, %s8009_s9  ;;  %v1005_v52 = vsub.f32 1.0, %v1004_v3  ;;  %v1294_v3 = vld [vmem:[%s10556_s24 + $0x8] sm:$0xff]  ;;  %v425_v24 = vpop.f32.mrf.mxu2  ;;  %v8676_v37 = vpop.f32.mrf.mxu3  ;;  %v1027_v40 = vand.u32 2147483647, %v844_v23  ;;  %vm1023_vm15 = vweird.f32 %v844_v23 }
 0x19f   :  { %vm1013_vm13 = vcmp.eq.f32.partialorder %v1012_v46, 8.507059e+37  ;;  %1376 = vmatpush.msra.mxu2 %v1294_v3 }
 0x1a0   :  { %v8667_v17 = vadd.f32 %v8530_v8, %v713_v25  ;;  %v1006_v42 = vmul.f32 %v7749_v47, %v1005_v52  ;;  %v1029_v25 = vand.u32 2147483648, %v844_v23  ;;  %v8678_v52 = vpop.f32.mrf.mxu1  ;;  %vm1028_vm1 = vcmp.eq.f32.partialorder %v1027_v40, 8.507059e+37 }
 0x1a2   :  { %v7751_v11 = vpop.eup %7750  ;;  %v7286_v32 = vmul.f32 -1.442695, %v8667_v17  ;;  %v1007_v49 = vadd.f32 %v7749_v47, %v1006_v42 }
 0x1a3   :  { %v7753_v35 = vpop.eup %7752  ;;  %v845_v26 = vadd.f32 1.0, %v7751_v11 }
 0x1a4   :  { %7754 = vpow2.f32 %v7286_v32  ;;  %v1011_v44 = vsel %vm1010_vm12, %v7749_v47, %v1007_v49  ;;  %v1019_v2 = vmul.f32 %v7753_v35, %v844_v23  ;;  %vm1024_vm14 = vweird.f32 %v7753_v35  ;;  %v1293_v23 = vld [vmem:[%s10556_s24] sm:$0xff] }
 0x1a5   :  { %7756 = vrcp.f32 %v845_v26  ;;  %v8670_v10 = vpop.f32.mrf.mxu0  ;;  %v1016_v13 = vsel %vm1013_vm13, %v1015_v7, %v1011_v44  ;;  %vm1025_vm0 = vmor %vm1023_vm15, %vm1024_vm14  ;;  %v1030_v49 = vor.u32 1.1754944e-38, %v1029_v25  ;;  %v426_v7 = vadd.f32 %v425_v24, %v8490_v58  ;;  %1377 = vmatpush.msra.mxu2 %v1293_v23 }
 0x1a6   :  { %1193 = vrot.lane.b32.xlu1 %v1016_v13, %s8009_s9  ;;  %v1020_v20 = vsub.f32 1.0, %v1019_v2  ;;  %v460_v24 = vpop.f32.mrf.mxu3  ;;  %vm1038_vm3 = vweird.f32 %v845_v26  ;;  %vm1301_vm14 = vcmask 523264  }
 0x1a8   :  { %v1021_v47 = vmul.f32 %v7753_v35, %v1020_v20  ;;  %v8688_v40 = vpop.f32.mrf.mxu1 }
 0x1aa   :  { %v7755_v42 = vpop.eup %7754  ;;  %v1022_v46 = vadd.f32 %v7753_v35, %v1021_v47  ;;  %v1044_v47 = vand.u32 2147483648, %v845_v26 }
 0x1ab   :  { %v7757_v11 = vpop.eup %7756  ;;  %v846_v32 = vadd.f32 1.0, %v7755_v42  ;;  %v428_v42 = vpop.f32.mrf.mxu2 }
 0x1ac   :  { %v1026_v44 = vsel %vm1025_vm0, %v7753_v35, %v1022_v46  ;;  %v1034_v2 = vmul.f32 %v7757_v11, %v845_v26  ;;  %vm1039_vm2 = vweird.f32 %v7757_v11  ;;  %v1042_v35 = vand.u32 2147483647, %v845_v26 }
 0x1ad   :  { %7758 = vrcp.f32 %v846_v32  ;;  %v595_v13 = vpop.f32.mrf.mxu0  ;;  %v1031_v3 = vsel %vm1028_vm1, %v1030_v49, %v1026_v44  ;;  %v429_v44 = vadd.f32 %v428_v42, %v8496_v60  ;;  %vm1040_vm4 = vmor %vm1038_vm3, %vm1039_vm2  ;;  %v1059_v30 = vand.u32 2147483648, %v846_v32 }
 0x1ae   :  { %v717_v62 = vadd.f32 %v595_v13, %v426_v7  ;;  %1195 = vrot.lane.b32.xlu2 %v1031_v3, %s8009_s9  ;;  %v1035_v20 = vsub.f32 1.0, %v1034_v2  ;;  %v1045_v2 = vor.u32 1.1754944e-38, %v1044_v47  ;;  %vm1043_vm5 = vcmp.eq.f32.partialorder %v1042_v35, 8.507059e+37 }
 0x1af   :  { %vm1053_vm7 = vweird.f32 %v846_v32 }
 0x1b0   :  { %v8686_v25 = vadd.f32 %v8530_v8, %v717_v62  ;;  %v1036_v58 = vmul.f32 %v7757_v11, %v1035_v20 }
 0x1b2   :  { %v7288_v46 = vmul.f32 -1.442695, %v8686_v25  ;;  %v1037_v49 = vadd.f32 %v7757_v11, %v1036_v58  ;;  %v1057_v58 = vand.u32 2147483647, %v846_v32 }
 0x1b3   :  { %v7759_v7 = vpop.eup %7758 }
 0x1b4   :  { %7760 = vpow2.f32 %v7288_v46  ;;  %v1041_v13 = vsel %vm1040_vm4, %v7757_v11, %v1037_v49  ;;  %v1049_v62 = vmul.f32 %v7759_v7, %v846_v32  ;;  %vm1054_vm6 = vweird.f32 %v7759_v7  ;;  %v463_v11 = vpop.f32.mrf.mxu3  ;;  %v633_v49 = vpop.f32.mrf.mxu1 }
 0x1b5   :  { %v598_v3 = vpop.f32.mrf.mxu0  ;;  %v1046_v20 = vsel %vm1043_vm5, %v1045_v2, %v1041_v13  ;;  %vm1055_vm8 = vmor %vm1053_vm7, %vm1054_vm6  ;;  %v1060_v46 = vor.u32 1.1754944e-38, %v1059_v30  ;;  %vm1058_vm9 = vcmp.eq.f32.partialorder %v1057_v58, 8.507059e+37 }
 0x1b6   :  { %v719_v23 = vadd.f32 %v598_v3, %v429_v44  ;;  %1197 = vrot.lane.b32.xlu1 %v1046_v20, %s8009_s9  ;;  %v1050_v53 = vsub.f32 1.0, %v1049_v62  ;;  %v458_v62 = vadd.f32 %v8676_v37, %v8409_v36 }
 0x1b8   :  { %v8694_v21 = vadd.f32 %v8530_v8, %v719_v23  ;;  %v1051_v26 = vmul.f32 %v7759_v7, %v1050_v53  ;;  %v688_v32 = vadd.f32 %v8678_v52, %v458_v62  ;;  %v8702_v23 = vperm.slane %v8524_v5, 1 }
 0x1b9   :  { %v461_v52 = vadd.f32 %v460_v24, %v8419_v39 }
 0x1ba   :  { %10561 = vst [vmem:[#allocation12_spill] sm:$0xff] %v8694_v21  ;;  %v7761_v60 = vpop.eup %7760  ;;  %v7289_v47 = vmul.f32 -1.442695, %v8694_v21  ;;  %v1052_v42 = vadd.f32 %v7759_v7, %v1051_v26 }
 0x1bb   :  { %v848_v35 = vadd.f32 1.0, %v7761_v60 }
 0x1bc   :  { %7762 = vpow2.f32 %v7289_v47  ;;  %v1056_v44 = vsel %vm1055_vm8, %v7759_v7, %v1052_v42  ;;  %v466_v30 = vpop.f32.mrf.mxu3  ;;  %v636_v7 = vpop.f32.mrf.mxu1 }
 0x1bd   :  { %7764 = vrcp.f32 %v848_v35  ;;  %v1061_v2 = vsel %vm1058_vm9, %v1060_v46, %v1056_v44  ;;  %v1089_v58 = vand.u32 2147483648, %v848_v35  ;;  %v1087_v42 = vand.u32 2147483647, %v848_v35 }
 0x1be   :  { %1199 = vrot.lane.b32.xlu1 %v1061_v2, %s8009_s9  ;;  %v734_v46 = vadd.f32 %v8702_v23, %v688_v32  ;;  %vm1083_vm11 = vweird.f32 %v848_v35 }
 0x1bf   :  { %v1090_v2 = vor.u32 1.1754944e-38, %v1089_v58  ;;  %vm1088_vm13 = vcmp.eq.f32.partialorder %v1087_v42, 8.507059e+37 }
 0x1c2   :  { %v7763_v53 = vpop.eup %7762 }
 0x1c3   :  { %v7765_v13 = vpop.eup %7764  ;;  %v849_v3 = vadd.f32 1.0, %v7763_v53 }
 0x1c4   :  { %v1079_v20 = vmul.f32 %v7765_v13, %v848_v35  ;;  %vm1084_vm10 = vweird.f32 %v7765_v13 }
 0x1c5   :  { %7766 = vrcp.f32 %v849_v3  ;;  %vm1085_vm12 = vmor %vm1083_vm11, %vm1084_vm10  ;;  %v1104_v35 = vand.u32 2147483648, %v849_v3  ;;  %v1102_v58 = vand.u32 2147483647, %v849_v3  ;;  %vm1098_vm0 = vweird.f32 %v849_v3 }
 0x1c6   :  { %v1080_v26 = vsub.f32 1.0, %v1079_v20  ;;  %v690_v20 = vadd.f32 %v8688_v40, %v461_v52  ;;  %v464_v40 = vadd.f32 %v463_v11, %v8429_v41  ;;  %v467_v41 = vadd.f32 %v466_v30, %v8439_v43 }
 0x1c7   :  { %vm1103_vm2 = vcmp.eq.f32.partialorder %v1102_v58, 8.507059e+37 }
 0x1c8   :  { %v1174_v60 = vpop.permute.xlu0 %1173  ;;  %v1081_v47 = vmul.f32 %v7765_v13, %v1080_v26 }
 0x1c9   :  { %v1233_v36 = vmul.f32 %v1174_v60, %v8533_v12  ;;  %v469_v12 = vpop.f32.mrf.mxu3  ;;  %v639_v60 = vpop.f32.mrf.mxu1 }
 0x1ca   :  { %v1082_v37 = vadd.f32 %v7765_v13, %v1081_v47 }
 0x1cb   :  { %v7767_v44 = vpop.eup %7766  ;;  %v1253_v5 = vadd.f32 %v1233_v36, %v734_v46 }
 0x1cc   :  { %v1086_v53 = vsel %vm1085_vm12, %v7765_v13, %v1082_v37  ;;  %v1094_v62 = vmul.f32 %v7767_v44, %v849_v3  ;;  %vm1099_vm15 = vweird.f32 %v7767_v44  ;;  %v736_v13 = vadd.f32 %v8702_v23, %v690_v20 }
 0x1cd   :  { %v1273_v26 = vmax.f32 %v1253_v5, 0.0  ;;  %v1091_v21 = vsel %vm1088_vm13, %v1090_v2, %v1086_v53  ;;  %vm1100_vm1 = vmor %vm1098_vm0, %vm1099_vm15  ;;  %v692_v37 = vadd.f32 %v633_v49, %v464_v40  ;;  %v694_v20 = vadd.f32 %v636_v7, %v467_v41 }
 0x1ce   :  { %1203 = vrot.lane.b32.xlu2 %v1091_v21, %s8009_s9  ;;  %v1095_v32 = vsub.f32 1.0, %v1094_v62  ;;  %v1105_v21 = vor.u32 1.1754944e-38, %v1104_v35  ;;  %v470_v35 = vadd.f32 %v469_v12, %v8447_v45  ;;  %vm2079_vm0 = vcmask 64512  }
 0x1cf   :  { %7293 = vmatmul.msk.f32.vlgmr.msra.gmra.mxu2 %vm1301_vm14, %v1273_v26  ;;  %v738_v53 = vadd.f32 %v8702_v23, %v692_v37 }
 0x1d0   :  { %v1176_v39 = vpop.permute.xlu0 %1175  ;;  %v1096_v24 = vmul.f32 %v7767_v44, %v1095_v32  ;;  %v1182_v49 = vpop.permute.xlu2 %1181  ;;  %v740_v32 = vadd.f32 %v8702_v23, %v694_v20 }
 0x1d1   :  { %v1234_v47 = vmul.f32 %v1176_v39, %v8547_v19  ;;  %v472_v19 = vpop.f32.mrf.mxu3  ;;  %v642_v62 = vpop.f32.mrf.mxu1 }
 0x1d2   :  { %v1097_v42 = vadd.f32 %v7767_v44, %v1096_v24  ;;  %v696_v24 = vadd.f32 %v639_v60, %v470_v35  ;;  %v473_v7 = vadd.f32 %v472_v19, %v8457_v48 }
 0x1d3   :  { %v1254_v46 = vadd.f32 %v1234_v47, %v736_v13  ;;  %v1237_v47 = vmul.f32 %v1182_v49, %v8589_v31 }
 0x1d4   :  { %v1101_v36 = vsel %vm1100_vm1, %v7767_v44, %v1097_v42  ;;  %v742_v30 = vadd.f32 %v8702_v23, %v696_v24 }
 0x1d5   :  { %v1106_v52 = vsel %vm1103_vm2, %v1105_v21, %v1101_v36  ;;  %v1274_v5 = vmax.f32 %v1254_v46, 0.0  ;;  %v698_v46 = vadd.f32 %v642_v62, %v473_v7 }
 0x1d6   :  { %1205 = vrot.lane.b32.xlu1 %v1106_v52, %s8009_s9  ;;  %v1257_v42 = vadd.f32 %v1237_v47, %v742_v30 }
 0x1d7   :  { %7294 = vmatmul.msk.f32.gmra.mxu2 %vm1301_vm14, %v1274_v5  ;;  %v744_v60 = vadd.f32 %v8702_v23, %v698_v46 }
 0x1d8   :  { %v1178_v2 = vpop.permute.xlu1 %1177  ;;  %v1184_v40 = vpop.permute.xlu2 %1183  ;;  %v1277_v45 = vmax.f32 %v1257_v42, 0.0 }
 0x1d9   :  { %v1235_v3 = vmul.f32 %v1178_v2, %v8560_v28  ;;  %v475_v58 = vpop.f32.mrf.mxu3  ;;  %v645_v28 = vpop.f32.mrf.mxu1 }
 0x1da   :  { %v476_v36 = vadd.f32 %v475_v58, %v8469_v51 }
 0x1db   :  { %v1255_v11 = vadd.f32 %v1235_v3, %v738_v53 }
 0x1dc   :  { %v700_v37 = vadd.f32 %v645_v28, %v476_v36 }
 0x1dd   :  { %v1275_v44 = vmax.f32 %v1255_v11, 0.0 }
 0x1de   :  { %v746_v53 = vadd.f32 %v8702_v23, %v700_v37 }
 0x1df   :  { %7295 = vmatmul.msk.f32.gmra.mxu2 %vm1301_vm14, %v1275_v44 }
 0x1e0   :  { %v1180_v26 = vpop.permute.xlu1 %1179 }
 0x1e1   :  { %v1236_v39 = vmul.f32 %v1180_v26, %v8574_v9  ;;  %v478_v21 = vpop.f32.mrf.mxu3  ;;  %v1238_v9 = vmul.f32 %v1184_v40, %v8596_v29  ;;  %v648_v12 = vpop.f32.mrf.mxu1 }
 0x1e2   :  { %v479_v29 = vadd.f32 %v478_v21, %v8480_v54 }
 0x1e3   :  { %v1256_v13 = vadd.f32 %v1236_v39, %v740_v32  ;;  %v1258_v31 = vadd.f32 %v1238_v9, %v744_v60 }
 0x1e4   :  { %v702_v62 = vadd.f32 %v648_v12, %v479_v29 }
 0x1e5   :  { %v1276_v43 = vmax.f32 %v1256_v13, 0.0  ;;  %v1278_v52 = vmax.f32 %v1258_v31, 0.0 }
 0x1e6   :  { %v748_v51 = vadd.f32 %v8702_v23, %v702_v62 }
 0x1e7   :  { %7296 = vmatmul.msk.f32.gmra.mxu2 %vm1301_vm14, %v1276_v43 }
 0x1e9   :  { %v481_v5 = vpop.f32.mrf.mxu3  ;;  %v651_v48 = vpop.f32.mrf.mxu1 }
 0x1ea   :  { %v482_v20 = vadd.f32 %v481_v5, %v8488_v57 }
 0x1ec   :  { %v704_v35 = vadd.f32 %v651_v48, %v482_v20 }
 0x1ee   :  { %v750_v24 = vadd.f32 %v8702_v23, %v704_v35  ;;  %v431_v35 = vpop.f32.mrf.mxu2 }
 0x1ef   :  { %7297 = vmatmul.msk.f32.gmra.mxu2 %vm1301_vm14, %v1277_v45 }
 0x1f0   :  { %v1190_v32 = vpop.permute.xlu2 %1189 }
 0x1f1   :  { %v484_v44 = vpop.f32.mrf.mxu3  ;;  %v654_v26 = vpop.f32.mrf.mxu1 }
 0x1f2   :  { %v485_v13 = vadd.f32 %v484_v44, %v8498_v61 }
 0x1f4   :  { %v706_v57 = vadd.f32 %v654_v26, %v485_v13  ;;  %v601_v13 = vpop.f32.mrf.mxu0 }
 0x1f6   :  { %v752_v30 = vadd.f32 %v8702_v23, %v706_v57 }
 0x1f7   :  { %7298 = vmatmul.msk.f32.gmra.mxu2 %vm1301_vm14, %v1278_v52 }
 0x1f8   :  { %v1186_v2 = vpop.permute.xlu0 %1185 }
 0x1f9   :  { %v1239_v19 = vmul.f32 %v1186_v2, %v8606_v50  ;;  %v1241_v50 = vmul.f32 %v1190_v32, %v8619_v56  ;;  %v487_v28 = vpop.f32.mrf.mxu3  ;;  %v657_v47 = vpop.f32.mrf.mxu1 }
 0x1fa   :  { %v488_v56 = vadd.f32 %v487_v28, %v8508_v0 }
 0x1fb   :  { %v1259_v3 = vadd.f32 %v1239_v19, %v746_v53  ;;  %v1261_v58 = vadd.f32 %v1241_v50, %v750_v24 }
 0x1fc   :  { %v708_v40 = vadd.f32 %v657_v47, %v488_v56  ;;  %v432_v56 = vadd.f32 %v431_v35, %v8504_v63 }
 0x1fd   :  { %v1279_v41 = vmax.f32 %v1259_v3, 0.0  ;;  %v1281_v43 = vmax.f32 %v1261_v58, 0.0 }
 0x1fe   :  { %v754_v9 = vadd.f32 %v8702_v23, %v708_v40 }
 0x1ff   :  { %7299 = vmatmul.msk.f32.gmra.mxu2 %vm1301_vm14, %v1279_v41 }
 0x200   :  { %v1188_v11 = vpop.permute.xlu1 %1187 }
 0x201   :  { %v1240_v49 = vmul.f32 %v1188_v11, %v8613_v34  ;;  %v490_v21 = vpop.f32.mrf.mxu3  ;;  %v660_v45 = vpop.f32.mrf.mxu1 }
 0x202   :  { %v491_v12 = vadd.f32 %v490_v21, %v8526_v6 }
 0x203   :  { %v1260_v39 = vadd.f32 %v1240_v49, %v748_v51 }
 0x204   :  { %v710_v36 = vadd.f32 %v660_v45, %v491_v12 }
 0x205   :  { %v1280_v54 = vmax.f32 %v1260_v39, 0.0 }
 0x206   :  { %v756_v52 = vadd.f32 %v8702_v23, %v710_v36 }
 0x207   :  { %7300 = vmatmul.msk.f32.gmra.mxu2 %vm1301_vm14, %v1280_v54 }
 0x208   :  { %v1196_v31 = vpop.permute.xlu2 %1195 }
 0x209   :  { %v493_v5 = vpop.f32.mrf.mxu3  ;;  %v663_v48 = vpop.f32.mrf.mxu1 }
 0x20a   :  { %v494_v53 = vadd.f32 %v493_v5, %v8541_v15 }
 0x20c   :  { %v712_v19 = vadd.f32 %v663_v48, %v494_v53 }
 0x20f   :  { %7301 = vmatmul.msk.f32.gmra.mxu2 %vm1301_vm14, %v1281_v43  ;;  %v604_v43 = vpop.f32.mrf.mxu0 }
 0x210   :  { %v1192_v34 = vpop.permute.xlu0 %1191 }
 0x211   :  { %v1242_v7 = vmul.f32 %v1192_v34, %v8630_v14  ;;  %v1244_v14 = vmul.f32 %v1196_v31, %v8647_v16  ;;  %v496_v16 = vpop.f32.mrf.mxu3  ;;  %v666_v62 = vpop.f32.mrf.mxu1 }
 0x212   :  { %v497_v41 = vadd.f32 %v496_v16, %v8557_v27 }
 0x213   :  { %v1262_v42 = vadd.f32 %v1242_v7, %v752_v30  ;;  %v1264_v2 = vadd.f32 %v1244_v14, %v756_v52 }
 0x214   :  { %v714_v51 = vadd.f32 %v666_v62, %v497_v41 }
 0x215   :  { %v1282_v46 = vmax.f32 %v1262_v42, 0.0  ;;  %v1284_v29 = vmax.f32 %v1264_v2, 0.0 }
 0x216   :  { %v760_v15 = vadd.f32 %v8702_v23, %v714_v51 }
 0x217   :  { %7302 = vmatmul.msk.f32.gmra.mxu2 %vm1301_vm14, %v1282_v46 }
 0x218   :  { %v1194_v61 = vpop.permute.xlu1 %1193 }
 0x219   :  { %v1243_v60 = vmul.f32 %v1194_v61, %v8636_v38  ;;  %v758_v38 = vadd.f32 %v8702_v23, %v712_v19 }
 0x21b   :  { %v1263_v37 = vadd.f32 %v1243_v60, %v754_v9 }
 0x21d   :  { %v1283_v0 = vmax.f32 %v1263_v37, 0.0 }
 0x21f   :  { %7303 = vmatmul.msk.f32.gmra.mxu2 %vm1301_vm14, %v1283_v0 }
 0x227   :  { %7304 = vmatmul.msk.f32.gmra.mxu2 %vm1301_vm14, %v1284_v29 }
 0x228   :  { %v1198_v6 = vpop.permute.xlu1 %1197 }
 0x229   :  { %v1245_v3 = vmul.f32 %v1198_v6, %v8655_v59  ;;  %v434_v59 = vpop.f32.mrf.mxu2  ;;  %v97_v6 = vld [vmem:[%s10562_s28] sm:$0xff] }
 0x22a   :  { %v435_v34 = vadd.f32 %v434_v59, %v8512_v1  ;;  %2215 = vmatpush.msra.mxu3 %v97_v6 }
 0x22b   :  { %v1265_v11 = vadd.f32 %v1245_v3, %v758_v38 }
 0x22c   :  { %v723_v30 = vadd.f32 %v604_v43, %v435_v34 }
 0x22d   :  { %v1285_v20 = vmax.f32 %v1265_v11, 0.0 }
 0x22e   :  { %v8773_v7 = vadd.f32 %v8530_v8, %v723_v30 }
 0x22f   :  { %7305 = vmatmul.msk.f32.gmra.mxu2 %vm1301_vm14, %v1285_v20 }
 0x230   :  { %v1200_v44 = vpop.permute.xlu1 %1199 }
 0x231   :  { %v1246_v49 = vmul.f32 %v1200_v44, %v8667_v17  ;;  %v8762_v39 = vpop.f32.mrf.mxu2  ;;  %v423_v17 = vadd.f32 %v8659_v33, %v8482_v55  ;;  %v721_v55 = vadd.f32 %v601_v13, %v432_v56  ;;  %v7291_v33 = vmul.f32 -1.442695, %v8773_v7  ;;  %v1204_v13 = vpop.permute.xlu2 %1203 }
 0x233   :  { %v1266_v26 = vadd.f32 %v1246_v49, %v760_v15  ;;  %v715_v28 = vadd.f32 %v8670_v10, %v423_v17  ;;  %v8778_v40 = vadd.f32 %v8530_v8, %v721_v55 }
 0x235   :  { %v1286_v32 = vmax.f32 %v1266_v26, 0.0  ;;  %v8768_v47 = vadd.f32 %v8530_v8, %v715_v28  ;;  %v7290_v46 = vmul.f32 -1.442695, %v8778_v40 }
 0x237   :  { %7306 = vmatmul.msk.f32.gmra.mxu2 %vm1301_vm14, %v1286_v32  ;;  %v7287_v57 = vmul.f32 -1.442695, %v8768_v47 }
 0x239   :  { %7768 = vpow2.f32 %v7287_v57 }
 0x23a   :  { %7770 = vpow2.f32 %v7291_v33  ;;  %v499_v33 = vpop.f32.mrf.mxu3 }
 0x23f   :  { %v7769_v42 = vpop.eup %7768 }
 0x240   :  { %v847_v10 = vadd.f32 1.0, %v7769_v42  ;;  %v7771_v1 = vpop.eup %7770 }
 0x241   :  { %v851_v45 = vadd.f32 1.0, %v7771_v1 }
 0x242   :  { %7772 = vrcp.f32 %v847_v10  ;;  %v1074_v14 = vand.u32 2147483648, %v847_v10  ;;  %vm1068_vm4 = vweird.f32 %v847_v10  ;;  %v1072_v0 = vand.u32 2147483647, %v847_v10  ;;  %v502_v1 = vpop.f32.mrf.mxu3 }
 0x243   :  { %7774 = vpow2.f32 %v7290_v46  ;;  %v1134_v16 = vand.u32 2147483648, %v851_v45  ;;  %vm1128_vm8 = vweird.f32 %v851_v45  ;;  %v1132_v62 = vand.u32 2147483647, %v851_v45 }
 0x244   :  { %7776 = vrcp.f32 %v851_v45  ;;  %v1075_v2 = vor.u32 1.1754944e-38, %v1074_v14  ;;  %vm1073_vm6 = vcmp.eq.f32.partialorder %v1072_v0, 8.507059e+37 }
 0x245   :  { %v1135_v51 = vor.u32 1.1754944e-38, %v1134_v16  ;;  %vm1133_vm10 = vcmp.eq.f32.partialorder %v1132_v62, 8.507059e+37  ;;  %v10564_v62 = vld [vmem:[#allocation9_spill] sm:$0xff] }
 0x248   :  { %v7773_v21 = vpop.eup %7772  ;;  %v1206_v30 = vpop.permute.xlu1 %1205 }
 0x249   :  { %v1064_v61 = vmul.f32 %v7773_v21, %v847_v10  ;;  %v7775_v9 = vpop.eup %7774  ;;  %vm1069_vm3 = vweird.f32 %v7773_v21  ;;  %v669_v10 = vpop.f32.mrf.mxu1 }
 0x24a   :  { %v850_v12 = vadd.f32 1.0, %v7775_v9  ;;  %v7777_v31 = vpop.eup %7776  ;;  %vm1070_vm5 = vmor %vm1068_vm4, %vm1069_vm3  ;;  %v505_v14 = vpop.f32.mrf.mxu3 }
 0x24b   :  { %v1065_v63 = vsub.f32 1.0, %v1064_v61  ;;  %v1124_v37 = vmul.f32 %v7777_v31, %v851_v45  ;;  %vm1129_vm7 = vweird.f32 %v7777_v31  ;;  %v500_v45 = vadd.f32 %v499_v33, %v8577_v4 }
 0x24c   :  { %7778 = vrcp.f32 %v850_v12  ;;  %vm1130_vm9 = vmor %vm1128_vm8, %vm1129_vm7  ;;  %v1119_v15 = vand.u32 2147483648, %v850_v12  ;;  %vm1113_vm12 = vweird.f32 %v850_v12  ;;  %v1117_v49 = vand.u32 2147483647, %v850_v12 }
 0x24d   :  { %v1066_v60 = vmul.f32 %v7773_v21, %v1065_v63  ;;  %v1125_v48 = vsub.f32 1.0, %v1124_v37  ;;  %v716_v61 = vadd.f32 %v669_v10, %v500_v45 }
 0x24e   :  { %v1120_v32 = vor.u32 1.1754944e-38, %v1119_v15  ;;  %vm1118_vm15 = vcmp.eq.f32.partialorder %v1117_v49, 8.507059e+37 }
 0x24f   :  { %v1067_v36 = vadd.f32 %v7773_v21, %v1066_v60  ;;  %v1126_v29 = vmul.f32 %v7777_v31, %v1125_v48  ;;  %v503_v60 = vadd.f32 %v502_v1, %v8627_v22 }
 0x251   :  { %v1071_v5 = vsel %vm1070_vm5, %v7773_v21, %v1067_v36  ;;  %v1127_v3 = vadd.f32 %v7777_v31, %v1126_v29  ;;  %v672_v21 = vpop.f32.mrf.mxu1  ;;  %v10563_v29 = vld [vmem:[#allocation12_spill] sm:$0xff]  ;;  %vm3006_vm5 = vcmask 130048  }
 0x252   :  { %v1379_v50 = vpop.f32.mrf.mxu2  ;;  %v7779_v52 = vpop.eup %7778  ;;  %v1076_v53 = vsel %vm1073_vm6, %v1075_v2, %v1071_v5  ;;  %v718_v36 = vadd.f32 %v672_v21, %v503_v60  ;;  %v1249_v6 = vmul.f32 %v1206_v30, %v10563_v29 }
 0x253   :  { %1439 = vxpose.xlu0.b32.start.end [1/1] (short) (narrow) %v1379_v50, 16  ;;  %v1109_v19 = vmul.f32 %v7779_v52, %v850_v12  ;;  %v1131_v11 = vsel %vm1130_vm9, %v7777_v31, %v1127_v3  ;;  %vm1114_vm11 = vweird.f32 %v7779_v52  ;;  %v762_v12 = vadd.f32 %v8702_v23, %v716_v61 }
 0x254   :  { %v1136_v20 = vsel %vm1133_vm10, %v1135_v51, %v1131_v11  ;;  %vm1115_vm13 = vmor %vm1113_vm12, %vm1114_vm11  ;;  %v764_v4 = vadd.f32 %v8702_v23, %v718_v36 }
 0x255   :  { %v1110_v38 = vsub.f32 1.0, %v1109_v19 }
 0x257   :  { %v1111_v41 = vmul.f32 %v7779_v52, %v1110_v38  ;;  %v508_v38 = vpop.f32.mrf.mxu3 }
 0x259   :  { %v1112_v44 = vadd.f32 %v7779_v52, %v1111_v41  ;;  %v675_v0 = vpop.f32.mrf.mxu1  ;;  %v509_v41 = vadd.f32 %v508_v38, %v10564_v62 }
 0x25a   :  { %v1382_v27 = vpop.f32.mrf.mxu2 }
 0x25b   :  { %1471 = vxpose.xlu2.b32.start.end [1/1] (short) (narrow) %v1382_v27, 16  ;;  %v1116_v26 = vsel %vm1115_vm13, %v7779_v52, %v1112_v44  ;;  %v1248_v52 = vmul.f32 %v1204_v13, %v8686_v25 }
 0x25c   :  { %v1121_v59 = vsel %vm1118_vm15, %v1120_v32, %v1116_v26  ;;  %v10565_v32 = vld [vmem:[#allocation11_spill] sm:$0xff] }
 0x25d   :  { %v1268_v22 = vadd.f32 %v1248_v52, %v764_v4 }
 0x25f   :  { %v1288_v19 = vmax.f32 %v1268_v22, 0.0  ;;  %v511_v49 = vpop.f32.mrf.mxu3 }
 0x261   :  { %v678_v3 = vpop.f32.mrf.mxu1 }
 0x262   :  { %v1385_v54 = vpop.f32.mrf.mxu2 }
 0x263   :  { %1503 = vxpose.xlu1.b32.start.end [1/1] (short) (narrow) %v1385_v54, 16 }
 0x267   :  { %v514_v60 = vpop.f32.mrf.mxu3 }
 0x269   :  { %v681_v26 = vpop.f32.mrf.mxu1 }
 0x26a   :  { %v1388_v24 = vpop.f32.mrf.mxu2 }
 0x26b   :  { %1535 = vxpose.xlu2.b32.start.end [1/1] (short) (narrow) %v1388_v24, 16 }
 0x272   :  { %v1391_v58 = vpop.f32.mrf.mxu2 }
 0x273   :  { %1567 = vxpose.xlu1.b32.start.end [1/1] (short) (narrow) %v1391_v58, 16 }
 0x27a   :  { %v1394_v35 = vpop.f32.mrf.mxu2 }
 0x282   :  { %v1397_v50 = vpop.f32.mrf.mxu2 }
 0x28a   :  { %v1400_v27 = vpop.f32.mrf.mxu2 }
 0x292   :  { %v1403_v54 = vpop.f32.mrf.mxu2 }
 0x29a   :  { %v1406_v24 = vpop.f32.mrf.mxu2 }
 0x2a2   :  { %v1409_v17 = vpop.f32.mrf.mxu2 }
 0x2aa   :  { %v1412_v57 = vpop.f32.mrf.mxu2 }
 0x2b2   :  { %v1415_v34 = vpop.f32.mrf.mxu2 }
 0x2ba   :  { %v1418_v42 = vpop.f32.mrf.mxu2 }
 0x2c9   :  { %1201 = vrot.lane.b32.xlu0 %v1076_v53, %s8009_s9  ;;  %v506_v53 = vadd.f32 %v505_v14, %v8638_v18  ;;  %v722_v18 = vadd.f32 %v678_v3, %v509_v41  ;;  %v684_v41 = vpop.f32.mrf.mxu1 }
 0x2cb   :  { %v768_v15 = vadd.f32 %v8702_v23, %v722_v18 }
 0x2d5   :  { %1209 = vrot.lane.b32.xlu1 %v1136_v20, %s8009_s9 }
 0x2dc   :  { %1207 = vrot.lane.b32.xlu2 %v1121_v59, %s8009_s9 }
 0x2eb   :  { %1599 = vxpose.xlu0.b32.start.end [1/1] (short) (narrow) %v1394_v35, 16  ;;  %v512_v35 = vadd.f32 %v511_v49, %v10565_v32 }
 0x2f4   :  { %v1487_v43 = vpop.trf.xlu2 }
 0x2f7   :  { %v1455_v58 = vpop.trf.xlu0 }
 0x2f8   :  { %7313 = vmatmul.msk.f32.vlgmr.msra.gmra.mxu3 %vm2079_vm0, %v1455_v58 }
 0x2fb   :  { %1663 = vxpose.xlu0.b32.start.end [1/1] (short) (narrow) %v1400_v27, 16  ;;  %v724_v27 = vadd.f32 %v681_v26, %v512_v35 }
 0x2fc   :  { %v1488_v56 = vpop.trf.xlu2 }
 0x2fd   :  { %v770_v58 = vadd.f32 %v8702_v23, %v724_v27 }
 0x2ff   :  { %v1456_v28 = vpop.trf.xlu0 }
 0x300   :  { %7314 = vmatmul.msk.f32.gmra.mxu3 %vm2079_vm0, %v1456_v28 }
 0x302   :  { %1631 = vxpose.xlu2.b32.start.end [1/1] (short) (narrow) %v1397_v50, 16 }
 0x304   :  { %v1551_v9 = vpop.trf.xlu2 }
 0x307   :  { %v1519_v55 = vpop.trf.xlu1 }
 0x308   :  { %7315 = vmatmul.msk.f32.gmra.mxu3 %vm2079_vm0, %v1487_v43 }
 0x30a   :  { %1695 = vxpose.xlu1.b32.start.end [1/1] (short) (narrow) %v1403_v54, 16 }
 0x30b   :  { %1727 = vxpose.xlu0.b32.start.end [1/1] (short) (narrow) %v1406_v24, 16 }
 0x30c   :  { %v1552_v2 = vpop.trf.xlu2 }
 0x30f   :  { %v1520_v46 = vpop.trf.xlu1 }
 0x310   :  { %7316 = vmatmul.msk.f32.gmra.mxu3 %vm2079_vm0, %v1488_v56 }
 0x312   :  { %1759 = vxpose.xlu2.b32.start.end [1/1] (short) (narrow) %v1409_v17, 16  ;;  %v607_v17 = vpop.f32.mrf.mxu0 }
 0x317   :  { %v1583_v48 = vpop.trf.xlu1 }
 0x318   :  { %7317 = vmatmul.msk.f32.gmra.mxu3 %vm2079_vm0, %v1519_v55 }
 0x31b   :  { %1791 = vxpose.xlu0.b32.start.end [1/1] (short) (narrow) %v1412_v57, 16 }
 0x31f   :  { %v1584_v16 = vpop.trf.xlu1 }
 0x320   :  { %7318 = vmatmul.msk.f32.gmra.mxu3 %vm2079_vm0, %v1520_v46 }
 0x322   :  { %1823 = vxpose.xlu2.b32.start.end [1/1] (short) (narrow) %v1415_v34, 16 }
 0x328   :  { %7319 = vmatmul.msk.f32.gmra.mxu3 %vm2079_vm0, %v1551_v9 }
 0x32b   :  { %1855 = vxpose.xlu0.b32.start.end [1/1] (short) (narrow) %v1418_v42, 16 }
 0x330   :  { %7320 = vmatmul.msk.f32.gmra.mxu3 %vm2079_vm0, %v1552_v2 }
 0x336   :  { %v1208_v51 = vpop.permute.xlu2 %1207 }
 0x337   :  { %v1250_v44 = vmul.f32 %v1208_v51, %v8778_v40  ;;  %v10566_v40 = vld [vmem:[#allocation8_spill] sm:$0xff] }
 0x338   :  { %7321 = vmatmul.msk.f32.gmra.mxu3 %vm2079_vm0, %v1583_v48  ;;  %v438_v13 = vadd.f32 %v8762_v39, %v10566_v40 }
 0x339   :  { %v1270_v59 = vadd.f32 %v1250_v44, %v768_v15 }
 0x33a   :  { %v725_v57 = vadd.f32 %v607_v17, %v438_v13 }
 0x33b   :  { %v1202_v63 = vpop.permute.xlu0 %1201  ;;  %v1290_v54 = vmax.f32 %v1270_v59, 0.0 }
 0x33c   :  { %v1247_v31 = vmul.f32 %v1202_v63, %v8768_v47  ;;  %v720_v47 = vadd.f32 %v675_v0, %v506_v53  ;;  %v8819_v34 = vadd.f32 %v8530_v8, %v725_v57 }
 0x33e   :  { %v1267_v37 = vadd.f32 %v1247_v31, %v762_v12  ;;  %v766_v25 = vadd.f32 %v8702_v23, %v720_v47  ;;  %v7292_v30 = vmul.f32 -1.442695, %v8819_v34 }
 0x340   :  { %v1287_v5 = vmax.f32 %v1267_v37, 0.0  ;;  %v1269_v11 = vadd.f32 %v1249_v6, %v766_v25  ;;  %7322 = vmatmul.msk.f32.gmra.mxu3 %vm2079_vm0, %v1584_v16  ;;  %7780 = vpow2.f32 %v7292_v30 }
 0x342   :  { %7307 = vmatmul.msk.f32.gmra.mxu2 %vm1301_vm14, %v1287_v5  ;;  %v1289_v20 = vmax.f32 %v1269_v11, 0.0  ;;  %v10567_v11 = vld [vmem:[#allocation10_spill] sm:$0xff] }
 0x343   :  { %v515_v51 = vadd.f32 %v514_v60, %v10567_v11 }
 0x345   :  { %v726_v18 = vadd.f32 %v684_v41, %v515_v51 }
 0x347   :  { %v1210_v50 = vpop.permute.xlu1 %1209  ;;  %v772_v49 = vadd.f32 %v8702_v23, %v726_v18 }
 0x348   :  { %v1251_v24 = vmul.f32 %v1210_v50, %v8773_v7  ;;  %v7781_v7 = vpop.eup %7780 }
 0x349   :  { %v852_v56 = vadd.f32 1.0, %v7781_v7 }
 0x34a   :  { %7308 = vmatmul.msk.f32.gmra.mxu2 %vm1301_vm14, %v1288_v19  ;;  %v1271_v28 = vadd.f32 %v1251_v24, %v770_v58 }
 0x34b   :  { %7782 = vrcp.f32 %v852_v56  ;;  %v1149_v39 = vand.u32 2147483648, %v852_v56  ;;  %vm1143_vm2 = vweird.f32 %v852_v56  ;;  %v1147_v1 = vand.u32 2147483647, %v852_v56 }
 0x34c   :  { %v1291_v43 = vmax.f32 %v1271_v28, 0.0 }
 0x34d   :  { %v1150_v45 = vor.u32 1.1754944e-38, %v1149_v39  ;;  %vm1148_vm4 = vcmp.eq.f32.partialorder %v1147_v1, 8.507059e+37 }
 0x351   :  { %v7783_v42 = vpop.eup %7782 }
 0x352   :  { %7309 = vmatmul.msk.f32.gmra.mxu2 %vm1301_vm14, %v1289_v20  ;;  %v1139_v55 = vmul.f32 %v7783_v42, %v852_v56  ;;  %vm1144_vm1 = vweird.f32 %v7783_v42 }
 0x353   :  { %vm1145_vm3 = vmor %vm1143_vm2, %vm1144_vm1 }
 0x354   :  { %v1140_v33 = vsub.f32 1.0, %v1139_v55 }
 0x356   :  { %v1141_v10 = vmul.f32 %v7783_v42, %v1140_v33 }
 0x358   :  { %v1142_v46 = vadd.f32 %v7783_v42, %v1141_v10 }
 0x35a   :  { %7310 = vmatmul.msk.f32.gmra.mxu2 %vm1301_vm14, %v1290_v54  ;;  %v1146_v21 = vsel %vm1145_vm3, %v7783_v42, %v1142_v46 }
 0x35b   :  { %v1151_v61 = vsel %vm1148_vm4, %v1150_v45, %v1146_v21 }
 0x362   :  { %7311 = vmatmul.msk.f32.gmra.mxu2 %vm1301_vm14, %v1291_v43 }
 0x37b   :  { %v2217_v36 = vpop.f32.mrf.mxu3 }
 0x383   :  { %v2220_v14 = vpop.f32.mrf.mxu3 }
 0x38b   :  { %v2223_v5 = vpop.f32.mrf.mxu3 }
 0x38f   :  { %v1615_v8 = vpop.trf.xlu0 }
 0x390   :  { %7323 = vmatmul.msk.f32.gmra.mxu3 %vm2079_vm0, %v1615_v8 }
 0x393   :  { %1211 = vrot.lane.b32.xlu2 %v1151_v61, %s8009_s9  ;;  %v2226_v47 = vpop.f32.mrf.mxu3 }
 0x397   :  { %v1616_v9 = vpop.trf.xlu0 }
 0x398   :  { %7324 = vmatmul.msk.f32.gmra.mxu3 %vm2079_vm0, %v1616_v9 }
 0x39b   :  { %v1647_v63 = vpop.trf.xlu2  ;;  %v2229_v38 = vpop.f32.mrf.mxu3 }
 0x39f   :  { %v1679_v31 = vpop.trf.xlu0 }
 0x3a0   :  { %7325 = vmatmul.msk.f32.gmra.mxu3 %vm2079_vm0, %v1647_v63  ;;  %v7356_v63 = vld [vmem:[%s10527_s5 + $0x38] sm:$0xff] }
 0x3a1   :  { %3134 = vmatpush.msra.mxu1 %v7356_v63 }
 0x3a3   :  { %v1648_v12 = vpop.trf.xlu2  ;;  %v2232_v16 = vpop.f32.mrf.mxu3 }
 0x3a7   :  { %v1680_v37 = vpop.trf.xlu0 }
 0x3a8   :  { %7326 = vmatmul.msk.f32.gmra.mxu3 %vm2079_vm0, %v1648_v12 }
 0x3ab   :  { %v1775_v52 = vpop.trf.xlu2  ;;  %v2235_v15 = vpop.f32.mrf.mxu3 }
 0x3ae   :  { %v1711_v0 = vpop.trf.xlu1 }
 0x3af   :  { %v1743_v2 = vpop.trf.xlu0 }
 0x3b0   :  { %7327 = vmatmul.msk.f32.gmra.mxu3 %vm2079_vm0, %v1679_v31 }
 0x3b3   :  { %v1776_v22 = vpop.trf.xlu2  ;;  %v2238_v50 = vpop.f32.mrf.mxu3 }
 0x3b6   :  { %v1712_v4 = vpop.trf.xlu1 }
 0x3b7   :  { %v1744_v29 = vpop.trf.xlu0 }
 0x3b8   :  { %7328 = vmatmul.msk.f32.gmra.mxu3 %vm2079_vm0, %v1680_v37 }
 0x3bb   :  { %v1839_v6 = vpop.trf.xlu2  ;;  %v2241_v23 = vpop.f32.mrf.mxu3 }
 0x3bf   :  { %v1807_v20 = vpop.trf.xlu0 }
 0x3c0   :  { %7329 = vmatmul.msk.f32.gmra.mxu3 %vm2079_vm0, %v1711_v0 }
 0x3c3   :  { %v1840_v25 = vpop.trf.xlu2  ;;  %v2244_v27 = vpop.f32.mrf.mxu3 }
 0x3c5   :  { %v1421_v48 = vpop.f32.mrf.mxu2 }
 0x3c6   :  { %1887 = vxpose.xlu1.b32.start.end [1/1] (short) (narrow) %v1421_v48, 16  ;;  %v2997_v48 = vld [vmem:[%s10527_s5] sm:$0xff] }
 0x3c7   :  { %v1808_v59 = vpop.trf.xlu0 }
 0x3c8   :  { %7330 = vmatmul.msk.f32.gmra.mxu3 %vm2079_vm0, %v1712_v4  ;;  %v7355_v4 = vld [vmem:[%s10527_s5 + $0x30] sm:$0xff] }
 0x3c9   :  { %3069 = vmatpush.msra.mxu0 %v7355_v4 }
 0x3cd   :  { %v1424_v53 = vpop.f32.mrf.mxu2 }
 0x3ce   :  { %1919 = vxpose.xlu0.b32.start.end [1/1] (short) (narrow) %v1424_v53, 16 }
 0x3cf   :  { %v1871_v13 = vpop.trf.xlu0 }
 0x3d0   :  { %7331 = vmatmul.msk.f32.gmra.mxu3 %vm2079_vm0, %v1743_v2 }
 0x3d5   :  { %v1427_v19 = vpop.f32.mrf.mxu2 }
 0x3d6   :  { %1951 = vxpose.xlu1.b32.start.end [1/1] (short) (narrow) %v1427_v19, 16 }
 0x3d7   :  { %v1872_v57 = vpop.trf.xlu0 }
 0x3d8   :  { %7332 = vmatmul.msk.f32.gmra.mxu3 %vm2079_vm0, %v1744_v29 }
 0x3dd   :  { %v1430_v3 = vpop.f32.mrf.mxu2 }
 0x3de   :  { %1983 = vxpose.xlu0.b32.start.end [1/1] (short) (narrow) %v1430_v3, 16 }
 0x3e0   :  { %7333 = vmatmul.msk.f32.gmra.mxu3 %vm2079_vm0, %v1775_v52  ;;  %v2999_v52 = vld [vmem:[%s10527_s5 + $0x10] sm:$0xff] }
 0x3e1   :  { %3205 = vmatpush.msrb.mxu2 %v2999_v52 }
 0x3e3   :  { %3206 = vmatpush.msrb.mxu2 %v2997_v48 }
 0x3e5   :  { %v1433_v62 = vpop.f32.mrf.mxu2 }
 0x3e6   :  { %2015 = vxpose.xlu1.b32.start.end [1/1] (short) (narrow) %v1433_v62, 16 }
 0x3e8   :  { %7334 = vmatmul.msk.f32.gmra.mxu3 %vm2079_vm0, %v1776_v22  ;;  %v7353_v22 = vld [vmem:[%s10527_s5 + $0x20] sm:$0xff] }
 0x3e9   :  { %3070 = vmatpush.msra.mxu0 %v7353_v22 }
 0x3ed   :  { %v1212_v44 = vpop.permute.xlu2 %1211 }
 0x3ee   :  { %v1252_v26 = vmul.f32 %v1212_v44, %v8819_v34  ;;  %2337 = vxpose.xlu0.b32.start [1/2] (short) (narrow) %v2217_v36, 8 }
 0x3f0   :  { %v1272_v32 = vadd.f32 %v1252_v26, %v772_v49  ;;  %7335 = vmatmul.msk.f32.gmra.mxu3 %vm2079_vm0, %v1807_v20 }
 0x3f2   :  { %v1292_v35 = vmax.f32 %v1272_v32, 0.0 }
 0x3f4   :  { %7312 = vmatmul.msk.f32.gmra.mxu2 %vm1301_vm14, %v1292_v35 }
 0x3f6   :  { %2338 = vxpose.xlu0.b32.end [2/2] (short) (narrow) %v2220_v14, 8  ;;  %2401 = vxpose.xlu1.b32.start [1/2] (short) (narrow) %v2229_v38, 8 }
 0x3f8   :  { %7336 = vmatmul.msk.f32.gmra.mxu3 %vm2079_vm0, %v1808_v59 }
 0x3fe   :  { %2369 = vxpose.xlu0.b32.start [1/2] (short) (narrow) %v2223_v5, 8  ;;  %2402 = vxpose.xlu1.b32.end [2/2] (short) (narrow) %v2232_v16, 8 }
 0x400   :  { %7337 = vmatmul.msk.f32.gmra.mxu3 %vm2079_vm0, %v1839_v6 }
 0x406   :  { %2370 = vxpose.xlu0.b32.end [2/2] (short) (narrow) %v2226_v47, 8  ;;  %2465 = vxpose.xlu1.b32.start [1/2] (short) (narrow) %v2241_v23, 8  ;;  %v7354_v47 = vld [vmem:[%s10527_s5 + $0x28] sm:$0xff] }
 0x407   :  { %3135 = vmatpush.msra.mxu1 %v7354_v47 }
 0x408   :  { %7338 = vmatmul.msk.f32.gmra.mxu3 %vm2079_vm0, %v1840_v25 }
 0x40e   :  { %2433 = vxpose.xlu0.b32.start [1/2] (short) (narrow) %v2235_v15, 8  ;;  %2466 = vxpose.xlu1.b32.end [2/2] (short) (narrow) %v2244_v27, 8 }
 0x410   :  { %7339 = vmatmul.msk.f32.gmra.mxu3 %vm2079_vm0, %v1871_v13 }
 0x413   :  { %v2247_v54 = vpop.f32.mrf.mxu3 }
 0x416   :  { %2434 = vxpose.xlu0.b32.end [2/2] (short) (narrow) %v2238_v50, 8  ;;  %v7423_v50 = vld [vmem:[%s10527_s5 + $0x50] sm:$0xff] }
 0x417   :  { %3346 = vmatpush.msrb.mxu1 %v7423_v50 }
 0x418   :  { %7340 = vmatmul.msk.f32.gmra.mxu3 %vm2079_vm0, %v1872_v57 }
 0x41b   :  { %v2250_v24 = vpop.f32.mrf.mxu3 }
 0x41e   :  { %2497 = vxpose.xlu0.b32.start [1/2] (short) (narrow) %v2247_v54, 8 }
 0x423   :  { %v2253_v58 = vpop.f32.mrf.mxu3 }
 0x424   :  { %2529 = vxpose.xlu1.b32.start [1/2] (short) (narrow) %v2253_v58, 8 }
 0x426   :  { %2498 = vxpose.xlu0.b32.end [2/2] (short) (narrow) %v2250_v24, 8 }
 0x42b   :  { %v2256_v17 = vpop.f32.mrf.mxu3 }
 0x42c   :  { %2530 = vxpose.xlu1.b32.end [2/2] (short) (narrow) %v2256_v17, 8 }
 0x433   :  { %v2259_v40 = vpop.f32.mrf.mxu3 }
 0x434   :  { %2561 = vxpose.xlu0.b32.start [1/2] (short) (narrow) %v2259_v40, 8 }
 0x43b   :  { %v2262_v28 = vpop.f32.mrf.mxu3 }
 0x43c   :  { %2562 = vxpose.xlu0.b32.end [2/2] (short) (narrow) %v2262_v28, 8 }
 0x443   :  { %v2265_v43 = vpop.f32.mrf.mxu3 }
 0x444   :  { %2593 = vxpose.xlu1.b32.start [1/2] (short) (narrow) %v2265_v43, 8 }
 0x44b   :  { %v2268_v34 = vpop.f32.mrf.mxu3 }
 0x44c   :  { %2594 = vxpose.xlu1.b32.end [2/2] (short) (narrow) %v2268_v34, 8 }
 0x453   :  { %v8846_v30 = vpop.f32.mrf.mxu3 }
 0x45b   :  { %v8848_v7 = vpop.f32.mrf.mxu3 }
 0x463   :  { %v8850_v56 = vpop.f32.mrf.mxu3 }
 0x46a   :  { %v1903_v42 = vpop.trf.xlu1 }
 0x46b   :  { %v8852_v55 = vpop.f32.mrf.mxu3  ;;  %7341 = vmatmul.msk.f32.gmra.mxu3 %vm2079_vm0, %v1903_v42 }
 0x472   :  { %v1904_v33 = vpop.trf.xlu1  ;;  %v1935_v46 = vpop.trf.xlu0 }
 0x473   :  { %v2283_v10 = vpop.f32.mrf.mxu3  ;;  %7342 = vmatmul.msk.f32.gmra.mxu3 %vm2079_vm0, %v1904_v33 }
 0x474   :  { %2689 = vxpose.xlu2.b32.start [1/2] (short) (narrow) %v2283_v10, 8 }
 0x477   :  { %v1436_v39 = vpop.f32.mrf.mxu2 }
 0x478   :  { %2047 = vxpose.xlu0.b32.start.end [1/1] (short) (narrow) %v1436_v39, 16 }
 0x47a   :  { %v1936_v8 = vpop.trf.xlu0  ;;  %v1967_v45 = vpop.trf.xlu1 }
 0x47b   :  { %v2286_v1 = vpop.f32.mrf.mxu3  ;;  %7343 = vmatmul.msk.f32.gmra.mxu3 %vm2079_vm0, %v1935_v46 }
 0x47c   :  { %2690 = vxpose.xlu2.b32.end [2/2] (short) (narrow) %v2286_v1, 8 }
 0x482   :  { %v1968_v9 = vpop.trf.xlu1  ;;  %v1999_v12 = vpop.trf.xlu0 }
 0x483   :  { %v2289_v21 = vpop.f32.mrf.mxu3  ;;  %7344 = vmatmul.msk.f32.gmra.mxu3 %vm2079_vm0, %v1936_v8 }
 0x484   :  { %2721 = vxpose.xlu1.b32.start [1/2] (short) (narrow) %v2289_v21, 8  ;;  %v3000_v21 = vld [vmem:[%s10527_s5 + $0x18] sm:$0xff] }
 0x485   :  { %3270 = vmatpush.msrb.mxu0 %v3000_v21 }
 0x48a   :  { %v2000_v60 = vpop.trf.xlu0  ;;  %v2031_v31 = vpop.trf.xlu1 }
 0x48b   :  { %v2292_v61 = vpop.f32.mrf.mxu3  ;;  %7345 = vmatmul.msk.f32.gmra.mxu3 %vm2079_vm0, %v1967_v45  ;;  %v2998_v45 = vld [vmem:[%s10527_s5 + $0x8] sm:$0xff] }
 0x48c   :  { %2722 = vxpose.xlu1.b32.end [2/2] (short) (narrow) %v2292_v61, 8  ;;  %3271 = vmatpush.msrb.mxu0 %v2998_v45 }
 0x492   :  { %v2032_v36 = vpop.trf.xlu1  ;;  %v8867_v0 = vpop.trf.xlu0 }
 0x493   :  { %7346 = vmatmul.msk.f32.gmra.mxu3 %vm2079_vm0, %v1968_v9  ;;  %v2295_v37 = vpop.f32.mrf.mxu3  ;;  %v2977_v5 = vmax.f32 %v8867_v0, 0.0 }
 0x494   :  { %2753 = vxpose.xlu0.b32.start [1/2] (short) (narrow) %v2295_v37, 8 }
 0x495   :  { %7389 = vmatmul.msk.f32.vlgmr.msrb.gmra.mxu2 %vm3006_vm5, %v2977_v5 }
 0x49a   :  { %v2417_v19 = vpop.trf.xlu1 }
 0x49b   :  { %7347 = vmatmul.msk.f32.gmra.mxu3 %vm2079_vm0, %v1999_v12  ;;  %v2298_v14 = vpop.f32.mrf.mxu3  ;;  %v8896_v29 = vmax.f32 %v2417_v19, 0.0 }
 0x49c   :  { %2754 = vxpose.xlu0.b32.end [2/2] (short) (narrow) %v2298_v14, 8 }
 0x4a2   :  { %v2385_v2 = vpop.trf.xlu0 }
 0x4a3   :  { %7348 = vmatmul.msk.f32.gmra.mxu3 %vm2079_vm0, %v2000_v60  ;;  %v8882_v53 = vmax.f32 %v2385_v2, 0.0  ;;  %v7424_v60 = vld [vmem:[%s10527_s5 + $0x58] sm:$0xff] }
 0x4a4   :  { %3411 = vmatpush.msra.mxu2 %v7424_v60 }
 0x4a5   :  { %7357 = vmatmul.msk.f32.vlgmr.msra.gmra.mxu0 %vm3006_vm5, %v8882_v53  ;;  %7373 = vmatmul.msk.f32.vlgmr.msra.gmra.mxu1 %vm3006_vm5, %v8882_v53 }
 0x4a6   :  { %7390 = vmatmul.msk.f32.gmra.mxu2 %vm3006_vm5, %v8882_v53 }
 0x4aa   :  { %v2481_v3 = vpop.trf.xlu1 }
 0x4ab   :  { %7349 = vmatmul.msk.f32.gmra.mxu3 %vm2079_vm0, %v2031_v31  ;;  %v8912_v25 = vmax.f32 %v2481_v3, 0.0  ;;  %v7422_v31 = vld [vmem:[%s10527_s5 + $0x48] sm:$0xff] }
 0x4ac   :  { %3412 = vmatpush.msra.mxu2 %v7422_v31 }
 0x4ad   :  { %7358 = vmatmul.msk.f32.gmra.mxu0 %vm3006_vm5, %v8896_v29  ;;  %7374 = vmatmul.msk.f32.gmra.mxu1 %vm3006_vm5, %v8896_v29 }
 0x4ae   :  { %7391 = vmatmul.msk.f32.gmra.mxu2 %vm3006_vm5, %v8896_v29 }
 0x4b2   :  { %v2449_v6 = vpop.trf.xlu0 }
 0x4b3   :  { %7350 = vmatmul.msk.f32.gmra.mxu3 %vm2079_vm0, %v2032_v36  ;;  %v8904_v38 = vmax.f32 %v2449_v6, 0.0 }
 0x4b5   :  { %7359 = vmatmul.msk.f32.gmra.mxu0 %vm3006_vm5, %v8904_v38  ;;  %7375 = vmatmul.msk.f32.gmra.mxu1 %vm3006_vm5, %v8904_v38 }
 0x4b6   :  { %7392 = vmatmul.msk.f32.gmra.mxu2 %vm3006_vm5, %v8904_v38 }
 0x4bd   :  { %7360 = vmatmul.msk.f32.gmra.mxu0 %vm3006_vm5, %v8912_v25  ;;  %7376 = vmatmul.msk.f32.gmra.mxu1 %vm3006_vm5, %v8912_v25 }
 0x4be   :  { %7393 = vmatmul.msk.f32.gmra.mxu2 %vm3006_vm5, %v8912_v25 }
 0x4c2   :  { %v2513_v62 = vpop.trf.xlu0 }
 0x4c3   :  { %v8920_v41 = vmax.f32 %v2513_v62, 0.0 }
 0x4c5   :  { %7361 = vmatmul.msk.f32.gmra.mxu0 %vm3006_vm5, %v8920_v41  ;;  %7377 = vmatmul.msk.f32.gmra.mxu1 %vm3006_vm5, %v8920_v41 }
 0x4c6   :  { %7394 = vmatmul.msk.f32.gmra.mxu2 %vm3006_vm5, %v8920_v41 }
 0x4c8   :  { %v2545_v51 = vpop.trf.xlu1 }
 0x4c9   :  { %v8928_v18 = vmax.f32 %v2545_v51, 0.0 }
 0x4cd   :  { %7362 = vmatmul.msk.f32.gmra.mxu0 %vm3006_vm5, %v8928_v18  ;;  %7378 = vmatmul.msk.f32.gmra.mxu1 %vm3006_vm5, %v8928_v18 }
 0x4ce   :  { %7395 = vmatmul.msk.f32.gmra.mxu2 %vm3006_vm5, %v8928_v18 }
 0x4d8   :  { %v2577_v44 = vpop.trf.xlu0 }
 0x4d9   :  { %v8936_v15 = vmax.f32 %v2577_v44, 0.0 }
 0x4db   :  { %7363 = vmatmul.msk.f32.gmra.mxu0 %vm3006_vm5, %v8936_v15  ;;  %7379 = vmatmul.msk.f32.gmra.mxu1 %vm3006_vm5, %v8936_v15 }
 0x4dc   :  { %7396 = vmatmul.msk.f32.gmra.mxu2 %vm3006_vm5, %v8936_v15 }
 0x4e8   :  { %v2609_v26 = vpop.trf.xlu1 }
 0x4e9   :  { %v8944_v32 = vmax.f32 %v2609_v26, 0.0 }
 0x4eb   :  { %7364 = vmatmul.msk.f32.gmra.mxu0 %vm3006_vm5, %v8944_v32  ;;  %7380 = vmatmul.msk.f32.gmra.mxu1 %vm3006_vm5, %v8944_v32 }
 0x4ee   :  { %v2301_v16 = vpop.f32.mrf.mxu3 }
 0x4ef   :  { %2785 = vxpose.xlu1.b32.start [1/2] (short) (narrow) %v2301_v16, 8 }
 0x4f6   :  { %v2304_v11 = vpop.f32.mrf.mxu3 }
 0x4f7   :  { %2786 = vxpose.xlu1.b32.end [2/2] (short) (narrow) %v2304_v11, 8 }
 0x4fe   :  { %v2307_v20 = vpop.f32.mrf.mxu3 }
 0x4ff   :  { %2817 = vxpose.xlu0.b32.start [1/2] (short) (narrow) %v2307_v20, 8 }
 0x506   :  { %v2310_v49 = vpop.f32.mrf.mxu3 }
 0x507   :  { %2818 = vxpose.xlu0.b32.end [2/2] (short) (narrow) %v2310_v49, 8 }
 0x50d   :  { %v2705_v40 = vpop.trf.xlu2 }
 0x50e   :  { %v2313_v35 = vpop.f32.mrf.mxu3  ;;  %v8959_v13 = vmax.f32 %v2705_v40, 0.0 }
 0x50f   :  { %2657 = vxpose.xlu0.b32.start [1/2] (short) (narrow) %v8850_v56, 8  ;;  %2849 = vxpose.xlu1.b32.start [1/2] (short) (narrow) %v2313_v35, 8 }
 0x510   :  { %7365 = vmatmul.msk.f32.gmra.mxu0 %vm3006_vm5, %v8959_v13  ;;  %7381 = vmatmul.msk.f32.gmra.mxu1 %vm3006_vm5, %v8959_v13 }
 0x516   :  { %v2316_v59 = vpop.f32.mrf.mxu3 }
 0x517   :  { %2658 = vxpose.xlu0.b32.end [2/2] (short) (narrow) %v8852_v55, 8  ;;  %2850 = vxpose.xlu1.b32.end [2/2] (short) (narrow) %v2316_v59, 8 }
 0x518   :  { %v3208_v19 = vpop.f32.mrf.mxu2 }
 0x51c   :  { %v2063_v23 = vpop.trf.xlu0 }
 0x51d   :  { %7351 = vmatmul.msk.f32.gmra.mxu3 %vm2079_vm0, %v2063_v23 }
 0x51e   :  { %v2319_v27 = vpop.f32.mrf.mxu3 }
 0x51f   :  { %2881 = vxpose.xlu2.b32.start [1/2] (short) (narrow) %v2319_v27, 8 }
 0x522   :  { %v9016_v63 = vpop.f32.mrf.mxu1  ;;  %v3072_v22 = vpop.f32.mrf.mxu0 }
 0x524   :  { %v2064_v54 = vpop.trf.xlu0 }
 0x525   :  { %7352 = vmatmul.msk.f32.gmra.mxu3 %vm2079_vm0, %v2064_v54  ;;  %v9182_v54 = vld [vmem:[%s10528_s6] sm:$0x3] }
 0x526   :  { %v2322_v24 = vpop.f32.mrf.mxu3 }
 0x527   :  { %2882 = vxpose.xlu2.b32.end [2/2] (short) (narrow) %v2322_v24, 8  ;;  %v3209_v24 = vadd.f32 %v3208_v19, %v3072_v22 }
 0x528   :  { %v2737_v28 = vpop.trf.xlu1 }
 0x529   :  { %v8965_v57 = vmax.f32 %v2737_v28, 0.0 }
 0x52a   :  { %v9022_v12 = vpop.f32.mrf.mxu1  ;;  %v3075_v6 = vpop.f32.mrf.mxu0 }
 0x52b   :  { %7366 = vmatmul.msk.f32.gmra.mxu0 %vm3006_vm5, %v8965_v57  ;;  %7382 = vmatmul.msk.f32.gmra.mxu1 %vm3006_vm5, %v8965_v57 }
 0x52e   :  { %v2325_v58 = vpop.f32.mrf.mxu3 }
 0x52f   :  { %2625 = vxpose.xlu2.b32.start [1/2] (short) (narrow) %v8846_v30, 8  ;;  %2913 = vxpose.xlu1.b32.start [1/2] (short) (narrow) %v2325_v58, 8  ;;  %v7421_v30 = vld [vmem:[%s10527_s5 + $0x40] sm:$0xff]  ;;  %v9185_v58 = vperm.slane %v9182_v54, 0 }
 0x530   :  { %3347 = vmatpush.msrb.mxu1 %v7421_v30 }
 0x532   :  { %v9032_v36 = vpop.f32.mrf.mxu1 }
 0x536   :  { %v2328_v17 = vpop.f32.mrf.mxu3 }
 0x537   :  { %2626 = vxpose.xlu2.b32.end [2/2] (short) (narrow) %v8848_v7, 8  ;;  %2914 = vxpose.xlu1.b32.end [2/2] (short) (narrow) %v2328_v17, 8 }
 0x538   :  { %v2769_v43 = vpop.trf.xlu0 }
 0x539   :  { %v8971_v34 = vmax.f32 %v2769_v43, 0.0 }
 0x53a   :  { %v9042_v52 = vpop.f32.mrf.mxu1 }
 0x53b   :  { %7367 = vmatmul.msk.f32.gmra.mxu0 %vm3006_vm5, %v8971_v34  ;;  %7383 = vmatmul.msk.f32.gmra.mxu1 %vm3006_vm5, %v8971_v34 }
 0x542   :  { %v9055_v48 = vpop.f32.mrf.mxu1 }
 0x54a   :  { %v9065_v0 = vpop.f32.mrf.mxu1 }
 0x593   :  { %v2801_v7 = vpop.trf.xlu1 }
 0x594   :  { %v8980_v56 = vmax.f32 %v2801_v7, 0.0 }
 0x596   :  { %7368 = vmatmul.msk.f32.gmra.mxu0 %vm3006_vm5, %v8980_v56  ;;  %7384 = vmatmul.msk.f32.gmra.mxu1 %vm3006_vm5, %v8980_v56 }
 0x5a0   :  { %v2331_v42 = vpop.f32.mrf.mxu3 }
 0x5a1   :  { %2945 = vxpose.xlu1.b32.start [1/2] (short) (narrow) %v2331_v42, 8 }
 0x5a3   :  { %v2833_v55 = vpop.trf.xlu0 }
 0x5a4   :  { %v8986_v33 = vmax.f32 %v2833_v55, 0.0 }
 0x5a6   :  { %7369 = vmatmul.msk.f32.gmra.mxu0 %vm3006_vm5, %v8986_v33  ;;  %7385 = vmatmul.msk.f32.gmra.mxu1 %vm3006_vm5, %v8986_v33 }
 0x5a8   :  { %v2334_v10 = vpop.f32.mrf.mxu3 }
 0x5a9   :  { %2946 = vxpose.xlu1.b32.end [2/2] (short) (narrow) %v2334_v10, 8 }
 0x5b3   :  { %v8992_v46 = vpop.trf.xlu0  ;;  %v2865_v39 = vpop.trf.xlu1 }
 0x5b4   :  { %v2987_v1 = vmax.f32 %v8992_v46, 0.0  ;;  %v8995_v8 = vmax.f32 %v2865_v39, 0.0 }
 0x5b6   :  { %7397 = vmatmul.msk.f32.gmra.mxu2 %vm3006_vm5, %v2987_v1  ;;  %7370 = vmatmul.msk.f32.gmra.mxu0 %vm3006_vm5, %v8995_v8 }
 0x5b7   :  { %7386 = vmatmul.msk.f32.gmra.mxu1 %vm3006_vm5, %v8995_v8 }
 0x5b8   :  { %v2897_v61 = vpop.trf.xlu2 }
 0x5b9   :  { %v9010_v9 = vmax.f32 %v2897_v61, 0.0 }
 0x5be   :  { %7398 = vmatmul.msk.f32.gmra.mxu2 %vm3006_vm5, %v8959_v13  ;;  %7371 = vmatmul.msk.f32.gmra.mxu0 %vm3006_vm5, %v9010_v9 }
 0x5bf   :  { %7387 = vmatmul.msk.f32.gmra.mxu1 %vm3006_vm5, %v9010_v9 }
 0x5c6   :  { %7399 = vmatmul.msk.f32.gmra.mxu2 %vm3006_vm5, %v8965_v57 }
 0x5ce   :  { %7400 = vmatmul.msk.f32.gmra.mxu2 %vm3006_vm5, %v8971_v34 }
 0x5d3   :  { %v2929_v37 = vpop.trf.xlu1 }
 0x5d4   :  { %v9034_v14 = vmax.f32 %v2929_v37, 0.0 }
 0x5d6   :  { %7372 = vmatmul.msk.f32.gmra.mxu0 %vm3006_vm5, %v9034_v14  ;;  %7388 = vmatmul.msk.f32.gmra.mxu1 %vm3006_vm5, %v9034_v14 }
 0x5d7   :  { %7401 = vmatmul.msk.f32.gmra.mxu2 %vm3006_vm5, %v8980_v56 }
 0x5de   :  { %7405 = vmatmul.msk.f32.vlgmr.msrb.gmra.mxu0 %vm3006_vm5, %v2977_v5  ;;  %7425 = vmatmul.msk.f32.vlgmr.msrb.gmra.mxu1 %vm3006_vm5, %v8896_v29  ;;  %v9073_v5 = vpop.f32.mrf.mxu1 }
 0x5df   :  { %7402 = vmatmul.msk.f32.gmra.mxu2 %vm3006_vm5, %v8986_v33 }
 0x5e6   :  { %7406 = vmatmul.msk.f32.gmra.mxu0 %vm3006_vm5, %v8882_v53  ;;  %7426 = vmatmul.msk.f32.gmra.mxu1 %vm3006_vm5, %v8904_v38  ;;  %v9081_v4 = vpop.f32.mrf.mxu1  ;;  %v2641_v53 = vpop.trf.xlu2 }
 0x5e7   :  { %7403 = vmatmul.msk.f32.gmra.mxu2 %vm3006_vm5, %v8995_v8  ;;  %v2986_v47 = vmax.f32 %v2641_v53, 0.0 }
 0x5ee   :  { %7407 = vmatmul.msk.f32.gmra.mxu0 %vm3006_vm5, %v8896_v29  ;;  %7427 = vmatmul.msk.f32.gmra.mxu1 %vm3006_vm5, %v8912_v25  ;;  %v9089_v2 = vpop.f32.mrf.mxu1 }
 0x5ef   :  { %7404 = vmatmul.msk.f32.gmra.mxu2 %vm3006_vm5, %v9010_v9 }
 0x5f6   :  { %7408 = vmatmul.msk.f32.gmra.mxu0 %vm3006_vm5, %v8904_v38  ;;  %7428 = vmatmul.msk.f32.gmra.mxu1 %vm3006_vm5, %v8920_v41 }
 0x5f7   :  { %7441 = vmatmul.msk.f32.vlgmr.msra.gmra.mxu2 %vm3006_vm5, %v8896_v29  ;;  %v9102_v29 = vpop.f32.mrf.mxu1 }
 0x5fe   :  { %7409 = vmatmul.msk.f32.gmra.mxu0 %vm3006_vm5, %v8912_v25  ;;  %7429 = vmatmul.msk.f32.gmra.mxu1 %vm3006_vm5, %v8928_v18 }
 0x5ff   :  { %7442 = vmatmul.msk.f32.gmra.mxu2 %vm3006_vm5, %v8904_v38  ;;  %v3211_v38 = vpop.f32.mrf.mxu2  ;;  %v9111_v3 = vpop.f32.mrf.mxu1 }
 0x600   :  { %v3212_v43 = vadd.f32 %v3211_v38, %v3075_v6 }
 0x606   :  { %7410 = vmatmul.msk.f32.gmra.mxu0 %vm3006_vm5, %v8920_v41  ;;  %7430 = vmatmul.msk.f32.gmra.mxu1 %vm3006_vm5, %v8936_v15 }
 0x607   :  { %7443 = vmatmul.msk.f32.gmra.mxu2 %vm3006_vm5, %v8912_v25  ;;  %v3078_v25 = vpop.f32.mrf.mxu0  ;;  %v3214_v16 = vpop.f32.mrf.mxu2 }
 0x608   :  { %v3215_v46 = vadd.f32 %v3214_v16, %v3078_v25 }
 0x60e   :  { %7411 = vmatmul.msk.f32.gmra.mxu0 %vm3006_vm5, %v8928_v18  ;;  %7431 = vmatmul.msk.f32.gmra.mxu1 %vm3006_vm5, %v8944_v32 }
 0x60f   :  { %7444 = vmatmul.msk.f32.gmra.mxu2 %vm3006_vm5, %v8920_v41  ;;  %v9121_v41 = vpop.f32.mrf.mxu0  ;;  %v3217_v11 = vpop.f32.mrf.mxu2 }
 0x610   :  { %v3218_v37 = vadd.f32 %v3217_v11, %v9121_v41 }
 0x613   :  { %v9119_v62 = vpop.f32.mrf.mxu1 }
 0x616   :  { %7412 = vmatmul.msk.f32.gmra.mxu0 %vm3006_vm5, %v8936_v15  ;;  %7432 = vmatmul.msk.f32.gmra.mxu1 %vm3006_vm5, %v2986_v47 }
 0x617   :  { %7445 = vmatmul.msk.f32.gmra.mxu2 %vm3006_vm5, %v8928_v18  ;;  %v9136_v18 = vpop.f32.mrf.mxu0  ;;  %v9142_v20 = vpop.f32.mrf.mxu2 }
 0x618   :  { %v3221_v11 = vadd.f32 %v9142_v20, %v9136_v18 }
 0x61e   :  { %7413 = vmatmul.msk.f32.gmra.mxu0 %vm3006_vm5, %v2987_v1  ;;  %7433 = vmatmul.msk.f32.gmra.mxu1 %vm3006_vm5, %v8965_v57 }
 0x61f   :  { %7446 = vmatmul.msk.f32.gmra.mxu2 %vm3006_vm5, %v8936_v15  ;;  %v9148_v15 = vpop.f32.mrf.mxu0  ;;  %v9156_v49 = vpop.f32.mrf.mxu2 }
 0x623   :  { %v9128_v51 = vpop.f32.mrf.mxu1 }
 0x626   :  { %7414 = vmatmul.msk.f32.gmra.mxu0 %vm3006_vm5, %v8959_v13  ;;  %7434 = vmatmul.msk.f32.gmra.mxu1 %vm3006_vm5, %v8971_v34 }
 0x627   :  { %7447 = vmatmul.msk.f32.gmra.mxu2 %vm3006_vm5, %v8944_v32  ;;  %v9160_v32 = vpop.f32.mrf.mxu0  ;;  %v9168_v50 = vpop.f32.mrf.mxu2 }
 0x62e   :  { %7415 = vmatmul.msk.f32.gmra.mxu0 %vm3006_vm5, %v8965_v57  ;;  %7435 = vmatmul.msk.f32.gmra.mxu1 %vm3006_vm5, %v8980_v56 }
 0x62f   :  { %7448 = vmatmul.msk.f32.gmra.mxu2 %vm3006_vm5, %v2986_v47  ;;  %v9172_v27 = vpop.f32.mrf.mxu0  ;;  %v9187_v13 = vpop.f32.mrf.mxu2 }
 0x634   :  { %v9146_v44 = vpop.f32.mrf.mxu1 }
 0x636   :  { %7416 = vmatmul.msk.f32.gmra.mxu0 %vm3006_vm5, %v8971_v34  ;;  %7436 = vmatmul.msk.f32.gmra.mxu1 %vm3006_vm5, %v8986_v33 }
 0x637   :  { %7449 = vmatmul.msk.f32.gmra.mxu2 %vm3006_vm5, %v8965_v57  ;;  %v9195_v30 = vpop.f32.mrf.mxu0 }
 0x63c   :  { %v9158_v26 = vpop.f32.mrf.mxu1 }
 0x63e   :  { %7417 = vmatmul.msk.f32.gmra.mxu0 %vm3006_vm5, %v8980_v56  ;;  %7437 = vmatmul.msk.f32.gmra.mxu1 %vm3006_vm5, %v8995_v8 }
 0x63f   :  { %7450 = vmatmul.msk.f32.gmra.mxu2 %vm3006_vm5, %v8971_v34 }
 0x645   :  { %v2961_v35 = vpop.trf.xlu1 }
 0x646   :  { %7418 = vmatmul.msk.f32.gmra.mxu0 %vm3006_vm5, %v8986_v33  ;;  %7438 = vmatmul.msk.f32.gmra.mxu1 %vm3006_vm5, %v9010_v9  ;;  %v2996_v59 = vmax.f32 %v2961_v35, 0.0 }
 0x647   :  { %7451 = vmatmul.msk.f32.gmra.mxu2 %vm3006_vm5, %v8980_v56  ;;  %v9197_v56 = vpop.f32.mrf.mxu2 }
 0x64e   :  { %7419 = vmatmul.msk.f32.gmra.mxu0 %vm3006_vm5, %v8995_v8  ;;  %7439 = vmatmul.msk.f32.gmra.mxu1 %vm3006_vm5, %v9034_v14 }
 0x64f   :  { %7452 = vmatmul.msk.f32.gmra.mxu2 %vm3006_vm5, %v8986_v33  ;;  %v9210_v45 = vpop.f32.mrf.mxu2 }
 0x653   :  { %v9170_v23 = vpop.f32.mrf.mxu1 }
 0x656   :  { %7420 = vmatmul.msk.f32.gmra.mxu0 %vm3006_vm5, %v9010_v9  ;;  %7440 = vmatmul.msk.f32.gmra.mxu1 %vm3006_vm5, %v2996_v59 }
 0x657   :  { %7453 = vmatmul.msk.f32.gmra.mxu2 %vm3006_vm5, %v8995_v8  ;;  %v9205_v8 = vpop.f32.mrf.mxu0 }
 0x65b   :  { %v3349_v17 = vpop.f32.mrf.mxu1 }
 0x65c   :  { %v3462_v40 = vadd.f32 %v3349_v17, %v3209_v24  ;;  %v9223_v17 = vpop.f32.mrf.mxu2 }
 0x65e   :  { %v9190_v28 = vadd.f32 %v9185_v58, %v3462_v40 }
 0x65f   :  { %7454 = vmatmul.msk.f32.gmra.mxu2 %vm3006_vm5, %v9010_v9  ;;  %v9218_v35 = vpop.f32.mrf.mxu0 }
 0x660   :  { %v7457_v57 = vmul.f32 -1.442695, %v9190_v28 }
 0x662   :  { %7784 = vpow2.f32 %v7457_v57 }
 0x663   :  { %v3352_v34 = vpop.f32.mrf.mxu1 }
 0x664   :  { %v3464_v7 = vadd.f32 %v3352_v34, %v3212_v43 }
 0x666   :  { %v9200_v42 = vadd.f32 %v9185_v58, %v3464_v7 }
 0x667   :  { %7455 = vmatmul.msk.f32.gmra.mxu2 %vm3006_vm5, %v9034_v14 }
 0x668   :  { %v7785_v55 = vpop.eup %7784  ;;  %v7458_v33 = vmul.f32 -1.442695, %v9200_v42 }
 0x669   :  { %v3580_v10 = vadd.f32 1.0, %v7785_v55 }
 0x66a   :  { %7786 = vpow2.f32 %v7458_v33 }
 0x66b   :  { %7788 = vrcp.f32 %v3580_v10  ;;  %v3355_v39 = vpop.f32.mrf.mxu1  ;;  %v3607_v19 = vand.u32 2147483648, %v3580_v10  ;;  %v3605_v25 = vand.u32 2147483647, %v3580_v10  ;;  %vm3601_vm7 = vweird.f32 %v3580_v10 }
 0x66c   :  { %v3466_v1 = vadd.f32 %v3355_v39, %v3215_v46 }
 0x66d   :  { %v3608_v57 = vor.u32 1.1754944e-38, %v3607_v19  ;;  %vm3606_vm9 = vcmp.eq.f32.partialorder %v3605_v25, 8.507059e+37 }
 0x66e   :  { %v9208_v21 = vadd.f32 %v9185_v58, %v3466_v1 }
 0x66f   :  { %7456 = vmatmul.msk.f32.gmra.mxu2 %vm3006_vm5, %v2996_v59 }
 0x670   :  { %v7787_v61 = vpop.eup %7786  ;;  %v7459_v9 = vmul.f32 -1.442695, %v9208_v21 }
 0x671   :  { %v7789_v60 = vpop.eup %7788  ;;  %v3581_v31 = vadd.f32 1.0, %v7787_v61 }
 0x672   :  { %7790 = vpow2.f32 %v7459_v9  ;;  %v3597_v14 = vmul.f32 %v7789_v60, %v3580_v10  ;;  %vm3602_vm6 = vweird.f32 %v7789_v60 }
 0x673   :  { %7792 = vrcp.f32 %v3581_v31  ;;  %v3358_v53 = vpop.f32.mrf.mxu1  ;;  %vm3603_vm8 = vmor %vm3601_vm7, %vm3602_vm6  ;;  %v3622_v46 = vand.u32 2147483648, %v3581_v31  ;;  %v3620_v20 = vand.u32 2147483647, %v3581_v31  ;;  %vm3616_vm11 = vweird.f32 %v3581_v31 }
 0x674   :  { %v3468_v22 = vadd.f32 %v3358_v53, %v3218_v37  ;;  %v3598_v47 = vsub.f32 1.0, %v3597_v14  ;;  %v3224_v37 = vadd.f32 %v9156_v49, %v9148_v15 }
 0x675   :  { %v3623_v53 = vor.u32 1.1754944e-38, %v3622_v46  ;;  %vm3621_vm13 = vcmp.eq.f32.partialorder %v3620_v20, 8.507059e+37 }
 0x676   :  { %v9216_v6 = vadd.f32 %v9185_v58, %v3468_v22  ;;  %v3599_v38 = vmul.f32 %v7789_v60, %v3598_v47  ;;  %v9232_v22 = vpop.f32.mrf.mxu0 }
 0x678   :  { %v7791_v16 = vpop.eup %7790  ;;  %v7460_v59 = vmul.f32 -1.442695, %v9216_v6  ;;  %v3600_v24 = vadd.f32 %v7789_v60, %v3599_v38  ;;  %v9234_v38 = vpop.f32.mrf.mxu2 }
 0x679   :  { %v7793_v41 = vpop.eup %7792  ;;  %v3582_v40 = vadd.f32 1.0, %v7791_v16 }
 0x67a   :  { %7794 = vpow2.f32 %v7460_v59  ;;  %v3604_v43 = vsel %vm3603_vm8, %v7789_v60, %v3600_v24  ;;  %v3612_v34 = vmul.f32 %v7793_v41, %v3581_v31  ;;  %vm3617_vm10 = vweird.f32 %v7793_v41 }
 0x67b   :  { %7796 = vrcp.f32 %v3582_v40  ;;  %v3361_v7 = vpop.f32.mrf.mxu1  ;;  %v3609_v55 = vsel %vm3606_vm9, %v3608_v57, %v3604_v43  ;;  %vm3618_vm12 = vmor %vm3616_vm11, %vm3617_vm10  ;;  %v3637_v24 = vand.u32 2147483648, %v3582_v40  ;;  %vm3631_vm1 = vweird.f32 %v3582_v40 }
 0x67c   :  { %v3470_v33 = vadd.f32 %v3361_v7, %v3221_v11  ;;  %3852 = vrot.lane.b32.xlu0 %v3609_v55, %s8009_s9  ;;  %v3613_v10 = vsub.f32 1.0, %v3612_v34  ;;  %v3635_v11 = vand.u32 2147483647, %v3582_v40  ;;  %v3227_v7 = vadd.f32 %v9168_v50, %v9160_v32 }
 0x67e   :  { %v9227_v39 = vadd.f32 %v9185_v58, %v3470_v33  ;;  %v3614_v18 = vmul.f32 %v7793_v41, %v3613_v10  ;;  %v3638_v33 = vor.u32 1.1754944e-38, %v3637_v24  ;;  %vm3636_vm3 = vcmp.eq.f32.partialorder %v3635_v11, 8.507059e+37 }
 0x680   :  { %v7795_v1 = vpop.eup %7794  ;;  %v7461_v61 = vmul.f32 -1.442695, %v9227_v39  ;;  %v3615_v9 = vadd.f32 %v7793_v41, %v3614_v18 }
 0x681   :  { %v7797_v60 = vpop.eup %7796  ;;  %v3583_v14 = vadd.f32 1.0, %v7795_v1  ;;  %v9243_v1 = vpop.f32.mrf.mxu0 }
 0x682   :  { %7798 = vpow2.f32 %v7461_v61  ;;  %v3619_v47 = vsel %vm3618_vm12, %v7793_v41, %v3615_v9  ;;  %v3627_v19 = vmul.f32 %v7797_v60, %v3582_v40  ;;  %vm3632_vm15 = vweird.f32 %v7797_v60  ;;  %v9246_v9 = vpop.f32.mrf.mxu2 }
 0x683   :  { %7800 = vrcp.f32 %v3583_v14  ;;  %v3364_v25 = vpop.f32.mrf.mxu1  ;;  %v3624_v16 = vsel %vm3621_vm13, %v3623_v53, %v3619_v47  ;;  %vm3633_vm2 = vmor %vm3631_vm1, %vm3632_vm15  ;;  %vm3646_vm6 = vweird.f32 %v3583_v14 }
 0x684   :  { %v3472_v59 = vadd.f32 %v3364_v25, %v3224_v37  ;;  %3854 = vrot.lane.b32.xlu2 %v3624_v16, %s8009_s9  ;;  %v3628_v31 = vsub.f32 1.0, %v3627_v19  ;;  %v3652_v37 = vand.u32 2147483648, %v3583_v14  ;;  %v3230_v16 = vadd.f32 %v9187_v13, %v9172_v27 }
 0x686   :  { %v9238_v15 = vadd.f32 %v9185_v58, %v3472_v59  ;;  %v3629_v49 = vmul.f32 %v7797_v60, %v3628_v31  ;;  %v3653_v31 = vor.u32 1.1754944e-38, %v3652_v37 }
 0x688   :  { %v7799_v57 = vpop.eup %7798  ;;  %v7462_v41 = vmul.f32 -1.442695, %v9238_v15  ;;  %v3630_v43 = vadd.f32 %v7797_v60, %v3629_v49 }
 0x689   :  { %v7801_v34 = vpop.eup %7800  ;;  %v3584_v55 = vadd.f32 1.0, %v7799_v57 }
 0x68a   :  { %7802 = vpow2.f32 %v7462_v41  ;;  %v3634_v10 = vsel %vm3633_vm2, %v7797_v60, %v3630_v43  ;;  %v3642_v46 = vmul.f32 %v7801_v34, %v3583_v14  ;;  %vm3647_vm4 = vweird.f32 %v7801_v34 }
 0x68b   :  { %7804 = vrcp.f32 %v3584_v55  ;;  %v3367_v18 = vpop.f32.mrf.mxu1  ;;  %v3639_v20 = vsel %vm3636_vm3, %v3638_v33, %v3634_v10  ;;  %v3650_v60 = vand.u32 2147483647, %v3583_v14  ;;  %vm3648_vm7 = vmor %vm3646_vm6, %vm3647_vm4  ;;  %v9255_v14 = vpop.f32.mrf.mxu0  ;;  %v3665_v13 = vand.u32 2147483647, %v3584_v55 }
 0x68c   :  { %v3474_v61 = vadd.f32 %v3367_v18, %v3227_v7  ;;  %3856 = vrot.lane.b32.xlu1 %v3639_v20, %s8009_s9  ;;  %v3643_v40 = vsub.f32 1.0, %v3642_v46  ;;  %v3667_v7 = vand.u32 2147483648, %v3584_v55  ;;  %v9260_v10 = vpop.f32.mrf.mxu2  ;;  %vm3661_vm10 = vweird.f32 %v3584_v55 }
 0x68d   :  { %vm3651_vm8 = vcmp.eq.f32.partialorder %v3650_v60, 8.507059e+37  ;;  %vm3666_vm12 = vcmp.eq.f32.partialorder %v3665_v13, 8.507059e+37 }
 0x68e   :  { %v9249_v32 = vadd.f32 %v9185_v58, %v3474_v61  ;;  %v3644_v50 = vmul.f32 %v7801_v34, %v3643_v40  ;;  %v3233_v61 = vadd.f32 %v9197_v56, %v9195_v30  ;;  %v3668_v37 = vor.u32 1.1754944e-38, %v3667_v7 }
 0x690   :  { %v7803_v53 = vpop.eup %7802  ;;  %v7463_v47 = vmul.f32 -1.442695, %v9249_v32  ;;  %v3645_v19 = vadd.f32 %v7801_v34, %v3644_v50 }
 0x691   :  { %v7805_v25 = vpop.eup %7804  ;;  %v3585_v59 = vadd.f32 1.0, %v7803_v53 }
 0x692   :  { %7806 = vpow2.f32 %v7463_v47  ;;  %v3649_v24 = vsel %vm3648_vm7, %v7801_v34, %v3645_v19  ;;  %v3657_v49 = vmul.f32 %v7805_v25, %v3584_v55  ;;  %vm3662_vm9 = vweird.f32 %v7805_v25 }
 0x693   :  { %7808 = vrcp.f32 %v3585_v59  ;;  %v3370_v11 = vpop.f32.mrf.mxu1  ;;  %v3654_v57 = vsel %vm3651_vm8, %v3653_v31, %v3649_v24  ;;  %vm3663_vm11 = vmor %vm3661_vm10, %vm3662_vm9  ;;  %v3682_v31 = vand.u32 2147483648, %v3585_v59  ;;  %v3680_v30 = vand.u32 2147483647, %v3585_v59 }
 0x694   :  { %v3476_v41 = vadd.f32 %v3370_v11, %v3230_v16  ;;  %3858 = vrot.lane.b32.xlu1 %v3654_v57, %s8009_s9  ;;  %v3658_v43 = vsub.f32 1.0, %v3657_v49  ;;  %v9269_v49 = vpop.f32.mrf.mxu0  ;;  %vm3676_vm15 = vweird.f32 %v3585_v59 }
 0x695   :  { %vm3681_vm2 = vcmp.eq.f32.partialorder %v3680_v30, 8.507059e+37 }
 0x696   :  { %v9258_v33 = vadd.f32 %v9185_v58, %v3476_v41  ;;  %v3659_v27 = vmul.f32 %v7805_v25, %v3658_v43  ;;  %v3236_v41 = vadd.f32 %v9210_v45, %v9205_v8  ;;  %v9274_v43 = vpop.f32.mrf.mxu2 }
 0x698   :  { %v7807_v34 = vpop.eup %7806  ;;  %v7464_v46 = vmul.f32 -1.442695, %v9258_v33  ;;  %v3660_v18 = vadd.f32 %v7805_v25, %v3659_v27  ;;  %v3683_v27 = vor.u32 1.1754944e-38, %v3682_v31 }
 0x699   :  { %v7809_v20 = vpop.eup %7808  ;;  %v3586_v40 = vadd.f32 1.0, %v7807_v34 }
 0x69a   :  { %7810 = vpow2.f32 %v7464_v46  ;;  %v3664_v50 = vsel %vm3663_vm11, %v7805_v25, %v3660_v18  ;;  %v3672_v60 = vmul.f32 %v7809_v20, %v3585_v59  ;;  %vm3677_vm13 = vweird.f32 %v7809_v20 }
 0x69b   :  { %7812 = vrcp.f32 %v3586_v40  ;;  %v3373_v53 = vpop.f32.mrf.mxu1  ;;  %v3669_v47 = vsel %vm3666_vm12, %v3668_v37, %v3664_v50  ;;  %vm3678_vm1 = vmor %vm3676_vm15, %vm3677_vm13  ;;  %v3697_v37 = vand.u32 2147483648, %v3586_v40  ;;  %v3695_v45 = vand.u32 2147483647, %v3586_v40 }
 0x69c   :  { %v3478_v19 = vadd.f32 %v3373_v53, %v3233_v61  ;;  %3860 = vrot.lane.b32.xlu2 %v3669_v47, %s8009_s9  ;;  %v3673_v16 = vsub.f32 1.0, %v3672_v60  ;;  %vm3691_vm4 = vweird.f32 %v3586_v40 }
 0x69d   :  { %v3698_v31 = vor.u32 1.1754944e-38, %v3697_v37  ;;  %vm3696_vm7 = vcmp.eq.f32.partialorder %v3695_v45, 8.507059e+37 }
 0x69e   :  { %v9267_v55 = vadd.f32 %v9185_v58, %v3478_v19  ;;  %v3674_v24 = vmul.f32 %v7809_v20, %v3673_v16  ;;  %v3239_v19 = vadd.f32 %v9223_v17, %v9218_v35 }
 0x6a0   :  { %v7811_v56 = vpop.eup %7810  ;;  %v7465_v25 = vmul.f32 -1.442695, %v9267_v55  ;;  %v3675_v11 = vadd.f32 %v7809_v20, %v3674_v24  ;;  %v9283_v24 = vpop.f32.mrf.mxu0 }
 0x6a1   :  { %v7813_v57 = vpop.eup %7812  ;;  %v3587_v7 = vadd.f32 1.0, %v7811_v56 }
 0x6a2   :  { %7814 = vpow2.f32 %v7465_v25  ;;  %v3679_v13 = vsel %vm3678_vm1, %v7809_v20, %v3675_v11  ;;  %v3687_v34 = vmul.f32 %v7813_v57, %v3586_v40  ;;  %vm3692_vm3 = vweird.f32 %v7813_v57  ;;  %v9285_v25 = vpop.f32.mrf.mxu2 }
 0x6a3   :  { %7816 = vrcp.f32 %v3587_v7  ;;  %v3376_v46 = vpop.f32.mrf.mxu1  ;;  %v3684_v18 = vsel %vm3681_vm2, %v3683_v27, %v3679_v13  ;;  %vm3693_vm6 = vmor %vm3691_vm4, %vm3692_vm3  ;;  %v3712_v13 = vand.u32 2147483648, %v3587_v7  ;;  %vm3706_vm9 = vweird.f32 %v3587_v7 }
 0x6a4   :  { %v3480_v61 = vadd.f32 %v3376_v46, %v3236_v41  ;;  %3862 = vrot.lane.b32.xlu1 %v3684_v18, %s8009_s9  ;;  %v3688_v59 = vsub.f32 1.0, %v3687_v34  ;;  %v3710_v34 = vand.u32 2147483647, %v3587_v7 }
 0x6a6   :  { %v9278_v50 = vadd.f32 %v9185_v58, %v3480_v61  ;;  %v3689_v8 = vmul.f32 %v7813_v57, %v3688_v59  ;;  %v3242_v59 = vadd.f32 %v9234_v38, %v9232_v22  ;;  %vm3711_vm11 = vcmp.eq.f32.partialorder %v3710_v34, 8.507059e+37 }
 0x6a8   :  { %v7815_v60 = vpop.eup %7814  ;;  %v7466_v53 = vmul.f32 -1.442695, %v9278_v50  ;;  %v3690_v20 = vadd.f32 %v7813_v57, %v3689_v8  ;;  %v3713_v8 = vor.u32 1.1754944e-38, %v3712_v13  ;;  %v3245_v13 = vadd.f32 %v9246_v9, %v9243_v1 }
 0x6a9   :  { %v7817_v47 = vpop.eup %7816  ;;  %v3588_v16 = vadd.f32 1.0, %v7815_v60 }
 0x6aa   :  { %7818 = vpow2.f32 %v7466_v53  ;;  %v3694_v30 = vsel %vm3693_vm6, %v7813_v57, %v3690_v20  ;;  %v3702_v56 = vmul.f32 %v7817_v47, %v3587_v7  ;;  %vm3707_vm8 = vweird.f32 %v7817_v47 }
 0x6ab   :  { %7820 = vrcp.f32 %v3588_v16  ;;  %v3379_v11 = vpop.f32.mrf.mxu1  ;;  %v3699_v41 = vsel %vm3696_vm7, %v3698_v31, %v3694_v30  ;;  %vm3708_vm10 = vmor %vm3706_vm9, %vm3707_vm8  ;;  %v9297_v30 = vpop.f32.mrf.mxu2  ;;  %vm3721_vm13 = vweird.f32 %v3588_v16 }
 0x6ac   :  { %v3482_v27 = vadd.f32 %v3379_v11, %v3239_v19  ;;  %3864 = vrot.lane.b32.xlu0 %v3699_v41, %s8009_s9  ;;  %v3703_v40 = vsub.f32 1.0, %v3702_v56  ;;  %v9294_v19 = vpop.f32.mrf.mxu0  ;;  %v3727_v56 = vand.u32 2147483648, %v3588_v16 }
 0x6ae   :  { %v9289_v35 = vadd.f32 %v9185_v58, %v3482_v27  ;;  %v3704_v17 = vmul.f32 %v7817_v47, %v3703_v40  ;;  %v3728_v34 = vor.u32 1.1754944e-38, %v3727_v56 }
 0x6b0   :  { %v7819_v46 = vpop.eup %7818  ;;  %v7467_v57 = vmul.f32 -1.442695, %v9289_v35  ;;  %v3705_v18 = vadd.f32 %v7817_v47, %v3704_v17 }
 0x6b1   :  { %v7821_v61 = vpop.eup %7820  ;;  %v3589_v37 = vadd.f32 1.0, %v7819_v46 }
 0x6b2   :  { %7822 = vpow2.f32 %v7467_v57  ;;  %v3709_v45 = vsel %vm3708_vm10, %v7817_v47, %v3705_v18  ;;  %v3717_v60 = vmul.f32 %v7821_v61, %v3588_v16  ;;  %vm3722_vm12 = vweird.f32 %v7821_v61 }
 0x6b3   :  { %7824 = vrcp.f32 %v3589_v37  ;;  %v3382_v53 = vpop.f32.mrf.mxu1  ;;  %v3714_v20 = vsel %vm3711_vm11, %v3713_v8, %v3709_v45  ;;  %v3725_v47 = vand.u32 2147483647, %v3588_v16  ;;  %vm3723_vm15 = vmor %vm3721_vm13, %vm3722_vm12  ;;  %v3740_v9 = vand.u32 2147483647, %v3589_v37 }
 0x6b4   :  { %v3484_v31 = vadd.f32 %v3382_v53, %v3242_v59  ;;  %3866 = vrot.lane.b32.xlu2 %v3714_v20, %s8009_s9  ;;  %v3718_v7 = vsub.f32 1.0, %v3717_v60  ;;  %v3742_v60 = vand.u32 2147483648, %v3589_v37  ;;  %v9306_v16 = vpop.f32.mrf.mxu0  ;;  %v9311_v20 = vpop.f32.mrf.mxu2  ;;  %vm3736_vm3 = vweird.f32 %v3589_v37 }
 0x6b5   :  { %vm3726_vm1 = vcmp.eq.f32.partialorder %v3725_v47, 8.507059e+37  ;;  %vm3741_vm6 = vcmp.eq.f32.partialorder %v3740_v9, 8.507059e+37 }
 0x6b6   :  { %v9300_v22 = vadd.f32 %v9185_v58, %v3484_v31  ;;  %v3719_v38 = vmul.f32 %v7821_v61, %v3718_v7 }
 0x6b8   :  { %v7823_v11 = vpop.eup %7822  ;;  %v7468_v41 = vmul.f32 -1.442695, %v9300_v22  ;;  %v3720_v27 = vadd.f32 %v7821_v61, %v3719_v38  ;;  %v3248_v38 = vadd.f32 %v9260_v10, %v9255_v14 }
 0x6b9   :  { %v7825_v40 = vpop.eup %7824  ;;  %v3590_v17 = vadd.f32 1.0, %v7823_v11  ;;  %v3743_v11 = vor.u32 1.1754944e-38, %v3742_v60 }
 0x6ba   :  { %7826 = vpow2.f32 %v7468_v41  ;;  %v3724_v46 = vsel %vm3723_vm15, %v7821_v61, %v3720_v27  ;;  %v3732_v57 = vmul.f32 %v7825_v40, %v3589_v37  ;;  %vm3737_vm2 = vweird.f32 %v7825_v40 }
 0x6bb   :  { %7828 = vrcp.f32 %v3590_v17  ;;  %v3385_v18 = vpop.f32.mrf.mxu1  ;;  %v3729_v59 = vsel %vm3726_vm1, %v3728_v34, %v3724_v46  ;;  %vm3738_vm4 = vmor %vm3736_vm3, %vm3737_vm2  ;;  %v3755_v14 = vand.u32 2147483647, %v3590_v17  ;;  %vm3751_vm8 = vweird.f32 %v3590_v17 }
 0x6bc   :  { %v3486_v8 = vadd.f32 %v3385_v18, %v3245_v13  ;;  %3868 = vrot.lane.b32.xlu1 %v3729_v59, %s8009_s9  ;;  %v3733_v45 = vsub.f32 1.0, %v3732_v57  ;;  %v3757_v18 = vand.u32 2147483648, %v3590_v17  ;;  %v9325_v9 = vpop.f32.mrf.mxu2 }
 0x6bd   :  { %vm3756_vm10 = vcmp.eq.f32.partialorder %v3755_v14, 8.507059e+37 }
 0x6be   :  { %v9309_v53 = vadd.f32 %v9185_v58, %v3486_v8  ;;  %v3734_v1 = vmul.f32 %v7825_v40, %v3733_v45  ;;  %v9320_v8 = vpop.f32.mrf.mxu0 }
 0x6c0   :  { %v7827_v61 = vpop.eup %7826  ;;  %v7469_v31 = vmul.f32 -1.442695, %v9309_v53  ;;  %v3735_v7 = vadd.f32 %v7825_v40, %v3734_v1  ;;  %v3251_v1 = vadd.f32 %v9274_v43, %v9269_v49 }
 0x6c1   :  { %v7829_v56 = vpop.eup %7828  ;;  %v3591_v47 = vadd.f32 1.0, %v7827_v61 }
 0x6c2   :  { %7830 = vpow2.f32 %v7469_v31  ;;  %v3739_v41 = vsel %vm3738_vm4, %v7825_v40, %v3735_v7  ;;  %v3747_v27 = vmul.f32 %v7829_v56, %v3590_v17  ;;  %vm3752_vm7 = vweird.f32 %v7829_v56 }
 0x6c3   :  { %7832 = vrcp.f32 %v3591_v47  ;;  %v3388_v13 = vpop.f32.mrf.mxu1  ;;  %v3744_v34 = vsel %vm3741_vm6, %v3743_v11, %v3739_v41  ;;  %vm3753_vm9 = vmor %vm3751_vm8, %vm3752_vm7  ;;  %v3758_v31 = vor.u32 1.1754944e-38, %v3757_v18  ;;  %v3770_v43 = vand.u32 2147483647, %v3591_v47 }
 0x6c4   :  { %v3488_v46 = vadd.f32 %v3388_v13, %v3248_v38  ;;  %3870 = vrot.lane.b32.xlu0 %v3744_v34, %s8009_s9  ;;  %v3748_v57 = vsub.f32 1.0, %v3747_v27  ;;  %v3772_v13 = vand.u32 2147483648, %v3591_v47  ;;  %vm3766_vm12 = vweird.f32 %v3591_v47 }
 0x6c5   :  { %vm3771_vm15 = vcmp.eq.f32.partialorder %v3770_v43, 8.507059e+37 }
 0x6c6   :  { %v9318_v37 = vadd.f32 %v9185_v58, %v3488_v46  ;;  %v3749_v59 = vmul.f32 %v7829_v56, %v3748_v57 }
 0x6c8   :  { %v7831_v10 = vpop.eup %7830  ;;  %v7470_v40 = vmul.f32 -1.442695, %v9318_v37  ;;  %v3750_v45 = vadd.f32 %v7829_v56, %v3749_v59  ;;  %v3254_v59 = vadd.f32 %v9285_v25, %v9283_v24 }
 0x6c9   :  { %v7833_v60 = vpop.eup %7832  ;;  %v3592_v61 = vadd.f32 1.0, %v7831_v10  ;;  %v3773_v10 = vor.u32 1.1754944e-38, %v3772_v13 }
 0x6ca   :  { %7834 = vpow2.f32 %v7470_v40  ;;  %v3754_v7 = vsel %vm3753_vm9, %v7829_v56, %v3750_v45  ;;  %v3762_v38 = vmul.f32 %v7833_v60, %v3591_v47  ;;  %vm3767_vm11 = vweird.f32 %v7833_v60  ;;  %v9334_v40 = vpop.f32.mrf.mxu0 }
 0x6cb   :  { %7836 = vrcp.f32 %v3592_v61  ;;  %v3391_v11 = vpop.f32.mrf.mxu1  ;;  %v3759_v41 = vsel %vm3756_vm10, %v3758_v31, %v3754_v7  ;;  %vm3768_vm13 = vmor %vm3766_vm12, %vm3767_vm11  ;;  %v9336_v31 = vpop.f32.mrf.mxu2  ;;  %vm3781_vm2 = vweird.f32 %v3592_v61 }
 0x6cc   :  { %v3490_v27 = vadd.f32 %v3391_v11, %v3251_v1  ;;  %3872 = vrot.lane.b32.xlu2 %v3759_v41, %s8009_s9  ;;  %v3763_v17 = vsub.f32 1.0, %v3762_v38  ;;  %v3787_v41 = vand.u32 2147483648, %v3592_v61 }
 0x6ce   :  { %v9329_v34 = vadd.f32 %v9185_v58, %v3490_v27  ;;  %v3764_v49 = vmul.f32 %v7833_v60, %v3763_v17  ;;  %v3785_v27 = vand.u32 2147483647, %v3592_v61 }
 0x6d0   :  { %v7835_v46 = vpop.eup %7834  ;;  %v7471_v57 = vmul.f32 -1.442695, %v9329_v34  ;;  %v3765_v56 = vadd.f32 %v7833_v60, %v3764_v49  ;;  %vm3786_vm4 = vcmp.eq.f32.partialorder %v3785_v27, 8.507059e+37 }
 0x6d1   :  { %v7837_v18 = vpop.eup %7836  ;;  %v3593_v14 = vadd.f32 1.0, %v7835_v46  ;;  %v3788_v46 = vor.u32 1.1754944e-38, %v3787_v41 }
 0x6d2   :  { %7838 = vpow2.f32 %v7471_v57  ;;  %v3769_v45 = vsel %vm3768_vm13, %v7833_v60, %v3765_v56  ;;  %v3777_v1 = vmul.f32 %v7837_v18, %v3592_v61  ;;  %vm3782_vm1 = vweird.f32 %v7837_v18 }
 0x6d3   :  { %7840 = vrcp.f32 %v3593_v14  ;;  %v3394_v7 = vpop.f32.mrf.mxu1  ;;  %v3774_v38 = vsel %vm3771_vm15, %v3773_v10, %v3769_v45  ;;  %vm3783_vm3 = vmor %vm3781_vm2, %vm3782_vm1  ;;  %v9346_v45 = vpop.f32.mrf.mxu2  ;;  %v3800_v61 = vand.u32 2147483647, %v3593_v14  ;;  %vm3796_vm7 = vweird.f32 %v3593_v14 }
 0x6d4   :  { %v3492_v11 = vadd.f32 %v3394_v7, %v3254_v59  ;;  %3874 = vrot.lane.b32.xlu1 %v3774_v38, %s8009_s9  ;;  %v3778_v47 = vsub.f32 1.0, %v3777_v1  ;;  %v3802_v1 = vand.u32 2147483648, %v3593_v14 }
 0x6d5   :  { %vm3801_vm9 = vcmp.eq.f32.partialorder %v3800_v61, 8.507059e+37 }
 0x6d6   :  { %v9340_v24 = vadd.f32 %v9185_v58, %v3492_v11  ;;  %v3779_v25 = vmul.f32 %v7837_v18, %v3778_v47  ;;  %v9343_v58 = vpop.f32.mrf.mxu0  ;;  %v3803_v41 = vor.u32 1.1754944e-38, %v3802_v1 }
 0x6d8   :  { %v7839_v17 = vpop.eup %7838  ;;  %v7472_v60 = vmul.f32 -1.442695, %v9340_v24  ;;  %v3780_v13 = vadd.f32 %v7837_v18, %v3779_v25 }
 0x6d9   :  { %v7841_v49 = vpop.eup %7840  ;;  %v3594_v43 = vadd.f32 1.0, %v7839_v17 }
 0x6da   :  { %7842 = vpow2.f32 %v7472_v60  ;;  %v3784_v57 = vsel %vm3783_vm3, %v7837_v18, %v3780_v13  ;;  %v3792_v56 = vmul.f32 %v7841_v49, %v3593_v14  ;;  %vm3797_vm6 = vweird.f32 %v7841_v49 }
 0x6db   :  { %7844 = vrcp.f32 %v3594_v43  ;;  %v3789_v59 = vsel %vm3786_vm4, %v3788_v46, %v3784_v57  ;;  %vm3798_vm8 = vmor %vm3796_vm7, %vm3797_vm6  ;;  %v3817_v13 = vand.u32 2147483648, %v3594_v43  ;;  %vm3811_vm11 = vweird.f32 %v3594_v43 }
 0x6dc   :  { %3876 = vrot.lane.b32.xlu0 %v3789_v59, %s8009_s9  ;;  %v3793_v10 = vsub.f32 1.0, %v3792_v56  ;;  %v3815_v56 = vand.u32 2147483647, %v3594_v43  ;;  %v9351_v59 = vpop.f32.mrf.mxu2 }
 0x6de   :  { %v3794_v7 = vmul.f32 %v7841_v49, %v3793_v10  ;;  %v9349_v46 = vpop.f32.mrf.mxu0  ;;  %vm3816_vm13 = vcmp.eq.f32.partialorder %v3815_v56, 8.507059e+37 }
 0x6e0   :  { %v7843_v38 = vpop.eup %7842  ;;  %v3795_v11 = vadd.f32 %v7841_v49, %v3794_v7 }
 0x6e1   :  { %v7845_v47 = vpop.eup %7844  ;;  %v3595_v18 = vadd.f32 1.0, %v7843_v38 }
 0x6e2   :  { %v3799_v25 = vsel %vm3798_vm8, %v7841_v49, %v3795_v11  ;;  %v3807_v27 = vmul.f32 %v7845_v47, %v3594_v43  ;;  %vm3812_vm10 = vweird.f32 %v7845_v47  ;;  %v3818_v49 = vor.u32 1.1754944e-38, %v3817_v13 }
 0x6e3   :  { %7846 = vrcp.f32 %v3595_v18  ;;  %v3804_v17 = vsel %vm3801_vm9, %v3803_v41, %v3799_v25  ;;  %vm3813_vm12 = vmor %vm3811_vm11, %vm3812_vm10  ;;  %v3832_v11 = vand.u32 2147483648, %v3595_v18  ;;  %v3830_v25 = vand.u32 2147483647, %v3595_v18 }
 0x6e4   :  { %3878 = vrot.lane.b32.xlu2 %v3804_v17, %s8009_s9  ;;  %v3808_v60 = vsub.f32 1.0, %v3807_v27  ;;  %vm3826_vm1 = vweird.f32 %v3595_v18 }
 0x6e5   :  { %v3833_v43 = vor.u32 1.1754944e-38, %v3832_v11  ;;  %vm3831_vm3 = vcmp.eq.f32.partialorder %v3830_v25, 8.507059e+37 }
 0x6e6   :  { %v3809_v57 = vmul.f32 %v7845_v47, %v3808_v60  ;;  %v9354_v27 = vpop.f32.mrf.mxu0  ;;  %v9356_v60 = vpop.f32.mrf.mxu2 }
 0x6e8   :  { %v3810_v14 = vadd.f32 %v7845_v47, %v3809_v57 }
 0x6e9   :  { %v7847_v10 = vpop.eup %7846 }
 0x6ea   :  { %v3814_v1 = vsel %vm3813_vm12, %v7845_v47, %v3810_v14  ;;  %v3822_v7 = vmul.f32 %v7847_v10, %v3595_v18  ;;  %vm3827_vm15 = vweird.f32 %v7847_v10  ;;  %v3274_v14 = vadd.f32 %v9294_v19, %v9016_v63 }
 0x6eb   :  { %v3819_v61 = vsel %vm3816_vm13, %v3818_v49, %v3814_v1  ;;  %vm3828_vm2 = vmor %vm3826_vm1, %vm3827_vm15  ;;  %v3277_v63 = vadd.f32 %v9306_v16, %v9022_v12  ;;  %v3280_v16 = vadd.f32 %v9320_v8, %v9032_v36 }
 0x6ec   :  { %3880 = vrot.lane.b32.xlu1 %v3819_v61, %s8009_s9  ;;  %v3823_v38 = vsub.f32 1.0, %v3822_v7  ;;  %v3463_v1 = vadd.f32 %v9297_v30, %v3274_v14  ;;  %v9363_v7 = vperm.slane %v9182_v54, 1  ;;  %v3855_v30 = vpop.permute.xlu2 %3854 }
 0x6ed   :  { %v3467_v14 = vadd.f32 %v9325_v9, %v3280_v16 }
 0x6ee   :  { %v3824_v41 = vmul.f32 %v7847_v10, %v3823_v38  ;;  %v3294_v57 = vpop.f32.mrf.mxu0  ;;  %v3435_v56 = vpop.f32.mrf.mxu2  ;;  %v3283_v38 = vadd.f32 %v9334_v40, %v9042_v52  ;;  %v3901_v52 = vmul.f32 %v3855_v30, %v9200_v42 }
 0x6ef   :  { %v3853_v49 = vpop.permute.xlu0 %3852  ;;  %v3505_v8 = vadd.f32 %v9363_v7, %v3467_v14 }
 0x6f0   :  { %v3825_v17 = vadd.f32 %v7847_v10, %v3824_v41  ;;  %v3900_v61 = vmul.f32 %v3853_v49, %v9190_v28  ;;  %v3469_v54 = vadd.f32 %v9336_v31, %v3283_v38  ;;  %v3465_v28 = vadd.f32 %v9311_v20, %v3277_v63 }
 0x6f2   :  { %v3829_v13 = vsel %vm3828_vm2, %v7847_v10, %v3825_v17  ;;  %v3501_v10 = vadd.f32 %v9363_v7, %v3463_v1  ;;  %v3507_v40 = vadd.f32 %v9363_v7, %v3469_v54 }
 0x6f3   :  { %v3834_v47 = vsel %vm3831_vm3, %v3833_v43, %v3829_v13  ;;  %v3503_v13 = vadd.f32 %v9363_v7, %v3465_v28 }
 0x6f4   :  { %3882 = vrot.lane.b32.xlu0 %v3834_v47, %s8009_s9  ;;  %v9371_v41 = vadd.f32 %v3900_v61, %v3501_v10 }
 0x6f5   :  { %v9393_v20 = vadd.f32 %v3901_v52, %v3503_v13 }
 0x6f6   :  { %v9369_v11 = vpop.f32.mrf.mxu0  ;;  %v9375_v19 = vpop.f32.mrf.mxu2  ;;  %v3932_v43 = vmax.f32 %v9371_v41, 0.0 }
 0x6f7   :  { %v3861_v31 = vpop.permute.xlu2 %3860 }
 0x6f8   :  { %v3948_v12 = vsel %vm1301_vm14, %v3932_v43, 0.0  ;;  %v3904_v10 = vmul.f32 %v3861_v31, %v9227_v39  ;;  %v3289_v39 = vadd.f32 %v9349_v46, %v9065_v0 }
 0x6fe   :  { %v3857_v18 = vpop.permute.xlu1 %3856  ;;  %v9395_v42 = vpop.f32.mrf.mxu0 }
 0x6ff   :  { %v9399_v1 = vpop.f32.mrf.mxu2  ;;  %v3902_v36 = vmul.f32 %v3857_v18, %v9208_v21 }
 0x701   :  { %v9413_v63 = vadd.f32 %v3902_v36, %v3505_v8 }
 0x703   :  { %v3934_v52 = vmax.f32 %v9413_v63, 0.0 }
 0x706   :  { %v3859_v25 = vpop.permute.xlu1 %3858  ;;  %v3303_v28 = vpop.f32.mrf.mxu0 }
 0x707   :  { %v3903_v17 = vmul.f32 %v3859_v25, %v9216_v6  ;;  %v3286_v6 = vadd.f32 %v9343_v58, %v9055_v48  ;;  %v3933_v48 = vmax.f32 %v9393_v20, 0.0  ;;  %v3473_v25 = vadd.f32 %v9351_v59, %v3289_v39 }
 0x708   :  { %v3304_v16 = vadd.f32 %v3303_v28, %v9111_v3  ;;  %v3298_v39 = vadd.f32 %v9369_v11, %v9089_v2  ;;  %v3301_v2 = vadd.f32 %v9395_v42, %v9102_v29 }
 0x709   :  { %v9384_v47 = vadd.f32 %v3903_v17, %v3507_v40  ;;  %v3471_v49 = vadd.f32 %v9346_v45, %v3286_v6  ;;  %v3295_v45 = vadd.f32 %v3294_v57, %v9081_v4  ;;  %v3951_v21 = vsel %vm1301_vm14, %v3933_v48, 0.0  ;;  %v3444_v40 = vpop.f32.mrf.mxu2 }
 0x70a   :  { %v3292_v4 = vadd.f32 %v9354_v27, %v9073_v5 }
 0x70b   :  { %v3935_v61 = vmax.f32 %v9384_v47, 0.0  ;;  %v3509_v58 = vadd.f32 %v9363_v7, %v3471_v49  ;;  %v3477_v54 = vadd.f32 %v3435_v56, %v3295_v45  ;;  %v3511_v56 = vadd.f32 %v9363_v7, %v3473_v25 }
 0x70c   :  { %v3475_v0 = vadd.f32 %v9356_v60, %v3292_v4 }
 0x70d   :  { %3949 = vadd.xlane.f32.xlu2 %v3948_v12  ;;  %v3957_v9 = vsel %vm1301_vm14, %v3935_v61, 0.0  ;;  %v9411_v38 = vadd.f32 %v3904_v10, %v3509_v58  ;;  %v3515_v46 = vadd.f32 %v9363_v7, %v3477_v54  ;;  %v3483_v10 = vadd.f32 %v3444_v40, %v3304_v16 }
 0x70e   :  { %v3867_v18 = vpop.permute.xlu2 %3866  ;;  %v3306_v14 = vpop.f32.mrf.mxu0  ;;  %v3479_v54 = vadd.f32 %v9375_v19, %v3298_v39  ;;  %v3481_v19 = vadd.f32 %v9399_v1, %v3301_v2 }
 0x70f   :  { %v3907_v57 = vmul.f32 %v3867_v18, %v9258_v33  ;;  %v3936_v17 = vmax.f32 %v9411_v38, 0.0  ;;  %v3954_v33 = vsel %vm1301_vm14, %v3934_v52, 0.0  ;;  %v3521_v45 = vadd.f32 %v9363_v7, %v3483_v10 }
 0x711   :  { %v9430_v59 = vadd.f32 %v3907_v57, %v3515_v46  ;;  %v3960_v5 = vsel %vm1301_vm14, %v3936_v17, 0.0  ;;  %v3447_v8 = vpop.f32.mrf.mxu2 }
 0x713   :  { %v3939_v31 = vmax.f32 %v9430_v59, 0.0 }
 0x715   :  { %3958 = vadd.xlane.f32.xlu2 %v3957_v9  ;;  %v3969_v58 = vsel %vm1301_vm14, %v3939_v31, 0.0 }
 0x716   :  { %3952 = vadd.xlane.f32.xlu1 %v3951_v21  ;;  %v3863_v30 = vpop.permute.xlu1 %3862  ;;  %v3309_v25 = vpop.f32.mrf.mxu0 }
 0x717   :  { %v3905_v13 = vmul.f32 %v3863_v30, %v9238_v15  ;;  %v3513_v15 = vadd.f32 %v9363_v7, %v3475_v0  ;;  %v3310_v39 = vadd.f32 %v3309_v25, %v9128_v51 }
 0x719   :  { %v9438_v27 = vadd.f32 %v3905_v13, %v3511_v56  ;;  %v3450_v4 = vpop.f32.mrf.mxu2 }
 0x71b   :  { %v3937_v49 = vmax.f32 %v9438_v27, 0.0 }
 0x71d   :  { %v3963_v9 = vsel %vm1301_vm14, %v3937_v49, 0.0 }
 0x71e   :  { %v3865_v12 = vpop.permute.xlu0 %3864  ;;  %3961 = vadd.xlane.f32.xlu1 %v3960_v5  ;;  %3955 = vadd.xlane.f32.xlu0 %v3954_v33  ;;  %v3312_v46 = vpop.f32.mrf.mxu0  ;;  %v3519_v5 = vadd.f32 %v9363_v7, %v3481_v19 }
 0x71f   :  { %v3906_v60 = vmul.f32 %v3865_v12, %v9249_v32  ;;  %v3313_v29 = vadd.f32 %v3312_v46, %v9146_v44 }
 0x721   :  { %v9443_v6 = vadd.f32 %v3906_v60, %v3513_v15  ;;  %v3453_v33 = vpop.f32.mrf.mxu2 }
 0x722   :  { %v3489_v12 = vadd.f32 %v3453_v33, %v3313_v29 }
 0x723   :  { %v3938_v36 = vmax.f32 %v9443_v6, 0.0 }
 0x724   :  { %v3527_v16 = vadd.f32 %v9363_v7, %v3489_v12 }
 0x725   :  { %v3966_v32 = vsel %vm1301_vm14, %v3938_v36, 0.0 }
 0x726   :  { %v3873_v3 = vpop.permute.xlu2 %3872  ;;  %3970 = vadd.xlane.f32.xlu1 %v3969_v58  ;;  %3967 = vadd.xlane.f32.xlu2 %v3966_v32  ;;  %v3315_v25 = vpop.f32.mrf.mxu0 }
 0x727   :  { %v3910_v21 = vmul.f32 %v3873_v3, %v9289_v35  ;;  %3964 = vadd.xlane.f32.xlu0 %v3963_v9  ;;  %v3517_v35 = vadd.f32 %v9363_v7, %v3479_v54  ;;  %v3316_v2 = vadd.f32 %v3315_v25, %v9158_v26 }
 0x729   :  { %v9461_v18 = vadd.f32 %v3910_v21, %v3521_v45 }
 0x72b   :  { %v3942_v30 = vmax.f32 %v9461_v18, 0.0 }
 0x72d   :  { %v3978_v28 = vsel %vm1301_vm14, %v3942_v30, 0.0 }
 0x72e   :  { %3979 = vadd.xlane.f32.xlu1 %v3978_v28  ;;  %v3869_v57 = vpop.permute.xlu1 %3868  ;;  %v4217_v28 = vld [vmem:[#allocation2 + $0xf0] sm:$0xff] }
 0x72f   :  { %v3908_v40 = vmul.f32 %v3869_v57, %v9267_v55  ;;  %4263 = vmatpush.msrb.mxu3 %v4217_v28 }
 0x731   :  { %v9472_v11 = vadd.f32 %v3908_v40, %v3517_v35  ;;  %v3456_v40 = vpop.f32.mrf.mxu2 }
 0x732   :  { %v3491_v19 = vadd.f32 %v3456_v40, %v3316_v2  ;;  %v4211_v40 = vld [vmem:[#allocation2 + $0xc0] sm:$0xff] }
 0x733   :  { %v3940_v13 = vmax.f32 %v9472_v11, 0.0  ;;  %v8011_v11 = vmov 0  }
 0x734   :  { %7700 = vset.pattern.permute.xlu0 %v8011_v11  ;;  %7701 = vset.pattern.permute.xlu2 %v8011_v11 }
 0x735   :  { %v3972_v0 = vsel %vm1301_vm14, %v3940_v13, 0.0 }
 0x736   :  { %v3871_v56 = vpop.permute.xlu0 %3870  ;;  %3973 = vadd.xlane.f32.xlu0 %v3972_v0  ;;  %v3318_v0 = vpop.f32.mrf.mxu0 }
 0x737   :  { %v3909_v55 = vmul.f32 %v3871_v56, %v9278_v50  ;;  %v3307_v50 = vadd.f32 %v3306_v14, %v9119_v62  ;;  %v3487_v62 = vadd.f32 %v3450_v4, %v3310_v39  ;;  %v3529_v56 = vadd.f32 %v9363_v7, %v3491_v19 }
 0x739   :  { %v9482_v42 = vadd.f32 %v3909_v55, %v3519_v5  ;;  %v3485_v44 = vadd.f32 %v3447_v8, %v3307_v50  ;;  %v3525_v57 = vadd.f32 %v9363_v7, %v3487_v62  ;;  %v3459_v5 = vpop.f32.mrf.mxu2  ;;  %v3319_v55 = vadd.f32 %v3318_v0, %v9170_v23  ;;  %v4215_v50 = vld [vmem:[#allocation2 + $0xe0] sm:$0xff] }
 0x73a   :  { %4264 = vmatpush.msrb.mxu3 %v4215_v50 }
 0x73b   :  { %v3941_v1 = vmax.f32 %v9482_v42, 0.0  ;;  %v3523_v45 = vadd.f32 %v9363_v7, %v3485_v44  ;;  %v3493_v29 = vadd.f32 %v3459_v5, %v3319_v55  ;;  %v4213_v44 = vld [vmem:[#allocation2 + $0xd0] sm:$0xff] }
 0x73c   :  { %4265 = vmatpush.msrb.mxu3 %v4213_v44 }
 0x73d   :  { %v3975_v15 = vsel %vm1301_vm14, %v3941_v1, 0.0 }
 0x73e   :  { %v3879_v60 = vpop.permute.xlu2 %3878  ;;  %3976 = vadd.xlane.f32.xlu2 %v3975_v15  ;;  %4266 = vmatpush.msrb.mxu3 %v4211_v40 }
 0x73f   :  { %v3913_v10 = vmul.f32 %v3879_v60, %v9318_v37  ;;  %v3531_v60 = vadd.f32 %v9363_v7, %v3493_v29 }
 0x741   :  { %v9491_v58 = vadd.f32 %v3913_v10, %v3527_v16 }
 0x743   :  { %v3945_v32 = vmax.f32 %v9491_v58, 0.0 }
 0x745   :  { %v3987_v3 = vsel %vm1301_vm14, %v3945_v32, 0.0 }
 0x746   :  { %3988 = vadd.xlane.f32.xlu1 %v3987_v3  ;;  %v3875_v9 = vpop.permute.xlu1 %3874 }
 0x747   :  { %v3911_v21 = vmul.f32 %v3875_v9, %v9300_v22 }
 0x749   :  { %v9500_v37 = vadd.f32 %v3911_v21, %v3523_v45 }
 0x74b   :  { %v3943_v14 = vmax.f32 %v9500_v37, 0.0 }
 0x74d   :  { %v3981_v8 = vsel %vm1301_vm14, %v3943_v14, 0.0 }
 0x74e   :  { %v3877_v54 = vpop.permute.xlu0 %3876  ;;  %3982 = vadd.xlane.f32.xlu0 %v3981_v8 }
 0x74f   :  { %v3912_v35 = vmul.f32 %v3877_v54, %v9309_v53 }
 0x751   :  { %v9508_v22 = vadd.f32 %v3912_v35, %v3525_v57  ;;  %v8010_v35 = vmov 1024.0  }
 0x752   :  { %7848 = vrcp.f32 %v8010_v35 }
 0x753   :  { %v3944_v51 = vmax.f32 %v9508_v22, 0.0 }
 0x755   :  { %v3984_v4 = vsel %vm1301_vm14, %v3944_v51, 0.0 }
 0x756   :  { %3985 = vadd.xlane.f32.xlu2 %v3984_v4 }
 0x758   :  { %v7849_v19 = vpop.eup %7848 }
 0x759   :  { %vm4016_vm4 = vweird.f32 %v7849_v19 }
 0x75e   :  { %v3881_v46 = vpop.permute.xlu1 %3880 }
 0x75f   :  { %v3914_v53 = vmul.f32 %v3881_v46, %v9329_v34 }
 0x761   :  { %v9518_v33 = vadd.f32 %v3914_v53, %v3529_v56  ;;  %v4012_v53 = vmul.f32 1024.0, %v7849_v19 }
 0x763   :  { %v3946_v12 = vmax.f32 %v9518_v33, 0.0 }
 0x765   :  { %v3990_v15 = vsel %vm1301_vm14, %v3946_v12, 0.0 }
 0x766   :  { %v3883_v26 = vpop.permute.xlu0 %3882  ;;  %3991 = vadd.xlane.f32.xlu0 %v3990_v15  ;;  %v4013_v15 = vsub.f32 1.0, %v4012_v53 }
 0x767   :  { %v3915_v16 = vmul.f32 %v3883_v26, %v9340_v24 }
 0x769   :  { %v9526_v10 = vadd.f32 %v3915_v16, %v3531_v60 }
 0x76b   :  { %v3947_v34 = vmax.f32 %v9526_v10, 0.0  ;;  %v4205_v10 = vld [vmem:[#allocation2 + $0x90] sm:$0xff] }
 0x76d   :  { %v3993_v23 = vsel %vm1301_vm14, %v3947_v34, 0.0 }
 0x76e   :  { %3994 = vadd.xlane.f32.xlu2 %v3993_v23  ;;  %v4014_v23 = vmul.f32 %v7849_v19, %v4013_v15 }
 0x780   :  { %v3950_v3 = vpop.xlane.xlu2 %3949 }
 0x788   :  { %v3959_v39 = vpop.xlane.xlu2 %3958 }
 0x789   :  { %v3953_v9 = vpop.xlane.xlu1 %3952 }
 0x78a   :  { %v3996_v21 = vadd.f32 %v3953_v9, %v3950_v3  ;;  %v4015_v9 = vadd.f32 %v7849_v19, %v4014_v23  ;;  %v4115_v23 = vld [vmem:[%s10529_s7] sm:$0xff] }
 0x791   :  { %v3956_v45 = vpop.xlane.xlu0 %3955  ;;  %v3962_v62 = vpop.xlane.xlu1 %3961 }
 0x792   :  { %v3997_v7 = vadd.f32 %v3996_v21, %v3956_v45 }
 0x794   :  { %v3998_v24 = vadd.f32 %v3997_v7, %v3959_v39  ;;  %v9532_v7 = vsel %vm4016_vm4, %v7849_v19, %v4015_v9  ;;  %v4209_v19 = vld [vmem:[#allocation2 + $0xb0] sm:$0xff] }
 0x795   :  { %4267 = vmatpush.msrb.mxu3 %v4209_v19 }
 0x796   :  { %v3999_v54 = vadd.f32 %v3998_v24, %v3962_v62 }
 0x799   :  { %v3968_v57 = vpop.xlane.xlu2 %3967  ;;  %v3971_v4 = vpop.xlane.xlu1 %3970 }
 0x79a   :  { %v3965_v8 = vpop.xlane.xlu0 %3964 }
 0x79b   :  { %v4000_v28 = vadd.f32 %v3999_v54, %v3965_v8 }
 0x79d   :  { %v4001_v25 = vadd.f32 %v4000_v28, %v3968_v57 }
 0x79f   :  { %v4002_v0 = vadd.f32 %v4001_v25, %v3971_v4 }
 0x7a1   :  { %v3980_v55 = vpop.xlane.xlu1 %3979 }
 0x7a9   :  { %v3974_v2 = vpop.xlane.xlu0 %3973 }
 0x7aa   :  { %v4003_v56 = vadd.f32 %v4002_v0, %v3974_v2 }
 0x7b1   :  { %v3977_v46 = vpop.xlane.xlu2 %3976 }
 0x7b2   :  { %v4004_v5 = vadd.f32 %v4003_v56, %v3977_v46 }
 0x7b4   :  { %v4005_v26 = vadd.f32 %v4004_v5, %v3980_v55 }
 0x7b9   :  { %v3989_v44 = vpop.xlane.xlu1 %3988 }
 0x7c1   :  { %v3983_v29 = vpop.xlane.xlu0 %3982 }
 0x7c2   :  { %v4006_v16 = vadd.f32 %v4005_v26, %v3983_v29 }
 0x7c9   :  { %v3986_v60 = vpop.xlane.xlu2 %3985 }
 0x7ca   :  { %v4007_v50 = vadd.f32 %v4006_v16, %v3986_v60 }
 0x7cc   :  { %v4008_v45 = vadd.f32 %v4007_v50, %v3989_v44  ;;  %v4116_v50 = vld [vmem:[%s10530_s8] sm:$0xff] }
 0x7d9   :  { %v3992_v3 = vpop.xlane.xlu0 %3991 }
 0x7da   :  { %v4009_v21 = vadd.f32 %v4008_v45, %v3992_v3 }
 0x7e1   :  { %v3995_v39 = vpop.xlane.xlu2 %3994 }
 0x7e2   :  { %v4010_v24 = vadd.f32 %v4009_v21, %v3995_v39 }
 0x7e4   :  { %v9535_v62 = vmul.f32 %v9532_v7, %v4010_v24 }
 0x7e6   :  { %v9540_v8 = vsub.f32 %v3934_v52, %v9535_v62  ;;  %v9545_v54 = vsub.f32 %v3933_v48, %v9535_v62  ;;  %v9550_v28 = vsub.f32 %v3932_v43, %v9535_v62  ;;  %v9561_v20 = vsub.f32 %v3937_v49, %v9535_v62 }
 0x7e7   :  { %v9569_v52 = vsub.f32 %v3936_v17, %v9535_v62  ;;  %v9574_v25 = vsub.f32 %v3935_v61, %v9535_v62  ;;  %v9587_v47 = vsub.f32 %v3940_v13, %v9535_v62  ;;  %v9592_v61 = vsub.f32 %v3939_v31, %v9535_v62 }
 0x7e8   :  { %v4037_v57 = vmul.f32 %v9540_v8, %v9540_v8  ;;  %v4036_v35 = vmul.f32 %v9545_v54, %v9545_v54  ;;  %v4035_v63 = vmul.f32 %v9550_v28, %v9550_v28  ;;  %v4040_v27 = vmul.f32 %v9561_v20, %v9561_v20 }
 0x7e9   :  { %v4039_v49 = vmul.f32 %v9569_v52, %v9569_v52  ;;  %v4038_v4 = vmul.f32 %v9574_v25, %v9574_v25  ;;  %v9598_v2 = vsub.f32 %v3938_v36, %v9535_v62  ;;  %v4043_v59 = vmul.f32 %v9587_v47, %v9587_v47 }
 0x7ea   :  { %v4057_v48 = vsel %vm1301_vm14, %v4037_v57, 0.0  ;;  %v4054_v41 = vsel %vm1301_vm14, %v4036_v35, 0.0  ;;  %v4051_v43 = vsel %vm1301_vm14, %v4035_v63, 0.0  ;;  %v4066_v38 = vsel %vm1301_vm14, %v4040_v27, 0.0 }
 0x7eb   :  { %4058 = vadd.xlane.f32.xlu2 %v4057_v48  ;;  %4055 = vadd.xlane.f32.xlu0 %v4054_v41  ;;  %v4063_v17 = vsel %vm1301_vm14, %v4039_v49, 0.0  ;;  %v4060_v40 = vsel %vm1301_vm14, %v4038_v4, 0.0  ;;  %v4042_v31 = vmul.f32 %v9592_v61, %v9592_v61  ;;  %v4041_v13 = vmul.f32 %v9598_v2, %v9598_v2 }
 0x7ec   :  { %4052 = vadd.xlane.f32.xlu1 %v4051_v43  ;;  %v4075_v6 = vsel %vm1301_vm14, %v4043_v59, 0.0  ;;  %v9613_v0 = vsub.f32 %v3943_v14, %v9535_v62  ;;  %v9618_v46 = vsub.f32 %v3942_v30, %v9535_v62  ;;  %v9624_v53 = vsub.f32 %v3941_v1, %v9535_v62  ;;  %v4207_v30 = vld [vmem:[#allocation2 + $0xa0] sm:$0xff]  ;;  %v4218_v59 = vld [vmem:[#allocation2 + $0xf8] sm:$0xff] }
 0x7ed   :  { %v4072_v36 = vsel %vm1301_vm14, %v4042_v31, 0.0  ;;  %v4069_v56 = vsel %vm1301_vm14, %v4041_v13, 0.0  ;;  %4268 = vmatpush.msrb.mxu3 %v4207_v30  ;;  %v9637_v42 = vsub.f32 %v3946_v12, %v9535_v62  ;;  %v9642_v1 = vsub.f32 %v3945_v32, %v9535_v62  ;;  %v4200_v31 = vld [vmem:[#allocation2 + $0x70] sm:$0xff]  ;;  %v4201_v13 = vld [vmem:[#allocation2 + $0x78] sm:$0xff]  ;;  %4316 = vmatpush.msra.mxu0 %v4218_v59 }
 0x7ee   :  { %v4046_v37 = vmul.f32 %v9613_v0, %v9613_v0  ;;  %v4045_v14 = vmul.f32 %v9618_v46, %v9618_v46  ;;  %v4044_v18 = vmul.f32 %v9624_v53, %v9624_v53  ;;  %v9648_v15 = vsub.f32 %v3944_v51, %v9535_v62  ;;  %4375 = vmatpush.msra.mxu1 %v4200_v31  ;;  %v4214_v30 = vld [vmem:[#allocation2 + $0xd8] sm:$0xff] }
 0x7ef   :  { %v4049_v33 = vmul.f32 %v9637_v42, %v9637_v42  ;;  %v4048_v12 = vmul.f32 %v9642_v1, %v9642_v1  ;;  %v9662_v51 = vsub.f32 %v3947_v34, %v9535_v62  ;;  %4269 = vmatpush.msrb.mxu3 %v4205_v10  ;;  %4428 = vmatpush.msrb.mxu2 %v4201_v13 }
 0x7f0   :  { %v4084_v5 = vsel %vm1301_vm14, %v4046_v37, 0.0  ;;  %v4081_v55 = vsel %vm1301_vm14, %v4045_v14, 0.0  ;;  %v4078_v29 = vsel %vm1301_vm14, %v4044_v18, 0.0  ;;  %v4047_v58 = vmul.f32 %v9648_v15, %v9648_v15  ;;  %v4199_v37 = vld [vmem:[#allocation2 + $0x68] sm:$0xff]  ;;  %v4203_v18 = vld [vmem:[#allocation2 + $0x80] sm:$0xff] }
 0x7f1   :  { %v4093_v32 = vsel %vm1301_vm14, %v4049_v33, 0.0  ;;  %v4090_v26 = vsel %vm1301_vm14, %v4048_v12, 0.0  ;;  %v4050_v60 = vmul.f32 %v9662_v51, %v9662_v51  ;;  %4270 = vmatpush.msrb.mxu3 %v4203_v18  ;;  %4429 = vmatpush.msrb.mxu2 %v4199_v37  ;;  %v4212_v33 = vld [vmem:[#allocation2 + $0xc8] sm:$0xff]  ;;  %v4194_v12 = vld [vmem:[#allocation2 + $0x40] sm:$0xff] }
 0x7f2   :  { %v4087_v22 = vsel %vm1301_vm14, %v4047_v58, 0.0 }
 0x7f3   :  { %4067 = vadd.xlane.f32.xlu2 %v4066_v38  ;;  %4064 = vadd.xlane.f32.xlu0 %v4063_v17  ;;  %v4096_v16 = vsel %vm1301_vm14, %v4050_v60, 0.0  ;;  %v4192_v60 = vld [vmem:[#allocation2 + $0x30] sm:$0xff] }
 0x7f4   :  { %4061 = vadd.xlane.f32.xlu1 %v4060_v40 }
 0x7fb   :  { %4076 = vadd.xlane.f32.xlu2 %v4075_v6  ;;  %4073 = vadd.xlane.f32.xlu0 %v4072_v36  ;;  %v4216_v36 = vld [vmem:[#allocation2 + $0xe8] sm:$0xff] }
 0x7fc   :  { %4070 = vadd.xlane.f32.xlu1 %v4069_v56  ;;  %v4198_v56 = vld [vmem:[#allocation2 + $0x60] sm:$0xff]  ;;  %4317 = vmatpush.msra.mxu0 %v4216_v36 }
 0x7fd   :  { %4376 = vmatpush.msra.mxu1 %v4198_v56 }
 0x7fe   :  { %4318 = vmatpush.msra.mxu0 %v4214_v30 }
 0x800   :  { %4319 = vmatpush.msra.mxu0 %v4212_v33 }
 0x803   :  { %4085 = vadd.xlane.f32.xlu2 %v4084_v5  ;;  %4082 = vadd.xlane.f32.xlu0 %v4081_v55  ;;  %v4196_v5 = vld [vmem:[#allocation2 + $0x50] sm:$0xff] }
 0x804   :  { %4079 = vadd.xlane.f32.xlu1 %v4078_v29  ;;  %v4197_v29 = vld [vmem:[#allocation2 + $0x58] sm:$0xff]  ;;  %4377 = vmatpush.msra.mxu1 %v4196_v5 }
 0x805   :  { %4430 = vmatpush.msrb.mxu2 %v4197_v29 }
 0x806   :  { %4378 = vmatpush.msra.mxu1 %v4194_v12  ;;  %v4480_v12 = vld [vmem:[#allocation2 + $0x130] sm:$0xff] }
 0x808   :  { %4379 = vmatpush.msra.mxu1 %v4192_v60 }
 0x80b   :  { %4094 = vadd.xlane.f32.xlu2 %v4093_v32  ;;  %4091 = vadd.xlane.f32.xlu0 %v4090_v26  ;;  %v4195_v32 = vld [vmem:[#allocation2 + $0x48] sm:$0xff] }
 0x80c   :  { %4088 = vadd.xlane.f32.xlu1 %v4087_v22  ;;  %v4210_v22 = vld [vmem:[#allocation2 + $0xb8] sm:$0xff]  ;;  %4431 = vmatpush.msrb.mxu2 %v4195_v32 }
 0x80d   :  { %4320 = vmatpush.msra.mxu0 %v4210_v22 }
 0x814   :  { %4097 = vadd.xlane.f32.xlu1 %v4096_v16  ;;  %v4193_v16 = vld [vmem:[#allocation2 + $0x38] sm:$0xff] }
 0x815   :  { %4432 = vmatpush.msrb.mxu2 %v4193_v16  ;;  %v4478_v16 = vld [vmem:[#allocation2 + $0x120] sm:$0xff] }
 0x81f   :  { %4146 = vperm.xlu0 %7700, %v4115_v23   ;;  %v4208_v23 = vld [vmem:[#allocation2 + $0xa8] sm:$0xff] }
 0x820   :  { %4321 = vmatpush.msra.mxu0 %v4208_v23 }
 0x823   :  { %4167 = vperm.xlu2 %7701, %v4116_v50   ;;  %v4190_v50 = vld [vmem:[#allocation2 + $0x20] sm:$0xff] }
 0x824   :  { %4380 = vmatpush.msra.mxu1 %v4190_v50 }
 0x85e   :  { %v4059_v34 = vpop.xlane.xlu2 %4058  ;;  %v4056_v44 = vpop.xlane.xlu0 %4055 }
 0x85f   :  { %v4053_v3 = vpop.xlane.xlu1 %4052 }
 0x860   :  { %v4099_v9 = vadd.f32 %v4056_v44, %v4053_v3  ;;  %v4206_v3 = vld [vmem:[#allocation2 + $0x98] sm:$0xff] }
 0x861   :  { %4322 = vmatpush.msra.mxu0 %v4206_v3 }
 0x862   :  { %v4100_v21 = vadd.f32 %v4099_v9, %v4059_v34  ;;  %v4191_v34 = vld [vmem:[#allocation2 + $0x28] sm:$0xff]  ;;  %v4188_v9 = vld [vmem:[#allocation2 + $0x10] sm:$0xff] }
 0x863   :  { %4433 = vmatpush.msrb.mxu2 %v4191_v34  ;;  %4381 = vmatpush.msra.mxu1 %v4188_v9  ;;  %v4489_v34 = vld [vmem:[#allocation2 + $0x178] sm:$0xff]  ;;  %v4476_v9 = vld [vmem:[#allocation2 + $0x110] sm:$0xff] }
 0x866   :  { %v4065_v45 = vpop.xlane.xlu0 %4064  ;;  %v4068_v39 = vpop.xlane.xlu2 %4067 }
 0x867   :  { %v4062_v24 = vpop.xlane.xlu1 %4061 }
 0x868   :  { %v4101_v62 = vadd.f32 %v4100_v21, %v4062_v24  ;;  %v4189_v21 = vld [vmem:[#allocation2 + $0x18] sm:$0xff]  ;;  %v4204_v24 = vld [vmem:[#allocation2 + $0x88] sm:$0xff] }
 0x869   :  { %4434 = vmatpush.msrb.mxu2 %v4189_v21  ;;  %4323 = vmatpush.msra.mxu0 %v4204_v24  ;;  %v4481_v24 = vld [vmem:[#allocation2 + $0x138] sm:$0xff] }
 0x86a   :  { %v4102_v57 = vadd.f32 %v4101_v62, %v4065_v45  ;;  %v4186_v62 = vld [vmem:[#allocation2] sm:$0xff] }
 0x86b   :  { %4382 = vmatpush.msra.mxu1 %v4186_v62  ;;  %4557 = vmatpush.msrb.mxu0 %v4489_v34 }
 0x86c   :  { %v4103_v63 = vadd.f32 %v4102_v57, %v4068_v39  ;;  %v4187_v57 = vld [vmem:[#allocation2 + $0x8] sm:$0xff] }
 0x86d   :  { %4435 = vmatpush.msrb.mxu2 %v4187_v57  ;;  %v4474_v57 = vld [vmem:[#allocation2 + $0x100] sm:$0xff] }
 0x86e   :  { %v4074_v35 = vpop.xlane.xlu0 %4073  ;;  %v4077_v43 = vpop.xlane.xlu2 %4076 }
 0x86f   :  { %v4071_v48 = vpop.xlane.xlu1 %4070 }
 0x870   :  { %v4104_v41 = vadd.f32 %v4103_v63, %v4071_v48  ;;  %v7952_v48 = vld [vmem:[%s10562_s28] sm:$0xff] }
 0x871   :  { %5536 = vmatpush.msra.mxu2 %v7952_v48  ;;  %v4477_v48 = vld [vmem:[#allocation2 + $0x118] sm:$0xff] }
 0x872   :  { %v4105_v27 = vadd.f32 %v4104_v41, %v4074_v35  ;;  %v4488_v41 = vld [vmem:[#allocation2 + $0x170] sm:$0xff] }
 0x873   :  { %4504 = vmatpush.msra.mxu3 %v4488_v41  ;;  %v4475_v41 = vld [vmem:[#allocation2 + $0x108] sm:$0xff] }
 0x874   :  { %v4106_v49 = vadd.f32 %v4105_v27, %v4077_v43 }
 0x876   :  { %v4083_v4 = vpop.xlane.xlu0 %4082  ;;  %v4086_v19 = vpop.xlane.xlu2 %4085 }
 0x877   :  { %v4080_v38 = vpop.xlane.xlu1 %4079 }
 0x878   :  { %v4107_v17 = vadd.f32 %v4106_v49, %v4080_v38 }
 0x87a   :  { %v4108_v40 = vadd.f32 %v4107_v17, %v4083_v4 }
 0x87c   :  { %v4109_v6 = vadd.f32 %v4108_v40, %v4086_v19  ;;  %v4486_v19 = vld [vmem:[#allocation2 + $0x160] sm:$0xff] }
 0x87d   :  { %4505 = vmatpush.msra.mxu3 %v4486_v19 }
 0x87e   :  { %v4092_v58 = vpop.xlane.xlu0 %4091  ;;  %v4095_v10 = vpop.xlane.xlu2 %4094 }
 0x87f   :  { %v4089_v14 = vpop.xlane.xlu1 %4088 }
 0x880   :  { %v4110_v55 = vadd.f32 %v4109_v6, %v4089_v14 }
 0x882   :  { %v4111_v26 = vadd.f32 %v4110_v55, %v4092_v58 }
 0x884   :  { %v4112_v44 = vadd.f32 %v4111_v26, %v4095_v10 }
 0x886   :  { %v9685_v13 = vpop.permute.xlu2 %4167 }
 0x887   :  { %v4098_v45 = vpop.xlane.xlu1 %4097 }
 0x888   :  { %v4113_v39 = vadd.f32 %v4112_v44, %v4098_v45  ;;  %v4487_v44 = vld [vmem:[#allocation2 + $0x168] sm:$0xff]  ;;  %v4485_v45 = vld [vmem:[#allocation2 + $0x158] sm:$0xff] }
 0x889   :  { %4558 = vmatpush.msrb.mxu0 %v4487_v44 }
 0x88a   :  { %v4114_v35 = vmul.f32 %v4113_v39, %v9532_v7  ;;  %v4483_v39 = vld [vmem:[#allocation2 + $0x148] sm:$0xff] }
 0x88b   :  { %4559 = vmatpush.msrb.mxu0 %v4485_v45 }
 0x88c   :  { %v4117_v63 = vadd.f32 1e-05, %v4114_v35  ;;  %v4479_v35 = vld [vmem:[#allocation2 + $0x128] sm:$0xff] }
 0x88d   :  { %4560 = vmatpush.msrb.mxu0 %v4483_v39 }
 0x88e   :  { %7850 = vrsqrt.f32 %v4117_v63  ;;  %vm4124_vm7 = vweird.f32 %v4117_v63 }
 0x88f   :  { %4561 = vmatpush.msrb.mxu0 %v4481_v24 }
 0x891   :  { %v9679_v40 = vpop.permute.xlu0 %4146  ;;  %4562 = vmatpush.msrb.mxu0 %v4479_v35 }
 0x893   :  { %4563 = vmatpush.msrb.mxu0 %v4477_v48 }
 0x894   :  { %v7851_v43 = vpop.eup %7850 }
 0x895   :  { %v4119_v27 = vmul.f32 %v7851_v43, %v4117_v63  ;;  %vm4125_vm6 = vweird.f32 %v7851_v43  ;;  %4564 = vmatpush.msrb.mxu0 %v4475_v41 }
 0x896   :  { %vm4126_vm8 = vmor %vm4124_vm7, %vm4125_vm6 }
 0x897   :  { %v4120_v49 = vmul.f32 %v7851_v43, %v4119_v27 }
 0x899   :  { %v4121_v4 = vmul.f32 0.5, %v4120_v49 }
 0x89b   :  { %v4122_v38 = vsub.f32 1.5, %v4121_v4 }
 0x89d   :  { %v4123_v7 = vmul.f32 %v7851_v43, %v4122_v38 }
 0x89f   :  { %v9677_v17 = vsel %vm4126_vm8, %v7851_v43, %v4123_v7 }
 0x8a0   :  { %v4129_v59 = vmul.f32 %v9677_v17, %v9545_v54  ;;  %v4128_v31 = vmul.f32 %v9677_v17, %v9550_v28  ;;  %v4130_v14 = vmul.f32 %v9677_v17, %v9540_v8  ;;  %v4484_v54 = vld [vmem:[#allocation2 + $0x150] sm:$0xff]  ;;  %v4131_v30 = vmul.f32 %v9677_v17, %v9574_v25  ;;  %v4482_v25 = vld [vmem:[#allocation2 + $0x140] sm:$0xff] }
 0x8a1   :  { %4506 = vmatpush.msra.mxu3 %v4484_v54  ;;  %v4132_v55 = vmul.f32 %v9677_v17, %v9569_v52  ;;  %v4133_v52 = vmul.f32 %v9677_v17, %v9561_v20  ;;  %v4134_v20 = vmul.f32 %v9677_v17, %v9598_v2  ;;  %v4137_v2 = vmul.f32 %v9677_v17, %v9624_v53 }
 0x8a2   :  { %v4150_v6 = vmul.f32 %v9679_v40, %v4129_v59  ;;  %v4149_v36 = vmul.f32 %v9679_v40, %v4128_v31  ;;  %v4151_v28 = vmul.f32 %v9679_v40, %v4130_v14  ;;  %v4152_v8 = vmul.f32 %v9679_v40, %v4131_v30 }
 0x8a3   :  { %v4153_v29 = vmul.f32 %v9679_v40, %v4132_v55  ;;  %4507 = vmatpush.msra.mxu3 %v4482_v25  ;;  %v4154_v58 = vmul.f32 %v9679_v40, %v4133_v52  ;;  %v4155_v26 = vmul.f32 %v9679_v40, %v4134_v20  ;;  %v4136_v60 = vmul.f32 %v9677_v17, %v9587_v47 }
 0x8a4   :  { %v4171_v56 = vadd.f32 %v9685_v13, %v4150_v6  ;;  %v4170_v37 = vadd.f32 %v9685_v13, %v4149_v36  ;;  %v9699_v18 = vadd.f32 %v9685_v13, %v4151_v28  ;;  %v9711_v5 = vadd.f32 %v9685_v13, %v4152_v8 }
 0x8a5   :  { %v9725_v33 = vadd.f32 %v9685_v13, %v4153_v29  ;;  %4508 = vmatpush.msra.mxu3 %v4480_v12  ;;  %v9739_v32 = vadd.f32 %v9685_v13, %v4154_v58  ;;  %v9753_v22 = vadd.f32 %v9685_v13, %v4155_v26  ;;  %v4158_v23 = vmul.f32 %v9679_v40, %v4137_v2 }
 0x8a6   :  { %7473 = vmatmul.msk.f32.vlgmr.msrb.gmra.mxu3 %vm1301_vm14, %v4171_v56  ;;  %7485 = vmatmul.msk.f32.vlgmr.msra.gmra.mxu0 %vm1301_vm14, %v4171_v56  ;;  %v4157_v53 = vmul.f32 %v9679_v40, %v4136_v60  ;;  %v4138_v50 = vmul.f32 %v9677_v17, %v9618_v46  ;;  %v4139_v21 = vmul.f32 %v9677_v17, %v9613_v0 }
 0x8a7   :  { %7497 = vmatmul.msk.f32.vlgmr.msra.gmra.mxu1 %vm1301_vm14, %v4170_v37  ;;  %7509 = vmatmul.msk.f32.vlgmr.msrb.gmra.mxu2 %vm1301_vm14, %v4170_v37  ;;  %v4179_v47 = vadd.f32 %v9685_v13, %v4158_v23  ;;  %v4140_v63 = vmul.f32 %v9677_v17, %v9648_v15  ;;  %v4141_v15 = vmul.f32 %v9677_v17, %v9642_v1 }
 0x8a8   :  { %4509 = vmatpush.msra.mxu3 %v4478_v16  ;;  %v4178_v10 = vadd.f32 %v9685_v13, %v4157_v53  ;;  %v4159_v3 = vmul.f32 %v9679_v40, %v4138_v50  ;;  %v4160_v62 = vmul.f32 %v9679_v40, %v4139_v21  ;;  %v4142_v38 = vmul.f32 %v9677_v17, %v9637_v42 }
 0x8a9   :  { %v4161_v43 = vmul.f32 %v9679_v40, %v4140_v63  ;;  %v4162_v49 = vmul.f32 %v9679_v40, %v4141_v15  ;;  %v4135_v42 = vmul.f32 %v9677_v17, %v9592_v61  ;;  %v4143_v14 = vmul.f32 %v9677_v17, %v9662_v51 }
 0x8aa   :  { %4510 = vmatpush.msra.mxu3 %v4476_v9  ;;  %v9779_v46 = vadd.f32 %v9685_v13, %v4159_v3  ;;  %v4181_v0 = vadd.f32 %v9685_v13, %v4160_v62  ;;  %v4163_v1 = vmul.f32 %v9679_v40, %v4142_v38 }
 0x8ab   :  { %v4182_v27 = vadd.f32 %v9685_v13, %v4161_v43  ;;  %v4183_v4 = vadd.f32 %v9685_v13, %v4162_v49  ;;  %v4156_v19 = vmul.f32 %v9679_v40, %v4135_v42  ;;  %v4164_v54 = vmul.f32 %v9679_v40, %v4143_v14 }
 0x8ac   :  { %4511 = vmatpush.msra.mxu3 %v4474_v57  ;;  %v4184_v7 = vadd.f32 %v9685_v13, %v4163_v1 }
 0x8ad   :  { %v4177_v31 = vadd.f32 %v9685_v13, %v4156_v19 }
 0x8ae   :  { %7474 = vmatmul.msk.f32.gmra.mxu3 %vm1301_vm14, %v9699_v18  ;;  %7486 = vmatmul.msk.f32.gmra.mxu0 %vm1301_vm14, %v9699_v18 }
 0x8af   :  { %7498 = vmatmul.msk.f32.gmra.mxu1 %vm1301_vm14, %v4171_v56  ;;  %7510 = vmatmul.msk.f32.gmra.mxu2 %vm1301_vm14, %v4171_v56 }
 0x8b6   :  { %7475 = vmatmul.msk.f32.gmra.mxu3 %vm1301_vm14, %v9711_v5  ;;  %7487 = vmatmul.msk.f32.gmra.mxu0 %vm1301_vm14, %v9711_v5 }
 0x8b7   :  { %7499 = vmatmul.msk.f32.gmra.mxu1 %vm1301_vm14, %v9699_v18  ;;  %7511 = vmatmul.msk.f32.gmra.mxu2 %vm1301_vm14, %v9699_v18 }
 0x8be   :  { %7476 = vmatmul.msk.f32.gmra.mxu3 %vm1301_vm14, %v9725_v33  ;;  %7488 = vmatmul.msk.f32.gmra.mxu0 %vm1301_vm14, %v9725_v33 }
 0x8bf   :  { %7500 = vmatmul.msk.f32.gmra.mxu1 %vm1301_vm14, %v9711_v5  ;;  %7512 = vmatmul.msk.f32.gmra.mxu2 %vm1301_vm14, %v9711_v5 }
 0x8c6   :  { %7477 = vmatmul.msk.f32.gmra.mxu3 %vm1301_vm14, %v9739_v32  ;;  %7489 = vmatmul.msk.f32.gmra.mxu0 %vm1301_vm14, %v9739_v32 }
 0x8c7   :  { %7501 = vmatmul.msk.f32.gmra.mxu1 %vm1301_vm14, %v9725_v33  ;;  %7513 = vmatmul.msk.f32.gmra.mxu2 %vm1301_vm14, %v9725_v33 }
 0x8ce   :  { %7478 = vmatmul.msk.f32.gmra.mxu3 %vm1301_vm14, %v9753_v22  ;;  %7490 = vmatmul.msk.f32.gmra.mxu0 %vm1301_vm14, %v9753_v22 }
 0x8cf   :  { %7502 = vmatmul.msk.f32.gmra.mxu1 %vm1301_vm14, %v9739_v32  ;;  %7514 = vmatmul.msk.f32.gmra.mxu2 %vm1301_vm14, %v9739_v32 }
 0x8d6   :  { %7479 = vmatmul.msk.f32.gmra.mxu3 %vm1301_vm14, %v4179_v47  ;;  %7491 = vmatmul.msk.f32.gmra.mxu0 %vm1301_vm14, %v4179_v47 }
 0x8d7   :  { %7503 = vmatmul.msk.f32.gmra.mxu1 %vm1301_vm14, %v4178_v10  ;;  %7515 = vmatmul.msk.f32.gmra.mxu2 %vm1301_vm14, %v4178_v10 }
 0x8de   :  { %7480 = vmatmul.msk.f32.gmra.mxu3 %vm1301_vm14, %v9779_v46  ;;  %7492 = vmatmul.msk.f32.gmra.mxu0 %vm1301_vm14, %v9779_v46 }
 0x8df   :  { %7504 = vmatmul.msk.f32.gmra.mxu1 %vm1301_vm14, %v4179_v47  ;;  %7516 = vmatmul.msk.f32.gmra.mxu2 %vm1301_vm14, %v4179_v47 }
 0x8e6   :  { %7481 = vmatmul.msk.f32.gmra.mxu3 %vm1301_vm14, %v4181_v0  ;;  %7493 = vmatmul.msk.f32.gmra.mxu0 %vm1301_vm14, %v4181_v0 }
 0x8e7   :  { %7505 = vmatmul.msk.f32.gmra.mxu1 %vm1301_vm14, %v9779_v46  ;;  %7517 = vmatmul.msk.f32.gmra.mxu2 %vm1301_vm14, %v9779_v46 }
 0x8ee   :  { %7482 = vmatmul.msk.f32.gmra.mxu3 %vm1301_vm14, %v4182_v27  ;;  %7494 = vmatmul.msk.f32.gmra.mxu0 %vm1301_vm14, %v4182_v27 }
 0x8ef   :  { %7506 = vmatmul.msk.f32.gmra.mxu1 %vm1301_vm14, %v4181_v0  ;;  %7518 = vmatmul.msk.f32.gmra.mxu2 %vm1301_vm14, %v4181_v0 }
 0x8f6   :  { %7483 = vmatmul.msk.f32.gmra.mxu3 %vm1301_vm14, %v4183_v4  ;;  %7495 = vmatmul.msk.f32.gmra.mxu0 %vm1301_vm14, %v4183_v4 }
 0x8f7   :  { %7507 = vmatmul.msk.f32.gmra.mxu1 %vm1301_vm14, %v4182_v27  ;;  %7519 = vmatmul.msk.f32.gmra.mxu2 %vm1301_vm14, %v4182_v27 }
 0x8fe   :  { %7484 = vmatmul.msk.f32.gmra.mxu3 %vm1301_vm14, %v4184_v7  ;;  %7496 = vmatmul.msk.f32.gmra.mxu0 %vm1301_vm14, %v4184_v7 }
 0x8ff   :  { %7508 = vmatmul.msk.f32.gmra.mxu1 %vm1301_vm14, %v4183_v4  ;;  %7520 = vmatmul.msk.f32.gmra.mxu2 %vm1301_vm14, %v4183_v4 }
 0x906   :  { %7521 = vmatmul.msk.f32.vlgmr.msra.gmra.mxu3 %vm1301_vm14, %v9699_v18  ;;  %7533 = vmatmul.msk.f32.vlgmr.msrb.gmra.mxu0 %vm1301_vm14, %v9699_v18  ;;  %v4185_v18 = vadd.f32 %v9685_v13, %v4164_v54  ;;  %v9884_v13 = vld [vmem:[%s10532_s10] sm:$0x3] }
 0x90e   :  { %7522 = vmatmul.msk.f32.gmra.mxu3 %vm1301_vm14, %v9711_v5  ;;  %7534 = vmatmul.msk.f32.gmra.mxu0 %vm1301_vm14, %v9711_v5 }
 0x916   :  { %7523 = vmatmul.msk.f32.gmra.mxu3 %vm1301_vm14, %v9725_v33  ;;  %7535 = vmatmul.msk.f32.gmra.mxu0 %vm1301_vm14, %v9725_v33  ;;  %v9887_v33 = vperm.slane %v9884_v13, 0 }
 0x91e   :  { %7524 = vmatmul.msk.f32.gmra.mxu3 %vm1301_vm14, %v9739_v32  ;;  %7536 = vmatmul.msk.f32.gmra.mxu0 %vm1301_vm14, %v9739_v32 }
 0x923   :  { %v9889_v12 = vpop.f32.mrf.mxu0 }
 0x924   :  { %v4384_v51 = vpop.f32.mrf.mxu1 }
 0x926   :  { %7525 = vmatmul.msk.f32.gmra.mxu3 %vm1301_vm14, %v9753_v22  ;;  %7537 = vmatmul.msk.f32.gmra.mxu0 %vm1301_vm14, %v9753_v22 }
 0x929   :  { %v4272_v59 = vpop.f32.mrf.mxu3 }
 0x92a   :  { %v4385_v29 = vadd.f32 %v4384_v51, %v4272_v59 }
 0x92b   :  { %v9895_v16 = vpop.f32.mrf.mxu0 }
 0x92c   :  { %v4387_v55 = vpop.f32.mrf.mxu1 }
 0x92e   :  { %7526 = vmatmul.msk.f32.gmra.mxu3 %vm1301_vm14, %v4177_v31  ;;  %7538 = vmatmul.msk.f32.gmra.mxu0 %vm1301_vm14, %v4177_v31 }
 0x931   :  { %v4275_v6 = vpop.f32.mrf.mxu3 }
 0x932   :  { %v4388_v26 = vadd.f32 %v4387_v55, %v4275_v6 }
 0x934   :  { %v4390_v40 = vpop.f32.mrf.mxu1 }
 0x936   :  { %7527 = vmatmul.msk.f32.gmra.mxu3 %vm1301_vm14, %v9779_v46  ;;  %7539 = vmatmul.msk.f32.gmra.mxu0 %vm1301_vm14, %v9779_v46  ;;  %v9904_v46 = vpop.f32.mrf.mxu0 }
 0x939   :  { %v4278_v61 = vpop.f32.mrf.mxu3 }
 0x93a   :  { %v4391_v10 = vadd.f32 %v4390_v40, %v4278_v61 }
 0x93c   :  { %v4393_v22 = vpop.f32.mrf.mxu1 }
 0x93e   :  { %7528 = vmatmul.msk.f32.gmra.mxu3 %vm1301_vm14, %v4181_v0  ;;  %7540 = vmatmul.msk.f32.gmra.mxu0 %vm1301_vm14, %v4181_v0  ;;  %v9912_v59 = vpop.f32.mrf.mxu0 }
 0x941   :  { %v4281_v36 = vpop.f32.mrf.mxu3 }
 0x942   :  { %v4394_v62 = vadd.f32 %v4393_v22, %v4281_v36 }
 0x944   :  { %v4396_v44 = vpop.f32.mrf.mxu1 }
 0x946   :  { %7529 = vmatmul.msk.f32.gmra.mxu3 %vm1301_vm14, %v4182_v27  ;;  %7541 = vmatmul.msk.f32.gmra.mxu0 %vm1301_vm14, %v4182_v27 }
 0x949   :  { %v9855_v56 = vpop.f32.mrf.mxu3 }
 0x94c   :  { %v4399_v41 = vpop.f32.mrf.mxu1 }
 0x94e   :  { %7530 = vmatmul.msk.f32.gmra.mxu3 %vm1301_vm14, %v4183_v4  ;;  %7542 = vmatmul.msk.f32.gmra.mxu0 %vm1301_vm14, %v4183_v4 }
 0x951   :  { %v9859_v37 = vpop.f32.mrf.mxu3 }
 0x956   :  { %7531 = vmatmul.msk.f32.gmra.mxu3 %vm1301_vm14, %v4184_v7  ;;  %7543 = vmatmul.msk.f32.gmra.mxu0 %vm1301_vm14, %v4184_v7  ;;  %v4397_v7 = vadd.f32 %v4396_v44, %v9855_v56 }
 0x959   :  { %v9866_v28 = vpop.f32.mrf.mxu3 }
 0x95e   :  { %7532 = vmatmul.msk.f32.gmra.mxu3 %vm1301_vm14, %v4185_v18  ;;  %7544 = vmatmul.msk.f32.gmra.mxu0 %vm1301_vm14, %v4185_v18 }
 0x961   :  { %v9871_v30 = vpop.f32.mrf.mxu3 }
 0x969   :  { %v9873_v8 = vpop.f32.mrf.mxu3 }
 0x971   :  { %v9875_v5 = vpop.f32.mrf.mxu3 }
 0x979   :  { %v9877_v17 = vpop.f32.mrf.mxu3 }
 0x981   :  { %v9879_v25 = vpop.f32.mrf.mxu3 }
 0x989   :  { %v4513_v52 = vpop.f32.mrf.mxu3 }
 0x98a   :  { %v4602_v58 = vadd.f32 %v4513_v52, %v4385_v29  ;;  %v4402_v29 = vpop.f32.mrf.mxu1 }
 0x98c   :  { %v9892_v32 = vadd.f32 %v9887_v33, %v4602_v58 }
 0x98e   :  { %v7545_v20 = vmul.f32 -1.442695, %v9892_v32 }
 0x990   :  { %7852 = vpow2.f32 %v7545_v20 }
 0x991   :  { %v4516_v2 = vpop.f32.mrf.mxu3 }
 0x992   :  { %v4604_v60 = vadd.f32 %v4516_v2, %v4388_v26  ;;  %v4400_v26 = vadd.f32 %v4399_v41, %v9859_v37 }
 0x994   :  { %v9898_v23 = vadd.f32 %v9887_v33, %v4604_v60 }
 0x996   :  { %v7853_v53 = vpop.eup %7852  ;;  %v7546_v47 = vmul.f32 -1.442695, %v9898_v23 }
 0x997   :  { %v4692_v50 = vadd.f32 1.0, %v7853_v53 }
 0x998   :  { %7854 = vpow2.f32 %v7546_v47 }
 0x999   :  { %7856 = vrcp.f32 %v4692_v50  ;;  %v4519_v34 = vpop.f32.mrf.mxu3  ;;  %v4715_v48 = vand.u32 2147483648, %v4692_v50  ;;  %v4713_v15 = vand.u32 2147483647, %v4692_v50  ;;  %vm4709_vm10 = vweird.f32 %v4692_v50 }
 0x99a   :  { %v4606_v3 = vadd.f32 %v4519_v34, %v4391_v10  ;;  %v9920_v10 = vpop.f32.mrf.mxu0 }
 0x99b   :  { %v4716_v19 = vor.u32 1.1754944e-38, %v4715_v48  ;;  %vm4714_vm12 = vcmp.eq.f32.partialorder %v4713_v15, 8.507059e+37  ;;  %v4405_v48 = vpop.f32.mrf.mxu1 }
 0x99c   :  { %v9902_v9 = vadd.f32 %v9887_v33, %v4606_v3 }
 0x99e   :  { %v7855_v45 = vpop.eup %7854  ;;  %v7547_v21 = vmul.f32 -1.442695, %v9902_v9 }
 0x99f   :  { %v7857_v39 = vpop.eup %7856  ;;  %v4693_v24 = vadd.f32 1.0, %v7855_v45 }
 0x9a0   :  { %7858 = vpow2.f32 %v7547_v21  ;;  %v4705_v57 = vmul.f32 %v7857_v39, %v4692_v50  ;;  %vm4710_vm9 = vweird.f32 %v7857_v39 }
 0x9a1   :  { %7860 = vrcp.f32 %v4693_v24  ;;  %v4522_v35 = vpop.f32.mrf.mxu3  ;;  %vm4711_vm11 = vmor %vm4709_vm10, %vm4710_vm9  ;;  %v4730_v18 = vand.u32 2147483648, %v4693_v24  ;;  %v4728_v55 = vand.u32 2147483647, %v4693_v24  ;;  %vm4724_vm15 = vweird.f32 %v4693_v24 }
 0x9a2   :  { %v4608_v0 = vadd.f32 %v4522_v35, %v4394_v62  ;;  %v4706_v63 = vsub.f32 1.0, %v4705_v57  ;;  %v4403_v35 = vadd.f32 %v4402_v29, %v9866_v28 }
 0x9a3   :  { %v4731_v2 = vor.u32 1.1754944e-38, %v4730_v18  ;;  %vm4729_vm2 = vcmp.eq.f32.partialorder %v4728_v55, 8.507059e+37 }
 0x9a4   :  { %v9908_v43 = vadd.f32 %v9887_v33, %v4608_v0  ;;  %v4707_v27 = vmul.f32 %v7857_v39, %v4706_v63 }
 0x9a6   :  { %v7859_v49 = vpop.eup %7858  ;;  %v7548_v4 = vmul.f32 -1.442695, %v9908_v43  ;;  %v4708_v38 = vadd.f32 %v7857_v39, %v4707_v27 }
 0x9a7   :  { %v7861_v1 = vpop.eup %7860  ;;  %v4694_v42 = vadd.f32 1.0, %v7859_v49 }
 0x9a8   :  { %7862 = vpow2.f32 %v7548_v4  ;;  %v4712_v31 = vsel %vm4711_vm11, %v7857_v39, %v4708_v38  ;;  %v4720_v6 = vmul.f32 %v7861_v1, %v4693_v24  ;;  %vm4725_vm13 = vweird.f32 %v7861_v1 }
 0x9a9   :  { %7864 = vrcp.f32 %v4694_v42  ;;  %v4525_v61 = vpop.f32.mrf.mxu3  ;;  %v4717_v36 = vsel %vm4714_vm12, %v4716_v19, %v4712_v31  ;;  %vm4726_vm1 = vmor %vm4724_vm15, %vm4725_vm13  ;;  %v4745_v3 = vand.u32 2147483648, %v4694_v42  ;;  %v4743_v21 = vand.u32 2147483647, %v4694_v42 }
 0x9aa   :  { %v4610_v14 = vadd.f32 %v4525_v61, %v4397_v7  ;;  %4896 = vrot.lane.b32.xlu1 %v4717_v36, %s8009_s9  ;;  %v4721_v54 = vsub.f32 1.0, %v4720_v6  ;;  %vm4739_vm4 = vweird.f32 %v4694_v42  ;;  %v9929_v7 = vpop.f32.mrf.mxu0 }
 0x9ab   :  { %v4746_v63 = vor.u32 1.1754944e-38, %v4745_v3  ;;  %vm4744_vm7 = vcmp.eq.f32.partialorder %v4743_v21, 8.507059e+37 }
 0x9ac   :  { %v9916_v51 = vadd.f32 %v9887_v33, %v4610_v14  ;;  %v4722_v56 = vmul.f32 %v7861_v1, %v4721_v54  ;;  %v4406_v14 = vadd.f32 %v4405_v48, %v9871_v30 }
 0x9ae   :  { %v7863_v40 = vpop.eup %7862  ;;  %v7549_v52 = vmul.f32 -1.442695, %v9916_v51  ;;  %v4723_v58 = vadd.f32 %v7861_v1, %v4722_v56 }
 0x9af   :  { %v7865_v20 = vpop.eup %7864  ;;  %v4695_v22 = vadd.f32 1.0, %v7863_v40 }
 0x9b0   :  { %7866 = vpow2.f32 %v7549_v52  ;;  %v4727_v60 = vsel %vm4726_vm1, %v7861_v1, %v4723_v58  ;;  %v4735_v53 = vmul.f32 %v7865_v20, %v4694_v42  ;;  %vm4740_vm3 = vweird.f32 %v7865_v20  ;;  %v4975_v52 = vld [vmem:[%s10533_s11 + $0x38] sm:$0xff]  ;;  %v4408_v58 = vpop.f32.mrf.mxu1 }
 0x9b1   :  { %7868 = vrcp.f32 %v4695_v22  ;;  %v4528_v47 = vpop.f32.mrf.mxu3  ;;  %v4732_v50 = vsel %vm4729_vm2, %v4731_v2, %v4727_v60  ;;  %vm4741_vm6 = vmor %vm4739_vm4, %vm4740_vm3  ;;  %v4760_v1 = vand.u32 2147483648, %v4695_v22  ;;  %v4758_v19 = vand.u32 2147483647, %v4695_v22  ;;  %5020 = vmatpush.msrb.mxu1 %v4975_v52 }
 0x9b2   :  { %v4612_v34 = vadd.f32 %v4528_v47, %v4400_v26  ;;  %4898 = vrot.lane.b32.xlu2 %v4732_v50, %s8009_s9  ;;  %v4736_v44 = vsub.f32 1.0, %v4735_v53  ;;  %vm4754_vm9 = vweird.f32 %v4695_v22  ;;  %v9943_v47 = vpop.f32.mrf.mxu0  ;;  %v4409_v3 = vadd.f32 %v4408_v58, %v9873_v8 }
 0x9b3   :  { %v4761_v18 = vor.u32 1.1754944e-38, %v4760_v1  ;;  %vm4759_vm11 = vcmp.eq.f32.partialorder %v4758_v19, 8.507059e+37 }
 0x9b4   :  { %v9924_v45 = vadd.f32 %v9887_v33, %v4612_v34  ;;  %v4737_v37 = vmul.f32 %v7865_v20, %v4736_v44 }
 0x9b6   :  { %v7867_v39 = vpop.eup %7866  ;;  %v7550_v24 = vmul.f32 -1.442695, %v9924_v45  ;;  %v4738_v62 = vadd.f32 %v7865_v20, %v4737_v37 }
 0x9b7   :  { %v7869_v57 = vpop.eup %7868  ;;  %v4696_v0 = vadd.f32 1.0, %v7867_v39 }
 0x9b8   :  { %7870 = vpow2.f32 %v7550_v24  ;;  %v4742_v41 = vsel %vm4741_vm6, %v7865_v20, %v4738_v62  ;;  %v4750_v27 = vmul.f32 %v7869_v57, %v4695_v22  ;;  %vm4755_vm8 = vweird.f32 %v7869_v57  ;;  %v4411_v48 = vpop.f32.mrf.mxu1 }
 0x9b9   :  { %7872 = vrcp.f32 %v4696_v0  ;;  %v4531_v15 = vpop.f32.mrf.mxu3  ;;  %v4747_v49 = vsel %vm4744_vm7, %v4746_v63, %v4742_v41  ;;  %vm4756_vm10 = vmor %vm4754_vm9, %vm4755_vm8  ;;  %v4775_v30 = vand.u32 2147483648, %v4696_v0  ;;  %v4773_v60 = vand.u32 2147483647, %v4696_v0 }
 0x9ba   :  { %v4614_v4 = vadd.f32 %v4531_v15, %v4403_v35  ;;  %4900 = vrot.lane.b32.xlu1 %v4747_v49, %s8009_s9  ;;  %v4751_v38 = vsub.f32 1.0, %v4750_v27  ;;  %vm4769_vm13 = vweird.f32 %v4696_v0  ;;  %v4974_v35 = vld [vmem:[%s10533_s11 + $0x30] sm:$0xff] }
 0x9bb   :  { %v4776_v21 = vor.u32 1.1754944e-38, %v4775_v30  ;;  %vm4774_vm1 = vcmp.eq.f32.partialorder %v4773_v60, 8.507059e+37  ;;  %5021 = vmatpush.msrb.mxu1 %v4974_v35 }
 0x9bc   :  { %v9932_v28 = vadd.f32 %v9887_v33, %v4614_v4  ;;  %v4752_v42 = vmul.f32 %v7869_v57, %v4751_v38 }
 0x9be   :  { %v7871_v31 = vpop.eup %7870  ;;  %v7551_v6 = vmul.f32 -1.442695, %v9932_v28  ;;  %v4753_v61 = vadd.f32 %v7869_v57, %v4752_v42  ;;  %v4412_v42 = vadd.f32 %v4411_v48, %v9875_v5 }
 0x9bf   :  { %v7873_v36 = vpop.eup %7872  ;;  %v4697_v54 = vadd.f32 1.0, %v7871_v31 }
 0x9c0   :  { %7874 = vpow2.f32 %v7551_v6  ;;  %v4757_v56 = vsel %vm4756_vm10, %v7869_v57, %v4753_v61  ;;  %v4765_v55 = vmul.f32 %v7873_v36, %v4696_v0  ;;  %vm4770_vm12 = vweird.f32 %v7873_v36  ;;  %v9959_v6 = vpop.f32.mrf.mxu0 }
 0x9c1   :  { %7876 = vrcp.f32 %v4697_v54  ;;  %v4534_v40 = vpop.f32.mrf.mxu3  ;;  %v4762_v29 = vsel %vm4759_vm11, %v4761_v18, %v4757_v56  ;;  %vm4771_vm15 = vmor %vm4769_vm13, %vm4770_vm12  ;;  %v4790_v63 = vand.u32 2147483648, %v4697_v54  ;;  %v4788_v15 = vand.u32 2147483647, %v4697_v54 }
 0x9c2   :  { %v4616_v20 = vadd.f32 %v4534_v40, %v4406_v14  ;;  %4902 = vrot.lane.b32.xlu2 %v4762_v29, %s8009_s9  ;;  %v4766_v26 = vsub.f32 1.0, %v4765_v55  ;;  %vm4784_vm3 = vweird.f32 %v4697_v54  ;;  %v4972_v55 = vld [vmem:[%s10533_s11 + $0x20] sm:$0xff] }
 0x9c3   :  { %v4791_v31 = vor.u32 1.1754944e-38, %v4790_v63  ;;  %vm4789_vm6 = vcmp.eq.f32.partialorder %v4788_v15, 8.507059e+37 }
 0x9c4   :  { %v9941_v22 = vadd.f32 %v9887_v33, %v4616_v20  ;;  %v4767_v2 = vmul.f32 %v7873_v36, %v4766_v26  ;;  %v4414_v26 = vpop.f32.mrf.mxu1 }
 0x9c6   :  { %v7875_v53 = vpop.eup %7874  ;;  %v7552_v50 = vmul.f32 -1.442695, %v9941_v22  ;;  %v4768_v34 = vadd.f32 %v7873_v36, %v4767_v2 }
 0x9c7   :  { %v7877_v44 = vpop.eup %7876  ;;  %v9947_v37 = vadd.f32 1.0, %v7875_v53  ;;  %v4415_v53 = vadd.f32 %v4414_v26, %v9877_v17  ;;  %v4971_v17 = vld [vmem:[%s10533_s11 + $0x18] sm:$0xff] }
 0x9c8   :  { %7878 = vpow2.f32 %v7552_v50  ;;  %v4772_v39 = vsel %vm4771_vm15, %v7873_v36, %v4768_v34  ;;  %v4780_v24 = vmul.f32 %v7877_v44, %v4697_v54  ;;  %vm4785_vm2 = vweird.f32 %v7877_v44  ;;  %v4973_v54 = vld [vmem:[%s10533_s11 + $0x28] sm:$0xff] }
 0x9c9   :  { %7880 = vrcp.f32 %v9947_v37  ;;  %v4537_v62 = vpop.f32.mrf.mxu3  ;;  %v4777_v57 = vsel %vm4774_vm1, %v4776_v21, %v4772_v39  ;;  %vm4786_vm4 = vmor %vm4784_vm3, %vm4785_vm2  ;;  %5022 = vmatpush.msrb.mxu1 %v4973_v54  ;;  %v4805_v40 = vand.u32 2147483648, %v9947_v37  ;;  %v4803_v58 = vand.u32 2147483647, %v9947_v37 }
 0x9ca   :  { %v4618_v0 = vadd.f32 %v4537_v62, %v4409_v3  ;;  %4904 = vrot.lane.b32.xlu1 %v4777_v57, %s8009_s9  ;;  %v4781_v8 = vsub.f32 1.0, %v4780_v24  ;;  %vm4799_vm8 = vweird.f32 %v9947_v37  ;;  %v9977_v24 = vpop.f32.mrf.mxu0 }
 0x9cb   :  { %5023 = vmatpush.msrb.mxu1 %v4972_v55  ;;  %v4806_v34 = vor.u32 1.1754944e-38, %v4805_v40  ;;  %vm4804_vm10 = vcmp.eq.f32.partialorder %v4803_v58, 8.507059e+37 }
 0x9cc   :  { %v9955_v41 = vadd.f32 %v9887_v33, %v4618_v0  ;;  %v4782_v27 = vmul.f32 %v7877_v44, %v4781_v8 }
 0x9cd   :  { %5024 = vmatpush.msrb.mxu1 %v4971_v17 }
 0x9ce   :  { %v7879_v49 = vpop.eup %7878  ;;  %v7553_v4 = vmul.f32 -1.442695, %v9955_v41  ;;  %v4783_v38 = vadd.f32 %v7877_v44, %v4782_v27 }
 0x9cf   :  { %v7881_v1 = vpop.eup %7880  ;;  %v4699_v19 = vadd.f32 1.0, %v7879_v49 }
 0x9d0   :  { %7882 = vpow2.f32 %v7553_v4  ;;  %v4787_v61 = vsel %vm4786_vm4, %v7877_v44, %v4783_v38  ;;  %v4795_v36 = vmul.f32 %v7881_v1, %v9947_v37  ;;  %vm4800_vm7 = vweird.f32 %v7881_v1 }
 0x9d1   :  { %7884 = vrcp.f32 %v4699_v19  ;;  %v4540_v14 = vpop.f32.mrf.mxu3  ;;  %v4792_v18 = vsel %vm4789_vm6, %v4791_v31, %v4787_v61  ;;  %vm4801_vm9 = vmor %vm4799_vm8, %vm4800_vm7  ;;  %v4820_v37 = vand.u32 2147483648, %v4699_v19  ;;  %v4818_v8 = vand.u32 2147483647, %v4699_v19 }
 0x9d2   :  { %v4620_v56 = vadd.f32 %v4540_v14, %v4412_v42  ;;  %4906 = vrot.lane.b32.xlu0 %v4792_v18, %s8009_s9  ;;  %v4796_v5 = vsub.f32 1.0, %v4795_v36  ;;  %vm4814_vm12 = vweird.f32 %v4699_v19  ;;  %v9988_v36 = vpop.f32.mrf.mxu0 }
 0x9d3   :  { %v4821_v4 = vor.u32 1.1754944e-38, %v4820_v37  ;;  %vm4819_vm15 = vcmp.eq.f32.partialorder %v4818_v8, 8.507059e+37 }
 0x9d4   :  { %v9971_v29 = vadd.f32 %v9887_v33, %v4620_v56  ;;  %v4797_v52 = vmul.f32 %v7881_v1, %v4796_v5 }
 0x9d6   :  { %v7883_v20 = vpop.eup %7882  ;;  %v7554_v30 = vmul.f32 -1.442695, %v9971_v29  ;;  %v4798_v2 = vadd.f32 %v7881_v1, %v4797_v52 }
 0x9d7   :  { %v7885_v60 = vpop.eup %7884  ;;  %v4700_v50 = vadd.f32 1.0, %v7883_v20 }
 0x9d8   :  { %7886 = vpow2.f32 %v7554_v30  ;;  %v4802_v44 = vsel %vm4801_vm9, %v7881_v1, %v4798_v2  ;;  %v4810_v3 = vmul.f32 %v7885_v60, %v4699_v19  ;;  %vm4815_vm11 = vweird.f32 %v7885_v60 }
 0x9d9   :  { %7888 = vrcp.f32 %v4700_v50  ;;  %v4543_v21 = vpop.f32.mrf.mxu3  ;;  %v4807_v39 = vsel %vm4804_vm10, %v4806_v34, %v4802_v44  ;;  %vm4816_vm13 = vmor %vm4814_vm12, %vm4815_vm11  ;;  %v4835_v61 = vand.u32 2147483648, %v4700_v50  ;;  %v4833_v18 = vand.u32 2147483647, %v4700_v50 }
 0x9da   :  { %v4622_v62 = vadd.f32 %v4543_v21, %v4415_v53  ;;  %4908 = vrot.lane.b32.xlu2 %v4807_v39, %s8009_s9  ;;  %v4811_v57 = vsub.f32 1.0, %v4810_v3  ;;  %vm4829_vm2 = vweird.f32 %v4700_v50  ;;  %v4970_v39 = vld [vmem:[%s10533_s11 + $0x10] sm:$0xff] }
 0x9db   :  { %v4836_v55 = vor.u32 1.1754944e-38, %v4835_v61  ;;  %vm4834_vm4 = vcmp.eq.f32.partialorder %v4833_v18, 8.507059e+37  ;;  %5025 = vmatpush.msrb.mxu1 %v4970_v39 }
 0x9dc   :  { %v9984_v35 = vadd.f32 %v9887_v33, %v4622_v62  ;;  %v4812_v0 = vmul.f32 %v7885_v60, %v4811_v57  ;;  %v4969_v62 = vld [vmem:[%s10533_s11 + $0x8] sm:$0xff] }
 0x9dd   :  { %5026 = vmatpush.msrb.mxu1 %v4969_v62 }
 0x9de   :  { %v7887_v63 = vpop.eup %7886  ;;  %v7555_v48 = vmul.f32 -1.442695, %v9984_v35  ;;  %v4813_v27 = vadd.f32 %v7885_v60, %v4812_v0 }
 0x9df   :  { %v7889_v15 = vpop.eup %7888  ;;  %v4701_v49 = vadd.f32 1.0, %v7887_v63 }
 0x9e0   :  { %7890 = vpow2.f32 %v7555_v48  ;;  %v4817_v38 = vsel %vm4816_vm13, %v7885_v60, %v4813_v27  ;;  %v4825_v1 = vmul.f32 %v7889_v15, %v4700_v50  ;;  %vm4830_vm1 = vweird.f32 %v7889_v15  ;;  %v9991_v60 = vpop.f32.mrf.mxu0 }
 0x9e1   :  { %7892 = vrcp.f32 %v4701_v49  ;;  %v4822_v42 = vsel %vm4819_vm15, %v4821_v4, %v4817_v38  ;;  %vm4831_vm3 = vmor %vm4829_vm2, %vm4830_vm1  ;;  %v4850_v26 = vand.u32 2147483648, %v4701_v49  ;;  %v4848_v2 = vand.u32 2147483647, %v4701_v49  ;;  %v4968_v4 = vld [vmem:[%s10533_s11] sm:$0xff] }
 0x9e2   :  { %4910 = vrot.lane.b32.xlu1 %v4822_v42, %s8009_s9  ;;  %v4826_v31 = vsub.f32 1.0, %v4825_v1  ;;  %vm4844_vm7 = vweird.f32 %v4701_v49  ;;  %5027 = vmatpush.msrb.mxu1 %v4968_v4 }
 0x9e3   :  { %v4851_v34 = vor.u32 1.1754944e-38, %v4850_v26  ;;  %vm4849_vm9 = vcmp.eq.f32.partialorder %v4848_v2, 8.507059e+37 }
 0x9e4   :  { %v4827_v14 = vmul.f32 %v7889_v15, %v4826_v31 }
 0x9e6   :  { %v7891_v19 = vpop.eup %7890  ;;  %v4828_v54 = vadd.f32 %v7889_v15, %v4827_v14 }
 0x9e7   :  { %v7893_v56 = vpop.eup %7892  ;;  %v4702_v5 = vadd.f32 1.0, %v7891_v19  ;;  %v10008_v19 = vperm.slane %v9884_v13, 1 }
 0x9e8   :  { %v4832_v40 = vsel %vm4831_vm3, %v7889_v15, %v4828_v54  ;;  %v4840_v52 = vmul.f32 %v7893_v56, %v4701_v49  ;;  %vm4845_vm6 = vweird.f32 %v7893_v56  ;;  %v10000_v48 = vpop.f32.mrf.mxu0  ;;  %v4437_v49 = vpop.f32.mrf.mxu2 }
 0x9e9   :  { %7894 = vrcp.f32 %v4702_v5  ;;  %v4837_v58 = vsel %vm4834_vm4, %v4836_v55, %v4832_v40  ;;  %vm4846_vm8 = vmor %vm4844_vm7, %vm4845_vm6  ;;  %v4865_v17 = vand.u32 2147483648, %v4702_v5  ;;  %v4863_v0 = vand.u32 2147483647, %v4702_v5 }
 0x9ea   :  { %4912 = vrot.lane.b32.xlu0 %v4837_v58, %s8009_s9  ;;  %v4841_v20 = vsub.f32 1.0, %v4840_v52  ;;  %vm4859_vm11 = vweird.f32 %v4702_v5  ;;  %v4438_v14 = vadd.f32 %v4437_v49, %v9889_v12 }
 0x9eb   :  { %v4866_v63 = vor.u32 1.1754944e-38, %v4865_v17  ;;  %vm4864_vm13 = vcmp.eq.f32.partialorder %v4863_v0, 8.507059e+37 }
 0x9ec   :  { %v4842_v30 = vmul.f32 %v7893_v56, %v4841_v20 }
 0x9ee   :  { %v4843_v53 = vadd.f32 %v7893_v56, %v4842_v30 }
 0x9ef   :  { %v7895_v50 = vpop.eup %7894 }
 0x9f0   :  { %v4847_v44 = vsel %vm4846_vm8, %v7893_v56, %v4843_v53  ;;  %v4855_v3 = vmul.f32 %v7895_v50, %v4702_v5  ;;  %vm4860_vm10 = vweird.f32 %v7895_v50  ;;  %v4566_v38 = vpop.f32.mrf.mxu0  ;;  %v4440_v1 = vpop.f32.mrf.mxu2 }
 0x9f1   :  { %v4852_v21 = vsel %vm4849_vm9, %v4851_v34, %v4847_v44  ;;  %vm4861_vm12 = vmor %vm4859_vm11, %vm4860_vm10  ;;  %v4603_v18 = vadd.f32 %v4566_v38, %v4438_v14  ;;  %v4441_v56 = vadd.f32 %v4440_v1, %v9895_v16 }
 0x9f2   :  { %4914 = vrot.lane.b32.xlu2 %v4852_v21, %s8009_s9  ;;  %v4856_v57 = vsub.f32 1.0, %v4855_v3 }
 0x9f3   :  { %v4633_v5 = vadd.f32 %v10008_v19, %v4603_v18 }
 0x9f4   :  { %v4857_v37 = vmul.f32 %v7895_v50, %v4856_v57 }
 0x9f6   :  { %v4858_v8 = vadd.f32 %v7895_v50, %v4857_v37 }
 0x9f8   :  { %v4862_v27 = vsel %vm4861_vm12, %v7895_v50, %v4858_v8  ;;  %v4569_v42 = vpop.f32.mrf.mxu0  ;;  %v4443_v31 = vpop.f32.mrf.mxu2 }
 0x9f9   :  { %v4867_v15 = vsel %vm4864_vm13, %v4866_v63, %v4862_v27  ;;  %v4605_v58 = vadd.f32 %v4569_v42, %v4441_v56  ;;  %v4444_v53 = vadd.f32 %v4443_v31, %v9904_v46 }
 0x9fa   :  { %4916 = vrot.lane.b32.xlu1 %v4867_v15, %s8009_s9 }
 0x9fb   :  { %v4635_v12 = vadd.f32 %v10008_v19, %v4605_v58 }
 0xa00   :  { %v4572_v61 = vpop.f32.mrf.mxu0  ;;  %v4446_v40 = vpop.f32.mrf.mxu2 }
 0xa01   :  { %v4607_v50 = vadd.f32 %v4572_v61, %v4444_v53  ;;  %v4447_v3 = vadd.f32 %v4446_v40, %v9912_v59 }
 0xa03   :  { %v4637_v21 = vadd.f32 %v10008_v19, %v4607_v50 }
 0xa08   :  { %v4575_v26 = vpop.f32.mrf.mxu0  ;;  %v4449_v16 = vpop.f32.mrf.mxu2 }
 0xa09   :  { %v4609_v62 = vadd.f32 %v4575_v26, %v4447_v3  ;;  %v4450_v27 = vadd.f32 %v4449_v16, %v9920_v10 }
 0xa0b   :  { %v4639_v0 = vadd.f32 %v10008_v19, %v4609_v62 }
 0xa0c   :  { %v4899_v52 = vpop.permute.xlu2 %4898 }
 0xa0d   :  { %v4933_v30 = vmul.f32 %v4899_v52, %v9898_v23 }
 0xa0f   :  { %v4945_v13 = vadd.f32 %v4933_v30, %v4635_v12 }
 0xa10   :  { %v4578_v44 = vpop.f32.mrf.mxu0  ;;  %v4452_v46 = vpop.f32.mrf.mxu2 }
 0xa11   :  { %v4957_v34 = vmax.f32 %v4945_v13, 0.0  ;;  %v4611_v59 = vadd.f32 %v4578_v44, %v4450_v27  ;;  %v4453_v1 = vadd.f32 %v4452_v46, %v9929_v7 }
 0xa13   :  { %v4641_v4 = vadd.f32 %v10008_v19, %v4611_v59 }
 0xa18   :  { %v4581_v8 = vpop.f32.mrf.mxu0 }
 0xa19   :  { %v4613_v31 = vadd.f32 %v4581_v8, %v4453_v1 }
 0xa1b   :  { %v4643_v18 = vadd.f32 %v10008_v19, %v4613_v31 }
 0xa1c   :  { %v4897_v54 = vpop.permute.xlu1 %4896  ;;  %v4903_v39 = vpop.permute.xlu2 %4902 }
 0xa1d   :  { %v4932_v55 = vmul.f32 %v4897_v54, %v9892_v32  ;;  %v4935_v17 = vmul.f32 %v4903_v39, %v9908_v43 }
 0xa1f   :  { %v4944_v20 = vadd.f32 %v4932_v55, %v4633_v5  ;;  %v4947_v63 = vadd.f32 %v4935_v17, %v4639_v0 }
 0xa20   :  { %v4584_v38 = vpop.f32.mrf.mxu0 }
 0xa21   :  { %v4956_v2 = vmax.f32 %v4944_v20, 0.0  ;;  %v4959_v15 = vmax.f32 %v4947_v63, 0.0 }
 0xa23   :  { %7557 = vmatmul.msk.f32.vlgmr.msrb.gmra.mxu1 %vm1301_vm14, %v4956_v2 }
 0xa2b   :  { %7558 = vmatmul.msk.f32.gmra.mxu1 %vm1301_vm14, %v4957_v34 }
 0xa2c   :  { %v4901_v32 = vpop.permute.xlu1 %4900 }
 0xa2d   :  { %v4934_v23 = vmul.f32 %v4901_v32, %v9902_v9  ;;  %v4455_v9 = vpop.f32.mrf.mxu2 }
 0xa2e   :  { %v4456_v10 = vadd.f32 %v4455_v9, %v9943_v47  ;;  %v4417_v9 = vpop.f32.mrf.mxu1 }
 0xa2f   :  { %v4946_v57 = vadd.f32 %v4934_v23, %v4637_v21 }
 0xa30   :  { %v4615_v55 = vadd.f32 %v4584_v38, %v4456_v10  ;;  %v4546_v10 = vpop.f32.mrf.mxu3 }
 0xa31   :  { %v4958_v37 = vmax.f32 %v4946_v57, 0.0 }
 0xa32   :  { %v4645_v58 = vadd.f32 %v10008_v19, %v4615_v55 }
 0xa33   :  { %7559 = vmatmul.msk.f32.gmra.mxu1 %vm1301_vm14, %v4958_v37 }
 0xa34   :  { %v4909_v5 = vpop.permute.xlu2 %4908 }
 0xa35   :  { %v4458_v56 = vpop.f32.mrf.mxu2  ;;  %v4938_v52 = vmul.f32 %v4909_v5, %v9932_v28 }
 0xa36   :  { %v4459_v26 = vadd.f32 %v4458_v56, %v9959_v6 }
 0xa37   :  { %v4950_v20 = vadd.f32 %v4938_v52, %v4645_v58 }
 0xa39   :  { %v4962_v2 = vmax.f32 %v4950_v20, 0.0 }
 0xa3b   :  { %7560 = vmatmul.msk.f32.gmra.mxu1 %vm1301_vm14, %v4959_v15 }
 0xa3c   :  { %v4905_v49 = vpop.permute.xlu1 %4904 }
 0xa3d   :  { %v4936_v43 = vmul.f32 %v4905_v49, %v9916_v51  ;;  %v4587_v51 = vpop.f32.mrf.mxu0  ;;  %v4461_v47 = vpop.f32.mrf.mxu2 }
 0xa3e   :  { %v4617_v30 = vadd.f32 %v4587_v51, %v4459_v26  ;;  %v4462_v28 = vadd.f32 %v4461_v47, %v9977_v24 }
 0xa3f   :  { %v4948_v42 = vadd.f32 %v4936_v43, %v4641_v4 }
 0xa40   :  { %v4647_v13 = vadd.f32 %v10008_v19, %v4617_v30 }
 0xa41   :  { %v4960_v61 = vmax.f32 %v4948_v42, 0.0 }
 0xa43   :  { %7561 = vmatmul.msk.f32.gmra.mxu1 %vm1301_vm14, %v4960_v61 }
 0xa44   :  { %v4907_v14 = vpop.permute.xlu0 %4906 }
 0xa45   :  { %v4937_v54 = vmul.f32 %v4907_v14, %v9924_v45  ;;  %v4590_v12 = vpop.f32.mrf.mxu0  ;;  %v4464_v44 = vpop.f32.mrf.mxu2 }
 0xa46   :  { %v4619_v50 = vadd.f32 %v4590_v12, %v4462_v28  ;;  %v4465_v3 = vadd.f32 %v4464_v44, %v9988_v36 }
 0xa47   :  { %v4949_v40 = vadd.f32 %v4937_v54, %v4643_v18  ;;  %v4418_v18 = vadd.f32 %v4417_v9, %v9879_v25 }
 0xa48   :  { %v4649_v21 = vadd.f32 %v10008_v19, %v4619_v50 }
 0xa49   :  { %v4961_v7 = vmax.f32 %v4949_v40, 0.0  ;;  %v4624_v54 = vadd.f32 %v4546_v10, %v4418_v18 }
 0xa4b   :  { %7562 = vmatmul.msk.f32.gmra.mxu1 %vm1301_vm14, %v4961_v7  ;;  %v4654_v56 = vadd.f32 %v9887_v33, %v4624_v54 }
 0xa4c   :  { %v4915_v39 = vpop.permute.xlu2 %4914 }
 0xa4d   :  { %v4593_v6 = vpop.f32.mrf.mxu0  ;;  %v4467_v37 = vpop.f32.mrf.mxu2  ;;  %v7556_v5 = vmul.f32 -1.442695, %v4654_v56 }
 0xa4e   :  { %v4621_v62 = vadd.f32 %v4593_v6, %v4465_v3  ;;  %v4468_v8 = vadd.f32 %v4467_v37, %v9991_v60 }
 0xa4f   :  { %7896 = vpow2.f32 %v7556_v5 }
 0xa50   :  { %v4651_v17 = vadd.f32 %v10008_v19, %v4621_v62 }
 0xa53   :  { %7563 = vmatmul.msk.f32.gmra.mxu1 %vm1301_vm14, %v4962_v2 }
 0xa54   :  { %v4911_v45 = vpop.permute.xlu1 %4910 }
 0xa55   :  { %v4939_v53 = vmul.f32 %v4911_v45, %v9941_v22  ;;  %v4941_v22 = vmul.f32 %v4915_v39, %v9971_v29  ;;  %v4596_v0 = vpop.f32.mrf.mxu0  ;;  %v7897_v55 = vpop.eup %7896 }
 0xa56   :  { %v4623_v36 = vadd.f32 %v4596_v0, %v4468_v8  ;;  %v4703_v40 = vadd.f32 1.0, %v7897_v55 }
 0xa57   :  { %v4951_v16 = vadd.f32 %v4939_v53, %v4647_v13  ;;  %v4953_v46 = vadd.f32 %v4941_v22, %v4651_v17 }
 0xa58   :  { %v4653_v27 = vadd.f32 %v10008_v19, %v4623_v36  ;;  %7898 = vrcp.f32 %v4703_v40  ;;  %v4880_v26 = vand.u32 2147483648, %v4703_v40  ;;  %vm4874_vm1 = vweird.f32 %v4703_v40 }
 0xa59   :  { %v4963_v34 = vmax.f32 %v4951_v16, 0.0  ;;  %v4965_v63 = vmax.f32 %v4953_v46, 0.0  ;;  %v4878_v47 = vand.u32 2147483647, %v4703_v40 }
 0xa5a   :  { %v4881_v25 = vor.u32 1.1754944e-38, %v4880_v26  ;;  %v6008_v26 = vld [vmem:[%s10534_s12 + $0x10] sm:$0xff] }
 0xa5b   :  { %7564 = vmatmul.msk.f32.gmra.mxu1 %vm1301_vm14, %v4963_v34  ;;  %vm4879_vm3 = vcmp.eq.f32.partialorder %v4878_v47, 8.507059e+37  ;;  %6141 = vmatpush.msra.mxu0 %v6008_v26 }
 0xa5c   :  { %v4913_v32 = vpop.permute.xlu0 %4912 }
 0xa5d   :  { %v4940_v23 = vmul.f32 %v4913_v32, %v9955_v41 }
 0xa5e   :  { %v7899_v51 = vpop.eup %7898 }
 0xa5f   :  { %v4952_v57 = vadd.f32 %v4940_v23, %v4649_v21  ;;  %v4870_v52 = vmul.f32 %v7899_v51, %v4703_v40  ;;  %vm4875_vm15 = vweird.f32 %v7899_v51  ;;  %v4470_v21 = vpop.f32.mrf.mxu2  ;;  %v4599_v23 = vpop.f32.mrf.mxu0 }
 0xa60   :  { %vm4876_vm2 = vmor %vm4874_vm1, %vm4875_vm15  ;;  %v4471_v62 = vadd.f32 %v4470_v21, %v10000_v48  ;;  %v6007_v21 = vld [vmem:[%s10534_s12 + $0x8] sm:$0xff] }
 0xa61   :  { %v4964_v24 = vmax.f32 %v4952_v57, 0.0  ;;  %v4871_v7 = vsub.f32 1.0, %v4870_v52  ;;  %v7595_v52 = vld [vmem:[%s10534_s12 + $0x30] sm:$0xff] }
 0xa62   :  { %v4625_v57 = vadd.f32 %v4599_v23, %v4471_v62  ;;  %6053 = vmatpush.msrb.mxu3 %v7595_v52 }
 0xa63   :  { %7565 = vmatmul.msk.f32.gmra.mxu1 %vm1301_vm14, %v4964_v24  ;;  %v4872_v58 = vmul.f32 %v7899_v51, %v4871_v7  ;;  %v7593_v7 = vld [vmem:[%s10534_s12 + $0x20] sm:$0xff] }
 0xa64   :  { %v4655_v17 = vadd.f32 %v10008_v19, %v4625_v57  ;;  %6054 = vmatpush.msrb.mxu3 %v7593_v7  ;;  %v7632_v57 = vld [vmem:[%s10534_s12 + $0x58] sm:$0xff] }
 0xa65   :  { %v4873_v20 = vadd.f32 %v7899_v51, %v4872_v58 }
 0xa67   :  { %v4877_v30 = vsel %vm4876_vm2, %v7899_v51, %v4873_v20 }
 0xa68   :  { %v4882_v2 = vsel %vm4879_vm3, %v4881_v25, %v4877_v30  ;;  %v6006_v25 = vld [vmem:[%s10534_s12] sm:$0xff] }
 0xa69   :  { %6142 = vmatpush.msra.mxu0 %v6006_v25 }
 0xa6b   :  { %7566 = vmatmul.msk.f32.gmra.mxu1 %vm1301_vm14, %v4965_v63  ;;  %6275 = vmatpush.msrb.mxu0 %v7632_v57 }
 0xa6c   :  { %v4917_v41 = vpop.permute.xlu1 %4916 }
 0xa6d   :  { %v4942_v59 = vmul.f32 %v4917_v41, %v9984_v35 }
 0xa6f   :  { %v4954_v29 = vadd.f32 %v4942_v59, %v4653_v27 }
 0xa71   :  { %v4966_v15 = vmax.f32 %v4954_v29, 0.0 }
 0xa73   :  { %7567 = vmatmul.msk.f32.gmra.mxu1 %vm1301_vm14, %v4966_v15 }
 0xaa0   :  { %v5029_v49 = vpop.f32.mrf.mxu1 }
 0xaa1   :  { %5065 = vxpose.xlu0.b32.start.end [1/1] (short) (narrow) %v5029_v49, 16 }
 0xaa8   :  { %v5032_v4 = vpop.f32.mrf.mxu1 }
 0xaa9   :  { %5097 = vxpose.xlu2.b32.start.end [1/1] (short) (narrow) %v5032_v4, 16 }
 0xab0   :  { %v5035_v43 = vpop.f32.mrf.mxu1 }
 0xab1   :  { %5129 = vxpose.xlu1.b32.start.end [1/1] (short) (narrow) %v5035_v43, 16 }
 0xab8   :  { %v5038_v60 = vpop.f32.mrf.mxu1 }
 0xab9   :  { %5161 = vxpose.xlu0.b32.start.end [1/1] (short) (narrow) %v5038_v60, 16 }
 0xac0   :  { %v5041_v38 = vpop.f32.mrf.mxu1 }
 0xac1   :  { %5193 = vxpose.xlu2.b32.start.end [1/1] (short) (narrow) %v5041_v38, 16 }
 0xac8   :  { %v5044_v1 = vpop.f32.mrf.mxu1 }
 0xac9   :  { %5225 = vxpose.xlu0.b32.start.end [1/1] (short) (narrow) %v5044_v1, 16 }
 0xad0   :  { %v5047_v42 = vpop.f32.mrf.mxu1 }
 0xad1   :  { %5257 = vxpose.xlu2.b32.start.end [1/1] (short) (narrow) %v5047_v42, 16 }
 0xad8   :  { %v5050_v35 = vpop.f32.mrf.mxu1 }
 0xad9   :  { %5289 = vxpose.xlu1.b32.start.end [1/1] (short) (narrow) %v5050_v35, 16 }
 0xae0   :  { %v5053_v31 = vpop.f32.mrf.mxu1 }
 0xae1   :  { %5321 = vxpose.xlu2.b32.start.end [1/1] (short) (narrow) %v5053_v31, 16 }
 0xae8   :  { %v5056_v61 = vpop.f32.mrf.mxu1 }
 0xae9   :  { %5353 = vxpose.xlu1.b32.start.end [1/1] (short) (narrow) %v5056_v61, 16 }
 0xaf0   :  { %v5059_v14 = vpop.f32.mrf.mxu1 }
 0xaf1   :  { %5385 = vxpose.xlu2.b32.start.end [1/1] (short) (narrow) %v5059_v14, 16 }
 0xb3f   :  { %4918 = vrot.lane.b32.xlu0 %v4882_v2, %s8009_s9 }
 0xb42   :  { %v5113_v45 = vpop.trf.xlu2 }
 0xb45   :  { %v5081_v33 = vpop.trf.xlu0 }
 0xb46   :  { %7569 = vmatmul.msk.f32.vlgmr.msra.gmra.mxu2 %vm2079_vm0, %v5081_v33 }
 0xb4a   :  { %v5114_v13 = vpop.trf.xlu2 }
 0xb4d   :  { %v5082_v12 = vpop.trf.xlu0 }
 0xb4e   :  { %7570 = vmatmul.msk.f32.gmra.mxu2 %vm2079_vm0, %v5082_v12 }
 0xb55   :  { %v5145_v53 = vpop.trf.xlu1 }
 0xb56   :  { %7571 = vmatmul.msk.f32.gmra.mxu2 %vm2079_vm0, %v5113_v45 }
 0xb5a   :  { %v5209_v34 = vpop.trf.xlu2 }
 0xb5d   :  { %v5146_v28 = vpop.trf.xlu1  ;;  %v5177_v16 = vpop.trf.xlu0 }
 0xb5e   :  { %7572 = vmatmul.msk.f32.gmra.mxu2 %vm2079_vm0, %v5114_v13 }
 0xb62   :  { %v5210_v44 = vpop.trf.xlu2 }
 0xb65   :  { %v5178_v50 = vpop.trf.xlu0 }
 0xb66   :  { %7573 = vmatmul.msk.f32.gmra.mxu2 %vm2079_vm0, %v5145_v53 }
 0xb6a   :  { %v5273_v3 = vpop.trf.xlu2 }
 0xb6d   :  { %v5241_v6 = vpop.trf.xlu0 }
 0xb6e   :  { %7574 = vmatmul.msk.f32.gmra.mxu2 %vm2079_vm0, %v5146_v28 }
 0xb72   :  { %v5274_v39 = vpop.trf.xlu2 }
 0xb75   :  { %v5242_v32 = vpop.trf.xlu0 }
 0xb76   :  { %7575 = vmatmul.msk.f32.gmra.mxu2 %vm2079_vm0, %v5177_v16 }
 0xb7a   :  { %v5337_v36 = vpop.trf.xlu2 }
 0xb7d   :  { %v5305_v24 = vpop.trf.xlu1 }
 0xb7e   :  { %7576 = vmatmul.msk.f32.gmra.mxu2 %vm2079_vm0, %v5178_v50 }
 0xb82   :  { %v5338_v63 = vpop.trf.xlu2 }
 0xb85   :  { %v5306_v8 = vpop.trf.xlu1 }
 0xb86   :  { %7577 = vmatmul.msk.f32.gmra.mxu2 %vm2079_vm0, %v5209_v34  ;;  %v7596_v34 = vld [vmem:[%s10534_s12 + $0x38] sm:$0xff] }
 0xb87   :  { %6094 = vmatpush.msra.mxu3 %v7596_v34 }
 0xb8a   :  { %v5401_v15 = vpop.trf.xlu2 }
 0xb8d   :  { %v5369_v27 = vpop.trf.xlu1 }
 0xb8e   :  { %7578 = vmatmul.msk.f32.gmra.mxu2 %vm2079_vm0, %v5210_v44  ;;  %v7594_v44 = vld [vmem:[%s10534_s12 + $0x28] sm:$0xff] }
 0xb8f   :  { %6095 = vmatpush.msra.mxu3 %v7594_v44 }
 0xb92   :  { %v5402_v49 = vpop.trf.xlu2 }
 0xb95   :  { %v5370_v59 = vpop.trf.xlu1 }
 0xb96   :  { %7579 = vmatmul.msk.f32.gmra.mxu2 %vm2079_vm0, %v5241_v6 }
 0xb9e   :  { %7580 = vmatmul.msk.f32.gmra.mxu2 %vm2079_vm0, %v5242_v32 }
 0xba6   :  { %7581 = vmatmul.msk.f32.gmra.mxu2 %vm2079_vm0, %v5273_v3  ;;  %v6009_v3 = vld [vmem:[%s10534_s12 + $0x18] sm:$0xff] }
 0xba7   :  { %6182 = vmatpush.msra.mxu1 %v6009_v3 }
 0xba9   :  { %6183 = vmatpush.msra.mxu1 %v6007_v21 }
 0xbae   :  { %7582 = vmatmul.msk.f32.gmra.mxu2 %vm2079_vm0, %v5274_v39 }
 0xbb1   :  { %v4919_v22 = vpop.permute.xlu0 %4918 }
 0xbb2   :  { %v4943_v37 = vmul.f32 %v4919_v22, %v4654_v56 }
 0xbb4   :  { %v4955_v46 = vadd.f32 %v4943_v37, %v4655_v17  ;;  %v7630_v37 = vld [vmem:[%s10534_s12 + $0x48] sm:$0xff] }
 0xbb5   :  { %6276 = vmatpush.msrb.mxu0 %v7630_v37 }
 0xbb6   :  { %v4967_v0 = vmax.f32 %v4955_v46, 0.0  ;;  %7583 = vmatmul.msk.f32.gmra.mxu2 %vm2079_vm0, %v5305_v24  ;;  %v7631_v46 = vld [vmem:[%s10534_s12 + $0x50] sm:$0xff] }
 0xbb8   :  { %7568 = vmatmul.msk.f32.gmra.mxu1 %vm1301_vm14, %v4967_v0  ;;  %v7629_v0 = vld [vmem:[%s10534_s12 + $0x40] sm:$0xff] }
 0xbbe   :  { %7584 = vmatmul.msk.f32.gmra.mxu2 %vm2079_vm0, %v5306_v8 }
 0xbc6   :  { %7585 = vmatmul.msk.f32.gmra.mxu2 %vm2079_vm0, %v5337_v36 }
 0xbc9   :  { %v5538_v48 = vpop.f32.mrf.mxu2 }
 0xbce   :  { %7586 = vmatmul.msk.f32.gmra.mxu2 %vm2079_vm0, %v5338_v63 }
 0xbd1   :  { %v5541_v41 = vpop.f32.mrf.mxu2 }
 0xbd6   :  { %7587 = vmatmul.msk.f32.gmra.mxu2 %vm2079_vm0, %v5369_v27 }
 0xbd9   :  { %v5544_v19 = vpop.f32.mrf.mxu2 }
 0xbde   :  { %7588 = vmatmul.msk.f32.gmra.mxu2 %vm2079_vm0, %v5370_v59 }
 0xbe1   :  { %v5547_v29 = vpop.f32.mrf.mxu2 }
 0xbe6   :  { %7589 = vmatmul.msk.f32.gmra.mxu2 %vm2079_vm0, %v5401_v15 }
 0xbe9   :  { %v5550_v9 = vpop.f32.mrf.mxu2 }
 0xbea   :  { %5674 = vxpose.xlu2.b32.start [1/2] (short) (narrow) %v5550_v9, 8 }
 0xbee   :  { %7590 = vmatmul.msk.f32.gmra.mxu2 %vm2079_vm0, %v5402_v49 }
 0xbf1   :  { %v5553_v4 = vpop.f32.mrf.mxu2 }
 0xbf2   :  { %5675 = vxpose.xlu2.b32.end [2/2] (short) (narrow) %v5553_v4, 8 }
 0xbf9   :  { %v5556_v43 = vpop.f32.mrf.mxu2 }
 0xc01   :  { %v5559_v60 = vpop.f32.mrf.mxu2 }
 0xc09   :  { %v5562_v38 = vpop.f32.mrf.mxu2 }
 0xc0a   :  { %5738 = vxpose.xlu2.b32.start [1/2] (short) (narrow) %v5562_v38, 8 }
 0xc11   :  { %v5565_v1 = vpop.f32.mrf.mxu2 }
 0xc12   :  { %5739 = vxpose.xlu2.b32.end [2/2] (short) (narrow) %v5565_v1, 8 }
 0xc19   :  { %v5568_v42 = vpop.f32.mrf.mxu2 }
 0xc21   :  { %v5571_v35 = vpop.f32.mrf.mxu2 }
 0xc29   :  { %v5574_v31 = vpop.f32.mrf.mxu2 }
 0xc2a   :  { %5802 = vxpose.xlu0.b32.start [1/2] (short) (narrow) %v5574_v31, 8 }
 0xc31   :  { %v5577_v61 = vpop.f32.mrf.mxu2 }
 0xc32   :  { %5803 = vxpose.xlu0.b32.end [2/2] (short) (narrow) %v5577_v61, 8 }
 0xc35   :  { %v5062_v14 = vpop.f32.mrf.mxu1 }
 0xc36   :  { %5417 = vxpose.xlu1.b32.start.end [1/1] (short) (narrow) %v5062_v14, 16 }
 0xc39   :  { %v5580_v10 = vpop.f32.mrf.mxu2 }
 0xc41   :  { %v5583_v18 = vpop.f32.mrf.mxu2 }
 0xc46   :  { %5642 = vxpose.xlu1.b32.start [1/2] (short) (narrow) %v5544_v19, 8 }
 0xc49   :  { %v5586_v54 = vpop.f32.mrf.mxu2 }
 0xc4a   :  { %5866 = vxpose.xlu2.b32.start [1/2] (short) (narrow) %v5586_v54, 8 }
 0xc4e   :  { %5643 = vxpose.xlu1.b32.end [2/2] (short) (narrow) %v5547_v29, 8 }
 0xc51   :  { %v5589_v56 = vpop.f32.mrf.mxu2 }
 0xc52   :  { %5867 = vxpose.xlu2.b32.end [2/2] (short) (narrow) %v5589_v56, 8 }
 0xc56   :  { %5706 = vxpose.xlu1.b32.start [1/2] (short) (narrow) %v5556_v43, 8 }
 0xc59   :  { %v5592_v5 = vpop.f32.mrf.mxu2 }
 0xc5a   :  { %5898 = vxpose.xlu2.b32.start [1/2] (short) (narrow) %v5592_v5, 8 }
 0xc5e   :  { %5707 = vxpose.xlu1.b32.end [2/2] (short) (narrow) %v5559_v60, 8 }
 0xc61   :  { %v5595_v55 = vpop.f32.mrf.mxu2 }
 0xc62   :  { %5899 = vxpose.xlu2.b32.end [2/2] (short) (narrow) %v5595_v55, 8 }
 0xc66   :  { %5834 = vxpose.xlu1.b32.start [1/2] (short) (narrow) %v5580_v10, 8  ;;  %v10215_v10 = vld [vmem:[%s10535_s13] sm:$0x3] }
 0xc67   :  { %v10218_v54 = vperm.slane %v10215_v10, 0 }
 0xc69   :  { %v5598_v40 = vpop.f32.mrf.mxu2 }
 0xc6a   :  { %5610 = vxpose.xlu2.b32.start [1/2] (short) (narrow) %v5538_v48, 8 }
 0xc6e   :  { %5835 = vxpose.xlu1.b32.end [2/2] (short) (narrow) %v5583_v18, 8 }
 0xc71   :  { %v5601_v51 = vpop.f32.mrf.mxu2 }
 0xc72   :  { %5611 = vxpose.xlu2.b32.end [2/2] (short) (narrow) %v5541_v41, 8 }
 0xc76   :  { %5930 = vxpose.xlu1.b32.start [1/2] (short) (narrow) %v5598_v40, 8 }
 0xc7e   :  { %5931 = vxpose.xlu1.b32.end [2/2] (short) (narrow) %v5601_v51, 8 }
 0xc83   :  { %v5690_v20 = vpop.trf.xlu2 }
 0xc84   :  { %v10097_v45 = vmax.f32 %v5690_v20, 0.0 }
 0xc86   :  { %5770 = vxpose.xlu1.b32.start [1/2] (short) (narrow) %v5568_v42, 8 }
 0xc8e   :  { %5771 = vxpose.xlu1.b32.end [2/2] (short) (narrow) %v5571_v35, 8 }
 0xca3   :  { %v5754_v30 = vpop.trf.xlu2 }
 0xca4   :  { %v10105_v28 = vmax.f32 %v5754_v30, 0.0 }
 0xcce   :  { %v5818_v22 = vpop.trf.xlu0 }
 0xccf   :  { %v6000_v17 = vmax.f32 %v5818_v22, 0.0 }
 0xcda   :  { %v5433_v58 = vpop.trf.xlu1 }
 0xcdb   :  { %7591 = vmatmul.msk.f32.gmra.mxu2 %vm2079_vm0, %v5433_v58 }
 0xce1   :  { %7702 = vset.pattern.permute.xlu1 %v8011_v11 }
 0xce2   :  { %v5434_v47 = vpop.trf.xlu1 }
 0xce3   :  { %7592 = vmatmul.msk.f32.gmra.mxu2 %vm2079_vm0, %v5434_v47  ;;  %v5882_v12 = vpop.trf.xlu2 }
 0xce4   :  { %v6002_v23 = vmax.f32 %v5882_v12, 0.0 }
 0xcea   :  { %v5658_v2 = vpop.trf.xlu1 }
 0xceb   :  { %v5995_v33 = vmax.f32 %v5658_v2, 0.0 }
 0xced   :  { %7597 = vmatmul.msk.f32.vlgmr.msrb.gmra.mxu3 %vm3006_vm5, %v5995_v33 }
 0xcee   :  { %6234 = vmatpush.msrb.mxu3 %v7631_v46 }
 0xcf0   :  { %6235 = vmatpush.msrb.mxu3 %v7629_v0 }
 0xcf3   :  { %v5914_v11 = vpop.trf.xlu2 }
 0xcf4   :  { %v6003_v39 = vmax.f32 %v5914_v11, 0.0 }
 0xcf5   :  { %7598 = vmatmul.msk.f32.gmra.mxu3 %vm3006_vm5, %v10097_v45 }
 0xcfa   :  { %v5722_v13 = vpop.trf.xlu1 }
 0xcfb   :  { %v10101_v53 = vmax.f32 %v5722_v13, 0.0 }
 0xcfd   :  { %7599 = vmatmul.msk.f32.gmra.mxu3 %vm3006_vm5, %v10101_v53 }
 0xd03   :  { %v5626_v16 = vpop.trf.xlu2 }
 0xd04   :  { %v5994_v50 = vmax.f32 %v5626_v16, 0.0 }
 0xd05   :  { %7600 = vmatmul.msk.f32.gmra.mxu3 %vm3006_vm5, %v10105_v28 }
 0xd06   :  { %7613 = vmatmul.msk.f32.vlgmr.msra.gmra.mxu0 %vm3006_vm5, %v5994_v50  ;;  %7621 = vmatmul.msk.f32.vlgmr.msra.gmra.mxu1 %vm3006_vm5, %v5994_v50 }
 0xd0a   :  { %v5850_v6 = vpop.trf.xlu1 }
 0xd0b   :  { %v6001_v32 = vmax.f32 %v5850_v6, 0.0 }
 0xd0d   :  { %7601 = vmatmul.msk.f32.gmra.mxu3 %vm3006_vm5, %v6001_v32 }
 0xd0e   :  { %7614 = vmatmul.msk.f32.gmra.mxu0 %vm3006_vm5, %v5995_v33  ;;  %7622 = vmatmul.msk.f32.gmra.mxu1 %vm3006_vm5, %v5995_v33 }
 0xd15   :  { %7602 = vmatmul.msk.f32.gmra.mxu3 %vm3006_vm5, %v6002_v23 }
 0xd16   :  { %7615 = vmatmul.msk.f32.gmra.mxu0 %vm3006_vm5, %v10097_v45  ;;  %7623 = vmatmul.msk.f32.gmra.mxu1 %vm3006_vm5, %v10097_v45 }
 0xd1a   :  { %v5946_v62 = vpop.trf.xlu1 }
 0xd1b   :  { %v6004_v24 = vmax.f32 %v5946_v62, 0.0 }
 0xd1d   :  { %7603 = vmatmul.msk.f32.gmra.mxu3 %vm3006_vm5, %v6003_v39 }
 0xd1e   :  { %7616 = vmatmul.msk.f32.gmra.mxu0 %vm3006_vm5, %v10101_v53  ;;  %7624 = vmatmul.msk.f32.gmra.mxu1 %vm3006_vm5, %v10101_v53 }
 0xd25   :  { %7604 = vmatmul.msk.f32.gmra.mxu3 %vm3006_vm5, %v6004_v24 }
 0xd26   :  { %7617 = vmatmul.msk.f32.gmra.mxu0 %vm3006_vm5, %v6000_v17  ;;  %7625 = vmatmul.msk.f32.gmra.mxu1 %vm3006_vm5, %v6000_v17 }
 0xd2a   :  { %v5786_v8 = vpop.trf.xlu1 }
 0xd2b   :  { %v5999_v36 = vmax.f32 %v5786_v8, 0.0 }
 0xd2d   :  { %7605 = vmatmul.msk.f32.vlgmr.msra.gmra.mxu3 %vm3006_vm5, %v5995_v33 }
 0xd2e   :  { %7618 = vmatmul.msk.f32.gmra.mxu0 %vm3006_vm5, %v6001_v32  ;;  %7626 = vmatmul.msk.f32.gmra.mxu1 %vm3006_vm5, %v6001_v32 }
 0xd35   :  { %7606 = vmatmul.msk.f32.gmra.mxu3 %vm3006_vm5, %v10097_v45 }
 0xd36   :  { %7619 = vmatmul.msk.f32.gmra.mxu0 %vm3006_vm5, %v6002_v23  ;;  %7627 = vmatmul.msk.f32.gmra.mxu1 %vm3006_vm5, %v6002_v23 }
 0xd3d   :  { %7607 = vmatmul.msk.f32.gmra.mxu3 %vm3006_vm5, %v10101_v53 }
 0xd3e   :  { %7620 = vmatmul.msk.f32.gmra.mxu0 %vm3006_vm5, %v6003_v39  ;;  %7628 = vmatmul.msk.f32.gmra.mxu1 %vm3006_vm5, %v6003_v39 }
 0xd45   :  { %7608 = vmatmul.msk.f32.gmra.mxu3 %vm3006_vm5, %v10105_v28 }
 0xd46   :  { %7641 = vmatmul.msk.f32.vlgmr.msrb.gmra.mxu0 %vm3006_vm5, %v10097_v45 }
 0xd4d   :  { %7609 = vmatmul.msk.f32.gmra.mxu3 %vm3006_vm5, %v6001_v32 }
 0xd4e   :  { %7642 = vmatmul.msk.f32.gmra.mxu0 %vm3006_vm5, %v10101_v53 }
 0xd55   :  { %7610 = vmatmul.msk.f32.gmra.mxu3 %vm3006_vm5, %v6002_v23 }
 0xd56   :  { %7643 = vmatmul.msk.f32.gmra.mxu0 %vm3006_vm5, %v10105_v28 }
 0xd5d   :  { %7611 = vmatmul.msk.f32.gmra.mxu3 %vm3006_vm5, %v6003_v39 }
 0xd5e   :  { %v5604_v48 = vpop.f32.mrf.mxu2  ;;  %7644 = vmatmul.msk.f32.gmra.mxu0 %vm3006_vm5, %v5999_v36 }
 0xd5f   :  { %5962 = vxpose.xlu2.b32.start [1/2] (short) (narrow) %v5604_v48, 8 }
 0xd65   :  { %7612 = vmatmul.msk.f32.gmra.mxu3 %vm3006_vm5, %v6004_v24 }
 0xd66   :  { %v5607_v63 = vpop.f32.mrf.mxu2  ;;  %7645 = vmatmul.msk.f32.gmra.mxu0 %vm3006_vm5, %v6002_v23 }
 0xd67   :  { %5963 = vxpose.xlu2.b32.end [2/2] (short) (narrow) %v5607_v63, 8 }
 0xd6d   :  { %7633 = vmatmul.msk.f32.vlgmr.msrb.gmra.mxu3 %vm3006_vm5, %v10097_v45 }
 0xd6e   :  { %7646 = vmatmul.msk.f32.gmra.mxu0 %vm3006_vm5, %v6003_v39 }
 0xd70   :  { %v6056_v41 = vpop.f32.mrf.mxu3 }
 0xd75   :  { %7634 = vmatmul.msk.f32.gmra.mxu3 %vm3006_vm5, %v10101_v53 }
 0xd76   :  { %7647 = vmatmul.msk.f32.gmra.mxu0 %vm3006_vm5, %v6004_v24 }
 0xd78   :  { %v6059_v27 = vpop.f32.mrf.mxu3 }
 0xd7d   :  { %7635 = vmatmul.msk.f32.gmra.mxu3 %vm3006_vm5, %v10105_v28 }
 0xd80   :  { %v6062_v19 = vpop.f32.mrf.mxu3 }
 0xd83   :  { %v6144_v31 = vpop.f32.mrf.mxu0 }
 0xd84   :  { %v6145_v18 = vadd.f32 %v6144_v31, %v6056_v41 }
 0xd85   :  { %7636 = vmatmul.msk.f32.gmra.mxu3 %vm3006_vm5, %v5999_v36 }
 0xd88   :  { %v6065_v59 = vpop.f32.mrf.mxu3 }
 0xd8b   :  { %v6147_v14 = vpop.f32.mrf.mxu0 }
 0xd8c   :  { %v6148_v52 = vadd.f32 %v6147_v14, %v6059_v27 }
 0xd8d   :  { %7637 = vmatmul.msk.f32.gmra.mxu3 %vm3006_vm5, %v6002_v23 }
 0xd90   :  { %v10186_v29 = vpop.f32.mrf.mxu3 }
 0xd93   :  { %v6150_v40 = vpop.f32.mrf.mxu0 }
 0xd94   :  { %v6151_v33 = vadd.f32 %v6150_v40, %v6062_v19 }
 0xd95   :  { %7638 = vmatmul.msk.f32.gmra.mxu3 %vm3006_vm5, %v6003_v39 }
 0xd98   :  { %v10189_v15 = vpop.f32.mrf.mxu3 }
 0xd9b   :  { %v6153_v12 = vpop.f32.mrf.mxu0 }
 0xd9c   :  { %v6154_v34 = vadd.f32 %v6153_v12, %v6065_v59 }
 0xd9d   :  { %7639 = vmatmul.msk.f32.gmra.mxu3 %vm3006_vm5, %v6004_v24 }
 0xda0   :  { %v10192_v9 = vpop.f32.mrf.mxu3 }
 0xda3   :  { %v6156_v32 = vpop.f32.mrf.mxu0 }
 0xda4   :  { %v6157_v46 = vadd.f32 %v6156_v32, %v10186_v29 }
 0xda8   :  { %v10194_v49 = vpop.f32.mrf.mxu3 }
 0xdab   :  { %v6159_v31 = vpop.f32.mrf.mxu0 }
 0xdb0   :  { %v10196_v4 = vpop.f32.mrf.mxu3 }
 0xdb8   :  { %v10198_v43 = vpop.f32.mrf.mxu3 }
 0xdc0   :  { %v10200_v60 = vpop.f32.mrf.mxu3 }
 0xdc8   :  { %v10202_v38 = vpop.f32.mrf.mxu3 }
 0xdd0   :  { %v10204_v1 = vpop.f32.mrf.mxu3 }
 0xdd8   :  { %v10206_v42 = vpop.f32.mrf.mxu3 }
 0xde0   :  { %v10208_v35 = vpop.f32.mrf.mxu3 }
 0xde8   :  { %v10210_v61 = vpop.f32.mrf.mxu3 }
 0xdf0   :  { %v6237_v56 = vpop.f32.mrf.mxu3 }
 0xdf1   :  { %v6302_v5 = vadd.f32 %v6237_v56, %v6145_v18 }
 0xdf3   :  { %v10221_v55 = vadd.f32 %v10218_v54, %v6302_v5 }
 0xdf5   :  { %v7649_v51 = vmul.f32 -1.442695, %v10221_v55 }
 0xdf7   :  { %7900 = vpow2.f32 %v7649_v51 }
 0xdf8   :  { %v5978_v7 = vpop.trf.xlu2  ;;  %v6240_v58 = vpop.f32.mrf.mxu3 }
 0xdf9   :  { %v6005_v20 = vmax.f32 %v5978_v7, 0.0  ;;  %v6304_v26 = vadd.f32 %v6240_v58, %v6148_v52  ;;  %v6160_v52 = vadd.f32 %v6159_v31, %v10189_v15 }
 0xdfb   :  { %v10225_v47 = vadd.f32 %v10218_v54, %v6304_v26  ;;  %7640 = vmatmul.msk.f32.gmra.mxu3 %vm3006_vm5, %v6005_v20  ;;  %7648 = vmatmul.msk.f32.gmra.mxu0 %vm3006_vm5, %v6005_v20 }
 0xdfd   :  { %v7901_v30 = vpop.eup %7900  ;;  %v7650_v25 = vmul.f32 -1.442695, %v10225_v47 }
 0xdfe   :  { %v6364_v2 = vadd.f32 1.0, %v7901_v30 }
 0xdff   :  { %7902 = vpow2.f32 %v7650_v25 }
 0xe00   :  { %7904 = vrcp.f32 %v6364_v2  ;;  %v6243_v45 = vpop.f32.mrf.mxu3  ;;  %v6383_v23 = vand.u32 2147483648, %v6364_v2  ;;  %v6381_v57 = vand.u32 2147483647, %v6364_v2  ;;  %vm6377_vm5 = vweird.f32 %v6364_v2 }
 0xe01   :  { %v6306_v11 = vadd.f32 %v6243_v45, %v6151_v33 }
 0xe02   :  { %v6384_v8 = vor.u32 1.1754944e-38, %v6383_v23  ;;  %vm6382_vm6 = vcmp.eq.f32.partialorder %v6381_v57, 8.507059e+37 }
 0xe03   :  { %v10231_v13 = vadd.f32 %v10218_v54, %v6306_v11 }
 0xe05   :  { %v7903_v53 = vpop.eup %7902  ;;  %v7651_v28 = vmul.f32 -1.442695, %v10231_v13 }
 0xe06   :  { %v7905_v16 = vpop.eup %7904  ;;  %v6365_v50 = vadd.f32 1.0, %v7903_v53 }
 0xe07   :  { %7906 = vpow2.f32 %v7651_v28  ;;  %v6373_v44 = vmul.f32 %v7905_v16, %v6364_v2  ;;  %vm6378_vm0 = vweird.f32 %v7905_v16  ;;  %v6162_v28 = vpop.f32.mrf.mxu0 }
 0xe08   :  { %7908 = vrcp.f32 %v6365_v50  ;;  %v6246_v6 = vpop.f32.mrf.mxu3  ;;  %vm6379_vm4 = vmor %vm6377_vm5, %vm6378_vm0  ;;  %v6398_v59 = vand.u32 2147483648, %v6365_v50  ;;  %v6396_v18 = vand.u32 2147483647, %v6365_v50  ;;  %vm6392_vm8 = vweird.f32 %v6365_v50 }
 0xe09   :  { %v6308_v3 = vadd.f32 %v6246_v6, %v6154_v34  ;;  %v6374_v21 = vsub.f32 1.0, %v6373_v44  ;;  %v6163_v44 = vadd.f32 %v6162_v28, %v10192_v9 }
 0xe0a   :  { %v6399_v58 = vor.u32 1.1754944e-38, %v6398_v59  ;;  %vm6397_vm10 = vcmp.eq.f32.partialorder %v6396_v18, 8.507059e+37 }
 0xe0b   :  { %v10235_v39 = vadd.f32 %v10218_v54, %v6308_v3  ;;  %v6375_v62 = vmul.f32 %v7905_v16, %v6374_v21 }
 0xe0d   :  { %v7907_v22 = vpop.eup %7906  ;;  %v7652_v24 = vmul.f32 -1.442695, %v10235_v39  ;;  %v6376_v17 = vadd.f32 %v7905_v16, %v6375_v62 }
 0xe0e   :  { %v7909_v37 = vpop.eup %7908  ;;  %v6366_v0 = vadd.f32 1.0, %v7907_v22 }
 0xe0f   :  { %7910 = vpow2.f32 %v7652_v24  ;;  %v6380_v36 = vsel %vm6379_vm4, %v7905_v16, %v6376_v17  ;;  %v6388_v48 = vmul.f32 %v7909_v37, %v6365_v50  ;;  %vm6393_vm7 = vweird.f32 %v7909_v37 }
 0xe10   :  { %7912 = vrcp.f32 %v6366_v0  ;;  %v6249_v63 = vpop.f32.mrf.mxu3  ;;  %v6385_v41 = vsel %vm6382_vm6, %v6384_v8, %v6380_v36  ;;  %vm6394_vm9 = vmor %vm6392_vm8, %vm6393_vm7  ;;  %v6413_v12 = vand.u32 2147483648, %v6366_v0  ;;  %v6411_v15 = vand.u32 2147483647, %v6366_v0 }
 0xe11   :  { %v6310_v27 = vadd.f32 %v6249_v63, %v6157_v46  ;;  %6500 = vrot.lane.b32.xlu1 %v6385_v41, %s8009_s9  ;;  %v6389_v19 = vsub.f32 1.0, %v6388_v48  ;;  %vm6407_vm12 = vweird.f32 %v6366_v0 }
 0xe12   :  { %v6414_v32 = vor.u32 1.1754944e-38, %v6413_v12  ;;  %vm6412_vm15 = vcmp.eq.f32.partialorder %v6411_v15, 8.507059e+37 }
 0xe13   :  { %v10241_v14 = vadd.f32 %v10218_v54, %v6310_v27  ;;  %v6390_v29 = vmul.f32 %v7909_v37, %v6389_v19 }
 0xe15   :  { %v7911_v56 = vpop.eup %7910  ;;  %v7653_v5 = vmul.f32 -1.442695, %v10241_v14  ;;  %v6391_v40 = vadd.f32 %v7909_v37, %v6390_v29 }
 0xe16   :  { %v7913_v51 = vpop.eup %7912  ;;  %v6367_v7 = vadd.f32 1.0, %v7911_v56 }
 0xe17   :  { %7914 = vpow2.f32 %v7653_v5  ;;  %v6395_v20 = vsel %vm6394_vm9, %v7909_v37, %v6391_v40  ;;  %v6403_v26 = vmul.f32 %v7913_v51, %v6366_v0  ;;  %vm6408_vm11 = vweird.f32 %v7913_v51 }
 0xe18   :  { %7916 = vrcp.f32 %v6367_v7  ;;  %v6252_v30 = vpop.f32.mrf.mxu3  ;;  %v6400_v25 = vsel %vm6397_vm10, %v6399_v58, %v6395_v20  ;;  %vm6409_vm13 = vmor %vm6407_vm12, %vm6408_vm11  ;;  %v6428_v24 = vand.u32 2147483648, %v6367_v7  ;;  %v6426_v9 = vand.u32 2147483647, %v6367_v7 }
 0xe19   :  { %v6312_v2 = vadd.f32 %v6252_v30, %v6160_v52  ;;  %6502 = vrot.lane.b32.xlu2 %v6400_v25, %s8009_s9  ;;  %v6404_v33 = vsub.f32 1.0, %v6403_v26  ;;  %vm6422_vm2 = vweird.f32 %v6367_v7 }
 0xe1a   :  { %v6429_v63 = vor.u32 1.1754944e-38, %v6428_v24  ;;  %vm6427_vm0 = vcmp.eq.f32.partialorder %v6426_v9, 8.507059e+37 }
 0xe1b   :  { %v10247_v45 = vadd.f32 %v10218_v54, %v6312_v2  ;;  %v6405_v11 = vmul.f32 %v7913_v51, %v6404_v33 }
 0xe1d   :  { %v7915_v53 = vpop.eup %7914  ;;  %v7654_v16 = vmul.f32 -1.442695, %v10247_v45  ;;  %v6406_v50 = vadd.f32 %v7913_v51, %v6405_v11 }
 0xe1e   :  { %v7917_v34 = vpop.eup %7916  ;;  %v6368_v6 = vadd.f32 1.0, %v7915_v53 }
 0xe1f   :  { %7918 = vpow2.f32 %v7654_v16  ;;  %v6410_v3 = vsel %vm6409_vm13, %v7913_v51, %v6406_v50  ;;  %v6418_v21 = vmul.f32 %v7917_v34, %v6367_v7  ;;  %vm6423_vm1 = vweird.f32 %v7917_v34 }
 0xe20   :  { %7920 = vrcp.f32 %v6368_v6  ;;  %v6255_v23 = vpop.f32.mrf.mxu3  ;;  %v6415_v62 = vsel %vm6412_vm15, %v6414_v32, %v6410_v3  ;;  %vm6424_vm3 = vmor %vm6422_vm2, %vm6423_vm1  ;;  %v6443_v31 = vand.u32 2147483648, %v6368_v6  ;;  %v6441_v18 = vand.u32 2147483647, %v6368_v6 }
 0xe21   :  { %v6314_v57 = vadd.f32 %v6255_v23, %v6163_v44  ;;  %6504 = vrot.lane.b32.xlu0 %v6415_v62, %s8009_s9  ;;  %v6419_v22 = vsub.f32 1.0, %v6418_v21  ;;  %vm6437_vm4 = vweird.f32 %v6368_v6  ;;  %v6165_v23 = vpop.f32.mrf.mxu0  ;;  %v6185_v62 = vpop.f32.mrf.mxu1 }
 0xe22   :  { %v6444_v52 = vor.u32 1.1754944e-38, %v6443_v31  ;;  %vm6442_vm7 = vcmp.eq.f32.partialorder %v6441_v18, 8.507059e+37  ;;  %v6166_v24 = vadd.f32 %v6165_v23, %v10194_v49  ;;  %v6186_v9 = vadd.f32 %v6185_v62, %v10196_v4 }
 0xe23   :  { %v10253_v17 = vadd.f32 %v10218_v54, %v6314_v57  ;;  %v6420_v37 = vmul.f32 %v7917_v34, %v6419_v22 }
 0xe25   :  { %v7919_v46 = vpop.eup %7918  ;;  %v7655_v0 = vmul.f32 -1.442695, %v10253_v17  ;;  %v6421_v8 = vadd.f32 %v7917_v34, %v6420_v37 }
 0xe26   :  { %v7921_v36 = vpop.eup %7920  ;;  %v6369_v48 = vadd.f32 1.0, %v7919_v46 }
 0xe27   :  { %7922 = vpow2.f32 %v7655_v0  ;;  %v6425_v41 = vsel %vm6424_vm3, %v7917_v34, %v6421_v8  ;;  %v6433_v27 = vmul.f32 %v7921_v36, %v6368_v6  ;;  %vm6438_vm5 = vweird.f32 %v7921_v36 }
 0xe28   :  { %7924 = vrcp.f32 %v6369_v48  ;;  %v6430_v19 = vsel %vm6427_vm0, %v6429_v63, %v6425_v41  ;;  %vm6439_vm6 = vmor %vm6437_vm4, %vm6438_vm5  ;;  %v6458_v30 = vand.u32 2147483648, %v6369_v48  ;;  %v6456_v2 = vand.u32 2147483647, %v6369_v48 }
 0xe29   :  { %6506 = vrot.lane.b32.xlu1 %v6430_v19, %s8009_s9  ;;  %v6434_v59 = vsub.f32 1.0, %v6433_v27  ;;  %vm6452_vm9 = vweird.f32 %v6369_v48  ;;  %v6278_v57 = vpop.f32.mrf.mxu0  ;;  %v10260_v22 = vpop.f32.mrf.mxu1 }
 0xe2a   :  { %v6459_v11 = vor.u32 1.1754944e-38, %v6458_v30  ;;  %vm6457_vm11 = vcmp.eq.f32.partialorder %v6456_v2, 8.507059e+37  ;;  %v6303_v8 = vadd.f32 %v6278_v57, %v6186_v9 }
 0xe2b   :  { %v6435_v29 = vmul.f32 %v7921_v36, %v6434_v59 }
 0xe2d   :  { %v7923_v56 = vpop.eup %7922  ;;  %v6436_v5 = vadd.f32 %v7921_v36, %v6435_v29 }
 0xe2e   :  { %v7925_v40 = vpop.eup %7924  ;;  %v6370_v51 = vadd.f32 1.0, %v7923_v56 }
 0xe2f   :  { %v6440_v7 = vsel %vm6439_vm6, %v7921_v36, %v6436_v5  ;;  %v6448_v58 = vmul.f32 %v7925_v40, %v6369_v48  ;;  %vm6453_vm8 = vweird.f32 %v7925_v40  ;;  %v10267_v36 = vperm.slane %v10215_v10, 1 }
 0xe30   :  { %7926 = vrcp.f32 %v6370_v51  ;;  %v6445_v20 = vsel %vm6442_vm7, %v6444_v52, %v6440_v7  ;;  %vm6454_vm10 = vmor %vm6452_vm9, %vm6453_vm8  ;;  %v6473_v50 = vand.u32 2147483648, %v6370_v51  ;;  %v6471_v44 = vand.u32 2147483647, %v6370_v51 }
 0xe31   :  { %6508 = vrot.lane.b32.xlu1 %v6445_v20, %s8009_s9  ;;  %v6449_v26 = vsub.f32 1.0, %v6448_v58  ;;  %vm6467_vm13 = vweird.f32 %v6370_v51  ;;  %v10263_v37 = vpop.f32.mrf.mxu0  ;;  %v6325_v27 = vadd.f32 %v10267_v36, %v6303_v8  ;;  %v6191_v19 = vpop.f32.mrf.mxu1 }
 0xe32   :  { %v6474_v32 = vor.u32 1.1754944e-38, %v6473_v50  ;;  %vm6472_vm1 = vcmp.eq.f32.partialorder %v6471_v44, 8.507059e+37  ;;  %v6192_v18 = vadd.f32 %v6191_v19, %v10200_v60 }
 0xe33   :  { %v6450_v25 = vmul.f32 %v7925_v40, %v6449_v26 }
 0xe35   :  { %v6451_v33 = vadd.f32 %v7925_v40, %v6450_v25 }
 0xe36   :  { %v7927_v12 = vpop.eup %7926 }
 0xe37   :  { %v6455_v15 = vsel %vm6454_vm10, %v7925_v40, %v6451_v33  ;;  %v6463_v53 = vmul.f32 %v7927_v12, %v6370_v51  ;;  %vm6468_vm12 = vweird.f32 %v7927_v12 }
 0xe38   :  { %v6460_v28 = vsel %vm6457_vm11, %v6459_v11, %v6455_v15  ;;  %vm6469_vm15 = vmor %vm6467_vm13, %vm6468_vm12 }
 0xe39   :  { %6510 = vrot.lane.b32.xlu1 %v6460_v28, %s8009_s9  ;;  %v6464_v16 = vsub.f32 1.0, %v6463_v53  ;;  %v6284_v4 = vpop.f32.mrf.mxu0  ;;  %v6194_v56 = vpop.f32.mrf.mxu1 }
 0xe3a   :  { %v6307_v5 = vadd.f32 %v6284_v4, %v6192_v18  ;;  %v6195_v20 = vadd.f32 %v6194_v56, %v10202_v38 }
 0xe3b   :  { %v6465_v34 = vmul.f32 %v7927_v12, %v6464_v16 }
 0xe3c   :  { %v6329_v52 = vadd.f32 %v10267_v36, %v6307_v5 }
 0xe3d   :  { %v6466_v6 = vadd.f32 %v7927_v12, %v6465_v34 }
 0xe3f   :  { %v6470_v3 = vsel %vm6469_vm15, %v7927_v12, %v6466_v6 }
 0xe40   :  { %v6475_v21 = vsel %vm6472_vm1, %v6474_v32, %v6470_v3 }
 0xe41   :  { %6512 = vrot.lane.b32.xlu1 %v6475_v21, %s8009_s9  ;;  %v6197_v11 = vpop.f32.mrf.mxu1 }
 0xe49   :  { %v6200_v23 = vpop.f32.mrf.mxu1 }
 0xe51   :  { %v6203_v56 = vpop.f32.mrf.mxu1 }
 0xe7e   :  { %v6258_v46 = vpop.f32.mrf.mxu3 }
 0xe7f   :  { %v6316_v0 = vadd.f32 %v6258_v46, %v6166_v24 }
 0xe81   :  { %v10270_v48 = vadd.f32 %v10218_v54, %v6316_v0 }
 0xe83   :  { %v7656_v63 = vmul.f32 -1.442695, %v10270_v48  ;;  %v6501_v41 = vpop.permute.xlu1 %6500 }
 0xe84   :  { %v6524_v49 = vmul.f32 %v6501_v41, %v10221_v55  ;;  %v6287_v55 = vpop.f32.mrf.mxu0  ;;  %v6189_v41 = vadd.f32 %v10260_v22, %v10198_v43  ;;  %v6204_v22 = vadd.f32 %v6203_v56, %v10208_v35 }
 0xe85   :  { %7928 = vpow2.f32 %v7656_v63  ;;  %v6309_v25 = vadd.f32 %v6287_v55, %v6195_v20 }
 0xe86   :  { %v10275_v59 = vadd.f32 %v6524_v49, %v6325_v27  ;;  %v6503_v27 = vpop.permute.xlu2 %6502 }
 0xe87   :  { %v6331_v38 = vadd.f32 %v10267_v36, %v6309_v25  ;;  %v6525_v49 = vmul.f32 %v6503_v27, %v10225_v47 }
 0xe88   :  { %v6540_v31 = vmax.f32 %v10275_v59, 0.0 }
 0xe8a   :  { %v6548_v10 = vsel %vm1301_vm14, %v6540_v31, 0.0 }
 0xe8b   :  { %v7929_v54 = vpop.eup %7928  ;;  %6549 = vadd.xlane.f32.xlu1 %v6548_v10 }
 0xe8c   :  { %v6371_v29 = vadd.f32 1.0, %v7929_v54  ;;  %v6290_v53 = vpop.f32.mrf.mxu0 }
 0xe8e   :  { %7930 = vrcp.f32 %v6371_v29  ;;  %v6488_v60 = vand.u32 2147483648, %v6371_v29  ;;  %v6486_v12 = vand.u32 2147483647, %v6371_v29  ;;  %vm6482_vm3 = vweird.f32 %v6371_v29 }
 0xe90   :  { %v6489_v50 = vor.u32 1.1754944e-38, %v6488_v60  ;;  %vm6487_vm5 = vcmp.eq.f32.partialorder %v6486_v12, 8.507059e+37 }
 0xe93   :  { %v6505_v40 = vpop.permute.xlu0 %6504 }
 0xe94   :  { %v7931_v51 = vpop.eup %7930  ;;  %v6526_v7 = vmul.f32 %v6505_v40, %v10231_v13  ;;  %v6293_v62 = vpop.f32.mrf.mxu0 }
 0xe95   :  { %v6478_v58 = vmul.f32 %v7931_v51, %v6371_v29  ;;  %vm6483_vm2 = vweird.f32 %v7931_v51 }
 0xe96   :  { %v10285_v26 = vadd.f32 %v6526_v7, %v6329_v52  ;;  %vm6484_vm0 = vmor %vm6482_vm3, %vm6483_vm2 }
 0xe97   :  { %v6479_v30 = vsub.f32 1.0, %v6478_v58  ;;  %v6206_v58 = vpop.f32.mrf.mxu1 }
 0xe98   :  { %v6542_v2 = vmax.f32 %v10285_v26, 0.0 }
 0xe99   :  { %v6480_v33 = vmul.f32 %v7931_v51, %v6479_v30  ;;  %v6207_v30 = vadd.f32 %v6206_v58, %v10210_v61 }
 0xe9a   :  { %v6554_v15 = vsel %vm1301_vm14, %v6542_v2, 0.0 }
 0xe9b   :  { %6555 = vadd.xlane.f32.xlu0 %v6554_v15  ;;  %v6507_v13 = vpop.permute.xlu1 %6506  ;;  %v6481_v28 = vadd.f32 %v7931_v51, %v6480_v33 }
 0xe9c   :  { %v6527_v16 = vmul.f32 %v6507_v13, %v10235_v39  ;;  %v6201_v39 = vadd.f32 %v6200_v23, %v10206_v42  ;;  %v6305_v42 = vadd.f32 %v10263_v37, %v6189_v41  ;;  %v6296_v43 = vpop.f32.mrf.mxu0  ;;  %v8012_v13 = vmov 512.0  }
 0xe9d   :  { %v6485_v34 = vsel %vm6484_vm0, %v7931_v51, %v6481_v28  ;;  %v6315_v5 = vadd.f32 %v6296_v43, %v6204_v22  ;;  %7932 = vrcp.f32 %v8012_v13 }
 0xe9e   :  { %v10293_v44 = vadd.f32 %v6527_v16, %v6331_v38  ;;  %v6490_v6 = vsel %vm6487_vm5, %v6489_v50, %v6485_v34  ;;  %v6313_v57 = vadd.f32 %v6293_v62, %v6201_v39  ;;  %v6327_v19 = vadd.f32 %v10267_v36, %v6305_v42 }
 0xe9f   :  { %6514 = vrot.lane.b32.xlu2 %v6490_v6, %s8009_s9 }
 0xea0   :  { %v6543_v32 = vmax.f32 %v10293_v44, 0.0  ;;  %v6335_v9 = vadd.f32 %v10267_v36, %v6313_v57  ;;  %v10315_v4 = vadd.f32 %v6525_v49, %v6327_v19 }
 0xea2   :  { %v6557_v3 = vsel %vm1301_vm14, %v6543_v32, 0.0  ;;  %v6541_v54 = vmax.f32 %v10315_v4, 0.0 }
 0xea3   :  { %6558 = vadd.xlane.f32.xlu1 %v6557_v3  ;;  %v6509_v21 = vpop.permute.xlu1 %6508  ;;  %v7933_v16 = vpop.eup %7932 }
 0xea4   :  { %v6528_v29 = vmul.f32 %v6509_v21, %v10241_v14  ;;  %v6551_v47 = vsel %vm1301_vm14, %v6541_v54, 0.0  ;;  %v6337_v14 = vadd.f32 %v10267_v36, %v6315_v5  ;;  %v6299_v20 = vpop.f32.mrf.mxu0  ;;  %v6580_v34 = vmul.f32 512.0, %v7933_v16  ;;  %v6694_v21 = vld [vmem:[#allocation4 + $0x60] sm:$0xff] }
 0xea5   :  { %v6317_v25 = vadd.f32 %v6299_v20, %v6207_v30  ;;  %vm6584_vm4 = vweird.f32 %v7933_v16  ;;  %v6713_v20 = vld [vmem:[#allocation4 + $0xf0] sm:$0xff] }
 0xea6   :  { %v6864_v30 = vld [vmem:[#allocation4 + $0x170] sm:$0xff]  ;;  %6735 = vmatpush.msrb.mxu1 %v6713_v20  ;;  %v6704_v20 = vld [vmem:[#allocation4 + $0xa8] sm:$0xff] }
 0xea7   :  { %v6339_v60 = vadd.f32 %v10267_v36, %v6317_v25  ;;  %6880 = vmatpush.msra.mxu0 %v6864_v30  ;;  %v6711_v25 = vld [vmem:[#allocation4 + $0xe0] sm:$0xff] }
 0xea8   :  { %6736 = vmatpush.msrb.mxu1 %v6711_v25 }
 0xeab   :  { %v6511_v24 = vpop.permute.xlu1 %6510 }
 0xeac   :  { %v6529_v46 = vmul.f32 %v6511_v24, %v10247_v45  ;;  %v6198_v45 = vadd.f32 %v6197_v11, %v10204_v1  ;;  %v6692_v24 = vld [vmem:[#allocation4 + $0x50] sm:$0xff] }
 0xeae   :  { %v10303_v0 = vadd.f32 %v6529_v46, %v6335_v9  ;;  %v6311_v10 = vadd.f32 %v6290_v53, %v6198_v45  ;;  %v6696_v53 = vld [vmem:[#allocation4 + $0x70] sm:$0xff] }
 0xeaf   :  { %6799 = vmatpush.msrb.mxu2 %v6696_v53 }
 0xeb0   :  { %v6545_v8 = vmax.f32 %v10303_v0, 0.0  ;;  %v6333_v18 = vadd.f32 %v10267_v36, %v6311_v10 }
 0xeb1   :  { %6800 = vmatpush.msrb.mxu2 %v6694_v21  ;;  %v6705_v21 = vld [vmem:[#allocation4 + $0xb0] sm:$0xff] }
 0xeb2   :  { %v6563_v63 = vsel %vm1301_vm14, %v6545_v8, 0.0  ;;  %v10321_v37 = vadd.f32 %v6528_v29, %v6333_v18 }
 0xeb3   :  { %6564 = vadd.xlane.f32.xlu1 %v6563_v63  ;;  %v6513_v1 = vpop.permute.xlu1 %6512  ;;  %6801 = vmatpush.msrb.mxu2 %v6692_v24  ;;  %v6703_v24 = vld [vmem:[#allocation4 + $0xa0] sm:$0xff] }
 0xeb4   :  { %v6544_v55 = vmax.f32 %v10321_v37, 0.0  ;;  %v6530_v40 = vmul.f32 %v6513_v1, %v10253_v17  ;;  %v6690_v37 = vld [vmem:[#allocation4 + $0x40] sm:$0xff] }
 0xeb5   :  { %6802 = vmatpush.msrb.mxu2 %v6690_v37 }
 0xeb6   :  { %v10329_v51 = vadd.f32 %v6530_v40, %v6337_v14  ;;  %v6560_v52 = vsel %vm1301_vm14, %v6544_v55, 0.0  ;;  %v6686_v40 = vld [vmem:[#allocation4 + $0x20] sm:$0xff] }
 0xeb8   :  { %v6546_v35 = vmax.f32 %v10329_v51, 0.0  ;;  %v6635_v51 = vld [vmem:[%s10536_s14] sm:$0xff] }
 0xeba   :  { %v6566_v7 = vsel %vm1301_vm14, %v6546_v35, 0.0 }
 0xec8   :  { %6552 = vadd.xlane.f32.xlu2 %v6551_v47  ;;  %v6688_v47 = vld [vmem:[#allocation4 + $0x30] sm:$0xff] }
 0xec9   :  { %6803 = vmatpush.msrb.mxu2 %v6688_v47 }
 0xecb   :  { %6804 = vmatpush.msrb.mxu2 %v6686_v40 }
 0xed0   :  { %6561 = vadd.xlane.f32.xlu2 %v6560_v52 }
 0xed8   :  { %6567 = vadd.xlane.f32.xlu2 %v6566_v7 }
 0xef9   :  { %v6515_v17 = vpop.permute.xlu2 %6514 }
 0xefa   :  { %v6531_v33 = vmul.f32 %v6515_v17, %v10270_v48  ;;  %v6581_v48 = vsub.f32 1.0, %v6580_v34  ;;  %v6684_v17 = vld [vmem:[#allocation4 + $0x10] sm:$0xff]  ;;  %v6707_v34 = vld [vmem:[#allocation4 + $0xc0] sm:$0xff] }
 0xefb   :  { %6805 = vmatpush.msrb.mxu2 %v6684_v17 }
 0xefc   :  { %v6539_v12 = vadd.f32 %v6531_v33, %v6339_v60  ;;  %v6582_v39 = vmul.f32 %v7933_v16, %v6581_v48  ;;  %v6862_v60 = vld [vmem:[#allocation4 + $0x160] sm:$0xff]  ;;  %v6693_v48 = vld [vmem:[#allocation4 + $0x58] sm:$0xff] }
 0xefd   :  { %6881 = vmatpush.msra.mxu0 %v6862_v60  ;;  %v6702_v60 = vld [vmem:[#allocation4 + $0x98] sm:$0xff] }
 0xefe   :  { %v6547_v11 = vmax.f32 %v6539_v12, 0.0  ;;  %v6550_v28 = vpop.xlane.xlu1 %6549  ;;  %v6583_v46 = vadd.f32 %v7933_v16, %v6582_v39  ;;  %v6856_v39 = vld [vmem:[#allocation4 + $0x130] sm:$0xff] }
 0xf00   :  { %v6569_v15 = vsel %vm1301_vm14, %v6547_v11, 0.0  ;;  %v10340_v27 = vsel %vm6584_vm4, %v7933_v16, %v6583_v46  ;;  %v6697_v16 = vld [vmem:[#allocation4 + $0x78] sm:$0xff] }
 0xf01   :  { %6570 = vadd.xlane.f32.xlu1 %v6569_v15  ;;  %6828 = vmatpush.msra.mxu3 %v6697_v16  ;;  %v6700_v16 = vld [vmem:[#allocation4 + $0x88] sm:$0xff] }
 0xf0e   :  { %v6556_v6 = vpop.xlane.xlu0 %6555 }
 0xf16   :  { %v6559_v61 = vpop.xlane.xlu1 %6558 }
 0xf26   :  { %v6565_v62 = vpop.xlane.xlu1 %6564 }
 0xf3b   :  { %v6553_v38 = vpop.xlane.xlu2 %6552 }
 0xf3c   :  { %v6572_v50 = vadd.f32 %v6553_v38, %v6550_v28 }
 0xf3e   :  { %v6573_v36 = vadd.f32 %v6572_v50, %v6556_v6  ;;  %v6709_v50 = vld [vmem:[#allocation4 + $0xd0] sm:$0xff] }
 0xf3f   :  { %6737 = vmatpush.msrb.mxu1 %v6709_v50 }
 0xf40   :  { %v6574_v23 = vadd.f32 %v6573_v36, %v6559_v61  ;;  %v6860_v61 = vld [vmem:[#allocation4 + $0x150] sm:$0xff]  ;;  %v6695_v36 = vld [vmem:[#allocation4 + $0x68] sm:$0xff] }
 0xf41   :  { %6882 = vmatpush.msra.mxu0 %v6860_v61  ;;  %6829 = vmatpush.msra.mxu3 %v6695_v36 }
 0xf42   :  { %6738 = vmatpush.msrb.mxu1 %v6707_v34 }
 0xf43   :  { %v6562_v3 = vpop.xlane.xlu2 %6561  ;;  %6830 = vmatpush.msra.mxu3 %v6693_v48 }
 0xf44   :  { %v6575_v57 = vadd.f32 %v6574_v23, %v6562_v3  ;;  %v6858_v3 = vld [vmem:[#allocation4 + $0x140] sm:$0xff]  ;;  %6739 = vmatpush.msrb.mxu1 %v6705_v21 }
 0xf45   :  { %v6682_v23 = vld [vmem:[#allocation4] sm:$0xff]  ;;  %6883 = vmatpush.msra.mxu0 %v6858_v3 }
 0xf46   :  { %v6576_v63 = vadd.f32 %v6575_v57, %v6565_v62  ;;  %v6691_v62 = vld [vmem:[#allocation4 + $0x48] sm:$0xff]  ;;  %6806 = vmatpush.msrb.mxu2 %v6682_v23  ;;  %6740 = vmatpush.msrb.mxu1 %v6703_v24  ;;  %v6861_v23 = vld [vmem:[#allocation4 + $0x158] sm:$0xff] }
 0xf47   :  { %6884 = vmatpush.msra.mxu0 %v6856_v39  ;;  %6831 = vmatpush.msra.mxu3 %v6691_v62  ;;  %v6859_v39 = vld [vmem:[#allocation4 + $0x148] sm:$0xff]  ;;  %v6853_v24 = vld [vmem:[#allocation4 + $0x118] sm:$0xff] }
 0xf4b   :  { %v6568_v9 = vpop.xlane.xlu2 %6567 }
 0xf4c   :  { %v6577_v41 = vadd.f32 %v6576_v63, %v6568_v9  ;;  %v6854_v9 = vld [vmem:[#allocation4 + $0x120] sm:$0xff]  ;;  %v6689_v63 = vld [vmem:[#allocation4 + $0x38] sm:$0xff] }
 0xf4d   :  { %6885 = vmatpush.msra.mxu0 %v6854_v9  ;;  %6832 = vmatpush.msra.mxu3 %v6689_v63  ;;  %v6851_v9 = vld [vmem:[#allocation4 + $0x108] sm:$0xff] }
 0xf74   :  { %v6571_v42 = vpop.xlane.xlu1 %6570 }
 0xf75   :  { %v6578_v49 = vadd.f32 %v6577_v41, %v6571_v42  ;;  %v6701_v42 = vld [vmem:[#allocation4 + $0x90] sm:$0xff] }
 0xf76   :  { %6741 = vmatpush.msrb.mxu1 %v6701_v42 }
 0xf77   :  { %v6586_v19 = vmul.f32 %v10340_v27, %v6578_v49  ;;  %v6852_v49 = vld [vmem:[#allocation4 + $0x110] sm:$0xff] }
 0xf78   :  { %6886 = vmatpush.msra.mxu0 %v6852_v49 }
 0xf79   :  { %v10345_v45 = vsub.f32 %v6542_v2, %v6586_v19  ;;  %v10349_v10 = vsub.f32 %v6541_v54, %v6586_v19  ;;  %v10353_v29 = vsub.f32 %v6540_v31, %v6586_v19  ;;  %v10363_v26 = vsub.f32 %v6545_v8, %v6586_v19 }
 0xf7a   :  { %v10368_v31 = vsub.f32 %v6544_v55, %v6586_v19  ;;  %v10372_v54 = vsub.f32 %v6543_v32, %v6586_v19  ;;  %v10382_v44 = vsub.f32 %v6547_v11, %v6586_v19  ;;  %v10387_v55 = vsub.f32 %v6546_v35, %v6586_v19  ;;  %v6636_v35 = vld [vmem:[%s10537_s15] sm:$0xff] }
 0xf7b   :  { %v6597_v18 = vmul.f32 %v10345_v45, %v10345_v45  ;;  %v6596_v56 = vmul.f32 %v10349_v10, %v10349_v10  ;;  %v6595_v43 = vmul.f32 %v10353_v29, %v10353_v29  ;;  %v6600_v0 = vmul.f32 %v10363_v26, %v10363_v26 }
 0xf7c   :  { %v6599_v8 = vmul.f32 %v10368_v31, %v10368_v31  ;;  %v6598_v22 = vmul.f32 %v10372_v54, %v10372_v54  ;;  %v6602_v14 = vmul.f32 %v10382_v44, %v10382_v44  ;;  %v6601_v52 = vmul.f32 %v10387_v55, %v10387_v55 }
 0xf7d   :  { %v6609_v2 = vsel %vm1301_vm14, %v6597_v18, 0.0  ;;  %v6606_v4 = vsel %vm1301_vm14, %v6596_v56, 0.0  ;;  %v6603_v59 = vsel %vm1301_vm14, %v6595_v43, 0.0  ;;  %v6618_v1 = vsel %vm1301_vm14, %v6600_v0, 0.0  ;;  %v6687_v18 = vld [vmem:[#allocation4 + $0x28] sm:$0xff]  ;;  %v6699_v43 = vld [vmem:[#allocation4 + $0x80] sm:$0xff] }
 0xf7e   :  { %6610 = vadd.xlane.f32.xlu1 %v6609_v2  ;;  %6607 = vadd.xlane.f32.xlu2 %v6606_v4  ;;  %v6615_v5 = vsel %vm1301_vm14, %v6599_v8, 0.0  ;;  %v6612_v32 = vsel %vm1301_vm14, %v6598_v22, 0.0  ;;  %v6624_v7 = vsel %vm1301_vm14, %v6602_v14, 0.0  ;;  %v6621_v58 = vsel %vm1301_vm14, %v6601_v52, 0.0  ;;  %v6850_v2 = vld [vmem:[#allocation4 + $0x100] sm:$0xff]  ;;  %v6683_v8 = vld [vmem:[#allocation4 + $0x8] sm:$0xff] }
 0xf7f   :  { %6604 = vadd.xlane.f32.xlu0 %v6603_v59  ;;  %v6685_v59 = vld [vmem:[#allocation4 + $0x18] sm:$0xff]  ;;  %6833 = vmatpush.msra.mxu3 %v6687_v18 }
 0xf80   :  { %6742 = vmatpush.msrb.mxu1 %v6699_v43  ;;  %6887 = vmatpush.msra.mxu0 %v6850_v2  ;;  %v6710_v14 = vld [vmem:[#allocation4 + $0xd8] sm:$0xff] }
 0xf81   :  { %6834 = vmatpush.msra.mxu3 %v6685_v59 }
 0xf83   :  { %6835 = vmatpush.msra.mxu3 %v6683_v8 }
 0xf86   :  { %6619 = vadd.xlane.f32.xlu1 %v6618_v1  ;;  %6616 = vadd.xlane.f32.xlu2 %v6615_v5  ;;  %v6714_v5 = vld [vmem:[#allocation4 + $0xf8] sm:$0xff] }
 0xf87   :  { %6613 = vadd.xlane.f32.xlu0 %v6612_v32  ;;  %v6712_v32 = vld [vmem:[#allocation4 + $0xe8] sm:$0xff]  ;;  %6764 = vmatpush.msra.mxu1 %v6714_v5 }
 0xf89   :  { %6765 = vmatpush.msra.mxu1 %v6712_v32 }
 0xf8b   :  { %6766 = vmatpush.msra.mxu1 %v6710_v14 }
 0xf8e   :  { %6625 = vadd.xlane.f32.xlu2 %v6624_v7  ;;  %v6708_v7 = vld [vmem:[#allocation4 + $0xc8] sm:$0xff] }
 0xf8f   :  { %6622 = vadd.xlane.f32.xlu0 %v6621_v58  ;;  %6767 = vmatpush.msra.mxu1 %v6708_v7 }
 0xf9f   :  { %6658 = vperm.xlu1 %7702, %v6635_v51  }
 0xfa3   :  { %6671 = vperm.xlu0 %7700, %v6636_v35   ;;  %v6706_v35 = vld [vmem:[#allocation4 + $0xb8] sm:$0xff] }
 0xfa4   :  { %6768 = vmatpush.msra.mxu1 %v6706_v35 }
 0xfa6   :  { %6769 = vmatpush.msra.mxu1 %v6704_v20 }
 0xfa8   :  { %6770 = vmatpush.msra.mxu1 %v6702_v60 }
 0xfaa   :  { %6771 = vmatpush.msra.mxu1 %v6700_v16 }
 0xff1   :  { %v6608_v33 = vpop.xlane.xlu2 %6607  ;;  %v6611_v15 = vpop.xlane.xlu1 %6610 }
 0xff2   :  { %v6605_v12 = vpop.xlane.xlu0 %6604 }
 0xff3   :  { %v6627_v11 = vadd.f32 %v6608_v33, %v6605_v12 }
 0xff5   :  { %v6628_v53 = vadd.f32 %v6627_v11, %v6611_v15 }
 0xff9   :  { %v6617_v13 = vpop.xlane.xlu2 %6616  ;;  %v6620_v57 = vpop.xlane.xlu1 %6619 }
 0xffa   :  { %v6614_v28 = vpop.xlane.xlu0 %6613 }
 0xffb   :  { %v6629_v38 = vadd.f32 %v6628_v53, %v6614_v28 }
 0xffd   :  { %v6630_v6 = vadd.f32 %v6629_v38, %v6617_v13 }
 0xfff   :  { %v6631_v46 = vadd.f32 %v6630_v6, %v6620_v57  ;;  %v6855_v57 = vld [vmem:[#allocation4 + $0x128] sm:$0xff] }
0x1001   :  { %v6626_v56 = vpop.xlane.xlu2 %6625 }
0x1002   :  { %v6623_v41 = vpop.xlane.xlu0 %6622 }
0x1003   :  { %v6632_v19 = vadd.f32 %v6631_v46, %v6623_v41  ;;  %v10437_v41 = vld [vmem:[%s10539_s17] sm:$0x3] }
0x1005   :  { %v6633_v4 = vadd.f32 %v6632_v19, %v6626_v56  ;;  %v6940_v19 = vperm.slane %v10437_v41, 0 }
0x1007   :  { %v6634_v0 = vmul.f32 %v6633_v4, %v10340_v27 }
0x1009   :  { %v6637_v22 = vadd.f32 1e-05, %v6634_v0 }
0x100b   :  { %7934 = vrsqrt.f32 %v6637_v22  ;;  %vm6644_vm7 = vweird.f32 %v6637_v22 }
0x1011   :  { %v7935_v37 = vpop.eup %7934  ;;  %v6659_v51 = vpop.permute.xlu1 %6658 }
0x1012   :  { %v6639_v47 = vmul.f32 %v7935_v37, %v6637_v22  ;;  %vm6645_vm6 = vweird.f32 %v7935_v37 }
0x1013   :  { %vm6646_vm8 = vmor %vm6644_vm7, %vm6645_vm6 }
0x1014   :  { %v6640_v1 = vmul.f32 %v7935_v37, %v6639_v47 }
0x1015   :  { %v6672_v15 = vpop.permute.xlu0 %6671 }
0x1016   :  { %v6641_v40 = vmul.f32 0.5, %v6640_v1 }
0x1018   :  { %v6642_v52 = vsub.f32 1.5, %v6641_v40 }
0x101a   :  { %v6643_v27 = vmul.f32 %v7935_v37, %v6642_v52 }
0x101c   :  { %v6647_v58 = vsel %vm6646_vm8, %v7935_v37, %v6643_v27 }
0x101d   :  { %v6649_v30 = vmul.f32 %v6647_v58, %v10349_v10  ;;  %v6648_v25 = vmul.f32 %v6647_v58, %v10353_v29  ;;  %v6650_v17 = vmul.f32 %v6647_v58, %v10345_v45  ;;  %v6651_v38 = vmul.f32 %v6647_v58, %v10372_v54 }
0x101e   :  { %v6653_v10 = vmul.f32 %v6647_v58, %v10363_v26  ;;  %v6652_v29 = vmul.f32 %v6647_v58, %v10368_v31  ;;  %v6654_v61 = vmul.f32 %v6647_v58, %v10387_v55  ;;  %v6655_v26 = vmul.f32 %v6647_v58, %v10382_v44  ;;  %v6865_v31 = vld [vmem:[#allocation4 + $0x178] sm:$0xff]  ;;  %v6863_v55 = vld [vmem:[#allocation4 + $0x168] sm:$0xff] }
0x101f   :  { %v6662_v33 = vmul.f32 %v6659_v51, %v6649_v30  ;;  %v6661_v12 = vmul.f32 %v6659_v51, %v6648_v25  ;;  %v6663_v11 = vmul.f32 %v6659_v51, %v6650_v17  ;;  %v6664_v45 = vmul.f32 %v6659_v51, %v6651_v38  ;;  %v6857_v44 = vld [vmem:[#allocation4 + $0x138] sm:$0xff] }
0x1020   :  { %v6666_v54 = vmul.f32 %v6659_v51, %v6653_v10  ;;  %v6665_v34 = vmul.f32 %v6659_v51, %v6652_v29  ;;  %v6667_v6 = vmul.f32 %v6659_v51, %v6654_v61  ;;  %v6668_v48 = vmul.f32 %v6659_v51, %v6655_v26 }
0x1021   :  { %v6675_v53 = vadd.f32 %v6672_v15, %v6662_v33  ;;  %v6674_v13 = vadd.f32 %v6672_v15, %v6661_v12  ;;  %v6676_v28 = vadd.f32 %v6672_v15, %v6663_v11  ;;  %v6677_v50 = vadd.f32 %v6672_v15, %v6664_v45 }
0x1022   :  { %v6679_v3 = vadd.f32 %v6672_v15, %v6666_v54  ;;  %v6678_v36 = vadd.f32 %v6672_v15, %v6665_v34  ;;  %v6680_v21 = vadd.f32 %v6672_v15, %v6667_v6  ;;  %v6681_v62 = vadd.f32 %v6672_v15, %v6668_v48 }
0x1023   :  { %7657 = vmatmul.msk.f32.vlgmr.msrb.gmra.mxu1 %vm1301_vm14, %v6675_v53  ;;  %7665 = vmatmul.msk.f32.vlgmr.msrb.gmra.mxu2 %vm1301_vm14, %v6674_v13 }
0x1024   :  { %7669 = vmatmul.msk.f32.vlgmr.msra.gmra.mxu3 %vm1301_vm14, %v6674_v13  ;;  %7673 = vmatmul.msk.f32.vlgmr.msra.gmra.mxu0 %vm1301_vm14, %v6676_v28 }
0x1025   :  { %6909 = vmatpush.msrb.mxu1 %v6865_v31 }
0x1027   :  { %6910 = vmatpush.msrb.mxu1 %v6863_v55 }
0x1029   :  { %6911 = vmatpush.msrb.mxu1 %v6861_v23 }
0x102b   :  { %7658 = vmatmul.msk.f32.gmra.mxu1 %vm1301_vm14, %v6676_v28  ;;  %7666 = vmatmul.msk.f32.gmra.mxu2 %vm1301_vm14, %v6675_v53 }
0x102c   :  { %7670 = vmatmul.msk.f32.gmra.mxu3 %vm1301_vm14, %v6675_v53  ;;  %7674 = vmatmul.msk.f32.gmra.mxu0 %vm1301_vm14, %v6677_v50 }
0x102d   :  { %6912 = vmatpush.msrb.mxu1 %v6859_v39 }
0x102f   :  { %6913 = vmatpush.msrb.mxu1 %v6857_v44 }
0x1031   :  { %6914 = vmatpush.msrb.mxu1 %v6855_v57 }
0x1033   :  { %7659 = vmatmul.msk.f32.gmra.mxu1 %vm1301_vm14, %v6679_v3  ;;  %7667 = vmatmul.msk.f32.gmra.mxu2 %vm1301_vm14, %v6678_v36 }
0x1034   :  { %7671 = vmatmul.msk.f32.gmra.mxu3 %vm1301_vm14, %v6678_v36  ;;  %7675 = vmatmul.msk.f32.gmra.mxu0 %vm1301_vm14, %v6680_v21 }
0x1035   :  { %6915 = vmatpush.msrb.mxu1 %v6853_v24 }
0x1037   :  { %6916 = vmatpush.msrb.mxu1 %v6851_v9 }
0x103b   :  { %7660 = vmatmul.msk.f32.gmra.mxu1 %vm1301_vm14, %v6680_v21  ;;  %7668 = vmatmul.msk.f32.gmra.mxu2 %vm1301_vm14, %v6679_v3 }
0x103c   :  { %7672 = vmatmul.msk.f32.gmra.mxu3 %vm1301_vm14, %v6679_v3  ;;  %7676 = vmatmul.msk.f32.gmra.mxu0 %vm1301_vm14, %v6681_v62 }
0x1043   :  { %7661 = vmatmul.msk.f32.vlgmr.msra.gmra.mxu1 %vm1301_vm14, %v6675_v53 }
0x104b   :  { %7662 = vmatmul.msk.f32.gmra.mxu1 %vm1301_vm14, %v6676_v28 }
0x1053   :  { %7663 = vmatmul.msk.f32.gmra.mxu1 %vm1301_vm14, %v6679_v3 }
0x105b   :  { %7664 = vmatmul.msk.f32.gmra.mxu1 %vm1301_vm14, %v6680_v21 }
0x1063   :  { %7677 = vmatmul.msk.f32.vlgmr.msrb.gmra.mxu1 %vm1301_vm14, %v6676_v28 }
0x106b   :  { %7678 = vmatmul.msk.f32.gmra.mxu1 %vm1301_vm14, %v6677_v50 }
0x1073   :  { %7679 = vmatmul.msk.f32.gmra.mxu1 %vm1301_vm14, %v6680_v21 }
0x107b   :  { %7680 = vmatmul.msk.f32.gmra.mxu1 %vm1301_vm14, %v6681_v62 }
0x10a0   :  { %v6744_v46 = vpop.f32.mrf.mxu1 }
0x10a1   :  { %v6889_v63 = vpop.f32.mrf.mxu0 }
0x10a6   :  { %v6808_v42 = vpop.f32.mrf.mxu2 }
0x10a7   :  { %v6809_v49 = vadd.f32 %v6808_v42, %v6744_v46 }
0x10a8   :  { %v6747_v56 = vpop.f32.mrf.mxu1 }
0x10a9   :  { %v6930_v18 = vadd.f32 %v6889_v63, %v6809_v49  ;;  %v6892_v2 = vpop.f32.mrf.mxu0 }
0x10ab   :  { %v10440_v43 = vadd.f32 %v6940_v19, %v6930_v18 }
0x10ad   :  { %v7681_v4 = vmul.f32 -1.442695, %v10440_v43 }
0x10ae   :  { %v6811_v59 = vpop.f32.mrf.mxu2 }
0x10af   :  { %7936 = vpow2.f32 %v7681_v4  ;;  %v6812_v0 = vadd.f32 %v6811_v59, %v6747_v56 }
0x10b0   :  { %v6750_v37 = vpop.f32.mrf.mxu1 }
0x10b1   :  { %v6932_v8 = vadd.f32 %v6892_v2, %v6812_v0  ;;  %v6895_v32 = vpop.f32.mrf.mxu0  ;;  %v7063_v0 = vld [vmem:[%s10540_s18 + $0x38] sm:$0xff] }
0x10b2   :  { %7115 = vmatpush.msrb.mxu3 %v7063_v0 }
0x10b3   :  { %v10443_v22 = vadd.f32 %v6940_v19, %v6932_v8  ;;  %v7062_v8 = vld [vmem:[%s10540_s18 + $0x30] sm:$0xff] }
0x10b4   :  { %7116 = vmatpush.msrb.mxu3 %v7062_v8 }
0x10b5   :  { %v7937_v47 = vpop.eup %7936  ;;  %v7682_v1 = vmul.f32 -1.442695, %v10443_v22 }
0x10b6   :  { %v6964_v5 = vadd.f32 1.0, %v7937_v47  ;;  %v6814_v40 = vpop.f32.mrf.mxu2  ;;  %v7061_v47 = vld [vmem:[%s10540_s18 + $0x28] sm:$0xff] }
0x10b7   :  { %7938 = vpow2.f32 %v7682_v1  ;;  %v6815_v14 = vadd.f32 %v6814_v40, %v6750_v37  ;;  %7117 = vmatpush.msrb.mxu3 %v7061_v47 }
0x10b8   :  { %7940 = vrcp.f32 %v6964_v5  ;;  %v6753_v20 = vpop.f32.mrf.mxu1  ;;  %v6979_v11 = vand.u32 2147483648, %v6964_v5  ;;  %v6977_v13 = vand.u32 2147483647, %v6964_v5  ;;  %vm6973_vm10 = vweird.f32 %v6964_v5 }
0x10b9   :  { %v6934_v52 = vadd.f32 %v6895_v32, %v6815_v14  ;;  %v6898_v60 = vpop.f32.mrf.mxu0  ;;  %v7060_v32 = vld [vmem:[%s10540_s18 + $0x20] sm:$0xff]  ;;  %v7059_v14 = vld [vmem:[%s10540_s18 + $0x18] sm:$0xff] }
0x10ba   :  { %v6980_v29 = vor.u32 1.1754944e-38, %v6979_v11  ;;  %vm6978_vm12 = vcmp.eq.f32.partialorder %v6977_v13, 8.507059e+37  ;;  %7118 = vmatpush.msrb.mxu3 %v7060_v32  ;;  %v6941_v11 = vperm.slane %v10437_v41, 1  ;;  %v7069_v13 = vld [vmem:[%s10540_s18 + $0x68] sm:$0xff]  ;;  %v7067_v41 = vld [vmem:[%s10540_s18 + $0x58] sm:$0xff] }
0x10bb   :  { %v10446_v7 = vadd.f32 %v6940_v19, %v6934_v52 }
0x10bc   :  { %7119 = vmatpush.msrb.mxu3 %v7059_v14 }
0x10bd   :  { %v7939_v27 = vpop.eup %7938  ;;  %v7683_v58 = vmul.f32 -1.442695, %v10446_v7 }
0x10be   :  { %v7941_v51 = vpop.eup %7940  ;;  %v6965_v35 = vadd.f32 1.0, %v7939_v27  ;;  %v6817_v30 = vpop.f32.mrf.mxu2 }
0x10bf   :  { %7942 = vpow2.f32 %v7683_v58  ;;  %v6818_v25 = vadd.f32 %v6817_v30, %v6753_v20  ;;  %v6969_v17 = vmul.f32 %v7941_v51, %v6964_v5  ;;  %vm6974_vm9 = vweird.f32 %v7941_v51  ;;  %v7058_v58 = vld [vmem:[%s10540_s18 + $0x10] sm:$0xff]  ;;  %v7056_v20 = vld [vmem:[%s10540_s18] sm:$0xff]  ;;  %v7071_v30 = vld [vmem:[%s10540_s18 + $0x78] sm:$0xff] }
0x10c0   :  { %7944 = vrcp.f32 %v6965_v35  ;;  %vm6975_vm11 = vmor %vm6973_vm10, %vm6974_vm9  ;;  %v6994_v6 = vand.u32 2147483648, %v6965_v35  ;;  %v6992_v36 = vand.u32 2147483647, %v6965_v35  ;;  %vm6988_vm15 = vweird.f32 %v6965_v35  ;;  %v6773_v52 = vpop.f32.mrf.mxu1  ;;  %7120 = vmatpush.msrb.mxu3 %v7058_v58  ;;  %7086 = vmatpush.msra.mxu2 %v7071_v30 }
0x10c1   :  { %v6936_v33 = vadd.f32 %v6898_v60, %v6818_v25  ;;  %v6970_v12 = vsub.f32 1.0, %v6969_v17  ;;  %v6837_v17 = vpop.f32.mrf.mxu3  ;;  %vm7136_vm10 = vcmask 23552  }
0x10c2   :  { %v6995_v48 = vor.u32 1.1754944e-38, %v6994_v6  ;;  %vm6993_vm2 = vcmp.eq.f32.partialorder %v6992_v36, 8.507059e+37 }
0x10c3   :  { %v10449_v15 = vadd.f32 %v6940_v19, %v6936_v33  ;;  %v6971_v53 = vmul.f32 %v7941_v51, %v6970_v12  ;;  %v6838_v33 = vadd.f32 %v6837_v17, %v6773_v52 }
0x10c5   :  { %v7943_v28 = vpop.eup %7942  ;;  %v7684_v38 = vmul.f32 -1.442695, %v10449_v15  ;;  %v6972_v16 = vadd.f32 %v7941_v51, %v6971_v53  ;;  %v7070_v53 = vld [vmem:[%s10540_s18 + $0x70] sm:$0xff] }
0x10c6   :  { %v7945_v45 = vpop.eup %7944  ;;  %v6966_v10 = vadd.f32 1.0, %v7943_v28  ;;  %7087 = vmatpush.msra.mxu2 %v7070_v53  ;;  %v7068_v28 = vld [vmem:[%s10540_s18 + $0x60] sm:$0xff] }
0x10c7   :  { %7946 = vpow2.f32 %v7684_v38  ;;  %v6976_v50 = vsel %vm6975_vm11, %v7941_v51, %v6972_v16  ;;  %v6984_v61 = vmul.f32 %v7945_v45, %v6965_v35  ;;  %vm6989_vm13 = vweird.f32 %v7945_v45  ;;  %v7057_v51 = vld [vmem:[%s10540_s18 + $0x8] sm:$0xff] }
0x10c8   :  { %7948 = vrcp.f32 %v6966_v10  ;;  %v6981_v54 = vsel %vm6978_vm12, %v6980_v29, %v6976_v50  ;;  %vm6990_vm1 = vmor %vm6988_vm15, %vm6989_vm13  ;;  %v7009_v57 = vand.u32 2147483648, %v6966_v10  ;;  %v7007_v9 = vand.u32 2147483647, %v6966_v10  ;;  %v6776_v27 = vpop.f32.mrf.mxu1  ;;  %7121 = vmatpush.msrb.mxu3 %v7057_v51  ;;  %7088 = vmatpush.msra.mxu2 %v7069_v13  ;;  %v7066_v50 = vld [vmem:[%s10540_s18 + $0x50] sm:$0xff] }
0x10c9   :  { %7032 = vrot.lane.b32.xlu2 %v6981_v54, %s8009_s9  ;;  %v6985_v34 = vsub.f32 1.0, %v6984_v61  ;;  %vm7003_vm0 = vweird.f32 %v6966_v10  ;;  %v7065_v61 = vld [vmem:[%s10540_s18 + $0x48] sm:$0xff]  ;;  %v6840_v54 = vpop.f32.mrf.mxu3 }
0x10ca   :  { %v7010_v42 = vor.u32 1.1754944e-38, %v7009_v57  ;;  %vm7008_vm4 = vcmp.eq.f32.partialorder %v7007_v9, 8.507059e+37  ;;  %7122 = vmatpush.msrb.mxu3 %v7056_v20  ;;  %7089 = vmatpush.msra.mxu2 %v7068_v28  ;;  %v6841_v36 = vadd.f32 %v6840_v54, %v6776_v27 }
0x10cb   :  { %v6986_v3 = vmul.f32 %v7945_v45, %v6985_v34 }
0x10cc   :  { %7090 = vmatpush.msra.mxu2 %v7067_v41 }
0x10cd   :  { %v7947_v21 = vpop.eup %7946  ;;  %v6987_v26 = vadd.f32 %v7945_v45, %v6986_v3 }
0x10ce   :  { %v7949_v31 = vpop.eup %7948  ;;  %v6967_v55 = vadd.f32 1.0, %v7947_v21  ;;  %7091 = vmatpush.msra.mxu2 %v7066_v50 }
0x10cf   :  { %v6991_v23 = vsel %vm6990_vm1, %v7945_v45, %v6987_v26  ;;  %v6999_v62 = vmul.f32 %v7949_v31, %v6966_v10  ;;  %vm7004_vm3 = vweird.f32 %v7949_v31 }
0x10d0   :  { %7950 = vrcp.f32 %v6967_v55  ;;  %v6996_v39 = vsel %vm6993_vm2, %v6995_v48, %v6991_v23  ;;  %vm7005_vm5 = vmor %vm7003_vm0, %vm7004_vm3  ;;  %v7024_v2 = vand.u32 2147483648, %v6967_v55  ;;  %v7022_v59 = vand.u32 2147483647, %v6967_v55  ;;  %v6779_v35 = vpop.f32.mrf.mxu1  ;;  %7092 = vmatpush.msra.mxu2 %v7065_v61 }
0x10d1   :  { %7034 = vrot.lane.b32.xlu0 %v6996_v39, %s8009_s9  ;;  %v7000_v44 = vsub.f32 1.0, %v6999_v62  ;;  %vm7018_vm7 = vweird.f32 %v6967_v55  ;;  %v6843_v6 = vpop.f32.mrf.mxu3 }
0x10d2   :  { %v7025_v1 = vor.u32 1.1754944e-38, %v7024_v2  ;;  %vm7023_vm9 = vcmp.eq.f32.partialorder %v7022_v59, 8.507059e+37 }
0x10d3   :  { %v7001_v24 = vmul.f32 %v7949_v31, %v7000_v44  ;;  %v6844_v44 = vadd.f32 %v6843_v6, %v6779_v35 }
0x10d5   :  { %v7002_v46 = vadd.f32 %v7949_v31, %v7001_v24 }
0x10d6   :  { %v7951_v63 = vpop.eup %7950 }
0x10d7   :  { %v7006_v49 = vsel %vm7005_vm5, %v7949_v31, %v7002_v46  ;;  %v7014_v19 = vmul.f32 %v7951_v63, %v6967_v55  ;;  %vm7019_vm6 = vweird.f32 %v7951_v63 }
0x10d8   :  { %v7011_v18 = vsel %vm7008_vm4, %v7010_v42, %v7006_v49  ;;  %vm7020_vm8 = vmor %vm7018_vm7, %vm7019_vm6  ;;  %v6782_v25 = vpop.f32.mrf.mxu1 }
0x10d9   :  { %7036 = vrot.lane.b32.xlu1 %v7011_v18, %s8009_s9  ;;  %v7015_v56 = vsub.f32 1.0, %v7014_v19  ;;  %v6846_v26 = vpop.f32.mrf.mxu3 }
0x10da   :  { %v6847_v48 = vadd.f32 %v6846_v26, %v6782_v25 }
0x10db   :  { %v7016_v4 = vmul.f32 %v7951_v63, %v7015_v56 }
0x10dd   :  { %v7017_v37 = vadd.f32 %v7951_v63, %v7016_v4 }
0x10df   :  { %v7021_v5 = vsel %vm7020_vm8, %v7951_v63, %v7017_v37 }
0x10e0   :  { %v7026_v40 = vsel %vm7023_vm9, %v7025_v1, %v7021_v5  ;;  %v6918_v60 = vpop.f32.mrf.mxu1 }
0x10e1   :  { %7038 = vrot.lane.b32.xlu2 %v7026_v40, %s8009_s9  ;;  %v6931_v12 = vadd.f32 %v6918_v60, %v6838_v33 }
0x10e3   :  { %v6945_v16 = vadd.f32 %v6941_v11, %v6931_v12 }
0x10e8   :  { %v6921_v34 = vpop.f32.mrf.mxu1 }
0x10e9   :  { %v6933_v21 = vadd.f32 %v6921_v34, %v6841_v36 }
0x10eb   :  { %v6947_v23 = vadd.f32 %v6941_v11, %v6933_v21 }
0x10f0   :  { %v6924_v3 = vpop.f32.mrf.mxu1 }
0x10f1   :  { %v6935_v9 = vadd.f32 %v6924_v3, %v6844_v44 }
0x10f3   :  { %v6949_v19 = vadd.f32 %v6941_v11, %v6935_v9 }
0x10f8   :  { %v6927_v31 = vpop.f32.mrf.mxu1 }
0x10f9   :  { %v6937_v57 = vadd.f32 %v6927_v31, %v6847_v48 }
0x10fb   :  { %v6951_v42 = vadd.f32 %v6941_v11, %v6937_v57 }
0x1123   :  { %v7033_v38 = vpop.permute.xlu2 %7032 }
0x1124   :  { %v7044_v45 = vmul.f32 %v7033_v38, %v10440_v43  ;;  %v7064_v43 = vld [vmem:[%s10540_s18 + $0x40] sm:$0xff] }
0x1125   :  { %7093 = vmatpush.msra.mxu2 %v7064_v43 }
0x1126   :  { %v7048_v10 = vadd.f32 %v7044_v45, %v6945_v16 }
0x1128   :  { %v7052_v29 = vmax.f32 %v7048_v10, 0.0 }
0x112a   :  { %7687 = vmatmul.msk.f32.vlgmr.msrb.gmra.mxu3 %vm1301_vm14, %v7052_v29 }
0x113b   :  { %v7039_v39 = vpop.permute.xlu2 %7038 }
0x113c   :  { %v7047_v46 = vmul.f32 %v7039_v39, %v10449_v15 }
0x113e   :  { %v7051_v18 = vadd.f32 %v7047_v46, %v6951_v42 }
0x1140   :  { %v7055_v4 = vmax.f32 %v7051_v18, 0.0 }
0x1143   :  { %v7035_v55 = vpop.permute.xlu0 %7034 }
0x1144   :  { %v7045_v62 = vmul.f32 %v7035_v55, %v10443_v22  ;;  %v7703_v22 = vld [vmem:[%s10541_s19] ss:$0 sm:$0xff] }
0x1146   :  { %v7049_v24 = vadd.f32 %v7045_v62, %v6947_v23 }
0x1148   :  { %v7053_v63 = vmax.f32 %v7049_v24, 0.0 }
0x114a   :  { %7685 = vmatmul.msk.f32.vlgmr.msra.gmra.mxu2 %vm1301_vm14, %v7053_v63 }
0x114b   :  { %v7037_v49 = vpop.permute.xlu1 %7036 }
0x114c   :  { %v7046_v56 = vmul.f32 %v7037_v49, %v10446_v7 }
0x114e   :  { %v7050_v2 = vadd.f32 %v7046_v56, %v6949_v19 }
0x1150   :  { %v7054_v59 = vmax.f32 %v7050_v2, 0.0 }
0x1152   :  { %7686 = vmatmul.msk.f32.gmra.mxu2 %vm1301_vm14, %v7055_v4  ;;  %7688 = vmatmul.msk.f32.gmra.mxu3 %vm1301_vm14, %v7054_v59 }
0x11ad   :  { %v7124_v15 = vpop.f32.mrf.mxu3 }
0x11cd   :  { %v7095_v0 = vpop.f32.mrf.mxu2 }
0x11ce   :  { %v7125_v8 = vadd.f32 %v7124_v15, %v7095_v0 }
0x11d0   :  { %v7134_v37 = vadd.f32 %v7703_v22, %v7125_v8 }
0x11d2   :  { %7137 = vst.msk [vmem:[%s10542_s20] sm:$0xff] %vm7136_vm10, %v7134_v37 }
0x11d5   :  { %v7098_v7 = vpop.f32.mrf.mxu2  ;;  %v7127_v47 = vpop.f32.mrf.mxu3 }
0x11d6   :  { %v7128_v1 = vadd.f32 %v7127_v47, %v7098_v7 }
0x11d8   :  { %v7135_v5 = vadd.f32 %v7703_v22, %v7128_v1 }
0x11da   :  { %7138 = vst.msk [vmem:[%s10542_s20 + $0x8] sm:$0xff] %vm7136_vm10, %v7135_v5 }
0x11db   :  { %7143 = vsyncpa [#allocation3], 1 }
0x11dc   :  { %7144 = vsyncpa [#allocation5], 1 }

</bundles_post_ra>
